<compile_context>
chip_gen: v7x
topology: tpu7x:2x2x1
jax: 0.10.0
libtpu: 0.0.40
codegen_flags: <defaults>
</compile_context>

<pallas_src>
import jax
import jax.numpy as jnp
from jax.experimental import pallas as pl
from jax.experimental.pallas import tpu as pltpu

CONV_KERNEL = 8
CONV_STRIDE = 2
SEQ_LEN = 224


# ------------------------------------------------------------------------
# Fused kernel (one batch element per grid step):
#   conv + ReLU + mean-pool  ->  LSTM  ->  siamese head
# Row layout inside a block: row = breath*2 + {0: x-branch, 1: compr-branch}.
# ------------------------------------------------------------------------
def _make_fused_kernel(n_breaths, n_chans, n_filters, hidden, t_conv):
    K = CONV_KERNEL
    S = n_breaths
    C = n_chans
    F = n_filters
    H = hidden
    inv_t = 1.0 / float(t_conv)

    def kernel(xe_ref, xo_ref, wconv_ref, bconv_ref,
               wih_ref, whh_ref, blstm_ref,
               wi_ref, wfa_ref, wfb_ref, bf_ref,
               out_ref, feats_scr):
        # ---- Stage 1: Conv1d(k=8, s=2) + bias + ReLU + global mean pool -------
        # Per-filter (N, T) register-resident accumulator, SMEM-scalar weights.
        # The even/odd phase split turns the stride-2 taps into contiguous lane
        # slices; the 8 slices are hoisted and reused across all F filters.
        xe = xe_ref[0]                                         # (C, 2S, L//2)
        xo = xo_ref[0]
        taps = []
        for c in range(C):
            for k in range(K):
                src = xe if (k % 2 == 0) else xo
                base = k // 2
                taps.append(src[c, :, base:base + t_conv])     # (2S, T)
        for f in range(F):
            w_off = f * C * K
            acc = taps[0] * wconv_ref[w_off]                   # scalar * vector MACs
            for j in range(1, C * K):
                acc = acc + taps[j] * wconv_ref[w_off + j]
            y = jnp.maximum(acc + bconv_ref[f], 0.0)           # bias + ReLU, (2S, T)
            feats_scr[:, f:f + 1] = jnp.sum(y, axis=-1, keepdims=True) * inv_t

        # ---- Stage 2: LSTM input projection hoisted to one MXU matmul ---------
        feats = feats_scr[...]                                 # (2S, F)
        gx = jnp.dot(feats, wih_ref[...],
                     preferred_element_type=jnp.float32) + blstm_ref[...]   # (2S, 4H)

        # ---- Stage 3: LSTM recurrence (gates pre-ordered i,f,o,g) + fused head -
        whh = whh_ref[...]                                     # (H, 4H)
        wi0 = wi_ref[0:1, :]                                   # (1, H)
        wi1 = wi_ref[1:2, :]
        wfa = wfa_ref[...]                                     # (S, 2) = wf[:, 0::2].T
        wfb = wfb_ref[...]                                     # (S, 2) = wf[:, 1::2].T
        h = jnp.zeros((2, H), jnp.float32)
        c = jnp.zeros((2, H), jnp.float32)
        out_acc = jnp.zeros((1, 2), jnp.float32)
        for t in range(S):                                     # S small -> static unroll
            # TODO(synk): h @ whh is a tiny (2,H)@(H,4H) pass on the serial path;
            # a VPU variant needs per-lane scalar extraction of h, so MXU is kept.
            gates = gx[2 * t:2 * t + 2, :] + jnp.dot(
                h, whh, preferred_element_type=jnp.float32)    # (2, 4H)
            sig = jax.nn.sigmoid(gates[:, :3 * H])             # i, f, o in one pass
            g_g = jnp.tanh(gates[:, 3 * H:])                   # g
            i_g = sig[:, :H]
            f_g = sig[:, H:2 * H]
            o_g = sig[:, 2 * H:]
            c = f_g * c + i_g * g_g
            h = o_g * jnp.tanh(c)
            # Fused head: |compr - x| -> linear_intermediate -> linear_final,
            # accumulated in registers (bias terms folded into bf_eff).
            dh = jnp.abs(h[1:2, :] - h[0:1, :])                # (1, H)
            r0 = jnp.sum(dh * wi0)
            r1 = jnp.sum(dh * wi1)
            out_acc = out_acc + r0 * wfa[t:t + 1, :] + r1 * wfb[t:t + 1, :]
        out_ref[0] = out_acc + bf_ref[...]

    return kernel


# ------------------------------------------------------------------------
# Host-side wrapper: branch fusion, layout prep, weight re-packing, pallas_call
# ------------------------------------------------------------------------
def _reorder_gates(w, hidden):
    # PyTorch packs LSTM gate rows as [i; f; g; o]; reorder to [i; f; o; g] so the
    # kernel can apply one sigmoid over the first 3H contiguous lanes.
    return jnp.concatenate([w[:2 * hidden], w[3 * hidden:], w[2 * hidden:3 * hidden]],
                           axis=0)


def forward(params, x, compr):
    if x.shape[-1] != SEQ_LEN:
        raise Exception("input breaths must have sequence length of 224")
    B, S, C, L = x.shape
    F = params["conv_w"].shape[0]
    H = params["w_hh"].shape[1]
    T = (L - CONV_KERNEL) // CONV_STRIDE + 1
    L2 = L // 2

    # Fuse the two siamese branches; per-batch rows are breath-major with the
    # (x, compr) pair interleaved: row = breath*2 + {0: x, 1: compr}.  Channels
    # are moved in front of the rows so blocks are (sublane, lane)-dense.
    xp = jnp.stack([x, compr], axis=2).reshape(B, 2 * S, C, L)
    xp = jnp.transpose(xp, (0, 2, 1, 3))                       # (B, C, 2S, L)
    x_even = xp[..., 0::2]                                     # (B, C, 2S, L2)
    x_odd = xp[..., 1::2]

    # Conv weights/bias as flat SMEM scalar arrays (VPU-native broadcast operand).
    wconv = params["conv_w"].reshape(-1)                       # (F*C*K,)
    bconv = params["conv_b"]                                   # (F,)

    # LSTM weights: gate rows reordered [i;f;g;o] -> [i;f;o;g], then transposed.
    wih = _reorder_gates(params["w_ih"], H).T                  # (F, 4H)
    whh = _reorder_gates(params["w_hh"], H).T                  # (H, 4H)
    blstm = (_reorder_gates(params["b_ih"], H)
             + _reorder_gates(params["b_hh"], H)).reshape(1, 4 * H)

    # Head weights; linear_intermediate bias folded into an effective final bias.
    wi = params["wi"]                                          # (2, H)
    wfa = params["wf"][:, 0::2].T                              # (S, 2): wf[o, 2s]
    wfb = params["wf"][:, 1::2].T                              # (S, 2): wf[o, 2s+1]
    bf_eff = (params["bf"]
              + jnp.sum(wfa, axis=0) * params["bi"][0]
              + jnp.sum(wfb, axis=0) * params["bi"][1]).reshape(1, 2)

    kernel = _make_fused_kernel(S, C, F, H, T)
    smem = pl.BlockSpec(memory_space=pltpu.MemorySpace.SMEM)
    out = pl.pallas_call(
        kernel,
        out_shape=jax.ShapeDtypeStruct((B, 1, 2), jnp.float32),
        grid=(B,),
        in_specs=[
            pl.BlockSpec((1, C, 2 * S, L2), lambda b: (b, 0, 0, 0)),   # even phase
            pl.BlockSpec((1, C, 2 * S, L2), lambda b: (b, 0, 0, 0)),   # odd phase
            smem,                                                      # conv W (scalars)
            smem,                                                      # conv b (scalars)
            pl.BlockSpec((F, 4 * H), lambda b: (0, 0)),                # w_ih (reordered)
            pl.BlockSpec((H, 4 * H), lambda b: (0, 0)),                # w_hh (reordered)
            pl.BlockSpec((1, 4 * H), lambda b: (0, 0)),                # lstm bias
            pl.BlockSpec((2, H), lambda b: (0, 0)),                    # linear_intermediate W
            pl.BlockSpec((S, 2), lambda b: (0, 0)),                    # wf even columns
            pl.BlockSpec((S, 2), lambda b: (0, 0)),                    # wf odd columns
            pl.BlockSpec((1, 2), lambda b: (0, 0)),                    # effective final bias
        ],
        out_specs=pl.BlockSpec((1, 1, 2), lambda b: (b, 0, 0)),
        scratch_shapes=[pltpu.VMEM((2 * S, F), jnp.float32)],          # pooled conv features
        compiler_params=pltpu.CompilerParams(
            dimension_semantics=("parallel",)),                        # both TCs on v7x
    )(x_even, x_odd, wconv, bconv, wih, whh, blstm, wi, wfa, wfb, bf_eff)
    return out.reshape(B, 2)


# ------------------------------------------------------------------------
# Parameters (deterministic synthetic init, PyTorch-style raw shapes)
# ------------------------------------------------------------------------
def init_params(key, in_chans, n_out_filters, hidden_units, sub_batch_size):
    ks = jax.random.split(key, 10)

    def u(k, shape, fan_in):
        s = 1.0 / (fan_in ** 0.5)
        return jax.random.uniform(k, shape, jnp.float32, -s, s)

    return {
        "conv_w": u(ks[0], (n_out_filters, in_chans, CONV_KERNEL), in_chans * CONV_KERNEL),
        "conv_b": u(ks[1], (n_out_filters,), in_chans * CONV_KERNEL),
        "w_ih": u(ks[2], (4 * hidden_units, n_out_filters), hidden_units),
        "w_hh": u(ks[3], (4 * hidden_units, hidden_units), hidden_units),
        "b_ih": u(ks[4], (4 * hidden_units,), hidden_units),
        "b_hh": u(ks[5], (4 * hidden_units,), hidden_units),
        "wi": u(ks[6], (2, hidden_units), hidden_units),               # linear_intermediate
        "bi": u(ks[7], (2,), hidden_units),
        "wf": u(ks[8], (2, 2 * sub_batch_size), 2 * sub_batch_size),   # linear_final
        "bf": u(ks[9], (2,), 2 * sub_batch_size),
    }


if __name__ == "__main__":
    B, SUB_BATCH, CHANS, SEQ = 2, 8, 1, 224
    N_FILTERS, HIDDEN = 32, 32

    key = jax.random.PRNGKey(0)
    kx, kc, kp = jax.random.split(key, 3)
    x = jax.random.normal(kx, (B, SUB_BATCH, CHANS, SEQ), dtype=jnp.float32)
    compr = jax.random.normal(kc, (B, SUB_BATCH, CHANS, SEQ), dtype=jnp.float32)
    params = init_params(kp, CHANS, N_FILTERS, HIDDEN, SUB_BATCH)

    fwd = jax.jit(forward)
    out = jax.block_until_ready(fwd(params, x, compr))

    assert out.shape == (B, 2), out.shape
    assert bool(jnp.all(jnp.isfinite(out)))
    print("KERNEL_OK")
</pallas_src>

<mosaic_0001>
module attributes {stable_mosaic.version = 11 : i64} {
  func.func @kernel(%arg0: i32, %arg1: memref<1x1x16x112xf32, #tpu.memory_space<vmem>>, %arg2: memref<1x1x16x112xf32, #tpu.memory_space<vmem>>, %arg3: memref<256xf32, #tpu.memory_space<smem>>, %arg4: memref<32xf32, #tpu.memory_space<smem>>, %arg5: memref<32x128xf32, #tpu.memory_space<vmem>>, %arg6: memref<32x128xf32, #tpu.memory_space<vmem>>, %arg7: memref<1x128xf32, #tpu.memory_space<vmem>>, %arg8: memref<2x32xf32, #tpu.memory_space<vmem>>, %arg9: memref<8x2xf32, #tpu.memory_space<vmem>>, %arg10: memref<8x2xf32, #tpu.memory_space<vmem>>, %arg11: memref<1x2xf32, #tpu.memory_space<vmem>>, %arg12: memref<1x1x2xf32, #tpu.memory_space<vmem>>, %arg13: memref<16x32xf32, #tpu.memory_space<vmem>>) attributes {dimension_semantics = [#tpu.dimension_semantics<parallel>], iteration_bounds = array<i64: 2>, scalar_prefetch = 0 : i64, scratch_operands = 1 : i64, tpu.core_type = #tpu.core_type<tc>, window_params = [{transform_indices = @transform_0, window_bounds = array<i64: 1, 1, 16, 112>}, {transform_indices = @transform_1, window_bounds = array<i64: 1, 1, 16, 112>}, {transform_indices = @transform_2, window_bounds = array<i64: 256>}, {transform_indices = @transform_3, window_bounds = array<i64: 32>}, {pipeline_mode = #tpu.pipeline_mode<synchronous>, transform_indices = @transform_4, window_bounds = array<i64: 32, 128>}, {pipeline_mode = #tpu.pipeline_mode<synchronous>, transform_indices = @transform_5, window_bounds = array<i64: 32, 128>}, {pipeline_mode = #tpu.pipeline_mode<synchronous>, transform_indices = @transform_6, window_bounds = array<i64: 1, 128>}, {pipeline_mode = #tpu.pipeline_mode<synchronous>, transform_indices = @transform_7, window_bounds = array<i64: 2, 32>}, {pipeline_mode = #tpu.pipeline_mode<synchronous>, transform_indices = @transform_8, window_bounds = array<i64: 8, 2>}, {pipeline_mode = #tpu.pipeline_mode<synchronous>, transform_indices = @transform_9, window_bounds = array<i64: 8, 2>}, {pipeline_mode = #tpu.pipeline_mode<synchronous>, transform_indices = @transform_10, window_bounds = array<i64: 1, 2>}, {transform_indices = @transform_11, window_bounds = array<i64: 1, 1, 2>}]} {
    %c0 = arith.constant 0 : index
    %c0_0 = arith.constant 0 : index
    %c0_1 = arith.constant 0 : index
    %c0_2 = arith.constant 0 : index
    %0 = vector.load %arg1[%c0, %c0_0, %c0_1, %c0_2] : memref<1x1x16x112xf32, #tpu.memory_space<vmem>>, vector<1x1x16x112xf32>
    %1 = vector.shape_cast %0 : vector<1x1x16x112xf32> to vector<1x16x112xf32>
    %c0_3 = arith.constant 0 : index
    %c0_4 = arith.constant 0 : index
    %c0_5 = arith.constant 0 : index
    %c0_6 = arith.constant 0 : index
    %2 = vector.load %arg2[%c0_3, %c0_4, %c0_5, %c0_6] : memref<1x1x16x112xf32, #tpu.memory_space<vmem>>, vector<1x1x16x112xf32>
    %3 = vector.shape_cast %2 : vector<1x1x16x112xf32> to vector<1x16x112xf32>
    %4 = vector.extract_strided_slice %1 {offsets = [0, 0, 0], sizes = [1, 16, 109], strides = [1, 1, 1]} : vector<1x16x112xf32> to vector<1x16x109xf32>
    %5 = vector.shape_cast %4 : vector<1x16x109xf32> to vector<16x109xf32>
    %6 = vector.extract_strided_slice %3 {offsets = [0, 0, 0], sizes = [1, 16, 109], strides = [1, 1, 1]} : vector<1x16x112xf32> to vector<1x16x109xf32>
    %7 = vector.shape_cast %6 : vector<1x16x109xf32> to vector<16x109xf32>
    %8 = vector.extract_strided_slice %1 {offsets = [0, 0, 1], sizes = [1, 16, 109], strides = [1, 1, 1]} : vector<1x16x112xf32> to vector<1x16x109xf32>
    %9 = vector.shape_cast %8 : vector<1x16x109xf32> to vector<16x109xf32>
    %10 = vector.extract_strided_slice %3 {offsets = [0, 0, 1], sizes = [1, 16, 109], strides = [1, 1, 1]} : vector<1x16x112xf32> to vector<1x16x109xf32>
    %11 = vector.shape_cast %10 : vector<1x16x109xf32> to vector<16x109xf32>
    %12 = vector.extract_strided_slice %1 {offsets = [0, 0, 2], sizes = [1, 16, 109], strides = [1, 1, 1]} : vector<1x16x112xf32> to vector<1x16x109xf32>
    %13 = vector.shape_cast %12 : vector<1x16x109xf32> to vector<16x109xf32>
    %14 = vector.extract_strided_slice %3 {offsets = [0, 0, 2], sizes = [1, 16, 109], strides = [1, 1, 1]} : vector<1x16x112xf32> to vector<1x16x109xf32>
    %15 = vector.shape_cast %14 : vector<1x16x109xf32> to vector<16x109xf32>
    %16 = vector.extract_strided_slice %1 {offsets = [0, 0, 3], sizes = [1, 16, 109], strides = [1, 1, 1]} : vector<1x16x112xf32> to vector<1x16x109xf32>
    %17 = vector.shape_cast %16 : vector<1x16x109xf32> to vector<16x109xf32>
    %18 = vector.extract_strided_slice %3 {offsets = [0, 0, 3], sizes = [1, 16, 109], strides = [1, 1, 1]} : vector<1x16x112xf32> to vector<1x16x109xf32>
    %19 = vector.shape_cast %18 : vector<1x16x109xf32> to vector<16x109xf32>
    %c0_7 = arith.constant 0 : index
    %20 = memref.load %arg3[%c0_7] : memref<256xf32, #tpu.memory_space<smem>>
    %21 = vector.broadcast %20 : f32 to vector<16x109xf32>
    %22 = arith.mulf %5, %21 : vector<16x109xf32>
    %c1 = arith.constant 1 : index
    %23 = memref.load %arg3[%c1] : memref<256xf32, #tpu.memory_space<smem>>
    %24 = vector.broadcast %23 : f32 to vector<16x109xf32>
    %25 = arith.mulf %7, %24 : vector<16x109xf32>
    %26 = arith.addf %22, %25 : vector<16x109xf32>
    %c2 = arith.constant 2 : index
    %27 = memref.load %arg3[%c2] : memref<256xf32, #tpu.memory_space<smem>>
    %28 = vector.broadcast %27 : f32 to vector<16x109xf32>
    %29 = arith.mulf %9, %28 : vector<16x109xf32>
    %30 = arith.addf %26, %29 : vector<16x109xf32>
    %c3 = arith.constant 3 : index
    %31 = memref.load %arg3[%c3] : memref<256xf32, #tpu.memory_space<smem>>
    %32 = vector.broadcast %31 : f32 to vector<16x109xf32>
    %33 = arith.mulf %11, %32 : vector<16x109xf32>
    %34 = arith.addf %30, %33 : vector<16x109xf32>
    %c4 = arith.constant 4 : index
    %35 = memref.load %arg3[%c4] : memref<256xf32, #tpu.memory_space<smem>>
    %36 = vector.broadcast %35 : f32 to vector<16x109xf32>
    %37 = arith.mulf %13, %36 : vector<16x109xf32>
    %38 = arith.addf %34, %37 : vector<16x109xf32>
    %c5 = arith.constant 5 : index
    %39 = memref.load %arg3[%c5] : memref<256xf32, #tpu.memory_space<smem>>
    %40 = vector.broadcast %39 : f32 to vector<16x109xf32>
    %41 = arith.mulf %15, %40 : vector<16x109xf32>
    %42 = arith.addf %38, %41 : vector<16x109xf32>
    %c6 = arith.constant 6 : index
    %43 = memref.load %arg3[%c6] : memref<256xf32, #tpu.memory_space<smem>>
    %44 = vector.broadcast %43 : f32 to vector<16x109xf32>
    %45 = arith.mulf %17, %44 : vector<16x109xf32>
    %46 = arith.addf %42, %45 : vector<16x109xf32>
    %c7 = arith.constant 7 : index
    %47 = memref.load %arg3[%c7] : memref<256xf32, #tpu.memory_space<smem>>
    %48 = vector.broadcast %47 : f32 to vector<16x109xf32>
    %49 = arith.mulf %19, %48 : vector<16x109xf32>
    %50 = arith.addf %46, %49 : vector<16x109xf32>
    %c0_8 = arith.constant 0 : index
    %51 = memref.load %arg4[%c0_8] : memref<32xf32, #tpu.memory_space<smem>>
    %52 = vector.broadcast %51 : f32 to vector<16x109xf32>
    %53 = arith.addf %50, %52 : vector<16x109xf32>
    %cst = arith.constant 0.000000e+00 : f32
    %54 = vector.broadcast %cst : f32 to vector<16x109xf32>
    %55 = arith.maximumf %53, %54 : vector<16x109xf32>
    %cst_9 = arith.constant dense<0.000000e+00> : vector<16xf32>
    %56 = vector.multi_reduction <add>, %55, %cst_9 [1] : vector<16x109xf32> to vector<16xf32>
    %57 = vector.shape_cast %56 : vector<16xf32> to vector<16x1xf32>
    %cst_10 = arith.constant 0.00917431153 : f32
    %58 = vector.broadcast %cst_10 : f32 to vector<16x1xf32>
    %59 = arith.mulf %57, %58 : vector<16x1xf32>
    %c0_11 = arith.constant 0 : index
    %c0_12 = arith.constant 0 : index
    %60 = vector.load %arg13[%c0_11, %c0_12] : memref<16x32xf32, #tpu.memory_space<vmem>>, vector<16x1xf32>
    tpu.vector_store %arg13[%c0_11, %c0_12], %59 {strides = array<i32>} : memref<16x32xf32, #tpu.memory_space<vmem>>, vector<16x1xf32>,
    %c8 = arith.constant 8 : index
    %61 = memref.load %arg3[%c8] : memref<256xf32, #tpu.memory_space<smem>>
    %62 = vector.broadcast %61 : f32 to vector<16x109xf32>
    %63 = arith.mulf %5, %62 : vector<16x109xf32>
    %c9 = arith.constant 9 : index
    %64 = memref.load %arg3[%c9] : memref<256xf32, #tpu.memory_space<smem>>
    %65 = vector.broadcast %64 : f32 to vector<16x109xf32>
    %66 = arith.mulf %7, %65 : vector<16x109xf32>
    %67 = arith.addf %63, %66 : vector<16x109xf32>
    %c10 = arith.constant 10 : index
    %68 = memref.load %arg3[%c10] : memref<256xf32, #tpu.memory_space<smem>>
    %69 = vector.broadcast %68 : f32 to vector<16x109xf32>
    %70 = arith.mulf %9, %69 : vector<16x109xf32>
    %71 = arith.addf %67, %70 : vector<16x109xf32>
    %c11 = arith.constant 11 : index
    %72 = memref.load %arg3[%c11] : memref<256xf32, #tpu.memory_space<smem>>
    %73 = vector.broadcast %72 : f32 to vector<16x109xf32>
    %74 = arith.mulf %11, %73 : vector<16x109xf32>
    %75 = arith.addf %71, %74 : vector<16x109xf32>
    %c12 = arith.constant 12 : index
    %76 = memref.load %arg3[%c12] : memref<256xf32, #tpu.memory_space<smem>>
    %77 = vector.broadcast %76 : f32 to vector<16x109xf32>
    %78 = arith.mulf %13, %77 : vector<16x109xf32>
    %79 = arith.addf %75, %78 : vector<16x109xf32>
    %c13 = arith.constant 13 : index
    %80 = memref.load %arg3[%c13] : memref<256xf32, #tpu.memory_space<smem>>
    %81 = vector.broadcast %80 : f32 to vector<16x109xf32>
    %82 = arith.mulf %15, %81 : vector<16x109xf32>
    %83 = arith.addf %79, %82 : vector<16x109xf32>
    %c14 = arith.constant 14 : index
    %84 = memref.load %arg3[%c14] : memref<256xf32, #tpu.memory_space<smem>>
    %85 = vector.broadcast %84 : f32 to vector<16x109xf32>
    %86 = arith.mulf %17, %85 : vector<16x109xf32>
    %87 = arith.addf %83, %86 : vector<16x109xf32>
    %c15 = arith.constant 15 : index
    %88 = memref.load %arg3[%c15] : memref<256xf32, #tpu.memory_space<smem>>
    %89 = vector.broadcast %88 : f32 to vector<16x109xf32>
    %90 = arith.mulf %19, %89 : vector<16x109xf32>
    %91 = arith.addf %87, %90 : vector<16x109xf32>
    %c1_13 = arith.constant 1 : index
    %92 = memref.load %arg4[%c1_13] : memref<32xf32, #tpu.memory_space<smem>>
    %93 = vector.broadcast %92 : f32 to vector<16x109xf32>
    %94 = arith.addf %91, %93 : vector<16x109xf32>
    %cst_14 = arith.constant 0.000000e+00 : f32
    %95 = vector.broadcast %cst_14 : f32 to vector<16x109xf32>
    %96 = arith.maximumf %94, %95 : vector<16x109xf32>
    %cst_15 = arith.constant dense<0.000000e+00> : vector<16xf32>
    %97 = vector.multi_reduction <add>, %96, %cst_15 [1] : vector<16x109xf32> to vector<16xf32>
    %98 = vector.shape_cast %97 : vector<16xf32> to vector<16x1xf32>
    %cst_16 = arith.constant 0.00917431153 : f32
    %99 = vector.broadcast %cst_16 : f32 to vector<16x1xf32>
    %100 = arith.mulf %98, %99 : vector<16x1xf32>
    %c0_17 = arith.constant 0 : index
    %c1_18 = arith.constant 1 : index
    %101 = vector.load %arg13[%c0_17, %c1_18] : memref<16x32xf32, #tpu.memory_space<vmem>>, vector<16x1xf32>
    tpu.vector_store %arg13[%c0_17, %c1_18], %100 {strides = array<i32>} : memref<16x32xf32, #tpu.memory_space<vmem>>, vector<16x1xf32>,
    %c16 = arith.constant 16 : index
    %102 = memref.load %arg3[%c16] : memref<256xf32, #tpu.memory_space<smem>>
    %103 = vector.broadcast %102 : f32 to vector<16x109xf32>
    %104 = arith.mulf %5, %103 : vector<16x109xf32>
    %c17 = arith.constant 17 : index
    %105 = memref.load %arg3[%c17] : memref<256xf32, #tpu.memory_space<smem>>
    %106 = vector.broadcast %105 : f32 to vector<16x109xf32>
    %107 = arith.mulf %7, %106 : vector<16x109xf32>
    %108 = arith.addf %104, %107 : vector<16x109xf32>
    %c18 = arith.constant 18 : index
    %109 = memref.load %arg3[%c18] : memref<256xf32, #tpu.memory_space<smem>>
    %110 = vector.broadcast %109 : f32 to vector<16x109xf32>
    %111 = arith.mulf %9, %110 : vector<16x109xf32>
    %112 = arith.addf %108, %111 : vector<16x109xf32>
    %c19 = arith.constant 19 : index
    %113 = memref.load %arg3[%c19] : memref<256xf32, #tpu.memory_space<smem>>
    %114 = vector.broadcast %113 : f32 to vector<16x109xf32>
    %115 = arith.mulf %11, %114 : vector<16x109xf32>
    %116 = arith.addf %112, %115 : vector<16x109xf32>
    %c20 = arith.constant 20 : index
    %117 = memref.load %arg3[%c20] : memref<256xf32, #tpu.memory_space<smem>>
    %118 = vector.broadcast %117 : f32 to vector<16x109xf32>
    %119 = arith.mulf %13, %118 : vector<16x109xf32>
    %120 = arith.addf %116, %119 : vector<16x109xf32>
    %c21 = arith.constant 21 : index
    %121 = memref.load %arg3[%c21] : memref<256xf32, #tpu.memory_space<smem>>
    %122 = vector.broadcast %121 : f32 to vector<16x109xf32>
    %123 = arith.mulf %15, %122 : vector<16x109xf32>
    %124 = arith.addf %120, %123 : vector<16x109xf32>
    %c22 = arith.constant 22 : index
    %125 = memref.load %arg3[%c22] : memref<256xf32, #tpu.memory_space<smem>>
    %126 = vector.broadcast %125 : f32 to vector<16x109xf32>
    %127 = arith.mulf %17, %126 : vector<16x109xf32>
    %128 = arith.addf %124, %127 : vector<16x109xf32>
    %c23 = arith.constant 23 : index
    %129 = memref.load %arg3[%c23] : memref<256xf32, #tpu.memory_space<smem>>
    %130 = vector.broadcast %129 : f32 to vector<16x109xf32>
    %131 = arith.mulf %19, %130 : vector<16x109xf32>
    %132 = arith.addf %128, %131 : vector<16x109xf32>
    %c2_19 = arith.constant 2 : index
    %133 = memref.load %arg4[%c2_19] : memref<32xf32, #tpu.memory_space<smem>>
    %134 = vector.broadcast %133 : f32 to vector<16x109xf32>
    %135 = arith.addf %132, %134 : vector<16x109xf32>
    %cst_20 = arith.constant 0.000000e+00 : f32
    %136 = vector.broadcast %cst_20 : f32 to vector<16x109xf32>
    %137 = arith.maximumf %135, %136 : vector<16x109xf32>
    %cst_21 = arith.constant dense<0.000000e+00> : vector<16xf32>
    %138 = vector.multi_reduction <add>, %137, %cst_21 [1] : vector<16x109xf32> to vector<16xf32>
    %139 = vector.shape_cast %138 : vector<16xf32> to vector<16x1xf32>
    %cst_22 = arith.constant 0.00917431153 : f32
    %140 = vector.broadcast %cst_22 : f32 to vector<16x1xf32>
    %141 = arith.mulf %139, %140 : vector<16x1xf32>
    %c0_23 = arith.constant 0 : index
    %c2_24 = arith.constant 2 : index
    %142 = vector.load %arg13[%c0_23, %c2_24] : memref<16x32xf32, #tpu.memory_space<vmem>>, vector<16x1xf32>
    tpu.vector_store %arg13[%c0_23, %c2_24], %141 {strides = array<i32>} : memref<16x32xf32, #tpu.memory_space<vmem>>, vector<16x1xf32>,
    %c24 = arith.constant 24 : index
    %143 = memref.load %arg3[%c24] : memref<256xf32, #tpu.memory_space<smem>>
    %144 = vector.broadcast %143 : f32 to vector<16x109xf32>
    %145 = arith.mulf %5, %144 : vector<16x109xf32>
    %c25 = arith.constant 25 : index
    %146 = memref.load %arg3[%c25] : memref<256xf32, #tpu.memory_space<smem>>
    %147 = vector.broadcast %146 : f32 to vector<16x109xf32>
    %148 = arith.mulf %7, %147 : vector<16x109xf32>
    %149 = arith.addf %145, %148 : vector<16x109xf32>
    %c26 = arith.constant 26 : index
    %150 = memref.load %arg3[%c26] : memref<256xf32, #tpu.memory_space<smem>>
    %151 = vector.broadcast %150 : f32 to vector<16x109xf32>
    %152 = arith.mulf %9, %151 : vector<16x109xf32>
    %153 = arith.addf %149, %152 : vector<16x109xf32>
    %c27 = arith.constant 27 : index
    %154 = memref.load %arg3[%c27] : memref<256xf32, #tpu.memory_space<smem>>
    %155 = vector.broadcast %154 : f32 to vector<16x109xf32>
    %156 = arith.mulf %11, %155 : vector<16x109xf32>
    %157 = arith.addf %153, %156 : vector<16x109xf32>
    %c28 = arith.constant 28 : index
    %158 = memref.load %arg3[%c28] : memref<256xf32, #tpu.memory_space<smem>>
    %159 = vector.broadcast %158 : f32 to vector<16x109xf32>
    %160 = arith.mulf %13, %159 : vector<16x109xf32>
    %161 = arith.addf %157, %160 : vector<16x109xf32>
    %c29 = arith.constant 29 : index
    %162 = memref.load %arg3[%c29] : memref<256xf32, #tpu.memory_space<smem>>
    %163 = vector.broadcast %162 : f32 to vector<16x109xf32>
    %164 = arith.mulf %15, %163 : vector<16x109xf32>
    %165 = arith.addf %161, %164 : vector<16x109xf32>
    %c30 = arith.constant 30 : index
    %166 = memref.load %arg3[%c30] : memref<256xf32, #tpu.memory_space<smem>>
    %167 = vector.broadcast %166 : f32 to vector<16x109xf32>
    %168 = arith.mulf %17, %167 : vector<16x109xf32>
    %169 = arith.addf %165, %168 : vector<16x109xf32>
    %c31 = arith.constant 31 : index
    %170 = memref.load %arg3[%c31] : memref<256xf32, #tpu.memory_space<smem>>
    %171 = vector.broadcast %170 : f32 to vector<16x109xf32>
    %172 = arith.mulf %19, %171 : vector<16x109xf32>
    %173 = arith.addf %169, %172 : vector<16x109xf32>
    %c3_25 = arith.constant 3 : index
    %174 = memref.load %arg4[%c3_25] : memref<32xf32, #tpu.memory_space<smem>>
    %175 = vector.broadcast %174 : f32 to vector<16x109xf32>
    %176 = arith.addf %173, %175 : vector<16x109xf32>
    %cst_26 = arith.constant 0.000000e+00 : f32
    %177 = vector.broadcast %cst_26 : f32 to vector<16x109xf32>
    %178 = arith.maximumf %176, %177 : vector<16x109xf32>
    %cst_27 = arith.constant dense<0.000000e+00> : vector<16xf32>
    %179 = vector.multi_reduction <add>, %178, %cst_27 [1] : vector<16x109xf32> to vector<16xf32>
    %180 = vector.shape_cast %179 : vector<16xf32> to vector<16x1xf32>
    %cst_28 = arith.constant 0.00917431153 : f32
    %181 = vector.broadcast %cst_28 : f32 to vector<16x1xf32>
    %182 = arith.mulf %180, %181 : vector<16x1xf32>
    %c0_29 = arith.constant 0 : index
    %c3_30 = arith.constant 3 : index
    %183 = vector.load %arg13[%c0_29, %c3_30] : memref<16x32xf32, #tpu.memory_space<vmem>>, vector<16x1xf32>
    tpu.vector_store %arg13[%c0_29, %c3_30], %182 {strides = array<i32>} : memref<16x32xf32, #tpu.memory_space<vmem>>, vector<16x1xf32>,
    %c32 = arith.constant 32 : index
    %184 = memref.load %arg3[%c32] : memref<256xf32, #tpu.memory_space<smem>>
    %185 = vector.broadcast %184 : f32 to vector<16x109xf32>
    %186 = arith.mulf %5, %185 : vector<16x109xf32>
    %c33 = arith.constant 33 : index
    %187 = memref.load %arg3[%c33] : memref<256xf32, #tpu.memory_space<smem>>
    %188 = vector.broadcast %187 : f32 to vector<16x109xf32>
    %189 = arith.mulf %7, %188 : vector<16x109xf32>
    %190 = arith.addf %186, %189 : vector<16x109xf32>
    %c34 = arith.constant 34 : index
    %191 = memref.load %arg3[%c34] : memref<256xf32, #tpu.memory_space<smem>>
    %192 = vector.broadcast %191 : f32 to vector<16x109xf32>
    %193 = arith.mulf %9, %192 : vector<16x109xf32>
    %194 = arith.addf %190, %193 : vector<16x109xf32>
    %c35 = arith.constant 35 : index
    %195 = memref.load %arg3[%c35] : memref<256xf32, #tpu.memory_space<smem>>
    %196 = vector.broadcast %195 : f32 to vector<16x109xf32>
    %197 = arith.mulf %11, %196 : vector<16x109xf32>
    %198 = arith.addf %194, %197 : vector<16x109xf32>
    %c36 = arith.constant 36 : index
    %199 = memref.load %arg3[%c36] : memref<256xf32, #tpu.memory_space<smem>>
    %200 = vector.broadcast %199 : f32 to vector<16x109xf32>
    %201 = arith.mulf %13, %200 : vector<16x109xf32>
    %202 = arith.addf %198, %201 : vector<16x109xf32>
    %c37 = arith.constant 37 : index
    %203 = memref.load %arg3[%c37] : memref<256xf32, #tpu.memory_space<smem>>
    %204 = vector.broadcast %203 : f32 to vector<16x109xf32>
    %205 = arith.mulf %15, %204 : vector<16x109xf32>
    %206 = arith.addf %202, %205 : vector<16x109xf32>
    %c38 = arith.constant 38 : index
    %207 = memref.load %arg3[%c38] : memref<256xf32, #tpu.memory_space<smem>>
    %208 = vector.broadcast %207 : f32 to vector<16x109xf32>
    %209 = arith.mulf %17, %208 : vector<16x109xf32>
    %210 = arith.addf %206, %209 : vector<16x109xf32>
    %c39 = arith.constant 39 : index
    %211 = memref.load %arg3[%c39] : memref<256xf32, #tpu.memory_space<smem>>
    %212 = vector.broadcast %211 : f32 to vector<16x109xf32>
    %213 = arith.mulf %19, %212 : vector<16x109xf32>
    %214 = arith.addf %210, %213 : vector<16x109xf32>
    %c4_31 = arith.constant 4 : index
    %215 = memref.load %arg4[%c4_31] : memref<32xf32, #tpu.memory_space<smem>>
    %216 = vector.broadcast %215 : f32 to vector<16x109xf32>
    %217 = arith.addf %214, %216 : vector<16x109xf32>
    %cst_32 = arith.constant 0.000000e+00 : f32
    %218 = vector.broadcast %cst_32 : f32 to vector<16x109xf32>
    %219 = arith.maximumf %217, %218 : vector<16x109xf32>
    %cst_33 = arith.constant dense<0.000000e+00> : vector<16xf32>
    %220 = vector.multi_reduction <add>, %219, %cst_33 [1] : vector<16x109xf32> to vector<16xf32>
    %221 = vector.shape_cast %220 : vector<16xf32> to vector<16x1xf32>
    %cst_34 = arith.constant 0.00917431153 : f32
    %222 = vector.broadcast %cst_34 : f32 to vector<16x1xf32>
    %223 = arith.mulf %221, %222 : vector<16x1xf32>
    %c0_35 = arith.constant 0 : index
    %c4_36 = arith.constant 4 : index
    %224 = vector.load %arg13[%c0_35, %c4_36] : memref<16x32xf32, #tpu.memory_space<vmem>>, vector<16x1xf32>
    tpu.vector_store %arg13[%c0_35, %c4_36], %223 {strides = array<i32>} : memref<16x32xf32, #tpu.memory_space<vmem>>, vector<16x1xf32>,
    %c40 = arith.constant 40 : index
    %225 = memref.load %arg3[%c40] : memref<256xf32, #tpu.memory_space<smem>>
    %226 = vector.broadcast %225 : f32 to vector<16x109xf32>
    %227 = arith.mulf %5, %226 : vector<16x109xf32>
    %c41 = arith.constant 41 : index
    %228 = memref.load %arg3[%c41] : memref<256xf32, #tpu.memory_space<smem>>
    %229 = vector.broadcast %228 : f32 to vector<16x109xf32>
    %230 = arith.mulf %7, %229 : vector<16x109xf32>
    %231 = arith.addf %227, %230 : vector<16x109xf32>
    %c42 = arith.constant 42 : index
    %232 = memref.load %arg3[%c42] : memref<256xf32, #tpu.memory_space<smem>>
    %233 = vector.broadcast %232 : f32 to vector<16x109xf32>
    %234 = arith.mulf %9, %233 : vector<16x109xf32>
    %235 = arith.addf %231, %234 : vector<16x109xf32>
    %c43 = arith.constant 43 : index
    %236 = memref.load %arg3[%c43] : memref<256xf32, #tpu.memory_space<smem>>
    %237 = vector.broadcast %236 : f32 to vector<16x109xf32>
    %238 = arith.mulf %11, %237 : vector<16x109xf32>
    %239 = arith.addf %235, %238 : vector<16x109xf32>
    %c44 = arith.constant 44 : index
    %240 = memref.load %arg3[%c44] : memref<256xf32, #tpu.memory_space<smem>>
    %241 = vector.broadcast %240 : f32 to vector<16x109xf32>
    %242 = arith.mulf %13, %241 : vector<16x109xf32>
    %243 = arith.addf %239, %242 : vector<16x109xf32>
    %c45 = arith.constant 45 : index
    %244 = memref.load %arg3[%c45] : memref<256xf32, #tpu.memory_space<smem>>
    %245 = vector.broadcast %244 : f32 to vector<16x109xf32>
    %246 = arith.mulf %15, %245 : vector<16x109xf32>
    %247 = arith.addf %243, %246 : vector<16x109xf32>
    %c46 = arith.constant 46 : index
    %248 = memref.load %arg3[%c46] : memref<256xf32, #tpu.memory_space<smem>>
    %249 = vector.broadcast %248 : f32 to vector<16x109xf32>
    %250 = arith.mulf %17, %249 : vector<16x109xf32>
    %251 = arith.addf %247, %250 : vector<16x109xf32>
    %c47 = arith.constant 47 : index
    %252 = memref.load %arg3[%c47] : memref<256xf32, #tpu.memory_space<smem>>
    %253 = vector.broadcast %252 : f32 to vector<16x109xf32>
    %254 = arith.mulf %19, %253 : vector<16x109xf32>
    %255 = arith.addf %251, %254 : vector<16x109xf32>
    %c5_37 = arith.constant 5 : index
    %256 = memref.load %arg4[%c5_37] : memref<32xf32, #tpu.memory_space<smem>>
    %257 = vector.broadcast %256 : f32 to vector<16x109xf32>
    %258 = arith.addf %255, %257 : vector<16x109xf32>
    %cst_38 = arith.constant 0.000000e+00 : f32
    %259 = vector.broadcast %cst_38 : f32 to vector<16x109xf32>
    %260 = arith.maximumf %258, %259 : vector<16x109xf32>
    %cst_39 = arith.constant dense<0.000000e+00> : vector<16xf32>
    %261 = vector.multi_reduction <add>, %260, %cst_39 [1] : vector<16x109xf32> to vector<16xf32>
    %262 = vector.shape_cast %261 : vector<16xf32> to vector<16x1xf32>
    %cst_40 = arith.constant 0.00917431153 : f32
    %263 = vector.broadcast %cst_40 : f32 to vector<16x1xf32>
    %264 = arith.mulf %262, %263 : vector<16x1xf32>
    %c0_41 = arith.constant 0 : index
    %c5_42 = arith.constant 5 : index
    %265 = vector.load %arg13[%c0_41, %c5_42] : memref<16x32xf32, #tpu.memory_space<vmem>>, vector<16x1xf32>
    tpu.vector_store %arg13[%c0_41, %c5_42], %264 {strides = array<i32>} : memref<16x32xf32, #tpu.memory_space<vmem>>, vector<16x1xf32>,
    %c48 = arith.constant 48 : index
    %266 = memref.load %arg3[%c48] : memref<256xf32, #tpu.memory_space<smem>>
    %267 = vector.broadcast %266 : f32 to vector<16x109xf32>
    %268 = arith.mulf %5, %267 : vector<16x109xf32>
    %c49 = arith.constant 49 : index
    %269 = memref.load %arg3[%c49] : memref<256xf32, #tpu.memory_space<smem>>
    %270 = vector.broadcast %269 : f32 to vector<16x109xf32>
    %271 = arith.mulf %7, %270 : vector<16x109xf32>
    %272 = arith.addf %268, %271 : vector<16x109xf32>
    %c50 = arith.constant 50 : index
    %273 = memref.load %arg3[%c50] : memref<256xf32, #tpu.memory_space<smem>>
    %274 = vector.broadcast %273 : f32 to vector<16x109xf32>
    %275 = arith.mulf %9, %274 : vector<16x109xf32>
    %276 = arith.addf %272, %275 : vector<16x109xf32>
    %c51 = arith.constant 51 : index
    %277 = memref.load %arg3[%c51] : memref<256xf32, #tpu.memory_space<smem>>
    %278 = vector.broadcast %277 : f32 to vector<16x109xf32>
    %279 = arith.mulf %11, %278 : vector<16x109xf32>
    %280 = arith.addf %276, %279 : vector<16x109xf32>
    %c52 = arith.constant 52 : index
    %281 = memref.load %arg3[%c52] : memref<256xf32, #tpu.memory_space<smem>>
    %282 = vector.broadcast %281 : f32 to vector<16x109xf32>
    %283 = arith.mulf %13, %282 : vector<16x109xf32>
    %284 = arith.addf %280, %283 : vector<16x109xf32>
    %c53 = arith.constant 53 : index
    %285 = memref.load %arg3[%c53] : memref<256xf32, #tpu.memory_space<smem>>
    %286 = vector.broadcast %285 : f32 to vector<16x109xf32>
    %287 = arith.mulf %15, %286 : vector<16x109xf32>
    %288 = arith.addf %284, %287 : vector<16x109xf32>
    %c54 = arith.constant 54 : index
    %289 = memref.load %arg3[%c54] : memref<256xf32, #tpu.memory_space<smem>>
    %290 = vector.broadcast %289 : f32 to vector<16x109xf32>
    %291 = arith.mulf %17, %290 : vector<16x109xf32>
    %292 = arith.addf %288, %291 : vector<16x109xf32>
    %c55 = arith.constant 55 : index
    %293 = memref.load %arg3[%c55] : memref<256xf32, #tpu.memory_space<smem>>
    %294 = vector.broadcast %293 : f32 to vector<16x109xf32>
    %295 = arith.mulf %19, %294 : vector<16x109xf32>
    %296 = arith.addf %292, %295 : vector<16x109xf32>
    %c6_43 = arith.constant 6 : index
    %297 = memref.load %arg4[%c6_43] : memref<32xf32, #tpu.memory_space<smem>>
    %298 = vector.broadcast %297 : f32 to vector<16x109xf32>
    %299 = arith.addf %296, %298 : vector<16x109xf32>
    %cst_44 = arith.constant 0.000000e+00 : f32
    %300 = vector.broadcast %cst_44 : f32 to vector<16x109xf32>
    %301 = arith.maximumf %299, %300 : vector<16x109xf32>
    %cst_45 = arith.constant dense<0.000000e+00> : vector<16xf32>
    %302 = vector.multi_reduction <add>, %301, %cst_45 [1] : vector<16x109xf32> to vector<16xf32>
    %303 = vector.shape_cast %302 : vector<16xf32> to vector<16x1xf32>
    %cst_46 = arith.constant 0.00917431153 : f32
    %304 = vector.broadcast %cst_46 : f32 to vector<16x1xf32>
    %305 = arith.mulf %303, %304 : vector<16x1xf32>
    %c0_47 = arith.constant 0 : index
    %c6_48 = arith.constant 6 : index
    %306 = vector.load %arg13[%c0_47, %c6_48] : memref<16x32xf32, #tpu.memory_space<vmem>>, vector<16x1xf32>
    tpu.vector_store %arg13[%c0_47, %c6_48], %305 {strides = array<i32>} : memref<16x32xf32, #tpu.memory_space<vmem>>, vector<16x1xf32>,
    %c56 = arith.constant 56 : index
    %307 = memref.load %arg3[%c56] : memref<256xf32, #tpu.memory_space<smem>>
    %308 = vector.broadcast %307 : f32 to vector<16x109xf32>
    %309 = arith.mulf %5, %308 : vector<16x109xf32>
    %c57 = arith.constant 57 : index
    %310 = memref.load %arg3[%c57] : memref<256xf32, #tpu.memory_space<smem>>
    %311 = vector.broadcast %310 : f32 to vector<16x109xf32>
    %312 = arith.mulf %7, %311 : vector<16x109xf32>
    %313 = arith.addf %309, %312 : vector<16x109xf32>
    %c58 = arith.constant 58 : index
    %314 = memref.load %arg3[%c58] : memref<256xf32, #tpu.memory_space<smem>>
    %315 = vector.broadcast %314 : f32 to vector<16x109xf32>
    %316 = arith.mulf %9, %315 : vector<16x109xf32>
    %317 = arith.addf %313, %316 : vector<16x109xf32>
    %c59 = arith.constant 59 : index
    %318 = memref.load %arg3[%c59] : memref<256xf32, #tpu.memory_space<smem>>
    %319 = vector.broadcast %318 : f32 to vector<16x109xf32>
    %320 = arith.mulf %11, %319 : vector<16x109xf32>
    %321 = arith.addf %317, %320 : vector<16x109xf32>
    %c60 = arith.constant 60 : index
    %322 = memref.load %arg3[%c60] : memref<256xf32, #tpu.memory_space<smem>>
    %323 = vector.broadcast %322 : f32 to vector<16x109xf32>
    %324 = arith.mulf %13, %323 : vector<16x109xf32>
    %325 = arith.addf %321, %324 : vector<16x109xf32>
    %c61 = arith.constant 61 : index
    %326 = memref.load %arg3[%c61] : memref<256xf32, #tpu.memory_space<smem>>
    %327 = vector.broadcast %326 : f32 to vector<16x109xf32>
    %328 = arith.mulf %15, %327 : vector<16x109xf32>
    %329 = arith.addf %325, %328 : vector<16x109xf32>
    %c62 = arith.constant 62 : index
    %330 = memref.load %arg3[%c62] : memref<256xf32, #tpu.memory_space<smem>>
    %331 = vector.broadcast %330 : f32 to vector<16x109xf32>
    %332 = arith.mulf %17, %331 : vector<16x109xf32>
    %333 = arith.addf %329, %332 : vector<16x109xf32>
    %c63 = arith.constant 63 : index
    %334 = memref.load %arg3[%c63] : memref<256xf32, #tpu.memory_space<smem>>
    %335 = vector.broadcast %334 : f32 to vector<16x109xf32>
    %336 = arith.mulf %19, %335 : vector<16x109xf32>
    %337 = arith.addf %333, %336 : vector<16x109xf32>
    %c7_49 = arith.constant 7 : index
    %338 = memref.load %arg4[%c7_49] : memref<32xf32, #tpu.memory_space<smem>>
    %339 = vector.broadcast %338 : f32 to vector<16x109xf32>
    %340 = arith.addf %337, %339 : vector<16x109xf32>
    %cst_50 = arith.constant 0.000000e+00 : f32
    %341 = vector.broadcast %cst_50 : f32 to vector<16x109xf32>
    %342 = arith.maximumf %340, %341 : vector<16x109xf32>
    %cst_51 = arith.constant dense<0.000000e+00> : vector<16xf32>
    %343 = vector.multi_reduction <add>, %342, %cst_51 [1] : vector<16x109xf32> to vector<16xf32>
    %344 = vector.shape_cast %343 : vector<16xf32> to vector<16x1xf32>
    %cst_52 = arith.constant 0.00917431153 : f32
    %345 = vector.broadcast %cst_52 : f32 to vector<16x1xf32>
    %346 = arith.mulf %344, %345 : vector<16x1xf32>
    %c0_53 = arith.constant 0 : index
    %c7_54 = arith.constant 7 : index
    %347 = vector.load %arg13[%c0_53, %c7_54] : memref<16x32xf32, #tpu.memory_space<vmem>>, vector<16x1xf32>
    tpu.vector_store %arg13[%c0_53, %c7_54], %346 {strides = array<i32>} : memref<16x32xf32, #tpu.memory_space<vmem>>, vector<16x1xf32>,
    %c64 = arith.constant 64 : index
    %348 = memref.load %arg3[%c64] : memref<256xf32, #tpu.memory_space<smem>>
    %349 = vector.broadcast %348 : f32 to vector<16x109xf32>
    %350 = arith.mulf %5, %349 : vector<16x109xf32>
    %c65 = arith.constant 65 : index
    %351 = memref.load %arg3[%c65] : memref<256xf32, #tpu.memory_space<smem>>
    %352 = vector.broadcast %351 : f32 to vector<16x109xf32>
    %353 = arith.mulf %7, %352 : vector<16x109xf32>
    %354 = arith.addf %350, %353 : vector<16x109xf32>
    %c66 = arith.constant 66 : index
    %355 = memref.load %arg3[%c66] : memref<256xf32, #tpu.memory_space<smem>>
    %356 = vector.broadcast %355 : f32 to vector<16x109xf32>
    %357 = arith.mulf %9, %356 : vector<16x109xf32>
    %358 = arith.addf %354, %357 : vector<16x109xf32>
    %c67 = arith.constant 67 : index
    %359 = memref.load %arg3[%c67] : memref<256xf32, #tpu.memory_space<smem>>
    %360 = vector.broadcast %359 : f32 to vector<16x109xf32>
    %361 = arith.mulf %11, %360 : vector<16x109xf32>
    %362 = arith.addf %358, %361 : vector<16x109xf32>
    %c68 = arith.constant 68 : index
    %363 = memref.load %arg3[%c68] : memref<256xf32, #tpu.memory_space<smem>>
    %364 = vector.broadcast %363 : f32 to vector<16x109xf32>
    %365 = arith.mulf %13, %364 : vector<16x109xf32>
    %366 = arith.addf %362, %365 : vector<16x109xf32>
    %c69 = arith.constant 69 : index
    %367 = memref.load %arg3[%c69] : memref<256xf32, #tpu.memory_space<smem>>
    %368 = vector.broadcast %367 : f32 to vector<16x109xf32>
    %369 = arith.mulf %15, %368 : vector<16x109xf32>
    %370 = arith.addf %366, %369 : vector<16x109xf32>
    %c70 = arith.constant 70 : index
    %371 = memref.load %arg3[%c70] : memref<256xf32, #tpu.memory_space<smem>>
    %372 = vector.broadcast %371 : f32 to vector<16x109xf32>
    %373 = arith.mulf %17, %372 : vector<16x109xf32>
    %374 = arith.addf %370, %373 : vector<16x109xf32>
    %c71 = arith.constant 71 : index
    %375 = memref.load %arg3[%c71] : memref<256xf32, #tpu.memory_space<smem>>
    %376 = vector.broadcast %375 : f32 to vector<16x109xf32>
    %377 = arith.mulf %19, %376 : vector<16x109xf32>
    %378 = arith.addf %374, %377 : vector<16x109xf32>
    %c8_55 = arith.constant 8 : index
    %379 = memref.load %arg4[%c8_55] : memref<32xf32, #tpu.memory_space<smem>>
    %380 = vector.broadcast %379 : f32 to vector<16x109xf32>
    %381 = arith.addf %378, %380 : vector<16x109xf32>
    %cst_56 = arith.constant 0.000000e+00 : f32
    %382 = vector.broadcast %cst_56 : f32 to vector<16x109xf32>
    %383 = arith.maximumf %381, %382 : vector<16x109xf32>
    %cst_57 = arith.constant dense<0.000000e+00> : vector<16xf32>
    %384 = vector.multi_reduction <add>, %383, %cst_57 [1] : vector<16x109xf32> to vector<16xf32>
    %385 = vector.shape_cast %384 : vector<16xf32> to vector<16x1xf32>
    %cst_58 = arith.constant 0.00917431153 : f32
    %386 = vector.broadcast %cst_58 : f32 to vector<16x1xf32>
    %387 = arith.mulf %385, %386 : vector<16x1xf32>
    %c0_59 = arith.constant 0 : index
    %c8_60 = arith.constant 8 : index
    %388 = vector.load %arg13[%c0_59, %c8_60] : memref<16x32xf32, #tpu.memory_space<vmem>>, vector<16x1xf32>
    tpu.vector_store %arg13[%c0_59, %c8_60], %387 {strides = array<i32>} : memref<16x32xf32, #tpu.memory_space<vmem>>, vector<16x1xf32>,
    %c72 = arith.constant 72 : index
    %389 = memref.load %arg3[%c72] : memref<256xf32, #tpu.memory_space<smem>>
    %390 = vector.broadcast %389 : f32 to vector<16x109xf32>
    %391 = arith.mulf %5, %390 : vector<16x109xf32>
    %c73 = arith.constant 73 : index
    %392 = memref.load %arg3[%c73] : memref<256xf32, #tpu.memory_space<smem>>
    %393 = vector.broadcast %392 : f32 to vector<16x109xf32>
    %394 = arith.mulf %7, %393 : vector<16x109xf32>
    %395 = arith.addf %391, %394 : vector<16x109xf32>
    %c74 = arith.constant 74 : index
    %396 = memref.load %arg3[%c74] : memref<256xf32, #tpu.memory_space<smem>>
    %397 = vector.broadcast %396 : f32 to vector<16x109xf32>
    %398 = arith.mulf %9, %397 : vector<16x109xf32>
    %399 = arith.addf %395, %398 : vector<16x109xf32>
    %c75 = arith.constant 75 : index
    %400 = memref.load %arg3[%c75] : memref<256xf32, #tpu.memory_space<smem>>
    %401 = vector.broadcast %400 : f32 to vector<16x109xf32>
    %402 = arith.mulf %11, %401 : vector<16x109xf32>
    %403 = arith.addf %399, %402 : vector<16x109xf32>
    %c76 = arith.constant 76 : index
    %404 = memref.load %arg3[%c76] : memref<256xf32, #tpu.memory_space<smem>>
    %405 = vector.broadcast %404 : f32 to vector<16x109xf32>
    %406 = arith.mulf %13, %405 : vector<16x109xf32>
    %407 = arith.addf %403, %406 : vector<16x109xf32>
    %c77 = arith.constant 77 : index
    %408 = memref.load %arg3[%c77] : memref<256xf32, #tpu.memory_space<smem>>
    %409 = vector.broadcast %408 : f32 to vector<16x109xf32>
    %410 = arith.mulf %15, %409 : vector<16x109xf32>
    %411 = arith.addf %407, %410 : vector<16x109xf32>
    %c78 = arith.constant 78 : index
    %412 = memref.load %arg3[%c78] : memref<256xf32, #tpu.memory_space<smem>>
    %413 = vector.broadcast %412 : f32 to vector<16x109xf32>
    %414 = arith.mulf %17, %413 : vector<16x109xf32>
    %415 = arith.addf %411, %414 : vector<16x109xf32>
    %c79 = arith.constant 79 : index
    %416 = memref.load %arg3[%c79] : memref<256xf32, #tpu.memory_space<smem>>
    %417 = vector.broadcast %416 : f32 to vector<16x109xf32>
    %418 = arith.mulf %19, %417 : vector<16x109xf32>
    %419 = arith.addf %415, %418 : vector<16x109xf32>
    %c9_61 = arith.constant 9 : index
    %420 = memref.load %arg4[%c9_61] : memref<32xf32, #tpu.memory_space<smem>>
    %421 = vector.broadcast %420 : f32 to vector<16x109xf32>
    %422 = arith.addf %419, %421 : vector<16x109xf32>
    %cst_62 = arith.constant 0.000000e+00 : f32
    %423 = vector.broadcast %cst_62 : f32 to vector<16x109xf32>
    %424 = arith.maximumf %422, %423 : vector<16x109xf32>
    %cst_63 = arith.constant dense<0.000000e+00> : vector<16xf32>
    %425 = vector.multi_reduction <add>, %424, %cst_63 [1] : vector<16x109xf32> to vector<16xf32>
    %426 = vector.shape_cast %425 : vector<16xf32> to vector<16x1xf32>
    %cst_64 = arith.constant 0.00917431153 : f32
    %427 = vector.broadcast %cst_64 : f32 to vector<16x1xf32>
    %428 = arith.mulf %426, %427 : vector<16x1xf32>
    %c0_65 = arith.constant 0 : index
    %c9_66 = arith.constant 9 : index
    %429 = vector.load %arg13[%c0_65, %c9_66] : memref<16x32xf32, #tpu.memory_space<vmem>>, vector<16x1xf32>
    tpu.vector_store %arg13[%c0_65, %c9_66], %428 {strides = array<i32>} : memref<16x32xf32, #tpu.memory_space<vmem>>, vector<16x1xf32>,
    %c80 = arith.constant 80 : index
    %430 = memref.load %arg3[%c80] : memref<256xf32, #tpu.memory_space<smem>>
    %431 = vector.broadcast %430 : f32 to vector<16x109xf32>
    %432 = arith.mulf %5, %431 : vector<16x109xf32>
    %c81 = arith.constant 81 : index
    %433 = memref.load %arg3[%c81] : memref<256xf32, #tpu.memory_space<smem>>
    %434 = vector.broadcast %433 : f32 to vector<16x109xf32>
    %435 = arith.mulf %7, %434 : vector<16x109xf32>
    %436 = arith.addf %432, %435 : vector<16x109xf32>
    %c82 = arith.constant 82 : index
    %437 = memref.load %arg3[%c82] : memref<256xf32, #tpu.memory_space<smem>>
    %438 = vector.broadcast %437 : f32 to vector<16x109xf32>
    %439 = arith.mulf %9, %438 : vector<16x109xf32>
    %440 = arith.addf %436, %439 : vector<16x109xf32>
    %c83 = arith.constant 83 : index
    %441 = memref.load %arg3[%c83] : memref<256xf32, #tpu.memory_space<smem>>
    %442 = vector.broadcast %441 : f32 to vector<16x109xf32>
    %443 = arith.mulf %11, %442 : vector<16x109xf32>
    %444 = arith.addf %440, %443 : vector<16x109xf32>
    %c84 = arith.constant 84 : index
    %445 = memref.load %arg3[%c84] : memref<256xf32, #tpu.memory_space<smem>>
    %446 = vector.broadcast %445 : f32 to vector<16x109xf32>
    %447 = arith.mulf %13, %446 : vector<16x109xf32>
    %448 = arith.addf %444, %447 : vector<16x109xf32>
    %c85 = arith.constant 85 : index
    %449 = memref.load %arg3[%c85] : memref<256xf32, #tpu.memory_space<smem>>
    %450 = vector.broadcast %449 : f32 to vector<16x109xf32>
    %451 = arith.mulf %15, %450 : vector<16x109xf32>
    %452 = arith.addf %448, %451 : vector<16x109xf32>
    %c86 = arith.constant 86 : index
    %453 = memref.load %arg3[%c86] : memref<256xf32, #tpu.memory_space<smem>>
    %454 = vector.broadcast %453 : f32 to vector<16x109xf32>
    %455 = arith.mulf %17, %454 : vector<16x109xf32>
    %456 = arith.addf %452, %455 : vector<16x109xf32>
    %c87 = arith.constant 87 : index
    %457 = memref.load %arg3[%c87] : memref<256xf32, #tpu.memory_space<smem>>
    %458 = vector.broadcast %457 : f32 to vector<16x109xf32>
    %459 = arith.mulf %19, %458 : vector<16x109xf32>
    %460 = arith.addf %456, %459 : vector<16x109xf32>
    %c10_67 = arith.constant 10 : index
    %461 = memref.load %arg4[%c10_67] : memref<32xf32, #tpu.memory_space<smem>>
    %462 = vector.broadcast %461 : f32 to vector<16x109xf32>
    %463 = arith.addf %460, %462 : vector<16x109xf32>
    %cst_68 = arith.constant 0.000000e+00 : f32
    %464 = vector.broadcast %cst_68 : f32 to vector<16x109xf32>
    %465 = arith.maximumf %463, %464 : vector<16x109xf32>
    %cst_69 = arith.constant dense<0.000000e+00> : vector<16xf32>
    %466 = vector.multi_reduction <add>, %465, %cst_69 [1] : vector<16x109xf32> to vector<16xf32>
    %467 = vector.shape_cast %466 : vector<16xf32> to vector<16x1xf32>
    %cst_70 = arith.constant 0.00917431153 : f32
    %468 = vector.broadcast %cst_70 : f32 to vector<16x1xf32>
    %469 = arith.mulf %467, %468 : vector<16x1xf32>
    %c0_71 = arith.constant 0 : index
    %c10_72 = arith.constant 10 : index
    %470 = vector.load %arg13[%c0_71, %c10_72] : memref<16x32xf32, #tpu.memory_space<vmem>>, vector<16x1xf32>
    tpu.vector_store %arg13[%c0_71, %c10_72], %469 {strides = array<i32>} : memref<16x32xf32, #tpu.memory_space<vmem>>, vector<16x1xf32>,
    %c88 = arith.constant 88 : index
    %471 = memref.load %arg3[%c88] : memref<256xf32, #tpu.memory_space<smem>>
    %472 = vector.broadcast %471 : f32 to vector<16x109xf32>
    %473 = arith.mulf %5, %472 : vector<16x109xf32>
    %c89 = arith.constant 89 : index
    %474 = memref.load %arg3[%c89] : memref<256xf32, #tpu.memory_space<smem>>
    %475 = vector.broadcast %474 : f32 to vector<16x109xf32>
    %476 = arith.mulf %7, %475 : vector<16x109xf32>
    %477 = arith.addf %473, %476 : vector<16x109xf32>
    %c90 = arith.constant 90 : index
    %478 = memref.load %arg3[%c90] : memref<256xf32, #tpu.memory_space<smem>>
    %479 = vector.broadcast %478 : f32 to vector<16x109xf32>
    %480 = arith.mulf %9, %479 : vector<16x109xf32>
    %481 = arith.addf %477, %480 : vector<16x109xf32>
    %c91 = arith.constant 91 : index
    %482 = memref.load %arg3[%c91] : memref<256xf32, #tpu.memory_space<smem>>
    %483 = vector.broadcast %482 : f32 to vector<16x109xf32>
    %484 = arith.mulf %11, %483 : vector<16x109xf32>
    %485 = arith.addf %481, %484 : vector<16x109xf32>
    %c92 = arith.constant 92 : index
    %486 = memref.load %arg3[%c92] : memref<256xf32, #tpu.memory_space<smem>>
    %487 = vector.broadcast %486 : f32 to vector<16x109xf32>
    %488 = arith.mulf %13, %487 : vector<16x109xf32>
    %489 = arith.addf %485, %488 : vector<16x109xf32>
    %c93 = arith.constant 93 : index
    %490 = memref.load %arg3[%c93] : memref<256xf32, #tpu.memory_space<smem>>
    %491 = vector.broadcast %490 : f32 to vector<16x109xf32>
    %492 = arith.mulf %15, %491 : vector<16x109xf32>
    %493 = arith.addf %489, %492 : vector<16x109xf32>
    %c94 = arith.constant 94 : index
    %494 = memref.load %arg3[%c94] : memref<256xf32, #tpu.memory_space<smem>>
    %495 = vector.broadcast %494 : f32 to vector<16x109xf32>
    %496 = arith.mulf %17, %495 : vector<16x109xf32>
    %497 = arith.addf %493, %496 : vector<16x109xf32>
    %c95 = arith.constant 95 : index
    %498 = memref.load %arg3[%c95] : memref<256xf32, #tpu.memory_space<smem>>
    %499 = vector.broadcast %498 : f32 to vector<16x109xf32>
    %500 = arith.mulf %19, %499 : vector<16x109xf32>
    %501 = arith.addf %497, %500 : vector<16x109xf32>
    %c11_73 = arith.constant 11 : index
    %502 = memref.load %arg4[%c11_73] : memref<32xf32, #tpu.memory_space<smem>>
    %503 = vector.broadcast %502 : f32 to vector<16x109xf32>
    %504 = arith.addf %501, %503 : vector<16x109xf32>
    %cst_74 = arith.constant 0.000000e+00 : f32
    %505 = vector.broadcast %cst_74 : f32 to vector<16x109xf32>
    %506 = arith.maximumf %504, %505 : vector<16x109xf32>
    %cst_75 = arith.constant dense<0.000000e+00> : vector<16xf32>
    %507 = vector.multi_reduction <add>, %506, %cst_75 [1] : vector<16x109xf32> to vector<16xf32>
    %508 = vector.shape_cast %507 : vector<16xf32> to vector<16x1xf32>
    %cst_76 = arith.constant 0.00917431153 : f32
    %509 = vector.broadcast %cst_76 : f32 to vector<16x1xf32>
    %510 = arith.mulf %508, %509 : vector<16x1xf32>
    %c0_77 = arith.constant 0 : index
    %c11_78 = arith.constant 11 : index
    %511 = vector.load %arg13[%c0_77, %c11_78] : memref<16x32xf32, #tpu.memory_space<vmem>>, vector<16x1xf32>
    tpu.vector_store %arg13[%c0_77, %c11_78], %510 {strides = array<i32>} : memref<16x32xf32, #tpu.memory_space<vmem>>, vector<16x1xf32>,
    %c96 = arith.constant 96 : index
    %512 = memref.load %arg3[%c96] : memref<256xf32, #tpu.memory_space<smem>>
    %513 = vector.broadcast %512 : f32 to vector<16x109xf32>
    %514 = arith.mulf %5, %513 : vector<16x109xf32>
    %c97 = arith.constant 97 : index
    %515 = memref.load %arg3[%c97] : memref<256xf32, #tpu.memory_space<smem>>
    %516 = vector.broadcast %515 : f32 to vector<16x109xf32>
    %517 = arith.mulf %7, %516 : vector<16x109xf32>
    %518 = arith.addf %514, %517 : vector<16x109xf32>
    %c98 = arith.constant 98 : index
    %519 = memref.load %arg3[%c98] : memref<256xf32, #tpu.memory_space<smem>>
    %520 = vector.broadcast %519 : f32 to vector<16x109xf32>
    %521 = arith.mulf %9, %520 : vector<16x109xf32>
    %522 = arith.addf %518, %521 : vector<16x109xf32>
    %c99 = arith.constant 99 : index
    %523 = memref.load %arg3[%c99] : memref<256xf32, #tpu.memory_space<smem>>
    %524 = vector.broadcast %523 : f32 to vector<16x109xf32>
    %525 = arith.mulf %11, %524 : vector<16x109xf32>
    %526 = arith.addf %522, %525 : vector<16x109xf32>
    %c100 = arith.constant 100 : index
    %527 = memref.load %arg3[%c100] : memref<256xf32, #tpu.memory_space<smem>>
    %528 = vector.broadcast %527 : f32 to vector<16x109xf32>
    %529 = arith.mulf %13, %528 : vector<16x109xf32>
    %530 = arith.addf %526, %529 : vector<16x109xf32>
    %c101 = arith.constant 101 : index
    %531 = memref.load %arg3[%c101] : memref<256xf32, #tpu.memory_space<smem>>
    %532 = vector.broadcast %531 : f32 to vector<16x109xf32>
    %533 = arith.mulf %15, %532 : vector<16x109xf32>
    %534 = arith.addf %530, %533 : vector<16x109xf32>
    %c102 = arith.constant 102 : index
    %535 = memref.load %arg3[%c102] : memref<256xf32, #tpu.memory_space<smem>>
    %536 = vector.broadcast %535 : f32 to vector<16x109xf32>
    %537 = arith.mulf %17, %536 : vector<16x109xf32>
    %538 = arith.addf %534, %537 : vector<16x109xf32>
    %c103 = arith.constant 103 : index
    %539 = memref.load %arg3[%c103] : memref<256xf32, #tpu.memory_space<smem>>
    %540 = vector.broadcast %539 : f32 to vector<16x109xf32>
    %541 = arith.mulf %19, %540 : vector<16x109xf32>
    %542 = arith.addf %538, %541 : vector<16x109xf32>
    %c12_79 = arith.constant 12 : index
    %543 = memref.load %arg4[%c12_79] : memref<32xf32, #tpu.memory_space<smem>>
    %544 = vector.broadcast %543 : f32 to vector<16x109xf32>
    %545 = arith.addf %542, %544 : vector<16x109xf32>
    %cst_80 = arith.constant 0.000000e+00 : f32
    %546 = vector.broadcast %cst_80 : f32 to vector<16x109xf32>
    %547 = arith.maximumf %545, %546 : vector<16x109xf32>
    %cst_81 = arith.constant dense<0.000000e+00> : vector<16xf32>
    %548 = vector.multi_reduction <add>, %547, %cst_81 [1] : vector<16x109xf32> to vector<16xf32>
    %549 = vector.shape_cast %548 : vector<16xf32> to vector<16x1xf32>
    %cst_82 = arith.constant 0.00917431153 : f32
    %550 = vector.broadcast %cst_82 : f32 to vector<16x1xf32>
    %551 = arith.mulf %549, %550 : vector<16x1xf32>
    %c0_83 = arith.constant 0 : index
    %c12_84 = arith.constant 12 : index
    %552 = vector.load %arg13[%c0_83, %c12_84] : memref<16x32xf32, #tpu.memory_space<vmem>>, vector<16x1xf32>
    tpu.vector_store %arg13[%c0_83, %c12_84], %551 {strides = array<i32>} : memref<16x32xf32, #tpu.memory_space<vmem>>, vector<16x1xf32>,
    %c104 = arith.constant 104 : index
    %553 = memref.load %arg3[%c104] : memref<256xf32, #tpu.memory_space<smem>>
    %554 = vector.broadcast %553 : f32 to vector<16x109xf32>
    %555 = arith.mulf %5, %554 : vector<16x109xf32>
    %c105 = arith.constant 105 : index
    %556 = memref.load %arg3[%c105] : memref<256xf32, #tpu.memory_space<smem>>
    %557 = vector.broadcast %556 : f32 to vector<16x109xf32>
    %558 = arith.mulf %7, %557 : vector<16x109xf32>
    %559 = arith.addf %555, %558 : vector<16x109xf32>
    %c106 = arith.constant 106 : index
    %560 = memref.load %arg3[%c106] : memref<256xf32, #tpu.memory_space<smem>>
    %561 = vector.broadcast %560 : f32 to vector<16x109xf32>
    %562 = arith.mulf %9, %561 : vector<16x109xf32>
    %563 = arith.addf %559, %562 : vector<16x109xf32>
    %c107 = arith.constant 107 : index
    %564 = memref.load %arg3[%c107] : memref<256xf32, #tpu.memory_space<smem>>
    %565 = vector.broadcast %564 : f32 to vector<16x109xf32>
    %566 = arith.mulf %11, %565 : vector<16x109xf32>
    %567 = arith.addf %563, %566 : vector<16x109xf32>
    %c108 = arith.constant 108 : index
    %568 = memref.load %arg3[%c108] : memref<256xf32, #tpu.memory_space<smem>>
    %569 = vector.broadcast %568 : f32 to vector<16x109xf32>
    %570 = arith.mulf %13, %569 : vector<16x109xf32>
    %571 = arith.addf %567, %570 : vector<16x109xf32>
    %c109 = arith.constant 109 : index
    %572 = memref.load %arg3[%c109] : memref<256xf32, #tpu.memory_space<smem>>
    %573 = vector.broadcast %572 : f32 to vector<16x109xf32>
    %574 = arith.mulf %15, %573 : vector<16x109xf32>
    %575 = arith.addf %571, %574 : vector<16x109xf32>
    %c110 = arith.constant 110 : index
    %576 = memref.load %arg3[%c110] : memref<256xf32, #tpu.memory_space<smem>>
    %577 = vector.broadcast %576 : f32 to vector<16x109xf32>
    %578 = arith.mulf %17, %577 : vector<16x109xf32>
    %579 = arith.addf %575, %578 : vector<16x109xf32>
    %c111 = arith.constant 111 : index
    %580 = memref.load %arg3[%c111] : memref<256xf32, #tpu.memory_space<smem>>
    %581 = vector.broadcast %580 : f32 to vector<16x109xf32>
    %582 = arith.mulf %19, %581 : vector<16x109xf32>
    %583 = arith.addf %579, %582 : vector<16x109xf32>
    %c13_85 = arith.constant 13 : index
    %584 = memref.load %arg4[%c13_85] : memref<32xf32, #tpu.memory_space<smem>>
    %585 = vector.broadcast %584 : f32 to vector<16x109xf32>
    %586 = arith.addf %583, %585 : vector<16x109xf32>
    %cst_86 = arith.constant 0.000000e+00 : f32
    %587 = vector.broadcast %cst_86 : f32 to vector<16x109xf32>
    %588 = arith.maximumf %586, %587 : vector<16x109xf32>
    %cst_87 = arith.constant dense<0.000000e+00> : vector<16xf32>
    %589 = vector.multi_reduction <add>, %588, %cst_87 [1] : vector<16x109xf32> to vector<16xf32>
    %590 = vector.shape_cast %589 : vector<16xf32> to vector<16x1xf32>
    %cst_88 = arith.constant 0.00917431153 : f32
    %591 = vector.broadcast %cst_88 : f32 to vector<16x1xf32>
    %592 = arith.mulf %590, %591 : vector<16x1xf32>
    %c0_89 = arith.constant 0 : index
    %c13_90 = arith.constant 13 : index
    %593 = vector.load %arg13[%c0_89, %c13_90] : memref<16x32xf32, #tpu.memory_space<vmem>>, vector<16x1xf32>
    tpu.vector_store %arg13[%c0_89, %c13_90], %592 {strides = array<i32>} : memref<16x32xf32, #tpu.memory_space<vmem>>, vector<16x1xf32>,
    %c112 = arith.constant 112 : index
    %594 = memref.load %arg3[%c112] : memref<256xf32, #tpu.memory_space<smem>>
    %595 = vector.broadcast %594 : f32 to vector<16x109xf32>
    %596 = arith.mulf %5, %595 : vector<16x109xf32>
    %c113 = arith.constant 113 : index
    %597 = memref.load %arg3[%c113] : memref<256xf32, #tpu.memory_space<smem>>
    %598 = vector.broadcast %597 : f32 to vector<16x109xf32>
    %599 = arith.mulf %7, %598 : vector<16x109xf32>
    %600 = arith.addf %596, %599 : vector<16x109xf32>
    %c114 = arith.constant 114 : index
    %601 = memref.load %arg3[%c114] : memref<256xf32, #tpu.memory_space<smem>>
    %602 = vector.broadcast %601 : f32 to vector<16x109xf32>
    %603 = arith.mulf %9, %602 : vector<16x109xf32>
    %604 = arith.addf %600, %603 : vector<16x109xf32>
    %c115 = arith.constant 115 : index
    %605 = memref.load %arg3[%c115] : memref<256xf32, #tpu.memory_space<smem>>
    %606 = vector.broadcast %605 : f32 to vector<16x109xf32>
    %607 = arith.mulf %11, %606 : vector<16x109xf32>
    %608 = arith.addf %604, %607 : vector<16x109xf32>
    %c116 = arith.constant 116 : index
    %609 = memref.load %arg3[%c116] : memref<256xf32, #tpu.memory_space<smem>>
    %610 = vector.broadcast %609 : f32 to vector<16x109xf32>
    %611 = arith.mulf %13, %610 : vector<16x109xf32>
    %612 = arith.addf %608, %611 : vector<16x109xf32>
    %c117 = arith.constant 117 : index
    %613 = memref.load %arg3[%c117] : memref<256xf32, #tpu.memory_space<smem>>
    %614 = vector.broadcast %613 : f32 to vector<16x109xf32>
    %615 = arith.mulf %15, %614 : vector<16x109xf32>
    %616 = arith.addf %612, %615 : vector<16x109xf32>
    %c118 = arith.constant 118 : index
    %617 = memref.load %arg3[%c118] : memref<256xf32, #tpu.memory_space<smem>>
    %618 = vector.broadcast %617 : f32 to vector<16x109xf32>
    %619 = arith.mulf %17, %618 : vector<16x109xf32>
    %620 = arith.addf %616, %619 : vector<16x109xf32>
    %c119 = arith.constant 119 : index
    %621 = memref.load %arg3[%c119] : memref<256xf32, #tpu.memory_space<smem>>
    %622 = vector.broadcast %621 : f32 to vector<16x109xf32>
    %623 = arith.mulf %19, %622 : vector<16x109xf32>
    %624 = arith.addf %620, %623 : vector<16x109xf32>
    %c14_91 = arith.constant 14 : index
    %625 = memref.load %arg4[%c14_91] : memref<32xf32, #tpu.memory_space<smem>>
    %626 = vector.broadcast %625 : f32 to vector<16x109xf32>
    %627 = arith.addf %624, %626 : vector<16x109xf32>
    %cst_92 = arith.constant 0.000000e+00 : f32
    %628 = vector.broadcast %cst_92 : f32 to vector<16x109xf32>
    %629 = arith.maximumf %627, %628 : vector<16x109xf32>
    %cst_93 = arith.constant dense<0.000000e+00> : vector<16xf32>
    %630 = vector.multi_reduction <add>, %629, %cst_93 [1] : vector<16x109xf32> to vector<16xf32>
    %631 = vector.shape_cast %630 : vector<16xf32> to vector<16x1xf32>
    %cst_94 = arith.constant 0.00917431153 : f32
    %632 = vector.broadcast %cst_94 : f32 to vector<16x1xf32>
    %633 = arith.mulf %631, %632 : vector<16x1xf32>
    %c0_95 = arith.constant 0 : index
    %c14_96 = arith.constant 14 : index
    %634 = vector.load %arg13[%c0_95, %c14_96] : memref<16x32xf32, #tpu.memory_space<vmem>>, vector<16x1xf32>
    tpu.vector_store %arg13[%c0_95, %c14_96], %633 {strides = array<i32>} : memref<16x32xf32, #tpu.memory_space<vmem>>, vector<16x1xf32>,
    %c120 = arith.constant 120 : index
    %635 = memref.load %arg3[%c120] : memref<256xf32, #tpu.memory_space<smem>>
    %636 = vector.broadcast %635 : f32 to vector<16x109xf32>
    %637 = arith.mulf %5, %636 : vector<16x109xf32>
    %c121 = arith.constant 121 : index
    %638 = memref.load %arg3[%c121] : memref<256xf32, #tpu.memory_space<smem>>
    %639 = vector.broadcast %638 : f32 to vector<16x109xf32>
    %640 = arith.mulf %7, %639 : vector<16x109xf32>
    %641 = arith.addf %637, %640 : vector<16x109xf32>
    %c122 = arith.constant 122 : index
    %642 = memref.load %arg3[%c122] : memref<256xf32, #tpu.memory_space<smem>>
    %643 = vector.broadcast %642 : f32 to vector<16x109xf32>
    %644 = arith.mulf %9, %643 : vector<16x109xf32>
    %645 = arith.addf %641, %644 : vector<16x109xf32>
    %c123 = arith.constant 123 : index
    %646 = memref.load %arg3[%c123] : memref<256xf32, #tpu.memory_space<smem>>
    %647 = vector.broadcast %646 : f32 to vector<16x109xf32>
    %648 = arith.mulf %11, %647 : vector<16x109xf32>
    %649 = arith.addf %645, %648 : vector<16x109xf32>
    %c124 = arith.constant 124 : index
    %650 = memref.load %arg3[%c124] : memref<256xf32, #tpu.memory_space<smem>>
    %651 = vector.broadcast %650 : f32 to vector<16x109xf32>
    %652 = arith.mulf %13, %651 : vector<16x109xf32>
    %653 = arith.addf %649, %652 : vector<16x109xf32>
    %c125 = arith.constant 125 : index
    %654 = memref.load %arg3[%c125] : memref<256xf32, #tpu.memory_space<smem>>
    %655 = vector.broadcast %654 : f32 to vector<16x109xf32>
    %656 = arith.mulf %15, %655 : vector<16x109xf32>
    %657 = arith.addf %653, %656 : vector<16x109xf32>
    %c126 = arith.constant 126 : index
    %658 = memref.load %arg3[%c126] : memref<256xf32, #tpu.memory_space<smem>>
    %659 = vector.broadcast %658 : f32 to vector<16x109xf32>
    %660 = arith.mulf %17, %659 : vector<16x109xf32>
    %661 = arith.addf %657, %660 : vector<16x109xf32>
    %c127 = arith.constant 127 : index
    %662 = memref.load %arg3[%c127] : memref<256xf32, #tpu.memory_space<smem>>
    %663 = vector.broadcast %662 : f32 to vector<16x109xf32>
    %664 = arith.mulf %19, %663 : vector<16x109xf32>
    %665 = arith.addf %661, %664 : vector<16x109xf32>
    %c15_97 = arith.constant 15 : index
    %666 = memref.load %arg4[%c15_97] : memref<32xf32, #tpu.memory_space<smem>>
    %667 = vector.broadcast %666 : f32 to vector<16x109xf32>
    %668 = arith.addf %665, %667 : vector<16x109xf32>
    %cst_98 = arith.constant 0.000000e+00 : f32
    %669 = vector.broadcast %cst_98 : f32 to vector<16x109xf32>
    %670 = arith.maximumf %668, %669 : vector<16x109xf32>
    %cst_99 = arith.constant dense<0.000000e+00> : vector<16xf32>
    %671 = vector.multi_reduction <add>, %670, %cst_99 [1] : vector<16x109xf32> to vector<16xf32>
    %672 = vector.shape_cast %671 : vector<16xf32> to vector<16x1xf32>
    %cst_100 = arith.constant 0.00917431153 : f32
    %673 = vector.broadcast %cst_100 : f32 to vector<16x1xf32>
    %674 = arith.mulf %672, %673 : vector<16x1xf32>
    %c0_101 = arith.constant 0 : index
    %c15_102 = arith.constant 15 : index
    %675 = vector.load %arg13[%c0_101, %c15_102] : memref<16x32xf32, #tpu.memory_space<vmem>>, vector<16x1xf32>
    tpu.vector_store %arg13[%c0_101, %c15_102], %674 {strides = array<i32>} : memref<16x32xf32, #tpu.memory_space<vmem>>, vector<16x1xf32>,
    %c128 = arith.constant 128 : index
    %676 = memref.load %arg3[%c128] : memref<256xf32, #tpu.memory_space<smem>>
    %677 = vector.broadcast %676 : f32 to vector<16x109xf32>
    %678 = arith.mulf %5, %677 : vector<16x109xf32>
    %c129 = arith.constant 129 : index
    %679 = memref.load %arg3[%c129] : memref<256xf32, #tpu.memory_space<smem>>
    %680 = vector.broadcast %679 : f32 to vector<16x109xf32>
    %681 = arith.mulf %7, %680 : vector<16x109xf32>
    %682 = arith.addf %678, %681 : vector<16x109xf32>
    %c130 = arith.constant 130 : index
    %683 = memref.load %arg3[%c130] : memref<256xf32, #tpu.memory_space<smem>>
    %684 = vector.broadcast %683 : f32 to vector<16x109xf32>
    %685 = arith.mulf %9, %684 : vector<16x109xf32>
    %686 = arith.addf %682, %685 : vector<16x109xf32>
    %c131 = arith.constant 131 : index
    %687 = memref.load %arg3[%c131] : memref<256xf32, #tpu.memory_space<smem>>
    %688 = vector.broadcast %687 : f32 to vector<16x109xf32>
    %689 = arith.mulf %11, %688 : vector<16x109xf32>
    %690 = arith.addf %686, %689 : vector<16x109xf32>
    %c132 = arith.constant 132 : index
    %691 = memref.load %arg3[%c132] : memref<256xf32, #tpu.memory_space<smem>>
    %692 = vector.broadcast %691 : f32 to vector<16x109xf32>
    %693 = arith.mulf %13, %692 : vector<16x109xf32>
    %694 = arith.addf %690, %693 : vector<16x109xf32>
    %c133 = arith.constant 133 : index
    %695 = memref.load %arg3[%c133] : memref<256xf32, #tpu.memory_space<smem>>
    %696 = vector.broadcast %695 : f32 to vector<16x109xf32>
    %697 = arith.mulf %15, %696 : vector<16x109xf32>
    %698 = arith.addf %694, %697 : vector<16x109xf32>
    %c134 = arith.constant 134 : index
    %699 = memref.load %arg3[%c134] : memref<256xf32, #tpu.memory_space<smem>>
    %700 = vector.broadcast %699 : f32 to vector<16x109xf32>
    %701 = arith.mulf %17, %700 : vector<16x109xf32>
    %702 = arith.addf %698, %701 : vector<16x109xf32>
    %c135 = arith.constant 135 : index
    %703 = memref.load %arg3[%c135] : memref<256xf32, #tpu.memory_space<smem>>
    %704 = vector.broadcast %703 : f32 to vector<16x109xf32>
    %705 = arith.mulf %19, %704 : vector<16x109xf32>
    %706 = arith.addf %702, %705 : vector<16x109xf32>
    %c16_103 = arith.constant 16 : index
    %707 = memref.load %arg4[%c16_103] : memref<32xf32, #tpu.memory_space<smem>>
    %708 = vector.broadcast %707 : f32 to vector<16x109xf32>
    %709 = arith.addf %706, %708 : vector<16x109xf32>
    %cst_104 = arith.constant 0.000000e+00 : f32
    %710 = vector.broadcast %cst_104 : f32 to vector<16x109xf32>
    %711 = arith.maximumf %709, %710 : vector<16x109xf32>
    %cst_105 = arith.constant dense<0.000000e+00> : vector<16xf32>
    %712 = vector.multi_reduction <add>, %711, %cst_105 [1] : vector<16x109xf32> to vector<16xf32>
    %713 = vector.shape_cast %712 : vector<16xf32> to vector<16x1xf32>
    %cst_106 = arith.constant 0.00917431153 : f32
    %714 = vector.broadcast %cst_106 : f32 to vector<16x1xf32>
    %715 = arith.mulf %713, %714 : vector<16x1xf32>
    %c0_107 = arith.constant 0 : index
    %c16_108 = arith.constant 16 : index
    %716 = vector.load %arg13[%c0_107, %c16_108] : memref<16x32xf32, #tpu.memory_space<vmem>>, vector<16x1xf32>
    tpu.vector_store %arg13[%c0_107, %c16_108], %715 {strides = array<i32>} : memref<16x32xf32, #tpu.memory_space<vmem>>, vector<16x1xf32>,
    %c136 = arith.constant 136 : index
    %717 = memref.load %arg3[%c136] : memref<256xf32, #tpu.memory_space<smem>>
    %718 = vector.broadcast %717 : f32 to vector<16x109xf32>
    %719 = arith.mulf %5, %718 : vector<16x109xf32>
    %c137 = arith.constant 137 : index
    %720 = memref.load %arg3[%c137] : memref<256xf32, #tpu.memory_space<smem>>
    %721 = vector.broadcast %720 : f32 to vector<16x109xf32>
    %722 = arith.mulf %7, %721 : vector<16x109xf32>
    %723 = arith.addf %719, %722 : vector<16x109xf32>
    %c138 = arith.constant 138 : index
    %724 = memref.load %arg3[%c138] : memref<256xf32, #tpu.memory_space<smem>>
    %725 = vector.broadcast %724 : f32 to vector<16x109xf32>
    %726 = arith.mulf %9, %725 : vector<16x109xf32>
    %727 = arith.addf %723, %726 : vector<16x109xf32>
    %c139 = arith.constant 139 : index
    %728 = memref.load %arg3[%c139] : memref<256xf32, #tpu.memory_space<smem>>
    %729 = vector.broadcast %728 : f32 to vector<16x109xf32>
    %730 = arith.mulf %11, %729 : vector<16x109xf32>
    %731 = arith.addf %727, %730 : vector<16x109xf32>
    %c140 = arith.constant 140 : index
    %732 = memref.load %arg3[%c140] : memref<256xf32, #tpu.memory_space<smem>>
    %733 = vector.broadcast %732 : f32 to vector<16x109xf32>
    %734 = arith.mulf %13, %733 : vector<16x109xf32>
    %735 = arith.addf %731, %734 : vector<16x109xf32>
    %c141 = arith.constant 141 : index
    %736 = memref.load %arg3[%c141] : memref<256xf32, #tpu.memory_space<smem>>
    %737 = vector.broadcast %736 : f32 to vector<16x109xf32>
    %738 = arith.mulf %15, %737 : vector<16x109xf32>
    %739 = arith.addf %735, %738 : vector<16x109xf32>
    %c142 = arith.constant 142 : index
    %740 = memref.load %arg3[%c142] : memref<256xf32, #tpu.memory_space<smem>>
    %741 = vector.broadcast %740 : f32 to vector<16x109xf32>
    %742 = arith.mulf %17, %741 : vector<16x109xf32>
    %743 = arith.addf %739, %742 : vector<16x109xf32>
    %c143 = arith.constant 143 : index
    %744 = memref.load %arg3[%c143] : memref<256xf32, #tpu.memory_space<smem>>
    %745 = vector.broadcast %744 : f32 to vector<16x109xf32>
    %746 = arith.mulf %19, %745 : vector<16x109xf32>
    %747 = arith.addf %743, %746 : vector<16x109xf32>
    %c17_109 = arith.constant 17 : index
    %748 = memref.load %arg4[%c17_109] : memref<32xf32, #tpu.memory_space<smem>>
    %749 = vector.broadcast %748 : f32 to vector<16x109xf32>
    %750 = arith.addf %747, %749 : vector<16x109xf32>
    %cst_110 = arith.constant 0.000000e+00 : f32
    %751 = vector.broadcast %cst_110 : f32 to vector<16x109xf32>
    %752 = arith.maximumf %750, %751 : vector<16x109xf32>
    %cst_111 = arith.constant dense<0.000000e+00> : vector<16xf32>
    %753 = vector.multi_reduction <add>, %752, %cst_111 [1] : vector<16x109xf32> to vector<16xf32>
    %754 = vector.shape_cast %753 : vector<16xf32> to vector<16x1xf32>
    %cst_112 = arith.constant 0.00917431153 : f32
    %755 = vector.broadcast %cst_112 : f32 to vector<16x1xf32>
    %756 = arith.mulf %754, %755 : vector<16x1xf32>
    %c0_113 = arith.constant 0 : index
    %c17_114 = arith.constant 17 : index
    %757 = vector.load %arg13[%c0_113, %c17_114] : memref<16x32xf32, #tpu.memory_space<vmem>>, vector<16x1xf32>
    tpu.vector_store %arg13[%c0_113, %c17_114], %756 {strides = array<i32>} : memref<16x32xf32, #tpu.memory_space<vmem>>, vector<16x1xf32>,
    %c144 = arith.constant 144 : index
    %758 = memref.load %arg3[%c144] : memref<256xf32, #tpu.memory_space<smem>>
    %759 = vector.broadcast %758 : f32 to vector<16x109xf32>
    %760 = arith.mulf %5, %759 : vector<16x109xf32>
    %c145 = arith.constant 145 : index
    %761 = memref.load %arg3[%c145] : memref<256xf32, #tpu.memory_space<smem>>
    %762 = vector.broadcast %761 : f32 to vector<16x109xf32>
    %763 = arith.mulf %7, %762 : vector<16x109xf32>
    %764 = arith.addf %760, %763 : vector<16x109xf32>
    %c146 = arith.constant 146 : index
    %765 = memref.load %arg3[%c146] : memref<256xf32, #tpu.memory_space<smem>>
    %766 = vector.broadcast %765 : f32 to vector<16x109xf32>
    %767 = arith.mulf %9, %766 : vector<16x109xf32>
    %768 = arith.addf %764, %767 : vector<16x109xf32>
    %c147 = arith.constant 147 : index
    %769 = memref.load %arg3[%c147] : memref<256xf32, #tpu.memory_space<smem>>
    %770 = vector.broadcast %769 : f32 to vector<16x109xf32>
    %771 = arith.mulf %11, %770 : vector<16x109xf32>
    %772 = arith.addf %768, %771 : vector<16x109xf32>
    %c148 = arith.constant 148 : index
    %773 = memref.load %arg3[%c148] : memref<256xf32, #tpu.memory_space<smem>>
    %774 = vector.broadcast %773 : f32 to vector<16x109xf32>
    %775 = arith.mulf %13, %774 : vector<16x109xf32>
    %776 = arith.addf %772, %775 : vector<16x109xf32>
    %c149 = arith.constant 149 : index
    %777 = memref.load %arg3[%c149] : memref<256xf32, #tpu.memory_space<smem>>
    %778 = vector.broadcast %777 : f32 to vector<16x109xf32>
    %779 = arith.mulf %15, %778 : vector<16x109xf32>
    %780 = arith.addf %776, %779 : vector<16x109xf32>
    %c150 = arith.constant 150 : index
    %781 = memref.load %arg3[%c150] : memref<256xf32, #tpu.memory_space<smem>>
    %782 = vector.broadcast %781 : f32 to vector<16x109xf32>
    %783 = arith.mulf %17, %782 : vector<16x109xf32>
    %784 = arith.addf %780, %783 : vector<16x109xf32>
    %c151 = arith.constant 151 : index
    %785 = memref.load %arg3[%c151] : memref<256xf32, #tpu.memory_space<smem>>
    %786 = vector.broadcast %785 : f32 to vector<16x109xf32>
    %787 = arith.mulf %19, %786 : vector<16x109xf32>
    %788 = arith.addf %784, %787 : vector<16x109xf32>
    %c18_115 = arith.constant 18 : index
    %789 = memref.load %arg4[%c18_115] : memref<32xf32, #tpu.memory_space<smem>>
    %790 = vector.broadcast %789 : f32 to vector<16x109xf32>
    %791 = arith.addf %788, %790 : vector<16x109xf32>
    %cst_116 = arith.constant 0.000000e+00 : f32
    %792 = vector.broadcast %cst_116 : f32 to vector<16x109xf32>
    %793 = arith.maximumf %791, %792 : vector<16x109xf32>
    %cst_117 = arith.constant dense<0.000000e+00> : vector<16xf32>
    %794 = vector.multi_reduction <add>, %793, %cst_117 [1] : vector<16x109xf32> to vector<16xf32>
    %795 = vector.shape_cast %794 : vector<16xf32> to vector<16x1xf32>
    %cst_118 = arith.constant 0.00917431153 : f32
    %796 = vector.broadcast %cst_118 : f32 to vector<16x1xf32>
    %797 = arith.mulf %795, %796 : vector<16x1xf32>
    %c0_119 = arith.constant 0 : index
    %c18_120 = arith.constant 18 : index
    %798 = vector.load %arg13[%c0_119, %c18_120] : memref<16x32xf32, #tpu.memory_space<vmem>>, vector<16x1xf32>
    tpu.vector_store %arg13[%c0_119, %c18_120], %797 {strides = array<i32>} : memref<16x32xf32, #tpu.memory_space<vmem>>, vector<16x1xf32>,
    %c152 = arith.constant 152 : index
    %799 = memref.load %arg3[%c152] : memref<256xf32, #tpu.memory_space<smem>>
    %800 = vector.broadcast %799 : f32 to vector<16x109xf32>
    %801 = arith.mulf %5, %800 : vector<16x109xf32>
    %c153 = arith.constant 153 : index
    %802 = memref.load %arg3[%c153] : memref<256xf32, #tpu.memory_space<smem>>
    %803 = vector.broadcast %802 : f32 to vector<16x109xf32>
    %804 = arith.mulf %7, %803 : vector<16x109xf32>
    %805 = arith.addf %801, %804 : vector<16x109xf32>
    %c154 = arith.constant 154 : index
    %806 = memref.load %arg3[%c154] : memref<256xf32, #tpu.memory_space<smem>>
    %807 = vector.broadcast %806 : f32 to vector<16x109xf32>
    %808 = arith.mulf %9, %807 : vector<16x109xf32>
    %809 = arith.addf %805, %808 : vector<16x109xf32>
    %c155 = arith.constant 155 : index
    %810 = memref.load %arg3[%c155] : memref<256xf32, #tpu.memory_space<smem>>
    %811 = vector.broadcast %810 : f32 to vector<16x109xf32>
    %812 = arith.mulf %11, %811 : vector<16x109xf32>
    %813 = arith.addf %809, %812 : vector<16x109xf32>
    %c156 = arith.constant 156 : index
    %814 = memref.load %arg3[%c156] : memref<256xf32, #tpu.memory_space<smem>>
    %815 = vector.broadcast %814 : f32 to vector<16x109xf32>
    %816 = arith.mulf %13, %815 : vector<16x109xf32>
    %817 = arith.addf %813, %816 : vector<16x109xf32>
    %c157 = arith.constant 157 : index
    %818 = memref.load %arg3[%c157] : memref<256xf32, #tpu.memory_space<smem>>
    %819 = vector.broadcast %818 : f32 to vector<16x109xf32>
    %820 = arith.mulf %15, %819 : vector<16x109xf32>
    %821 = arith.addf %817, %820 : vector<16x109xf32>
    %c158 = arith.constant 158 : index
    %822 = memref.load %arg3[%c158] : memref<256xf32, #tpu.memory_space<smem>>
    %823 = vector.broadcast %822 : f32 to vector<16x109xf32>
    %824 = arith.mulf %17, %823 : vector<16x109xf32>
    %825 = arith.addf %821, %824 : vector<16x109xf32>
    %c159 = arith.constant 159 : index
    %826 = memref.load %arg3[%c159] : memref<256xf32, #tpu.memory_space<smem>>
    %827 = vector.broadcast %826 : f32 to vector<16x109xf32>
    %828 = arith.mulf %19, %827 : vector<16x109xf32>
    %829 = arith.addf %825, %828 : vector<16x109xf32>
    %c19_121 = arith.constant 19 : index
    %830 = memref.load %arg4[%c19_121] : memref<32xf32, #tpu.memory_space<smem>>
    %831 = vector.broadcast %830 : f32 to vector<16x109xf32>
    %832 = arith.addf %829, %831 : vector<16x109xf32>
    %cst_122 = arith.constant 0.000000e+00 : f32
    %833 = vector.broadcast %cst_122 : f32 to vector<16x109xf32>
    %834 = arith.maximumf %832, %833 : vector<16x109xf32>
    %cst_123 = arith.constant dense<0.000000e+00> : vector<16xf32>
    %835 = vector.multi_reduction <add>, %834, %cst_123 [1] : vector<16x109xf32> to vector<16xf32>
    %836 = vector.shape_cast %835 : vector<16xf32> to vector<16x1xf32>
    %cst_124 = arith.constant 0.00917431153 : f32
    %837 = vector.broadcast %cst_124 : f32 to vector<16x1xf32>
    %838 = arith.mulf %836, %837 : vector<16x1xf32>
    %c0_125 = arith.constant 0 : index
    %c19_126 = arith.constant 19 : index
    %839 = vector.load %arg13[%c0_125, %c19_126] : memref<16x32xf32, #tpu.memory_space<vmem>>, vector<16x1xf32>
    tpu.vector_store %arg13[%c0_125, %c19_126], %838 {strides = array<i32>} : memref<16x32xf32, #tpu.memory_space<vmem>>, vector<16x1xf32>,
    %c160 = arith.constant 160 : index
    %840 = memref.load %arg3[%c160] : memref<256xf32, #tpu.memory_space<smem>>
    %841 = vector.broadcast %840 : f32 to vector<16x109xf32>
    %842 = arith.mulf %5, %841 : vector<16x109xf32>
    %c161 = arith.constant 161 : index
    %843 = memref.load %arg3[%c161] : memref<256xf32, #tpu.memory_space<smem>>
    %844 = vector.broadcast %843 : f32 to vector<16x109xf32>
    %845 = arith.mulf %7, %844 : vector<16x109xf32>
    %846 = arith.addf %842, %845 : vector<16x109xf32>
    %c162 = arith.constant 162 : index
    %847 = memref.load %arg3[%c162] : memref<256xf32, #tpu.memory_space<smem>>
    %848 = vector.broadcast %847 : f32 to vector<16x109xf32>
    %849 = arith.mulf %9, %848 : vector<16x109xf32>
    %850 = arith.addf %846, %849 : vector<16x109xf32>
    %c163 = arith.constant 163 : index
    %851 = memref.load %arg3[%c163] : memref<256xf32, #tpu.memory_space<smem>>
    %852 = vector.broadcast %851 : f32 to vector<16x109xf32>
    %853 = arith.mulf %11, %852 : vector<16x109xf32>
    %854 = arith.addf %850, %853 : vector<16x109xf32>
    %c164 = arith.constant 164 : index
    %855 = memref.load %arg3[%c164] : memref<256xf32, #tpu.memory_space<smem>>
    %856 = vector.broadcast %855 : f32 to vector<16x109xf32>
    %857 = arith.mulf %13, %856 : vector<16x109xf32>
    %858 = arith.addf %854, %857 : vector<16x109xf32>
    %c165 = arith.constant 165 : index
    %859 = memref.load %arg3[%c165] : memref<256xf32, #tpu.memory_space<smem>>
    %860 = vector.broadcast %859 : f32 to vector<16x109xf32>
    %861 = arith.mulf %15, %860 : vector<16x109xf32>
    %862 = arith.addf %858, %861 : vector<16x109xf32>
    %c166 = arith.constant 166 : index
    %863 = memref.load %arg3[%c166] : memref<256xf32, #tpu.memory_space<smem>>
    %864 = vector.broadcast %863 : f32 to vector<16x109xf32>
    %865 = arith.mulf %17, %864 : vector<16x109xf32>
    %866 = arith.addf %862, %865 : vector<16x109xf32>
    %c167 = arith.constant 167 : index
    %867 = memref.load %arg3[%c167] : memref<256xf32, #tpu.memory_space<smem>>
    %868 = vector.broadcast %867 : f32 to vector<16x109xf32>
    %869 = arith.mulf %19, %868 : vector<16x109xf32>
    %870 = arith.addf %866, %869 : vector<16x109xf32>
    %c20_127 = arith.constant 20 : index
    %871 = memref.load %arg4[%c20_127] : memref<32xf32, #tpu.memory_space<smem>>
    %872 = vector.broadcast %871 : f32 to vector<16x109xf32>
    %873 = arith.addf %870, %872 : vector<16x109xf32>
    %cst_128 = arith.constant 0.000000e+00 : f32
    %874 = vector.broadcast %cst_128 : f32 to vector<16x109xf32>
    %875 = arith.maximumf %873, %874 : vector<16x109xf32>
    %cst_129 = arith.constant dense<0.000000e+00> : vector<16xf32>
    %876 = vector.multi_reduction <add>, %875, %cst_129 [1] : vector<16x109xf32> to vector<16xf32>
    %877 = vector.shape_cast %876 : vector<16xf32> to vector<16x1xf32>
    %cst_130 = arith.constant 0.00917431153 : f32
    %878 = vector.broadcast %cst_130 : f32 to vector<16x1xf32>
    %879 = arith.mulf %877, %878 : vector<16x1xf32>
    %c0_131 = arith.constant 0 : index
    %c20_132 = arith.constant 20 : index
    %880 = vector.load %arg13[%c0_131, %c20_132] : memref<16x32xf32, #tpu.memory_space<vmem>>, vector<16x1xf32>
    tpu.vector_store %arg13[%c0_131, %c20_132], %879 {strides = array<i32>} : memref<16x32xf32, #tpu.memory_space<vmem>>, vector<16x1xf32>,
    %c168 = arith.constant 168 : index
    %881 = memref.load %arg3[%c168] : memref<256xf32, #tpu.memory_space<smem>>
    %882 = vector.broadcast %881 : f32 to vector<16x109xf32>
    %883 = arith.mulf %5, %882 : vector<16x109xf32>
    %c169 = arith.constant 169 : index
    %884 = memref.load %arg3[%c169] : memref<256xf32, #tpu.memory_space<smem>>
    %885 = vector.broadcast %884 : f32 to vector<16x109xf32>
    %886 = arith.mulf %7, %885 : vector<16x109xf32>
    %887 = arith.addf %883, %886 : vector<16x109xf32>
    %c170 = arith.constant 170 : index
    %888 = memref.load %arg3[%c170] : memref<256xf32, #tpu.memory_space<smem>>
    %889 = vector.broadcast %888 : f32 to vector<16x109xf32>
    %890 = arith.mulf %9, %889 : vector<16x109xf32>
    %891 = arith.addf %887, %890 : vector<16x109xf32>
    %c171 = arith.constant 171 : index
    %892 = memref.load %arg3[%c171] : memref<256xf32, #tpu.memory_space<smem>>
    %893 = vector.broadcast %892 : f32 to vector<16x109xf32>
    %894 = arith.mulf %11, %893 : vector<16x109xf32>
    %895 = arith.addf %891, %894 : vector<16x109xf32>
    %c172 = arith.constant 172 : index
    %896 = memref.load %arg3[%c172] : memref<256xf32, #tpu.memory_space<smem>>
    %897 = vector.broadcast %896 : f32 to vector<16x109xf32>
    %898 = arith.mulf %13, %897 : vector<16x109xf32>
    %899 = arith.addf %895, %898 : vector<16x109xf32>
    %c173 = arith.constant 173 : index
    %900 = memref.load %arg3[%c173] : memref<256xf32, #tpu.memory_space<smem>>
    %901 = vector.broadcast %900 : f32 to vector<16x109xf32>
    %902 = arith.mulf %15, %901 : vector<16x109xf32>
    %903 = arith.addf %899, %902 : vector<16x109xf32>
    %c174 = arith.constant 174 : index
    %904 = memref.load %arg3[%c174] : memref<256xf32, #tpu.memory_space<smem>>
    %905 = vector.broadcast %904 : f32 to vector<16x109xf32>
    %906 = arith.mulf %17, %905 : vector<16x109xf32>
    %907 = arith.addf %903, %906 : vector<16x109xf32>
    %c175 = arith.constant 175 : index
    %908 = memref.load %arg3[%c175] : memref<256xf32, #tpu.memory_space<smem>>
    %909 = vector.broadcast %908 : f32 to vector<16x109xf32>
    %910 = arith.mulf %19, %909 : vector<16x109xf32>
    %911 = arith.addf %907, %910 : vector<16x109xf32>
    %c21_133 = arith.constant 21 : index
    %912 = memref.load %arg4[%c21_133] : memref<32xf32, #tpu.memory_space<smem>>
    %913 = vector.broadcast %912 : f32 to vector<16x109xf32>
    %914 = arith.addf %911, %913 : vector<16x109xf32>
    %cst_134 = arith.constant 0.000000e+00 : f32
    %915 = vector.broadcast %cst_134 : f32 to vector<16x109xf32>
    %916 = arith.maximumf %914, %915 : vector<16x109xf32>
    %cst_135 = arith.constant dense<0.000000e+00> : vector<16xf32>
    %917 = vector.multi_reduction <add>, %916, %cst_135 [1] : vector<16x109xf32> to vector<16xf32>
    %918 = vector.shape_cast %917 : vector<16xf32> to vector<16x1xf32>
    %cst_136 = arith.constant 0.00917431153 : f32
    %919 = vector.broadcast %cst_136 : f32 to vector<16x1xf32>
    %920 = arith.mulf %918, %919 : vector<16x1xf32>
    %c0_137 = arith.constant 0 : index
    %c21_138 = arith.constant 21 : index
    %921 = vector.load %arg13[%c0_137, %c21_138] : memref<16x32xf32, #tpu.memory_space<vmem>>, vector<16x1xf32>
    tpu.vector_store %arg13[%c0_137, %c21_138], %920 {strides = array<i32>} : memref<16x32xf32, #tpu.memory_space<vmem>>, vector<16x1xf32>,
    %c176 = arith.constant 176 : index
    %922 = memref.load %arg3[%c176] : memref<256xf32, #tpu.memory_space<smem>>
    %923 = vector.broadcast %922 : f32 to vector<16x109xf32>
    %924 = arith.mulf %5, %923 : vector<16x109xf32>
    %c177 = arith.constant 177 : index
    %925 = memref.load %arg3[%c177] : memref<256xf32, #tpu.memory_space<smem>>
    %926 = vector.broadcast %925 : f32 to vector<16x109xf32>
    %927 = arith.mulf %7, %926 : vector<16x109xf32>
    %928 = arith.addf %924, %927 : vector<16x109xf32>
    %c178 = arith.constant 178 : index
    %929 = memref.load %arg3[%c178] : memref<256xf32, #tpu.memory_space<smem>>
    %930 = vector.broadcast %929 : f32 to vector<16x109xf32>
    %931 = arith.mulf %9, %930 : vector<16x109xf32>
    %932 = arith.addf %928, %931 : vector<16x109xf32>
    %c179 = arith.constant 179 : index
    %933 = memref.load %arg3[%c179] : memref<256xf32, #tpu.memory_space<smem>>
    %934 = vector.broadcast %933 : f32 to vector<16x109xf32>
    %935 = arith.mulf %11, %934 : vector<16x109xf32>
    %936 = arith.addf %932, %935 : vector<16x109xf32>
    %c180 = arith.constant 180 : index
    %937 = memref.load %arg3[%c180] : memref<256xf32, #tpu.memory_space<smem>>
    %938 = vector.broadcast %937 : f32 to vector<16x109xf32>
    %939 = arith.mulf %13, %938 : vector<16x109xf32>
    %940 = arith.addf %936, %939 : vector<16x109xf32>
    %c181 = arith.constant 181 : index
    %941 = memref.load %arg3[%c181] : memref<256xf32, #tpu.memory_space<smem>>
    %942 = vector.broadcast %941 : f32 to vector<16x109xf32>
    %943 = arith.mulf %15, %942 : vector<16x109xf32>
    %944 = arith.addf %940, %943 : vector<16x109xf32>
    %c182 = arith.constant 182 : index
    %945 = memref.load %arg3[%c182] : memref<256xf32, #tpu.memory_space<smem>>
    %946 = vector.broadcast %945 : f32 to vector<16x109xf32>
    %947 = arith.mulf %17, %946 : vector<16x109xf32>
    %948 = arith.addf %944, %947 : vector<16x109xf32>
    %c183 = arith.constant 183 : index
    %949 = memref.load %arg3[%c183] : memref<256xf32, #tpu.memory_space<smem>>
    %950 = vector.broadcast %949 : f32 to vector<16x109xf32>
    %951 = arith.mulf %19, %950 : vector<16x109xf32>
    %952 = arith.addf %948, %951 : vector<16x109xf32>
    %c22_139 = arith.constant 22 : index
    %953 = memref.load %arg4[%c22_139] : memref<32xf32, #tpu.memory_space<smem>>
    %954 = vector.broadcast %953 : f32 to vector<16x109xf32>
    %955 = arith.addf %952, %954 : vector<16x109xf32>
    %cst_140 = arith.constant 0.000000e+00 : f32
    %956 = vector.broadcast %cst_140 : f32 to vector<16x109xf32>
    %957 = arith.maximumf %955, %956 : vector<16x109xf32>
    %cst_141 = arith.constant dense<0.000000e+00> : vector<16xf32>
    %958 = vector.multi_reduction <add>, %957, %cst_141 [1] : vector<16x109xf32> to vector<16xf32>
    %959 = vector.shape_cast %958 : vector<16xf32> to vector<16x1xf32>
    %cst_142 = arith.constant 0.00917431153 : f32
    %960 = vector.broadcast %cst_142 : f32 to vector<16x1xf32>
    %961 = arith.mulf %959, %960 : vector<16x1xf32>
    %c0_143 = arith.constant 0 : index
    %c22_144 = arith.constant 22 : index
    %962 = vector.load %arg13[%c0_143, %c22_144] : memref<16x32xf32, #tpu.memory_space<vmem>>, vector<16x1xf32>
    tpu.vector_store %arg13[%c0_143, %c22_144], %961 {strides = array<i32>} : memref<16x32xf32, #tpu.memory_space<vmem>>, vector<16x1xf32>,
    %c184 = arith.constant 184 : index
    %963 = memref.load %arg3[%c184] : memref<256xf32, #tpu.memory_space<smem>>
    %964 = vector.broadcast %963 : f32 to vector<16x109xf32>
    %965 = arith.mulf %5, %964 : vector<16x109xf32>
    %c185 = arith.constant 185 : index
    %966 = memref.load %arg3[%c185] : memref<256xf32, #tpu.memory_space<smem>>
    %967 = vector.broadcast %966 : f32 to vector<16x109xf32>
    %968 = arith.mulf %7, %967 : vector<16x109xf32>
    %969 = arith.addf %965, %968 : vector<16x109xf32>
    %c186 = arith.constant 186 : index
    %970 = memref.load %arg3[%c186] : memref<256xf32, #tpu.memory_space<smem>>
    %971 = vector.broadcast %970 : f32 to vector<16x109xf32>
    %972 = arith.mulf %9, %971 : vector<16x109xf32>
    %973 = arith.addf %969, %972 : vector<16x109xf32>
    %c187 = arith.constant 187 : index
    %974 = memref.load %arg3[%c187] : memref<256xf32, #tpu.memory_space<smem>>
    %975 = vector.broadcast %974 : f32 to vector<16x109xf32>
    %976 = arith.mulf %11, %975 : vector<16x109xf32>
    %977 = arith.addf %973, %976 : vector<16x109xf32>
    %c188 = arith.constant 188 : index
    %978 = memref.load %arg3[%c188] : memref<256xf32, #tpu.memory_space<smem>>
    %979 = vector.broadcast %978 : f32 to vector<16x109xf32>
    %980 = arith.mulf %13, %979 : vector<16x109xf32>
    %981 = arith.addf %977, %980 : vector<16x109xf32>
    %c189 = arith.constant 189 : index
    %982 = memref.load %arg3[%c189] : memref<256xf32, #tpu.memory_space<smem>>
    %983 = vector.broadcast %982 : f32 to vector<16x109xf32>
    %984 = arith.mulf %15, %983 : vector<16x109xf32>
    %985 = arith.addf %981, %984 : vector<16x109xf32>
    %c190 = arith.constant 190 : index
    %986 = memref.load %arg3[%c190] : memref<256xf32, #tpu.memory_space<smem>>
    %987 = vector.broadcast %986 : f32 to vector<16x109xf32>
    %988 = arith.mulf %17, %987 : vector<16x109xf32>
    %989 = arith.addf %985, %988 : vector<16x109xf32>
    %c191 = arith.constant 191 : index
    %990 = memref.load %arg3[%c191] : memref<256xf32, #tpu.memory_space<smem>>
    %991 = vector.broadcast %990 : f32 to vector<16x109xf32>
    %992 = arith.mulf %19, %991 : vector<16x109xf32>
    %993 = arith.addf %989, %992 : vector<16x109xf32>
    %c23_145 = arith.constant 23 : index
    %994 = memref.load %arg4[%c23_145] : memref<32xf32, #tpu.memory_space<smem>>
    %995 = vector.broadcast %994 : f32 to vector<16x109xf32>
    %996 = arith.addf %993, %995 : vector<16x109xf32>
    %cst_146 = arith.constant 0.000000e+00 : f32
    %997 = vector.broadcast %cst_146 : f32 to vector<16x109xf32>
    %998 = arith.maximumf %996, %997 : vector<16x109xf32>
    %cst_147 = arith.constant dense<0.000000e+00> : vector<16xf32>
    %999 = vector.multi_reduction <add>, %998, %cst_147 [1] : vector<16x109xf32> to vector<16xf32>
    %1000 = vector.shape_cast %999 : vector<16xf32> to vector<16x1xf32>
    %cst_148 = arith.constant 0.00917431153 : f32
    %1001 = vector.broadcast %cst_148 : f32 to vector<16x1xf32>
    %1002 = arith.mulf %1000, %1001 : vector<16x1xf32>
    %c0_149 = arith.constant 0 : index
    %c23_150 = arith.constant 23 : index
    %1003 = vector.load %arg13[%c0_149, %c23_150] : memref<16x32xf32, #tpu.memory_space<vmem>>, vector<16x1xf32>
    tpu.vector_store %arg13[%c0_149, %c23_150], %1002 {strides = array<i32>} : memref<16x32xf32, #tpu.memory_space<vmem>>, vector<16x1xf32>,
    %c192 = arith.constant 192 : index
    %1004 = memref.load %arg3[%c192] : memref<256xf32, #tpu.memory_space<smem>>
    %1005 = vector.broadcast %1004 : f32 to vector<16x109xf32>
    %1006 = arith.mulf %5, %1005 : vector<16x109xf32>
    %c193 = arith.constant 193 : index
    %1007 = memref.load %arg3[%c193] : memref<256xf32, #tpu.memory_space<smem>>
    %1008 = vector.broadcast %1007 : f32 to vector<16x109xf32>
    %1009 = arith.mulf %7, %1008 : vector<16x109xf32>
    %1010 = arith.addf %1006, %1009 : vector<16x109xf32>
    %c194 = arith.constant 194 : index
    %1011 = memref.load %arg3[%c194] : memref<256xf32, #tpu.memory_space<smem>>
    %1012 = vector.broadcast %1011 : f32 to vector<16x109xf32>
    %1013 = arith.mulf %9, %1012 : vector<16x109xf32>
    %1014 = arith.addf %1010, %1013 : vector<16x109xf32>
    %c195 = arith.constant 195 : index
    %1015 = memref.load %arg3[%c195] : memref<256xf32, #tpu.memory_space<smem>>
    %1016 = vector.broadcast %1015 : f32 to vector<16x109xf32>
    %1017 = arith.mulf %11, %1016 : vector<16x109xf32>
    %1018 = arith.addf %1014, %1017 : vector<16x109xf32>
    %c196 = arith.constant 196 : index
    %1019 = memref.load %arg3[%c196] : memref<256xf32, #tpu.memory_space<smem>>
    %1020 = vector.broadcast %1019 : f32 to vector<16x109xf32>
    %1021 = arith.mulf %13, %1020 : vector<16x109xf32>
    %1022 = arith.addf %1018, %1021 : vector<16x109xf32>
    %c197 = arith.constant 197 : index
    %1023 = memref.load %arg3[%c197] : memref<256xf32, #tpu.memory_space<smem>>
    %1024 = vector.broadcast %1023 : f32 to vector<16x109xf32>
    %1025 = arith.mulf %15, %1024 : vector<16x109xf32>
    %1026 = arith.addf %1022, %1025 : vector<16x109xf32>
    %c198 = arith.constant 198 : index
    %1027 = memref.load %arg3[%c198] : memref<256xf32, #tpu.memory_space<smem>>
    %1028 = vector.broadcast %1027 : f32 to vector<16x109xf32>
    %1029 = arith.mulf %17, %1028 : vector<16x109xf32>
    %1030 = arith.addf %1026, %1029 : vector<16x109xf32>
    %c199 = arith.constant 199 : index
    %1031 = memref.load %arg3[%c199] : memref<256xf32, #tpu.memory_space<smem>>
    %1032 = vector.broadcast %1031 : f32 to vector<16x109xf32>
    %1033 = arith.mulf %19, %1032 : vector<16x109xf32>
    %1034 = arith.addf %1030, %1033 : vector<16x109xf32>
    %c24_151 = arith.constant 24 : index
    %1035 = memref.load %arg4[%c24_151] : memref<32xf32, #tpu.memory_space<smem>>
    %1036 = vector.broadcast %1035 : f32 to vector<16x109xf32>
    %1037 = arith.addf %1034, %1036 : vector<16x109xf32>
    %cst_152 = arith.constant 0.000000e+00 : f32
    %1038 = vector.broadcast %cst_152 : f32 to vector<16x109xf32>
    %1039 = arith.maximumf %1037, %1038 : vector<16x109xf32>
    %cst_153 = arith.constant dense<0.000000e+00> : vector<16xf32>
    %1040 = vector.multi_reduction <add>, %1039, %cst_153 [1] : vector<16x109xf32> to vector<16xf32>
    %1041 = vector.shape_cast %1040 : vector<16xf32> to vector<16x1xf32>
    %cst_154 = arith.constant 0.00917431153 : f32
    %1042 = vector.broadcast %cst_154 : f32 to vector<16x1xf32>
    %1043 = arith.mulf %1041, %1042 : vector<16x1xf32>
    %c0_155 = arith.constant 0 : index
    %c24_156 = arith.constant 24 : index
    %1044 = vector.load %arg13[%c0_155, %c24_156] : memref<16x32xf32, #tpu.memory_space<vmem>>, vector<16x1xf32>
    tpu.vector_store %arg13[%c0_155, %c24_156], %1043 {strides = array<i32>} : memref<16x32xf32, #tpu.memory_space<vmem>>, vector<16x1xf32>,
    %c200 = arith.constant 200 : index
    %1045 = memref.load %arg3[%c200] : memref<256xf32, #tpu.memory_space<smem>>
    %1046 = vector.broadcast %1045 : f32 to vector<16x109xf32>
    %1047 = arith.mulf %5, %1046 : vector<16x109xf32>
    %c201 = arith.constant 201 : index
    %1048 = memref.load %arg3[%c201] : memref<256xf32, #tpu.memory_space<smem>>
    %1049 = vector.broadcast %1048 : f32 to vector<16x109xf32>
    %1050 = arith.mulf %7, %1049 : vector<16x109xf32>
    %1051 = arith.addf %1047, %1050 : vector<16x109xf32>
    %c202 = arith.constant 202 : index
    %1052 = memref.load %arg3[%c202] : memref<256xf32, #tpu.memory_space<smem>>
    %1053 = vector.broadcast %1052 : f32 to vector<16x109xf32>
    %1054 = arith.mulf %9, %1053 : vector<16x109xf32>
    %1055 = arith.addf %1051, %1054 : vector<16x109xf32>
    %c203 = arith.constant 203 : index
    %1056 = memref.load %arg3[%c203] : memref<256xf32, #tpu.memory_space<smem>>
    %1057 = vector.broadcast %1056 : f32 to vector<16x109xf32>
    %1058 = arith.mulf %11, %1057 : vector<16x109xf32>
    %1059 = arith.addf %1055, %1058 : vector<16x109xf32>
    %c204 = arith.constant 204 : index
    %1060 = memref.load %arg3[%c204] : memref<256xf32, #tpu.memory_space<smem>>
    %1061 = vector.broadcast %1060 : f32 to vector<16x109xf32>
    %1062 = arith.mulf %13, %1061 : vector<16x109xf32>
    %1063 = arith.addf %1059, %1062 : vector<16x109xf32>
    %c205 = arith.constant 205 : index
    %1064 = memref.load %arg3[%c205] : memref<256xf32, #tpu.memory_space<smem>>
    %1065 = vector.broadcast %1064 : f32 to vector<16x109xf32>
    %1066 = arith.mulf %15, %1065 : vector<16x109xf32>
    %1067 = arith.addf %1063, %1066 : vector<16x109xf32>
    %c206 = arith.constant 206 : index
    %1068 = memref.load %arg3[%c206] : memref<256xf32, #tpu.memory_space<smem>>
    %1069 = vector.broadcast %1068 : f32 to vector<16x109xf32>
    %1070 = arith.mulf %17, %1069 : vector<16x109xf32>
    %1071 = arith.addf %1067, %1070 : vector<16x109xf32>
    %c207 = arith.constant 207 : index
    %1072 = memref.load %arg3[%c207] : memref<256xf32, #tpu.memory_space<smem>>
    %1073 = vector.broadcast %1072 : f32 to vector<16x109xf32>
    %1074 = arith.mulf %19, %1073 : vector<16x109xf32>
    %1075 = arith.addf %1071, %1074 : vector<16x109xf32>
    %c25_157 = arith.constant 25 : index
    %1076 = memref.load %arg4[%c25_157] : memref<32xf32, #tpu.memory_space<smem>>
    %1077 = vector.broadcast %1076 : f32 to vector<16x109xf32>
    %1078 = arith.addf %1075, %1077 : vector<16x109xf32>
    %cst_158 = arith.constant 0.000000e+00 : f32
    %1079 = vector.broadcast %cst_158 : f32 to vector<16x109xf32>
    %1080 = arith.maximumf %1078, %1079 : vector<16x109xf32>
    %cst_159 = arith.constant dense<0.000000e+00> : vector<16xf32>
    %1081 = vector.multi_reduction <add>, %1080, %cst_159 [1] : vector<16x109xf32> to vector<16xf32>
    %1082 = vector.shape_cast %1081 : vector<16xf32> to vector<16x1xf32>
    %cst_160 = arith.constant 0.00917431153 : f32
    %1083 = vector.broadcast %cst_160 : f32 to vector<16x1xf32>
    %1084 = arith.mulf %1082, %1083 : vector<16x1xf32>
    %c0_161 = arith.constant 0 : index
    %c25_162 = arith.constant 25 : index
    %1085 = vector.load %arg13[%c0_161, %c25_162] : memref<16x32xf32, #tpu.memory_space<vmem>>, vector<16x1xf32>
    tpu.vector_store %arg13[%c0_161, %c25_162], %1084 {strides = array<i32>} : memref<16x32xf32, #tpu.memory_space<vmem>>, vector<16x1xf32>,
    %c208 = arith.constant 208 : index
    %1086 = memref.load %arg3[%c208] : memref<256xf32, #tpu.memory_space<smem>>
    %1087 = vector.broadcast %1086 : f32 to vector<16x109xf32>
    %1088 = arith.mulf %5, %1087 : vector<16x109xf32>
    %c209 = arith.constant 209 : index
    %1089 = memref.load %arg3[%c209] : memref<256xf32, #tpu.memory_space<smem>>
    %1090 = vector.broadcast %1089 : f32 to vector<16x109xf32>
    %1091 = arith.mulf %7, %1090 : vector<16x109xf32>
    %1092 = arith.addf %1088, %1091 : vector<16x109xf32>
    %c210 = arith.constant 210 : index
    %1093 = memref.load %arg3[%c210] : memref<256xf32, #tpu.memory_space<smem>>
    %1094 = vector.broadcast %1093 : f32 to vector<16x109xf32>
    %1095 = arith.mulf %9, %1094 : vector<16x109xf32>
    %1096 = arith.addf %1092, %1095 : vector<16x109xf32>
    %c211 = arith.constant 211 : index
    %1097 = memref.load %arg3[%c211] : memref<256xf32, #tpu.memory_space<smem>>
    %1098 = vector.broadcast %1097 : f32 to vector<16x109xf32>
    %1099 = arith.mulf %11, %1098 : vector<16x109xf32>
    %1100 = arith.addf %1096, %1099 : vector<16x109xf32>
    %c212 = arith.constant 212 : index
    %1101 = memref.load %arg3[%c212] : memref<256xf32, #tpu.memory_space<smem>>
    %1102 = vector.broadcast %1101 : f32 to vector<16x109xf32>
    %1103 = arith.mulf %13, %1102 : vector<16x109xf32>
    %1104 = arith.addf %1100, %1103 : vector<16x109xf32>
    %c213 = arith.constant 213 : index
    %1105 = memref.load %arg3[%c213] : memref<256xf32, #tpu.memory_space<smem>>
    %1106 = vector.broadcast %1105 : f32 to vector<16x109xf32>
    %1107 = arith.mulf %15, %1106 : vector<16x109xf32>
    %1108 = arith.addf %1104, %1107 : vector<16x109xf32>
    %c214 = arith.constant 214 : index
    %1109 = memref.load %arg3[%c214] : memref<256xf32, #tpu.memory_space<smem>>
    %1110 = vector.broadcast %1109 : f32 to vector<16x109xf32>
    %1111 = arith.mulf %17, %1110 : vector<16x109xf32>
    %1112 = arith.addf %1108, %1111 : vector<16x109xf32>
    %c215 = arith.constant 215 : index
    %1113 = memref.load %arg3[%c215] : memref<256xf32, #tpu.memory_space<smem>>
    %1114 = vector.broadcast %1113 : f32 to vector<16x109xf32>
    %1115 = arith.mulf %19, %1114 : vector<16x109xf32>
    %1116 = arith.addf %1112, %1115 : vector<16x109xf32>
    %c26_163 = arith.constant 26 : index
    %1117 = memref.load %arg4[%c26_163] : memref<32xf32, #tpu.memory_space<smem>>
    %1118 = vector.broadcast %1117 : f32 to vector<16x109xf32>
    %1119 = arith.addf %1116, %1118 : vector<16x109xf32>
    %cst_164 = arith.constant 0.000000e+00 : f32
    %1120 = vector.broadcast %cst_164 : f32 to vector<16x109xf32>
    %1121 = arith.maximumf %1119, %1120 : vector<16x109xf32>
    %cst_165 = arith.constant dense<0.000000e+00> : vector<16xf32>
    %1122 = vector.multi_reduction <add>, %1121, %cst_165 [1] : vector<16x109xf32> to vector<16xf32>
    %1123 = vector.shape_cast %1122 : vector<16xf32> to vector<16x1xf32>
    %cst_166 = arith.constant 0.00917431153 : f32
    %1124 = vector.broadcast %cst_166 : f32 to vector<16x1xf32>
    %1125 = arith.mulf %1123, %1124 : vector<16x1xf32>
    %c0_167 = arith.constant 0 : index
    %c26_168 = arith.constant 26 : index
    %1126 = vector.load %arg13[%c0_167, %c26_168] : memref<16x32xf32, #tpu.memory_space<vmem>>, vector<16x1xf32>
    tpu.vector_store %arg13[%c0_167, %c26_168], %1125 {strides = array<i32>} : memref<16x32xf32, #tpu.memory_space<vmem>>, vector<16x1xf32>,
    %c216 = arith.constant 216 : index
    %1127 = memref.load %arg3[%c216] : memref<256xf32, #tpu.memory_space<smem>>
    %1128 = vector.broadcast %1127 : f32 to vector<16x109xf32>
    %1129 = arith.mulf %5, %1128 : vector<16x109xf32>
    %c217 = arith.constant 217 : index
    %1130 = memref.load %arg3[%c217] : memref<256xf32, #tpu.memory_space<smem>>
    %1131 = vector.broadcast %1130 : f32 to vector<16x109xf32>
    %1132 = arith.mulf %7, %1131 : vector<16x109xf32>
    %1133 = arith.addf %1129, %1132 : vector<16x109xf32>
    %c218 = arith.constant 218 : index
    %1134 = memref.load %arg3[%c218] : memref<256xf32, #tpu.memory_space<smem>>
    %1135 = vector.broadcast %1134 : f32 to vector<16x109xf32>
    %1136 = arith.mulf %9, %1135 : vector<16x109xf32>
    %1137 = arith.addf %1133, %1136 : vector<16x109xf32>
    %c219 = arith.constant 219 : index
    %1138 = memref.load %arg3[%c219] : memref<256xf32, #tpu.memory_space<smem>>
    %1139 = vector.broadcast %1138 : f32 to vector<16x109xf32>
    %1140 = arith.mulf %11, %1139 : vector<16x109xf32>
    %1141 = arith.addf %1137, %1140 : vector<16x109xf32>
    %c220 = arith.constant 220 : index
    %1142 = memref.load %arg3[%c220] : memref<256xf32, #tpu.memory_space<smem>>
    %1143 = vector.broadcast %1142 : f32 to vector<16x109xf32>
    %1144 = arith.mulf %13, %1143 : vector<16x109xf32>
    %1145 = arith.addf %1141, %1144 : vector<16x109xf32>
    %c221 = arith.constant 221 : index
    %1146 = memref.load %arg3[%c221] : memref<256xf32, #tpu.memory_space<smem>>
    %1147 = vector.broadcast %1146 : f32 to vector<16x109xf32>
    %1148 = arith.mulf %15, %1147 : vector<16x109xf32>
    %1149 = arith.addf %1145, %1148 : vector<16x109xf32>
    %c222 = arith.constant 222 : index
    %1150 = memref.load %arg3[%c222] : memref<256xf32, #tpu.memory_space<smem>>
    %1151 = vector.broadcast %1150 : f32 to vector<16x109xf32>
    %1152 = arith.mulf %17, %1151 : vector<16x109xf32>
    %1153 = arith.addf %1149, %1152 : vector<16x109xf32>
    %c223 = arith.constant 223 : index
    %1154 = memref.load %arg3[%c223] : memref<256xf32, #tpu.memory_space<smem>>
    %1155 = vector.broadcast %1154 : f32 to vector<16x109xf32>
    %1156 = arith.mulf %19, %1155 : vector<16x109xf32>
    %1157 = arith.addf %1153, %1156 : vector<16x109xf32>
    %c27_169 = arith.constant 27 : index
    %1158 = memref.load %arg4[%c27_169] : memref<32xf32, #tpu.memory_space<smem>>
    %1159 = vector.broadcast %1158 : f32 to vector<16x109xf32>
    %1160 = arith.addf %1157, %1159 : vector<16x109xf32>
    %cst_170 = arith.constant 0.000000e+00 : f32
    %1161 = vector.broadcast %cst_170 : f32 to vector<16x109xf32>
    %1162 = arith.maximumf %1160, %1161 : vector<16x109xf32>
    %cst_171 = arith.constant dense<0.000000e+00> : vector<16xf32>
    %1163 = vector.multi_reduction <add>, %1162, %cst_171 [1] : vector<16x109xf32> to vector<16xf32>
    %1164 = vector.shape_cast %1163 : vector<16xf32> to vector<16x1xf32>
    %cst_172 = arith.constant 0.00917431153 : f32
    %1165 = vector.broadcast %cst_172 : f32 to vector<16x1xf32>
    %1166 = arith.mulf %1164, %1165 : vector<16x1xf32>
    %c0_173 = arith.constant 0 : index
    %c27_174 = arith.constant 27 : index
    %1167 = vector.load %arg13[%c0_173, %c27_174] : memref<16x32xf32, #tpu.memory_space<vmem>>, vector<16x1xf32>
    tpu.vector_store %arg13[%c0_173, %c27_174], %1166 {strides = array<i32>} : memref<16x32xf32, #tpu.memory_space<vmem>>, vector<16x1xf32>,
    %c224 = arith.constant 224 : index
    %1168 = memref.load %arg3[%c224] : memref<256xf32, #tpu.memory_space<smem>>
    %1169 = vector.broadcast %1168 : f32 to vector<16x109xf32>
    %1170 = arith.mulf %5, %1169 : vector<16x109xf32>
    %c225 = arith.constant 225 : index
    %1171 = memref.load %arg3[%c225] : memref<256xf32, #tpu.memory_space<smem>>
    %1172 = vector.broadcast %1171 : f32 to vector<16x109xf32>
    %1173 = arith.mulf %7, %1172 : vector<16x109xf32>
    %1174 = arith.addf %1170, %1173 : vector<16x109xf32>
    %c226 = arith.constant 226 : index
    %1175 = memref.load %arg3[%c226] : memref<256xf32, #tpu.memory_space<smem>>
    %1176 = vector.broadcast %1175 : f32 to vector<16x109xf32>
    %1177 = arith.mulf %9, %1176 : vector<16x109xf32>
    %1178 = arith.addf %1174, %1177 : vector<16x109xf32>
    %c227 = arith.constant 227 : index
    %1179 = memref.load %arg3[%c227] : memref<256xf32, #tpu.memory_space<smem>>
    %1180 = vector.broadcast %1179 : f32 to vector<16x109xf32>
    %1181 = arith.mulf %11, %1180 : vector<16x109xf32>
    %1182 = arith.addf %1178, %1181 : vector<16x109xf32>
    %c228 = arith.constant 228 : index
    %1183 = memref.load %arg3[%c228] : memref<256xf32, #tpu.memory_space<smem>>
    %1184 = vector.broadcast %1183 : f32 to vector<16x109xf32>
    %1185 = arith.mulf %13, %1184 : vector<16x109xf32>
    %1186 = arith.addf %1182, %1185 : vector<16x109xf32>
    %c229 = arith.constant 229 : index
    %1187 = memref.load %arg3[%c229] : memref<256xf32, #tpu.memory_space<smem>>
    %1188 = vector.broadcast %1187 : f32 to vector<16x109xf32>
    %1189 = arith.mulf %15, %1188 : vector<16x109xf32>
    %1190 = arith.addf %1186, %1189 : vector<16x109xf32>
    %c230 = arith.constant 230 : index
    %1191 = memref.load %arg3[%c230] : memref<256xf32, #tpu.memory_space<smem>>
    %1192 = vector.broadcast %1191 : f32 to vector<16x109xf32>
    %1193 = arith.mulf %17, %1192 : vector<16x109xf32>
    %1194 = arith.addf %1190, %1193 : vector<16x109xf32>
    %c231 = arith.constant 231 : index
    %1195 = memref.load %arg3[%c231] : memref<256xf32, #tpu.memory_space<smem>>
    %1196 = vector.broadcast %1195 : f32 to vector<16x109xf32>
    %1197 = arith.mulf %19, %1196 : vector<16x109xf32>
    %1198 = arith.addf %1194, %1197 : vector<16x109xf32>
    %c28_175 = arith.constant 28 : index
    %1199 = memref.load %arg4[%c28_175] : memref<32xf32, #tpu.memory_space<smem>>
    %1200 = vector.broadcast %1199 : f32 to vector<16x109xf32>
    %1201 = arith.addf %1198, %1200 : vector<16x109xf32>
    %cst_176 = arith.constant 0.000000e+00 : f32
    %1202 = vector.broadcast %cst_176 : f32 to vector<16x109xf32>
    %1203 = arith.maximumf %1201, %1202 : vector<16x109xf32>
    %cst_177 = arith.constant dense<0.000000e+00> : vector<16xf32>
    %1204 = vector.multi_reduction <add>, %1203, %cst_177 [1] : vector<16x109xf32> to vector<16xf32>
    %1205 = vector.shape_cast %1204 : vector<16xf32> to vector<16x1xf32>
    %cst_178 = arith.constant 0.00917431153 : f32
    %1206 = vector.broadcast %cst_178 : f32 to vector<16x1xf32>
    %1207 = arith.mulf %1205, %1206 : vector<16x1xf32>
    %c0_179 = arith.constant 0 : index
    %c28_180 = arith.constant 28 : index
    %1208 = vector.load %arg13[%c0_179, %c28_180] : memref<16x32xf32, #tpu.memory_space<vmem>>, vector<16x1xf32>
    tpu.vector_store %arg13[%c0_179, %c28_180], %1207 {strides = array<i32>} : memref<16x32xf32, #tpu.memory_space<vmem>>, vector<16x1xf32>,
    %c232 = arith.constant 232 : index
    %1209 = memref.load %arg3[%c232] : memref<256xf32, #tpu.memory_space<smem>>
    %1210 = vector.broadcast %1209 : f32 to vector<16x109xf32>
    %1211 = arith.mulf %5, %1210 : vector<16x109xf32>
    %c233 = arith.constant 233 : index
    %1212 = memref.load %arg3[%c233] : memref<256xf32, #tpu.memory_space<smem>>
    %1213 = vector.broadcast %1212 : f32 to vector<16x109xf32>
    %1214 = arith.mulf %7, %1213 : vector<16x109xf32>
    %1215 = arith.addf %1211, %1214 : vector<16x109xf32>
    %c234 = arith.constant 234 : index
    %1216 = memref.load %arg3[%c234] : memref<256xf32, #tpu.memory_space<smem>>
    %1217 = vector.broadcast %1216 : f32 to vector<16x109xf32>
    %1218 = arith.mulf %9, %1217 : vector<16x109xf32>
    %1219 = arith.addf %1215, %1218 : vector<16x109xf32>
    %c235 = arith.constant 235 : index
    %1220 = memref.load %arg3[%c235] : memref<256xf32, #tpu.memory_space<smem>>
    %1221 = vector.broadcast %1220 : f32 to vector<16x109xf32>
    %1222 = arith.mulf %11, %1221 : vector<16x109xf32>
    %1223 = arith.addf %1219, %1222 : vector<16x109xf32>
    %c236 = arith.constant 236 : index
    %1224 = memref.load %arg3[%c236] : memref<256xf32, #tpu.memory_space<smem>>
    %1225 = vector.broadcast %1224 : f32 to vector<16x109xf32>
    %1226 = arith.mulf %13, %1225 : vector<16x109xf32>
    %1227 = arith.addf %1223, %1226 : vector<16x109xf32>
    %c237 = arith.constant 237 : index
    %1228 = memref.load %arg3[%c237] : memref<256xf32, #tpu.memory_space<smem>>
    %1229 = vector.broadcast %1228 : f32 to vector<16x109xf32>
    %1230 = arith.mulf %15, %1229 : vector<16x109xf32>
    %1231 = arith.addf %1227, %1230 : vector<16x109xf32>
    %c238 = arith.constant 238 : index
    %1232 = memref.load %arg3[%c238] : memref<256xf32, #tpu.memory_space<smem>>
    %1233 = vector.broadcast %1232 : f32 to vector<16x109xf32>
    %1234 = arith.mulf %17, %1233 : vector<16x109xf32>
    %1235 = arith.addf %1231, %1234 : vector<16x109xf32>
    %c239 = arith.constant 239 : index
    %1236 = memref.load %arg3[%c239] : memref<256xf32, #tpu.memory_space<smem>>
    %1237 = vector.broadcast %1236 : f32 to vector<16x109xf32>
    %1238 = arith.mulf %19, %1237 : vector<16x109xf32>
    %1239 = arith.addf %1235, %1238 : vector<16x109xf32>
    %c29_181 = arith.constant 29 : index
    %1240 = memref.load %arg4[%c29_181] : memref<32xf32, #tpu.memory_space<smem>>
    %1241 = vector.broadcast %1240 : f32 to vector<16x109xf32>
    %1242 = arith.addf %1239, %1241 : vector<16x109xf32>
    %cst_182 = arith.constant 0.000000e+00 : f32
    %1243 = vector.broadcast %cst_182 : f32 to vector<16x109xf32>
    %1244 = arith.maximumf %1242, %1243 : vector<16x109xf32>
    %cst_183 = arith.constant dense<0.000000e+00> : vector<16xf32>
    %1245 = vector.multi_reduction <add>, %1244, %cst_183 [1] : vector<16x109xf32> to vector<16xf32>
    %1246 = vector.shape_cast %1245 : vector<16xf32> to vector<16x1xf32>
    %cst_184 = arith.constant 0.00917431153 : f32
    %1247 = vector.broadcast %cst_184 : f32 to vector<16x1xf32>
    %1248 = arith.mulf %1246, %1247 : vector<16x1xf32>
    %c0_185 = arith.constant 0 : index
    %c29_186 = arith.constant 29 : index
    %1249 = vector.load %arg13[%c0_185, %c29_186] : memref<16x32xf32, #tpu.memory_space<vmem>>, vector<16x1xf32>
    tpu.vector_store %arg13[%c0_185, %c29_186], %1248 {strides = array<i32>} : memref<16x32xf32, #tpu.memory_space<vmem>>, vector<16x1xf32>,
    %c240 = arith.constant 240 : index
    %1250 = memref.load %arg3[%c240] : memref<256xf32, #tpu.memory_space<smem>>
    %1251 = vector.broadcast %1250 : f32 to vector<16x109xf32>
    %1252 = arith.mulf %5, %1251 : vector<16x109xf32>
    %c241 = arith.constant 241 : index
    %1253 = memref.load %arg3[%c241] : memref<256xf32, #tpu.memory_space<smem>>
    %1254 = vector.broadcast %1253 : f32 to vector<16x109xf32>
    %1255 = arith.mulf %7, %1254 : vector<16x109xf32>
    %1256 = arith.addf %1252, %1255 : vector<16x109xf32>
    %c242 = arith.constant 242 : index
    %1257 = memref.load %arg3[%c242] : memref<256xf32, #tpu.memory_space<smem>>
    %1258 = vector.broadcast %1257 : f32 to vector<16x109xf32>
    %1259 = arith.mulf %9, %1258 : vector<16x109xf32>
    %1260 = arith.addf %1256, %1259 : vector<16x109xf32>
    %c243 = arith.constant 243 : index
    %1261 = memref.load %arg3[%c243] : memref<256xf32, #tpu.memory_space<smem>>
    %1262 = vector.broadcast %1261 : f32 to vector<16x109xf32>
    %1263 = arith.mulf %11, %1262 : vector<16x109xf32>
    %1264 = arith.addf %1260, %1263 : vector<16x109xf32>
    %c244 = arith.constant 244 : index
    %1265 = memref.load %arg3[%c244] : memref<256xf32, #tpu.memory_space<smem>>
    %1266 = vector.broadcast %1265 : f32 to vector<16x109xf32>
    %1267 = arith.mulf %13, %1266 : vector<16x109xf32>
    %1268 = arith.addf %1264, %1267 : vector<16x109xf32>
    %c245 = arith.constant 245 : index
    %1269 = memref.load %arg3[%c245] : memref<256xf32, #tpu.memory_space<smem>>
    %1270 = vector.broadcast %1269 : f32 to vector<16x109xf32>
    %1271 = arith.mulf %15, %1270 : vector<16x109xf32>
    %1272 = arith.addf %1268, %1271 : vector<16x109xf32>
    %c246 = arith.constant 246 : index
    %1273 = memref.load %arg3[%c246] : memref<256xf32, #tpu.memory_space<smem>>
    %1274 = vector.broadcast %1273 : f32 to vector<16x109xf32>
    %1275 = arith.mulf %17, %1274 : vector<16x109xf32>
    %1276 = arith.addf %1272, %1275 : vector<16x109xf32>
    %c247 = arith.constant 247 : index
    %1277 = memref.load %arg3[%c247] : memref<256xf32, #tpu.memory_space<smem>>
    %1278 = vector.broadcast %1277 : f32 to vector<16x109xf32>
    %1279 = arith.mulf %19, %1278 : vector<16x109xf32>
    %1280 = arith.addf %1276, %1279 : vector<16x109xf32>
    %c30_187 = arith.constant 30 : index
    %1281 = memref.load %arg4[%c30_187] : memref<32xf32, #tpu.memory_space<smem>>
    %1282 = vector.broadcast %1281 : f32 to vector<16x109xf32>
    %1283 = arith.addf %1280, %1282 : vector<16x109xf32>
    %cst_188 = arith.constant 0.000000e+00 : f32
    %1284 = vector.broadcast %cst_188 : f32 to vector<16x109xf32>
    %1285 = arith.maximumf %1283, %1284 : vector<16x109xf32>
    %cst_189 = arith.constant dense<0.000000e+00> : vector<16xf32>
    %1286 = vector.multi_reduction <add>, %1285, %cst_189 [1] : vector<16x109xf32> to vector<16xf32>
    %1287 = vector.shape_cast %1286 : vector<16xf32> to vector<16x1xf32>
    %cst_190 = arith.constant 0.00917431153 : f32
    %1288 = vector.broadcast %cst_190 : f32 to vector<16x1xf32>
    %1289 = arith.mulf %1287, %1288 : vector<16x1xf32>
    %c0_191 = arith.constant 0 : index
    %c30_192 = arith.constant 30 : index
    %1290 = vector.load %arg13[%c0_191, %c30_192] : memref<16x32xf32, #tpu.memory_space<vmem>>, vector<16x1xf32>
    tpu.vector_store %arg13[%c0_191, %c30_192], %1289 {strides = array<i32>} : memref<16x32xf32, #tpu.memory_space<vmem>>, vector<16x1xf32>,
    %c248 = arith.constant 248 : index
    %1291 = memref.load %arg3[%c248] : memref<256xf32, #tpu.memory_space<smem>>
    %1292 = vector.broadcast %1291 : f32 to vector<16x109xf32>
    %1293 = arith.mulf %5, %1292 : vector<16x109xf32>
    %c249 = arith.constant 249 : index
    %1294 = memref.load %arg3[%c249] : memref<256xf32, #tpu.memory_space<smem>>
    %1295 = vector.broadcast %1294 : f32 to vector<16x109xf32>
    %1296 = arith.mulf %7, %1295 : vector<16x109xf32>
    %1297 = arith.addf %1293, %1296 : vector<16x109xf32>
    %c250 = arith.constant 250 : index
    %1298 = memref.load %arg3[%c250] : memref<256xf32, #tpu.memory_space<smem>>
    %1299 = vector.broadcast %1298 : f32 to vector<16x109xf32>
    %1300 = arith.mulf %9, %1299 : vector<16x109xf32>
    %1301 = arith.addf %1297, %1300 : vector<16x109xf32>
    %c251 = arith.constant 251 : index
    %1302 = memref.load %arg3[%c251] : memref<256xf32, #tpu.memory_space<smem>>
    %1303 = vector.broadcast %1302 : f32 to vector<16x109xf32>
    %1304 = arith.mulf %11, %1303 : vector<16x109xf32>
    %1305 = arith.addf %1301, %1304 : vector<16x109xf32>
    %c252 = arith.constant 252 : index
    %1306 = memref.load %arg3[%c252] : memref<256xf32, #tpu.memory_space<smem>>
    %1307 = vector.broadcast %1306 : f32 to vector<16x109xf32>
    %1308 = arith.mulf %13, %1307 : vector<16x109xf32>
    %1309 = arith.addf %1305, %1308 : vector<16x109xf32>
    %c253 = arith.constant 253 : index
    %1310 = memref.load %arg3[%c253] : memref<256xf32, #tpu.memory_space<smem>>
    %1311 = vector.broadcast %1310 : f32 to vector<16x109xf32>
    %1312 = arith.mulf %15, %1311 : vector<16x109xf32>
    %1313 = arith.addf %1309, %1312 : vector<16x109xf32>
    %c254 = arith.constant 254 : index
    %1314 = memref.load %arg3[%c254] : memref<256xf32, #tpu.memory_space<smem>>
    %1315 = vector.broadcast %1314 : f32 to vector<16x109xf32>
    %1316 = arith.mulf %17, %1315 : vector<16x109xf32>
    %1317 = arith.addf %1313, %1316 : vector<16x109xf32>
    %c255 = arith.constant 255 : index
    %1318 = memref.load %arg3[%c255] : memref<256xf32, #tpu.memory_space<smem>>
    %1319 = vector.broadcast %1318 : f32 to vector<16x109xf32>
    %1320 = arith.mulf %19, %1319 : vector<16x109xf32>
    %1321 = arith.addf %1317, %1320 : vector<16x109xf32>
    %c31_193 = arith.constant 31 : index
    %1322 = memref.load %arg4[%c31_193] : memref<32xf32, #tpu.memory_space<smem>>
    %1323 = vector.broadcast %1322 : f32 to vector<16x109xf32>
    %1324 = arith.addf %1321, %1323 : vector<16x109xf32>
    %cst_194 = arith.constant 0.000000e+00 : f32
    %1325 = vector.broadcast %cst_194 : f32 to vector<16x109xf32>
    %1326 = arith.maximumf %1324, %1325 : vector<16x109xf32>
    %cst_195 = arith.constant dense<0.000000e+00> : vector<16xf32>
    %1327 = vector.multi_reduction <add>, %1326, %cst_195 [1] : vector<16x109xf32> to vector<16xf32>
    %1328 = vector.shape_cast %1327 : vector<16xf32> to vector<16x1xf32>
    %cst_196 = arith.constant 0.00917431153 : f32
    %1329 = vector.broadcast %cst_196 : f32 to vector<16x1xf32>
    %1330 = arith.mulf %1328, %1329 : vector<16x1xf32>
    %c0_197 = arith.constant 0 : index
    %c31_198 = arith.constant 31 : index
    %1331 = vector.load %arg13[%c0_197, %c31_198] : memref<16x32xf32, #tpu.memory_space<vmem>>, vector<16x1xf32>
    tpu.vector_store %arg13[%c0_197, %c31_198], %1330 {strides = array<i32>} : memref<16x32xf32, #tpu.memory_space<vmem>>, vector<16x1xf32>,
    %c0_199 = arith.constant 0 : index
    %c0_200 = arith.constant 0 : index
    %1332 = vector.load %arg13[%c0_199, %c0_200] : memref<16x32xf32, #tpu.memory_space<vmem>>, vector<16x32xf32>
    %c0_201 = arith.constant 0 : index
    %c0_202 = arith.constant 0 : index
    %1333 = vector.load %arg5[%c0_201, %c0_202] : memref<32x128xf32, #tpu.memory_space<vmem>>, vector<32x128xf32>
    %cst_203 = arith.constant dense<0.000000e+00> : vector<16x128xf32>
    %1334 = tpu.matmul %1332, %1333, %cst_203 {dimension_numbers = #tpu.dot_dimension_numbers<[1], [0], [0], [1], [0, 0, 1, 1], [], []>} : vector<16x32xf32>, vector<32x128xf32>, vector<16x128xf32> -> vector<16x128xf32>
    %c0_204 = arith.constant 0 : index
    %c0_205 = arith.constant 0 : index
    %1335 = vector.load %arg7[%c0_204, %c0_205] : memref<1x128xf32, #tpu.memory_space<vmem>>, vector<1x128xf32>
    %1336 = vector.broadcast %1335 : vector<1x128xf32> to vector<16x128xf32>
    %1337 = arith.addf %1334, %1336 : vector<16x128xf32>
    %c0_206 = arith.constant 0 : index
    %c0_207 = arith.constant 0 : index
    %1338 = vector.load %arg6[%c0_206, %c0_207] : memref<32x128xf32, #tpu.memory_space<vmem>>, vector<32x128xf32>
    %c0_208 = arith.constant 0 : index
    %c0_209 = arith.constant 0 : index
    %1339 = vector.load %arg8[%c0_208, %c0_209] : memref<2x32xf32, #tpu.memory_space<vmem>>, vector<1x32xf32>
    %c1_210 = arith.constant 1 : index
    %c0_211 = arith.constant 0 : index
    %1340 = vector.load %arg8[%c1_210, %c0_211] : memref<2x32xf32, #tpu.memory_space<vmem>>, vector<1x32xf32>
    %c0_212 = arith.constant 0 : index
    %c0_213 = arith.constant 0 : index
    %1341 = vector.load %arg9[%c0_212, %c0_213] : memref<8x2xf32, #tpu.memory_space<vmem>>, vector<8x2xf32>
    %c0_214 = arith.constant 0 : index
    %c0_215 = arith.constant 0 : index
    %1342 = vector.load %arg10[%c0_214, %c0_215] : memref<8x2xf32, #tpu.memory_space<vmem>>, vector<8x2xf32>
    %cst_216 = arith.constant 0.000000e+00 : f32
    %1343 = vector.broadcast %cst_216 : f32 to vector<2x32xf32>
    %cst_217 = arith.constant 0.000000e+00 : f32
    %1344 = vector.broadcast %cst_217 : f32 to vector<2x32xf32>
    %cst_218 = arith.constant 0.000000e+00 : f32
    %1345 = vector.broadcast %cst_218 : f32 to vector<1x2xf32>
    %1346 = vector.extract_strided_slice %1337 {offsets = [0, 0], sizes = [2, 128], strides = [1, 1]} : vector<16x128xf32> to vector<2x128xf32>
    %cst_219 = arith.constant dense<0.000000e+00> : vector<2x128xf32>
    %1347 = tpu.matmul %1343, %1338, %cst_219 {dimension_numbers = #tpu.dot_dimension_numbers<[1], [0], [0], [1], [0, 0, 1, 1], [], []>} : vector<2x32xf32>, vector<32x128xf32>, vector<2x128xf32> -> vector<2x128xf32>
    %1348 = arith.addf %1346, %1347 : vector<2x128xf32>
    %1349 = vector.extract_strided_slice %1348 {offsets = [0, 0], sizes = [2, 96], strides = [1, 1]} : vector<2x128xf32> to vector<2x96xf32>
    %1350 = arith.negf %1349 : vector<2x96xf32>
    %1351 = math.exp %1350 : vector<2x96xf32>
    %cst_220 = arith.constant 1.000000e+00 : f32
    %1352 = vector.broadcast %cst_220 : f32 to vector<2x96xf32>
    %1353 = arith.addf %1352, %1351 : vector<2x96xf32>
    %1354 = arith.divf %1352, %1353 : vector<2x96xf32>
    %1355 = vector.extract_strided_slice %1348 {offsets = [0, 96], sizes = [2, 32], strides = [1, 1]} : vector<2x128xf32> to vector<2x32xf32>
    %1356 = math.tanh %1355 : vector<2x32xf32>
    %1357 = vector.extract_strided_slice %1354 {offsets = [0, 0], sizes = [2, 32], strides = [1, 1]} : vector<2x96xf32> to vector<2x32xf32>
    %1358 = vector.extract_strided_slice %1354 {offsets = [0, 32], sizes = [2, 32], strides = [1, 1]} : vector<2x96xf32> to vector<2x32xf32>
    %1359 = vector.extract_strided_slice %1354 {offsets = [0, 64], sizes = [2, 32], strides = [1, 1]} : vector<2x96xf32> to vector<2x32xf32>
    %1360 = arith.mulf %1358, %1344 : vector<2x32xf32>
    %1361 = arith.mulf %1357, %1356 : vector<2x32xf32>
    %1362 = arith.addf %1360, %1361 : vector<2x32xf32>
    %1363 = math.tanh %1362 : vector<2x32xf32>
    %1364 = arith.mulf %1359, %1363 : vector<2x32xf32>
    %1365 = vector.extract_strided_slice %1364 {offsets = [1, 0], sizes = [1, 32], strides = [1, 1]} : vector<2x32xf32> to vector<1x32xf32>
    %1366 = vector.extract_strided_slice %1364 {offsets = [0, 0], sizes = [1, 32], strides = [1, 1]} : vector<2x32xf32> to vector<1x32xf32>
    %1367 = arith.subf %1365, %1366 : vector<1x32xf32>
    %1368 = math.absf %1367 : vector<1x32xf32>
    %1369 = arith.mulf %1368, %1339 : vector<1x32xf32>
    %1370 = vector.shape_cast %1369 : vector<1x32xf32> to vector<1x1x32xf32>
    %cst_221 = arith.constant dense<0.000000e+00> : vector<1xf32>
    %1371 = vector.multi_reduction <add>, %1370, %cst_221 [1, 2] : vector<1x1x32xf32> to vector<1xf32>
    %1372 = vector.shape_cast %1371 : vector<1xf32> to vector<1x1x1xf32>
    %1373 = vector.extract %1372[0, 0, 0] : f32 from vector<1x1x1xf32>
    %1374 = arith.mulf %1368, %1340 : vector<1x32xf32>
    %1375 = vector.shape_cast %1374 : vector<1x32xf32> to vector<1x1x32xf32>
    %cst_222 = arith.constant dense<0.000000e+00> : vector<1xf32>
    %1376 = vector.multi_reduction <add>, %1375, %cst_222 [1, 2] : vector<1x1x32xf32> to vector<1xf32>
    %1377 = vector.shape_cast %1376 : vector<1xf32> to vector<1x1x1xf32>
    %1378 = vector.extract %1377[0, 0, 0] : f32 from vector<1x1x1xf32>
    %1379 = vector.extract_strided_slice %1341 {offsets = [0, 0], sizes = [1, 2], strides = [1, 1]} : vector<8x2xf32> to vector<1x2xf32>
    %1380 = vector.broadcast %1373 : f32 to vector<1x2xf32>
    %1381 = arith.mulf %1380, %1379 : vector<1x2xf32>
    %1382 = arith.addf %1345, %1381 : vector<1x2xf32>
    %1383 = vector.extract_strided_slice %1342 {offsets = [0, 0], sizes = [1, 2], strides = [1, 1]} : vector<8x2xf32> to vector<1x2xf32>
    %1384 = vector.broadcast %1378 : f32 to vector<1x2xf32>
    %1385 = arith.mulf %1384, %1383 : vector<1x2xf32>
    %1386 = arith.addf %1382, %1385 : vector<1x2xf32>
    %1387 = vector.extract_strided_slice %1337 {offsets = [2, 0], sizes = [2, 128], strides = [1, 1]} : vector<16x128xf32> to vector<2x128xf32>
    %cst_223 = arith.constant dense<0.000000e+00> : vector<2x128xf32>
    %1388 = tpu.matmul %1364, %1338, %cst_223 {dimension_numbers = #tpu.dot_dimension_numbers<[1], [0], [0], [1], [0, 0, 1, 1], [], []>} : vector<2x32xf32>, vector<32x128xf32>, vector<2x128xf32> -> vector<2x128xf32>
    %1389 = arith.addf %1387, %1388 : vector<2x128xf32>
    %1390 = vector.extract_strided_slice %1389 {offsets = [0, 0], sizes = [2, 96], strides = [1, 1]} : vector<2x128xf32> to vector<2x96xf32>
    %1391 = arith.negf %1390 : vector<2x96xf32>
    %1392 = math.exp %1391 : vector<2x96xf32>
    %cst_224 = arith.constant 1.000000e+00 : f32
    %1393 = vector.broadcast %cst_224 : f32 to vector<2x96xf32>
    %1394 = arith.addf %1393, %1392 : vector<2x96xf32>
    %1395 = arith.divf %1393, %1394 : vector<2x96xf32>
    %1396 = vector.extract_strided_slice %1389 {offsets = [0, 96], sizes = [2, 32], strides = [1, 1]} : vector<2x128xf32> to vector<2x32xf32>
    %1397 = math.tanh %1396 : vector<2x32xf32>
    %1398 = vector.extract_strided_slice %1395 {offsets = [0, 0], sizes = [2, 32], strides = [1, 1]} : vector<2x96xf32> to vector<2x32xf32>
    %1399 = vector.extract_strided_slice %1395 {offsets = [0, 32], sizes = [2, 32], strides = [1, 1]} : vector<2x96xf32> to vector<2x32xf32>
    %1400 = vector.extract_strided_slice %1395 {offsets = [0, 64], sizes = [2, 32], strides = [1, 1]} : vector<2x96xf32> to vector<2x32xf32>
    %1401 = arith.mulf %1399, %1362 : vector<2x32xf32>
    %1402 = arith.mulf %1398, %1397 : vector<2x32xf32>
    %1403 = arith.addf %1401, %1402 : vector<2x32xf32>
    %1404 = math.tanh %1403 : vector<2x32xf32>
    %1405 = arith.mulf %1400, %1404 : vector<2x32xf32>
    %1406 = vector.extract_strided_slice %1405 {offsets = [1, 0], sizes = [1, 32], strides = [1, 1]} : vector<2x32xf32> to vector<1x32xf32>
    %1407 = vector.extract_strided_slice %1405 {offsets = [0, 0], sizes = [1, 32], strides = [1, 1]} : vector<2x32xf32> to vector<1x32xf32>
    %1408 = arith.subf %1406, %1407 : vector<1x32xf32>
    %1409 = math.absf %1408 : vector<1x32xf32>
    %1410 = arith.mulf %1409, %1339 : vector<1x32xf32>
    %1411 = vector.shape_cast %1410 : vector<1x32xf32> to vector<1x1x32xf32>
    %cst_225 = arith.constant dense<0.000000e+00> : vector<1xf32>
    %1412 = vector.multi_reduction <add>, %1411, %cst_225 [1, 2] : vector<1x1x32xf32> to vector<1xf32>
    %1413 = vector.shape_cast %1412 : vector<1xf32> to vector<1x1x1xf32>
    %1414 = vector.extract %1413[0, 0, 0] : f32 from vector<1x1x1xf32>
    %1415 = arith.mulf %1409, %1340 : vector<1x32xf32>
    %1416 = vector.shape_cast %1415 : vector<1x32xf32> to vector<1x1x32xf32>
    %cst_226 = arith.constant dense<0.000000e+00> : vector<1xf32>
    %1417 = vector.multi_reduction <add>, %1416, %cst_226 [1, 2] : vector<1x1x32xf32> to vector<1xf32>
    %1418 = vector.shape_cast %1417 : vector<1xf32> to vector<1x1x1xf32>
    %1419 = vector.extract %1418[0, 0, 0] : f32 from vector<1x1x1xf32>
    %1420 = vector.extract_strided_slice %1341 {offsets = [1, 0], sizes = [1, 2], strides = [1, 1]} : vector<8x2xf32> to vector<1x2xf32>
    %1421 = vector.broadcast %1414 : f32 to vector<1x2xf32>
    %1422 = arith.mulf %1421, %1420 : vector<1x2xf32>
    %1423 = arith.addf %1386, %1422 : vector<1x2xf32>
    %1424 = vector.extract_strided_slice %1342 {offsets = [1, 0], sizes = [1, 2], strides = [1, 1]} : vector<8x2xf32> to vector<1x2xf32>
    %1425 = vector.broadcast %1419 : f32 to vector<1x2xf32>
    %1426 = arith.mulf %1425, %1424 : vector<1x2xf32>
    %1427 = arith.addf %1423, %1426 : vector<1x2xf32>
    %1428 = vector.extract_strided_slice %1337 {offsets = [4, 0], sizes = [2, 128], strides = [1, 1]} : vector<16x128xf32> to vector<2x128xf32>
    %cst_227 = arith.constant dense<0.000000e+00> : vector<2x128xf32>
    %1429 = tpu.matmul %1405, %1338, %cst_227 {dimension_numbers = #tpu.dot_dimension_numbers<[1], [0], [0], [1], [0, 0, 1, 1], [], []>} : vector<2x32xf32>, vector<32x128xf32>, vector<2x128xf32> -> vector<2x128xf32>
    %1430 = arith.addf %1428, %1429 : vector<2x128xf32>
    %1431 = vector.extract_strided_slice %1430 {offsets = [0, 0], sizes = [2, 96], strides = [1, 1]} : vector<2x128xf32> to vector<2x96xf32>
    %1432 = arith.negf %1431 : vector<2x96xf32>
    %1433 = math.exp %1432 : vector<2x96xf32>
    %cst_228 = arith.constant 1.000000e+00 : f32
    %1434 = vector.broadcast %cst_228 : f32 to vector<2x96xf32>
    %1435 = arith.addf %1434, %1433 : vector<2x96xf32>
    %1436 = arith.divf %1434, %1435 : vector<2x96xf32>
    %1437 = vector.extract_strided_slice %1430 {offsets = [0, 96], sizes = [2, 32], strides = [1, 1]} : vector<2x128xf32> to vector<2x32xf32>
    %1438 = math.tanh %1437 : vector<2x32xf32>
    %1439 = vector.extract_strided_slice %1436 {offsets = [0, 0], sizes = [2, 32], strides = [1, 1]} : vector<2x96xf32> to vector<2x32xf32>
    %1440 = vector.extract_strided_slice %1436 {offsets = [0, 32], sizes = [2, 32], strides = [1, 1]} : vector<2x96xf32> to vector<2x32xf32>
    %1441 = vector.extract_strided_slice %1436 {offsets = [0, 64], sizes = [2, 32], strides = [1, 1]} : vector<2x96xf32> to vector<2x32xf32>
    %1442 = arith.mulf %1440, %1403 : vector<2x32xf32>
    %1443 = arith.mulf %1439, %1438 : vector<2x32xf32>
    %1444 = arith.addf %1442, %1443 : vector<2x32xf32>
    %1445 = math.tanh %1444 : vector<2x32xf32>
    %1446 = arith.mulf %1441, %1445 : vector<2x32xf32>
    %1447 = vector.extract_strided_slice %1446 {offsets = [1, 0], sizes = [1, 32], strides = [1, 1]} : vector<2x32xf32> to vector<1x32xf32>
    %1448 = vector.extract_strided_slice %1446 {offsets = [0, 0], sizes = [1, 32], strides = [1, 1]} : vector<2x32xf32> to vector<1x32xf32>
    %1449 = arith.subf %1447, %1448 : vector<1x32xf32>
    %1450 = math.absf %1449 : vector<1x32xf32>
    %1451 = arith.mulf %1450, %1339 : vector<1x32xf32>
    %1452 = vector.shape_cast %1451 : vector<1x32xf32> to vector<1x1x32xf32>
    %cst_229 = arith.constant dense<0.000000e+00> : vector<1xf32>
    %1453 = vector.multi_reduction <add>, %1452, %cst_229 [1, 2] : vector<1x1x32xf32> to vector<1xf32>
    %1454 = vector.shape_cast %1453 : vector<1xf32> to vector<1x1x1xf32>
    %1455 = vector.extract %1454[0, 0, 0] : f32 from vector<1x1x1xf32>
    %1456 = arith.mulf %1450, %1340 : vector<1x32xf32>
    %1457 = vector.shape_cast %1456 : vector<1x32xf32> to vector<1x1x32xf32>
    %cst_230 = arith.constant dense<0.000000e+00> : vector<1xf32>
    %1458 = vector.multi_reduction <add>, %1457, %cst_230 [1, 2] : vector<1x1x32xf32> to vector<1xf32>
    %1459 = vector.shape_cast %1458 : vector<1xf32> to vector<1x1x1xf32>
    %1460 = vector.extract %1459[0, 0, 0] : f32 from vector<1x1x1xf32>
    %1461 = vector.extract_strided_slice %1341 {offsets = [2, 0], sizes = [1, 2], strides = [1, 1]} : vector<8x2xf32> to vector<1x2xf32>
    %1462 = vector.broadcast %1455 : f32 to vector<1x2xf32>
    %1463 = arith.mulf %1462, %1461 : vector<1x2xf32>
    %1464 = arith.addf %1427, %1463 : vector<1x2xf32>
    %1465 = vector.extract_strided_slice %1342 {offsets = [2, 0], sizes = [1, 2], strides = [1, 1]} : vector<8x2xf32> to vector<1x2xf32>
    %1466 = vector.broadcast %1460 : f32 to vector<1x2xf32>
    %1467 = arith.mulf %1466, %1465 : vector<1x2xf32>
    %1468 = arith.addf %1464, %1467 : vector<1x2xf32>
    %1469 = vector.extract_strided_slice %1337 {offsets = [6, 0], sizes = [2, 128], strides = [1, 1]} : vector<16x128xf32> to vector<2x128xf32>
    %cst_231 = arith.constant dense<0.000000e+00> : vector<2x128xf32>
    %1470 = tpu.matmul %1446, %1338, %cst_231 {dimension_numbers = #tpu.dot_dimension_numbers<[1], [0], [0], [1], [0, 0, 1, 1], [], []>} : vector<2x32xf32>, vector<32x128xf32>, vector<2x128xf32> -> vector<2x128xf32>
    %1471 = arith.addf %1469, %1470 : vector<2x128xf32>
    %1472 = vector.extract_strided_slice %1471 {offsets = [0, 0], sizes = [2, 96], strides = [1, 1]} : vector<2x128xf32> to vector<2x96xf32>
    %1473 = arith.negf %1472 : vector<2x96xf32>
    %1474 = math.exp %1473 : vector<2x96xf32>
    %cst_232 = arith.constant 1.000000e+00 : f32
    %1475 = vector.broadcast %cst_232 : f32 to vector<2x96xf32>
    %1476 = arith.addf %1475, %1474 : vector<2x96xf32>
    %1477 = arith.divf %1475, %1476 : vector<2x96xf32>
    %1478 = vector.extract_strided_slice %1471 {offsets = [0, 96], sizes = [2, 32], strides = [1, 1]} : vector<2x128xf32> to vector<2x32xf32>
    %1479 = math.tanh %1478 : vector<2x32xf32>
    %1480 = vector.extract_strided_slice %1477 {offsets = [0, 0], sizes = [2, 32], strides = [1, 1]} : vector<2x96xf32> to vector<2x32xf32>
    %1481 = vector.extract_strided_slice %1477 {offsets = [0, 32], sizes = [2, 32], strides = [1, 1]} : vector<2x96xf32> to vector<2x32xf32>
    %1482 = vector.extract_strided_slice %1477 {offsets = [0, 64], sizes = [2, 32], strides = [1, 1]} : vector<2x96xf32> to vector<2x32xf32>
    %1483 = arith.mulf %1481, %1444 : vector<2x32xf32>
    %1484 = arith.mulf %1480, %1479 : vector<2x32xf32>
    %1485 = arith.addf %1483, %1484 : vector<2x32xf32>
    %1486 = math.tanh %1485 : vector<2x32xf32>
    %1487 = arith.mulf %1482, %1486 : vector<2x32xf32>
    %1488 = vector.extract_strided_slice %1487 {offsets = [1, 0], sizes = [1, 32], strides = [1, 1]} : vector<2x32xf32> to vector<1x32xf32>
    %1489 = vector.extract_strided_slice %1487 {offsets = [0, 0], sizes = [1, 32], strides = [1, 1]} : vector<2x32xf32> to vector<1x32xf32>
    %1490 = arith.subf %1488, %1489 : vector<1x32xf32>
    %1491 = math.absf %1490 : vector<1x32xf32>
    %1492 = arith.mulf %1491, %1339 : vector<1x32xf32>
    %1493 = vector.shape_cast %1492 : vector<1x32xf32> to vector<1x1x32xf32>
    %cst_233 = arith.constant dense<0.000000e+00> : vector<1xf32>
    %1494 = vector.multi_reduction <add>, %1493, %cst_233 [1, 2] : vector<1x1x32xf32> to vector<1xf32>
    %1495 = vector.shape_cast %1494 : vector<1xf32> to vector<1x1x1xf32>
    %1496 = vector.extract %1495[0, 0, 0] : f32 from vector<1x1x1xf32>
    %1497 = arith.mulf %1491, %1340 : vector<1x32xf32>
    %1498 = vector.shape_cast %1497 : vector<1x32xf32> to vector<1x1x32xf32>
    %cst_234 = arith.constant dense<0.000000e+00> : vector<1xf32>
    %1499 = vector.multi_reduction <add>, %1498, %cst_234 [1, 2] : vector<1x1x32xf32> to vector<1xf32>
    %1500 = vector.shape_cast %1499 : vector<1xf32> to vector<1x1x1xf32>
    %1501 = vector.extract %1500[0, 0, 0] : f32 from vector<1x1x1xf32>
    %1502 = vector.extract_strided_slice %1341 {offsets = [3, 0], sizes = [1, 2], strides = [1, 1]} : vector<8x2xf32> to vector<1x2xf32>
    %1503 = vector.broadcast %1496 : f32 to vector<1x2xf32>
    %1504 = arith.mulf %1503, %1502 : vector<1x2xf32>
    %1505 = arith.addf %1468, %1504 : vector<1x2xf32>
    %1506 = vector.extract_strided_slice %1342 {offsets = [3, 0], sizes = [1, 2], strides = [1, 1]} : vector<8x2xf32> to vector<1x2xf32>
    %1507 = vector.broadcast %1501 : f32 to vector<1x2xf32>
    %1508 = arith.mulf %1507, %1506 : vector<1x2xf32>
    %1509 = arith.addf %1505, %1508 : vector<1x2xf32>
    %1510 = vector.extract_strided_slice %1337 {offsets = [8, 0], sizes = [2, 128], strides = [1, 1]} : vector<16x128xf32> to vector<2x128xf32>
    %cst_235 = arith.constant dense<0.000000e+00> : vector<2x128xf32>
    %1511 = tpu.matmul %1487, %1338, %cst_235 {dimension_numbers = #tpu.dot_dimension_numbers<[1], [0], [0], [1], [0, 0, 1, 1], [], []>} : vector<2x32xf32>, vector<32x128xf32>, vector<2x128xf32> -> vector<2x128xf32>
    %1512 = arith.addf %1510, %1511 : vector<2x128xf32>
    %1513 = vector.extract_strided_slice %1512 {offsets = [0, 0], sizes = [2, 96], strides = [1, 1]} : vector<2x128xf32> to vector<2x96xf32>
    %1514 = arith.negf %1513 : vector<2x96xf32>
    %1515 = math.exp %1514 : vector<2x96xf32>
    %cst_236 = arith.constant 1.000000e+00 : f32
    %1516 = vector.broadcast %cst_236 : f32 to vector<2x96xf32>
    %1517 = arith.addf %1516, %1515 : vector<2x96xf32>
    %1518 = arith.divf %1516, %1517 : vector<2x96xf32>
    %1519 = vector.extract_strided_slice %1512 {offsets = [0, 96], sizes = [2, 32], strides = [1, 1]} : vector<2x128xf32> to vector<2x32xf32>
    %1520 = math.tanh %1519 : vector<2x32xf32>
    %1521 = vector.extract_strided_slice %1518 {offsets = [0, 0], sizes = [2, 32], strides = [1, 1]} : vector<2x96xf32> to vector<2x32xf32>
    %1522 = vector.extract_strided_slice %1518 {offsets = [0, 32], sizes = [2, 32], strides = [1, 1]} : vector<2x96xf32> to vector<2x32xf32>
    %1523 = vector.extract_strided_slice %1518 {offsets = [0, 64], sizes = [2, 32], strides = [1, 1]} : vector<2x96xf32> to vector<2x32xf32>
    %1524 = arith.mulf %1522, %1485 : vector<2x32xf32>
    %1525 = arith.mulf %1521, %1520 : vector<2x32xf32>
    %1526 = arith.addf %1524, %1525 : vector<2x32xf32>
    %1527 = math.tanh %1526 : vector<2x32xf32>
    %1528 = arith.mulf %1523, %1527 : vector<2x32xf32>
    %1529 = vector.extract_strided_slice %1528 {offsets = [1, 0], sizes = [1, 32], strides = [1, 1]} : vector<2x32xf32> to vector<1x32xf32>
    %1530 = vector.extract_strided_slice %1528 {offsets = [0, 0], sizes = [1, 32], strides = [1, 1]} : vector<2x32xf32> to vector<1x32xf32>
    %1531 = arith.subf %1529, %1530 : vector<1x32xf32>
    %1532 = math.absf %1531 : vector<1x32xf32>
    %1533 = arith.mulf %1532, %1339 : vector<1x32xf32>
    %1534 = vector.shape_cast %1533 : vector<1x32xf32> to vector<1x1x32xf32>
    %cst_237 = arith.constant dense<0.000000e+00> : vector<1xf32>
    %1535 = vector.multi_reduction <add>, %1534, %cst_237 [1, 2] : vector<1x1x32xf32> to vector<1xf32>
    %1536 = vector.shape_cast %1535 : vector<1xf32> to vector<1x1x1xf32>
    %1537 = vector.extract %1536[0, 0, 0] : f32 from vector<1x1x1xf32>
    %1538 = arith.mulf %1532, %1340 : vector<1x32xf32>
    %1539 = vector.shape_cast %1538 : vector<1x32xf32> to vector<1x1x32xf32>
    %cst_238 = arith.constant dense<0.000000e+00> : vector<1xf32>
    %1540 = vector.multi_reduction <add>, %1539, %cst_238 [1, 2] : vector<1x1x32xf32> to vector<1xf32>
    %1541 = vector.shape_cast %1540 : vector<1xf32> to vector<1x1x1xf32>
    %1542 = vector.extract %1541[0, 0, 0] : f32 from vector<1x1x1xf32>
    %1543 = vector.extract_strided_slice %1341 {offsets = [4, 0], sizes = [1, 2], strides = [1, 1]} : vector<8x2xf32> to vector<1x2xf32>
    %1544 = vector.broadcast %1537 : f32 to vector<1x2xf32>
    %1545 = arith.mulf %1544, %1543 : vector<1x2xf32>
    %1546 = arith.addf %1509, %1545 : vector<1x2xf32>
    %1547 = vector.extract_strided_slice %1342 {offsets = [4, 0], sizes = [1, 2], strides = [1, 1]} : vector<8x2xf32> to vector<1x2xf32>
    %1548 = vector.broadcast %1542 : f32 to vector<1x2xf32>
    %1549 = arith.mulf %1548, %1547 : vector<1x2xf32>
    %1550 = arith.addf %1546, %1549 : vector<1x2xf32>
    %1551 = vector.extract_strided_slice %1337 {offsets = [10, 0], sizes = [2, 128], strides = [1, 1]} : vector<16x128xf32> to vector<2x128xf32>
    %cst_239 = arith.constant dense<0.000000e+00> : vector<2x128xf32>
    %1552 = tpu.matmul %1528, %1338, %cst_239 {dimension_numbers = #tpu.dot_dimension_numbers<[1], [0], [0], [1], [0, 0, 1, 1], [], []>} : vector<2x32xf32>, vector<32x128xf32>, vector<2x128xf32> -> vector<2x128xf32>
    %1553 = arith.addf %1551, %1552 : vector<2x128xf32>
    %1554 = vector.extract_strided_slice %1553 {offsets = [0, 0], sizes = [2, 96], strides = [1, 1]} : vector<2x128xf32> to vector<2x96xf32>
    %1555 = arith.negf %1554 : vector<2x96xf32>
    %1556 = math.exp %1555 : vector<2x96xf32>
    %cst_240 = arith.constant 1.000000e+00 : f32
    %1557 = vector.broadcast %cst_240 : f32 to vector<2x96xf32>
    %1558 = arith.addf %1557, %1556 : vector<2x96xf32>
    %1559 = arith.divf %1557, %1558 : vector<2x96xf32>
    %1560 = vector.extract_strided_slice %1553 {offsets = [0, 96], sizes = [2, 32], strides = [1, 1]} : vector<2x128xf32> to vector<2x32xf32>
    %1561 = math.tanh %1560 : vector<2x32xf32>
    %1562 = vector.extract_strided_slice %1559 {offsets = [0, 0], sizes = [2, 32], strides = [1, 1]} : vector<2x96xf32> to vector<2x32xf32>
    %1563 = vector.extract_strided_slice %1559 {offsets = [0, 32], sizes = [2, 32], strides = [1, 1]} : vector<2x96xf32> to vector<2x32xf32>
    %1564 = vector.extract_strided_slice %1559 {offsets = [0, 64], sizes = [2, 32], strides = [1, 1]} : vector<2x96xf32> to vector<2x32xf32>
    %1565 = arith.mulf %1563, %1526 : vector<2x32xf32>
    %1566 = arith.mulf %1562, %1561 : vector<2x32xf32>
    %1567 = arith.addf %1565, %1566 : vector<2x32xf32>
    %1568 = math.tanh %1567 : vector<2x32xf32>
    %1569 = arith.mulf %1564, %1568 : vector<2x32xf32>
    %1570 = vector.extract_strided_slice %1569 {offsets = [1, 0], sizes = [1, 32], strides = [1, 1]} : vector<2x32xf32> to vector<1x32xf32>
    %1571 = vector.extract_strided_slice %1569 {offsets = [0, 0], sizes = [1, 32], strides = [1, 1]} : vector<2x32xf32> to vector<1x32xf32>
    %1572 = arith.subf %1570, %1571 : vector<1x32xf32>
    %1573 = math.absf %1572 : vector<1x32xf32>
    %1574 = arith.mulf %1573, %1339 : vector<1x32xf32>
    %1575 = vector.shape_cast %1574 : vector<1x32xf32> to vector<1x1x32xf32>
    %cst_241 = arith.constant dense<0.000000e+00> : vector<1xf32>
    %1576 = vector.multi_reduction <add>, %1575, %cst_241 [1, 2] : vector<1x1x32xf32> to vector<1xf32>
    %1577 = vector.shape_cast %1576 : vector<1xf32> to vector<1x1x1xf32>
    %1578 = vector.extract %1577[0, 0, 0] : f32 from vector<1x1x1xf32>
    %1579 = arith.mulf %1573, %1340 : vector<1x32xf32>
    %1580 = vector.shape_cast %1579 : vector<1x32xf32> to vector<1x1x32xf32>
    %cst_242 = arith.constant dense<0.000000e+00> : vector<1xf32>
    %1581 = vector.multi_reduction <add>, %1580, %cst_242 [1, 2] : vector<1x1x32xf32> to vector<1xf32>
    %1582 = vector.shape_cast %1581 : vector<1xf32> to vector<1x1x1xf32>
    %1583 = vector.extract %1582[0, 0, 0] : f32 from vector<1x1x1xf32>
    %1584 = vector.extract_strided_slice %1341 {offsets = [5, 0], sizes = [1, 2], strides = [1, 1]} : vector<8x2xf32> to vector<1x2xf32>
    %1585 = vector.broadcast %1578 : f32 to vector<1x2xf32>
    %1586 = arith.mulf %1585, %1584 : vector<1x2xf32>
    %1587 = arith.addf %1550, %1586 : vector<1x2xf32>
    %1588 = vector.extract_strided_slice %1342 {offsets = [5, 0], sizes = [1, 2], strides = [1, 1]} : vector<8x2xf32> to vector<1x2xf32>
    %1589 = vector.broadcast %1583 : f32 to vector<1x2xf32>
    %1590 = arith.mulf %1589, %1588 : vector<1x2xf32>
    %1591 = arith.addf %1587, %1590 : vector<1x2xf32>
    %1592 = vector.extract_strided_slice %1337 {offsets = [12, 0], sizes = [2, 128], strides = [1, 1]} : vector<16x128xf32> to vector<2x128xf32>
    %cst_243 = arith.constant dense<0.000000e+00> : vector<2x128xf32>
    %1593 = tpu.matmul %1569, %1338, %cst_243 {dimension_numbers = #tpu.dot_dimension_numbers<[1], [0], [0], [1], [0, 0, 1, 1], [], []>} : vector<2x32xf32>, vector<32x128xf32>, vector<2x128xf32> -> vector<2x128xf32>
    %1594 = arith.addf %1592, %1593 : vector<2x128xf32>
    %1595 = vector.extract_strided_slice %1594 {offsets = [0, 0], sizes = [2, 96], strides = [1, 1]} : vector<2x128xf32> to vector<2x96xf32>
    %1596 = arith.negf %1595 : vector<2x96xf32>
    %1597 = math.exp %1596 : vector<2x96xf32>
    %cst_244 = arith.constant 1.000000e+00 : f32
    %1598 = vector.broadcast %cst_244 : f32 to vector<2x96xf32>
    %1599 = arith.addf %1598, %1597 : vector<2x96xf32>
    %1600 = arith.divf %1598, %1599 : vector<2x96xf32>
    %1601 = vector.extract_strided_slice %1594 {offsets = [0, 96], sizes = [2, 32], strides = [1, 1]} : vector<2x128xf32> to vector<2x32xf32>
    %1602 = math.tanh %1601 : vector<2x32xf32>
    %1603 = vector.extract_strided_slice %1600 {offsets = [0, 0], sizes = [2, 32], strides = [1, 1]} : vector<2x96xf32> to vector<2x32xf32>
    %1604 = vector.extract_strided_slice %1600 {offsets = [0, 32], sizes = [2, 32], strides = [1, 1]} : vector<2x96xf32> to vector<2x32xf32>
    %1605 = vector.extract_strided_slice %1600 {offsets = [0, 64], sizes = [2, 32], strides = [1, 1]} : vector<2x96xf32> to vector<2x32xf32>
    %1606 = arith.mulf %1604, %1567 : vector<2x32xf32>
    %1607 = arith.mulf %1603, %1602 : vector<2x32xf32>
    %1608 = arith.addf %1606, %1607 : vector<2x32xf32>
    %1609 = math.tanh %1608 : vector<2x32xf32>
    %1610 = arith.mulf %1605, %1609 : vector<2x32xf32>
    %1611 = vector.extract_strided_slice %1610 {offsets = [1, 0], sizes = [1, 32], strides = [1, 1]} : vector<2x32xf32> to vector<1x32xf32>
    %1612 = vector.extract_strided_slice %1610 {offsets = [0, 0], sizes = [1, 32], strides = [1, 1]} : vector<2x32xf32> to vector<1x32xf32>
    %1613 = arith.subf %1611, %1612 : vector<1x32xf32>
    %1614 = math.absf %1613 : vector<1x32xf32>
    %1615 = arith.mulf %1614, %1339 : vector<1x32xf32>
    %1616 = vector.shape_cast %1615 : vector<1x32xf32> to vector<1x1x32xf32>
    %cst_245 = arith.constant dense<0.000000e+00> : vector<1xf32>
    %1617 = vector.multi_reduction <add>, %1616, %cst_245 [1, 2] : vector<1x1x32xf32> to vector<1xf32>
    %1618 = vector.shape_cast %1617 : vector<1xf32> to vector<1x1x1xf32>
    %1619 = vector.extract %1618[0, 0, 0] : f32 from vector<1x1x1xf32>
    %1620 = arith.mulf %1614, %1340 : vector<1x32xf32>
    %1621 = vector.shape_cast %1620 : vector<1x32xf32> to vector<1x1x32xf32>
    %cst_246 = arith.constant dense<0.000000e+00> : vector<1xf32>
    %1622 = vector.multi_reduction <add>, %1621, %cst_246 [1, 2] : vector<1x1x32xf32> to vector<1xf32>
    %1623 = vector.shape_cast %1622 : vector<1xf32> to vector<1x1x1xf32>
    %1624 = vector.extract %1623[0, 0, 0] : f32 from vector<1x1x1xf32>
    %1625 = vector.extract_strided_slice %1341 {offsets = [6, 0], sizes = [1, 2], strides = [1, 1]} : vector<8x2xf32> to vector<1x2xf32>
    %1626 = vector.broadcast %1619 : f32 to vector<1x2xf32>
    %1627 = arith.mulf %1626, %1625 : vector<1x2xf32>
    %1628 = arith.addf %1591, %1627 : vector<1x2xf32>
    %1629 = vector.extract_strided_slice %1342 {offsets = [6, 0], sizes = [1, 2], strides = [1, 1]} : vector<8x2xf32> to vector<1x2xf32>
    %1630 = vector.broadcast %1624 : f32 to vector<1x2xf32>
    %1631 = arith.mulf %1630, %1629 : vector<1x2xf32>
    %1632 = arith.addf %1628, %1631 : vector<1x2xf32>
    %1633 = vector.extract_strided_slice %1337 {offsets = [14, 0], sizes = [2, 128], strides = [1, 1]} : vector<16x128xf32> to vector<2x128xf32>
    %cst_247 = arith.constant dense<0.000000e+00> : vector<2x128xf32>
    %1634 = tpu.matmul %1610, %1338, %cst_247 {dimension_numbers = #tpu.dot_dimension_numbers<[1], [0], [0], [1], [0, 0, 1, 1], [], []>} : vector<2x32xf32>, vector<32x128xf32>, vector<2x128xf32> -> vector<2x128xf32>
    %1635 = arith.addf %1633, %1634 : vector<2x128xf32>
    %1636 = vector.extract_strided_slice %1635 {offsets = [0, 0], sizes = [2, 96], strides = [1, 1]} : vector<2x128xf32> to vector<2x96xf32>
    %1637 = arith.negf %1636 : vector<2x96xf32>
    %1638 = math.exp %1637 : vector<2x96xf32>
    %cst_248 = arith.constant 1.000000e+00 : f32
    %1639 = vector.broadcast %cst_248 : f32 to vector<2x96xf32>
    %1640 = arith.addf %1639, %1638 : vector<2x96xf32>
    %1641 = arith.divf %1639, %1640 : vector<2x96xf32>
    %1642 = vector.extract_strided_slice %1635 {offsets = [0, 96], sizes = [2, 32], strides = [1, 1]} : vector<2x128xf32> to vector<2x32xf32>
    %1643 = math.tanh %1642 : vector<2x32xf32>
    %1644 = vector.extract_strided_slice %1641 {offsets = [0, 0], sizes = [2, 32], strides = [1, 1]} : vector<2x96xf32> to vector<2x32xf32>
    %1645 = vector.extract_strided_slice %1641 {offsets = [0, 32], sizes = [2, 32], strides = [1, 1]} : vector<2x96xf32> to vector<2x32xf32>
    %1646 = vector.extract_strided_slice %1641 {offsets = [0, 64], sizes = [2, 32], strides = [1, 1]} : vector<2x96xf32> to vector<2x32xf32>
    %1647 = arith.mulf %1645, %1608 : vector<2x32xf32>
    %1648 = arith.mulf %1644, %1643 : vector<2x32xf32>
    %1649 = arith.addf %1647, %1648 : vector<2x32xf32>
    %1650 = math.tanh %1649 : vector<2x32xf32>
    %1651 = arith.mulf %1646, %1650 : vector<2x32xf32>
    %1652 = vector.extract_strided_slice %1651 {offsets = [1, 0], sizes = [1, 32], strides = [1, 1]} : vector<2x32xf32> to vector<1x32xf32>
    %1653 = vector.extract_strided_slice %1651 {offsets = [0, 0], sizes = [1, 32], strides = [1, 1]} : vector<2x32xf32> to vector<1x32xf32>
    %1654 = arith.subf %1652, %1653 : vector<1x32xf32>
    %1655 = math.absf %1654 : vector<1x32xf32>
    %1656 = arith.mulf %1655, %1339 : vector<1x32xf32>
    %1657 = vector.shape_cast %1656 : vector<1x32xf32> to vector<1x1x32xf32>
    %cst_249 = arith.constant dense<0.000000e+00> : vector<1xf32>
    %1658 = vector.multi_reduction <add>, %1657, %cst_249 [1, 2] : vector<1x1x32xf32> to vector<1xf32>
    %1659 = vector.shape_cast %1658 : vector<1xf32> to vector<1x1x1xf32>
    %1660 = vector.extract %1659[0, 0, 0] : f32 from vector<1x1x1xf32>
    %1661 = arith.mulf %1655, %1340 : vector<1x32xf32>
    %1662 = vector.shape_cast %1661 : vector<1x32xf32> to vector<1x1x32xf32>
    %cst_250 = arith.constant dense<0.000000e+00> : vector<1xf32>
    %1663 = vector.multi_reduction <add>, %1662, %cst_250 [1, 2] : vector<1x1x32xf32> to vector<1xf32>
    %1664 = vector.shape_cast %1663 : vector<1xf32> to vector<1x1x1xf32>
    %1665 = vector.extract %1664[0, 0, 0] : f32 from vector<1x1x1xf32>
    %1666 = vector.extract_strided_slice %1341 {offsets = [7, 0], sizes = [1, 2], strides = [1, 1]} : vector<8x2xf32> to vector<1x2xf32>
    %1667 = vector.broadcast %1660 : f32 to vector<1x2xf32>
    %1668 = arith.mulf %1667, %1666 : vector<1x2xf32>
    %1669 = arith.addf %1632, %1668 : vector<1x2xf32>
    %1670 = vector.extract_strided_slice %1342 {offsets = [7, 0], sizes = [1, 2], strides = [1, 1]} : vector<8x2xf32> to vector<1x2xf32>
    %1671 = vector.broadcast %1665 : f32 to vector<1x2xf32>
    %1672 = arith.mulf %1671, %1670 : vector<1x2xf32>
    %1673 = arith.addf %1669, %1672 : vector<1x2xf32>
    %c0_251 = arith.constant 0 : index
    %c0_252 = arith.constant 0 : index
    %1674 = vector.load %arg11[%c0_251, %c0_252] : memref<1x2xf32, #tpu.memory_space<vmem>>, vector<1x2xf32>
    %1675 = arith.addf %1673, %1674 : vector<1x2xf32>
    %c0_253 = arith.constant 0 : index
    %c0_254 = arith.constant 0 : index
    %c0_255 = arith.constant 0 : index
    %1676 = vector.load %arg12[%c0_253, %c0_254, %c0_255] : memref<1x1x2xf32, #tpu.memory_space<vmem>>, vector<1x1x2xf32>
    %1677 = vector.shape_cast %1676 : vector<1x1x2xf32> to vector<1x2xf32>
    %1678 = vector.shape_cast %1675 : vector<1x2xf32> to vector<1x1x2xf32>
    tpu.vector_store %arg12[%c0_253, %c0_254, %c0_255], %1678 {strides = array<i32>} : memref<1x1x2xf32, #tpu.memory_space<vmem>>, vector<1x1x2xf32>,
    return
  }
  func.func @transform_0(%arg0: i32) -> (i32, i32, i32, i32) {
    %c0_i32 = arith.constant 0 : i32
    %c0_i32_0 = arith.constant 0 : i32
    %c0_i32_1 = arith.constant 0 : i32
    %c0_i32_2 = arith.constant 0 : i32
    return %arg0, %c0_i32, %c0_i32_0, %c0_i32_1 : i32, i32, i32, i32
  }
  func.func @transform_1(%arg0: i32) -> (i32, i32, i32, i32) {
    %c0_i32 = arith.constant 0 : i32
    %c0_i32_0 = arith.constant 0 : i32
    %c0_i32_1 = arith.constant 0 : i32
    %c0_i32_2 = arith.constant 0 : i32
    return %arg0, %c0_i32, %c0_i32_0, %c0_i32_1 : i32, i32, i32, i32
  }
  func.func @transform_2(%arg0: i32) -> i32 {
    %c0_i32 = arith.constant 0 : i32
    %c0_i32_0 = arith.constant 0 : i32
    return %c0_i32 : i32
  }
  func.func @transform_3(%arg0: i32) -> i32 {
    %c0_i32 = arith.constant 0 : i32
    %c0_i32_0 = arith.constant 0 : i32
    return %c0_i32 : i32
  }
  func.func @transform_4(%arg0: i32) -> (i32, i32) {
    %c0_i32 = arith.constant 0 : i32
    %c0_i32_0 = arith.constant 0 : i32
    %c0_i32_1 = arith.constant 0 : i32
    return %c0_i32, %c0_i32_0 : i32, i32
  }
  func.func @transform_5(%arg0: i32) -> (i32, i32) {
    %c0_i32 = arith.constant 0 : i32
    %c0_i32_0 = arith.constant 0 : i32
    %c0_i32_1 = arith.constant 0 : i32
    return %c0_i32, %c0_i32_0 : i32, i32
  }
  func.func @transform_6(%arg0: i32) -> (i32, i32) {
    %c0_i32 = arith.constant 0 : i32
    %c0_i32_0 = arith.constant 0 : i32
    %c0_i32_1 = arith.constant 0 : i32
    return %c0_i32, %c0_i32_0 : i32, i32
  }
  func.func @transform_7(%arg0: i32) -> (i32, i32) {
    %c0_i32 = arith.constant 0 : i32
    %c0_i32_0 = arith.constant 0 : i32
    %c0_i32_1 = arith.constant 0 : i32
    return %c0_i32, %c0_i32_0 : i32, i32
  }
  func.func @transform_8(%arg0: i32) -> (i32, i32) {
    %c0_i32 = arith.constant 0 : i32
    %c0_i32_0 = arith.constant 0 : i32
    %c0_i32_1 = arith.constant 0 : i32
    return %c0_i32, %c0_i32_0 : i32, i32
  }
  func.func @transform_9(%arg0: i32) -> (i32, i32) {
    %c0_i32 = arith.constant 0 : i32
    %c0_i32_0 = arith.constant 0 : i32
    %c0_i32_1 = arith.constant 0 : i32
    return %c0_i32, %c0_i32_0 : i32, i32
  }
  func.func @transform_10(%arg0: i32) -> (i32, i32) {
    %c0_i32 = arith.constant 0 : i32
    %c0_i32_0 = arith.constant 0 : i32
    %c0_i32_1 = arith.constant 0 : i32
    return %c0_i32, %c0_i32_0 : i32, i32
  }
  func.func @transform_11(%arg0: i32) -> (i32, i32, i32) {
    %c0_i32 = arith.constant 0 : i32
    %c0_i32_0 = arith.constant 0 : i32
    %c0_i32_1 = arith.constant 0 : i32
    return %arg0, %c0_i32, %c0_i32_0 : i32, i32, i32
  }
}

</mosaic_0001>

<bundles_post_ra>
// kernel: forward.1
= control target key start
LH: loop header
LB: loop body
LE: loop exit
PB: predicated region body
PF: predicated region fallthrough
CT: control target
= control target key end

     0   :  { %s10485_s0 = inlined_call_operand.vmem [shape: f32[2,1,16,112], index: 0, kind: input, shape index: {}]   ;;  %s10486_s1 = inlined_call_operand.vmem [shape: f32[2,1,16,112], index: 1, kind: input, shape index: {}]   ;;  %s10487_s2 = inlined_call_operand.vmem [shape: f32[256], index: 2, kind: input, shape index: {}]   ;;  %s10488_s3 = inlined_call_operand.vmem [shape: f32[32], index: 3, kind: input, shape index: {}]   ;;  %s10489_s4 = inlined_call_operand.vmem [shape: f32[32,128], index: 4, kind: input, shape index: {}]   ;;  %s10490_s5 = inlined_call_operand.vmem [shape: f32[32,128], index: 5, kind: input, shape index: {}]   ;;  %s10491_s6 = inlined_call_operand.vmem [shape: f32[1,128], index: 6, kind: input, shape index: {}]   ;;  %s10492_s7 = inlined_call_operand.vmem [shape: f32[2,32], index: 7, kind: input, shape index: {}]   ;;  %s10493_s8 = inlined_call_operand.vmem [shape: f32[8,2], index: 8, kind: input, shape index: {}]   ;;  %s10494_s9 = inlined_call_operand.vmem [shape: f32[8,2], index: 9, kind: input, shape index: {}]   ;;  %s10495_s10 = inlined_call_operand.vmem [shape: f32[1,2], index: 10, kind: input, shape index: {}]   ;;  %s10496_s11 = inlined_call_operand.hbm [shape: f32[2,1,2], index: 11, kind: output, shape index: {}]  }
   0x1   :  { %10519 = sst [smem:[#allocation301_spill]] %s10485_s0 }
   0x2   :  { %10520 = sst [smem:[#allocation302_spill]] %s10486_s1 }
   0x3   :  { %10521 = sst [smem:[#allocation303_spill]] %s10487_s2 }
   0x4   :  { %10522 = sst [smem:[#allocation304_spill]] %s10488_s3 }
   0x5   :  { %10523 = sst [smem:[#allocation305_spill]] %s10496_s11 }
   0x6   :  { %16 = vsyncpa [#allocation5], 0 }
   0x7   :  { %17 = vsyncpa [#allocation7], 0 }
   0x8   :  { %18 = vsyncpa [#allocation4], 0 }
   0x9   :  { %20 = vsyncpa [#allocation4 + $0x1], 0  ;;  %s6328_s17 = smov 0   ;;  %s6330_s18 = smov 0  }
   0xa   :  { %s6332_s19 = smov 0   ;;  %s6334_s20 = smov 0  }
   0xb LB: > { %10524 = sst [smem:[#allocation12_spill]] %s6243_s17  ;;  %s6349_s21 = sadd.s32 4294967295, %s6255_s20   ;;  %s6255_s20 = sphi %s6334_s20, %s11298_s20   ;;  %s6251_s19 = sphi %s6332_s19, %s11300_s19   ;;  %s6247_s18 = sphi %s6330_s18, %s11302_s18   ;;  %s6243_s17 = sphi %s6328_s17, %s11301_s17  }
   0xc   : > { %10525 = sst [smem:[#allocation13_spill]] %s6251_s19  ;;  %s5453_s22 = sadd.s32 4294967294, %s6255_s20  }
   0xd   : > { %10526 = sst [smem:[#allocation14_spill]] %s6255_s20  ;;  %s6353_s23 = sadd.s32 1, %s6255_s20  }
   0xe   : > { %10527 = sst [smem:[#allocation15_spill]] %s6353_s23  ;;  %s274_s24 = sadd.s32 1, %s6251_s19 }
   0xf   : > { %s271_s25 = ssub.s32 %s6255_s20, %s6353_s23  ;;  %p284_p0 = scmp.ne.s32.totalorder %s6251_s19, %s6247_s18 }
  0x10   : > { %p272_p1 = scmp.eq.s32.totalorder %s271_s25, 0  ;;  %p285_p2 = scmp.eq.s32.totalorder %s6349_s21, 1 }
  0x11   : > { %p290_p3 = scmp.ne.s32.totalorder %s6247_s18, %s6243_s17  ;;  %p291_p4 = scmp.eq.s32.totalorder %s5453_s22, 1 }
  0x12   : > { %s6364_s26 = scalar_select %p272_p1, %s6251_s19, %s274_s24  }
  0x13   : > { %p6366_p5 = por %p285_p2, %p284_p0  ;;  %p6370_p6 = por %p291_p4, %p290_p3 }
  0x14   : > { %10528 = sst [smem:[#allocation16_spill]] %s6364_s26  ;;  %p5454_p7 = scmp.ge.s32.totalorder %s6255_s20, 1 }
  0x15   : > { %s10529_s27 = scalar_select %p6366_p5, 1, 0 }
  0x16   : > { %s10530_s28 = scalar_select %p6370_p6, 1, 0 }
  0x17   : > { %p298_p8 = scmp.lt.s32.totalorder %s6255_s20, 3  ;;  %p10497_p9 = scmp.eq.s32.totalorder %s6349_s21, 0 }
  0x18   : > { %10531 = sst [smem:[#allocation17_spill]] %s10530_s28  ;;  %s10534_s3 = sld [smem:[#allocation304_spill]] }
  0x19   : > { %p6377_p10 = pnand %p5454_p7, %p298_p8  ;;  %s10533_s2 = sld [smem:[#allocation303_spill]] }
  0x1b   : > { %s10532_s29 = scalar_select %p6377_p10, 1, 0 }
  0x1c   : > { %p6017_p11 = pneg %p6377_p10 }
  0x1e   : > { %s322_s16 = sshll.u32 %s10534_s3, 4  ;;  %p6391_p12 = pnand %p10497_p9, %p6017_p11  ;;  %s323_s16 = int_to_ptr.vmem [resolvable:$true] %s322_s16 }
  0x1f   : > { %s311_s13 = sshll.u32 %s10533_s2, 4  ;;  %s312_s13 = int_to_ptr.vmem [resolvable:$true] %s311_s13 }
  0x20   : > { %s6155_s24 = scalar_lea.vmem %s312_s13, 32  ;;  %p6157_p0 = pneg %p6391_p12 }
  0x21   : > { %p6156_p13 = scmp.ne.s32.totalorder %s312_s13, %s6155_s24  ;;  %p6163_p3 = scmp.lt.s32.totalorder %s312_s13, %s312_s13 }
  0x22   : > { %p6164_p4 = scmp.lt.s32.totalorder %s6155_s24, %s6155_s24 }
  0x23   : > { %p6158_p1 = pnand %p6157_p0, %p6156_p13 }
  0x24   : > { %p6165_p7 = por %p6164_p4, %p6163_p3 }
  0x25   : > { %p6159_p2 = pneg %p6158_p1 }
  0x27   : > { %p6166_p8 = pnand %p6165_p7, %p6159_p2 }
  0x29   : > { %6169 = shalt.err (!%p6166_p8)
}
  0x2a   : > { %s6257_s25 = smov [#allocation3]   ;;  %s6170_s30 = scalar_lea.vmem %s323_s16, 16 }
  0x2b   : > { %6020 = dma.vmem_to_smem (!%p6391_p12), %s312_s13, 32, %s6257_s25, [#allocation5]  }
  0x2c   : > { %p6171_p11 = scmp.ne.s32.totalorder %s323_s16, %s6170_s30  ;;  %p6178_p5 = scmp.lt.s32.totalorder %s323_s16, %s323_s16 }
  0x2d   : > { %p6179_p10 = scmp.lt.s32.totalorder %s6170_s30, %s6170_s30 }
  0x2e   : > { %p6173_p9 = pnand %p6171_p11, %p6157_p0 }
  0x2f   : > { %p6180_p13 = por %p6179_p10, %p6178_p5 }
  0x30   : > { %p6174_p6 = pneg %p6173_p9 }
  0x32   : > { %p6181_p1 = pnand %p6180_p13, %p6174_p6 }
  0x34   : > { %6184 = shalt.err (!%p6181_p1)
}
  0x35   : > { %s6258_s12 = smov [#allocation6]   ;;  %p10536_p2 = scmp.ne.s32.totalorder %s10532_s29, 0 }
  0x36   : > { %6023 = dma.vmem_to_smem (!%p6391_p12), %s323_s16, 16, %s6258_s12, [#allocation7]  }
  0x37   : > { %372 = sbr.rel (%p10536_p2) target bundleno = 7836 (0x1e9c), region = 64 }
  0x3e   : > { %p10537_p3 = scmp.eq.s32.totalorder %s6349_s21, 0 }
  0x40   : > { %6230 = dma.done.wait (%p10537_p3), [#allocation5], 32   ;;  %p10538_p4 = pmov %p10537_p3 }
  0x41   : > { %p10539_p9 = pmov %p10537_p3 }
  0x42   : > { %6232 = vsyncadd (%p10538_p4), [#allocation5], 4294967264 }
  0x43   : > { %6234 = dma.done.wait (%p10539_p9), [#allocation7], 16   ;;  %p10540_p5 = pmov %p10537_p3 }
  0x45   : > { %6236 = vsyncadd (%p10540_p5), [#allocation7], 4294967280 }
  0x46   : > { %382 = sfence }
  0x47   : > { %p421_p6 = scmp.lt.s32.totalorder %s6349_s21, 1  ;;  %s5474_s13 = sld [smem:[#allocation3 + $0xa]]  ;;  %vm535_vm0 = vcmask 891904   ;;  %vm544_vm1 = vcmask 7168   ;;  %vm655_vm2 = vcmask 15368   ;;  %vm766_vm3 = vcmask 23568  }
  0x48   : > { %s5466_s14 = sld [smem:[#allocation3 + $0x2]]  ;;  %s6413_s15 = sld [smem:[#allocation3 + $0x3]]  ;;  %vm6263_vm4 = vmmov 0   ;;  %vm877_vm5 = vcmask 31768   ;;  %vm988_vm6 = vcmask 39968   ;;  %vm1099_vm7 = vcmask 48168  }
  0x49   : > { %s422_s29 = scalar_select %p421_p6, %s6349_s21, 1  ;;  %vm1210_vm8 = vcmask 56368   ;;  %vm1321_vm9 = vcmask 64568   ;;  %vm1432_vm10 = vcmask 72768   ;;  %vm1543_vm11 = vcmask 80968  }
  0x4a   : > { %s6415_s16 = sld [smem:[#allocation3 + $0x12]]  ;;  %s10541_s0 = sld [smem:[#allocation301_spill]]  ;;  %vm1654_vm12 = vcmask 89168   ;;  %vm1765_vm13 = vcmask 97368   ;;  %vm1876_vm14 = vcmask 105568   ;;  %vm1987_vm15 = vcmask 113768  }
  0x4b   : > { %s5772_s22 = sshll.u32 %s422_s29, 4  ;;  %s10542_s1 = sld [smem:[#allocation302_spill]] }
  0x4c   : > { %s6436_s29 = sld [smem:[#allocation3 + $0xb]]  ;;  %s10503_s2 = smov 127  }
  0x4d   : > { %v558_v2 = vstv %s5474_s13  ;;  %s5492_s13 = sld [smem:[#allocation3 + $0x1a]]  ;;  %s10505_s24 = smov 126  }
  0x4e   : > { %v446_v3 = vstv %s5466_s14  ;;  %v460_v7 = vstv %s6413_s15  ;;  %s5468_s14 = sld [smem:[#allocation3 + $0x4]]  ;;  %s5484_s15 = sld [smem:[#allocation3 + $0x13]] }
  0x4f   : > { %s6472_s25 = sld [smem:[#allocation3 + $0x1b]]  ;;  %s6479_s12 = sld [smem:[#allocation3 + $0x5]] }
  0x50   : > { %s6420_s30 = scalar_lea.vmem %s10541_s0, %s5772_s22  ;;  %v669_v10 = vstv %s6415_s16  ;;  %s5501_s16 = sld [smem:[#allocation3 + $0x22]] }
  0x51   : > { %s6425_s3 = scalar_lea.vmem %s10542_s1, %s5772_s22  ;;  %v6428_v0 = vld [vmem:[%s6420_s30] sm:$0xff]  ;;  %v6431_v1 = vld [vmem:[%s6420_s30 + $0x8] sm:$0xff]  ;;  %s6466_s22 = sld [smem:[#allocation3 + $0xc]] }
  0x52   : > { %v6434_v4 = vld [vmem:[%s6425_s3] sm:$0xff]  ;;  %v559_v5 = vmul.f32 %v558_v2, %v6428_v0  ;;  %v447_v6 = vmul.f32 %v446_v3, %v6428_v0  ;;  %v448_v8 = vmul.f32 %v446_v3, %v6431_v1  ;;  %v560_v11 = vmul.f32 %v558_v2, %v6431_v1  ;;  %v6452_v14 = vld [vmem:[%s6425_s3 + $0x8] sm:$0xff]  ;;  %s8212_s0 = sld [smem:[#allocation3 + $0xe5]]  ;;  %s8214_s1 = sld [smem:[#allocation3 + $0x10]] }
  0x53   : > { %v461_v9 = vmul.f32 %v460_v7, %v6434_v4  ;;  %v670_v12 = vmul.f32 %v669_v10, %v6428_v0  ;;  %v572_v13 = vstv %s6436_s29  ;;  %v462_v16 = vmul.f32 %v460_v7, %v6452_v14  ;;  %s6481_s29 = sld [smem:[#allocation3 + $0x2a]]  ;;  %s8228_s26 = sld [smem:[#allocation3 + $0x19]] }
  0x54   : > { %563 = vrot.lane.b32.xlu1 %v559_v5, %s10503_s2  ;;  %451 = vrot.lane.b32.xlu0 %v447_v6, %s10503_s2  ;;  %v573_v15 = vmul.f32 %v572_v13, %v6434_v4  ;;  %v780_v17 = vstv %s5492_s13  ;;  %v671_v19 = vmul.f32 %v669_v10, %v6431_v1  ;;  %v474_v20 = vstv %s5468_s14  ;;  %s6488_s13 = sld [smem:[#allocation3 + $0x14]]  ;;  %s6496_s14 = sld [smem:[#allocation3 + $0x23]] }
  0x55   : > { %v781_v18 = vmul.f32 %v780_v17, %v6428_v0  ;;  %v574_v21 = vmul.f32 %v572_v13, %v6452_v14  ;;  %v475_v22 = vmul.f32 %v474_v20, %v6428_v0  ;;  %v683_v23 = vstv %s5484_s15  ;;  %s6503_s15 = sld [smem:[#allocation3 + $0x32]]  ;;  %s10804_s19 = smov 125  }
  0x56   : > { %v782_v24 = vmul.f32 %v780_v17, %v6431_v1  ;;  %v684_v25 = vmul.f32 %v683_v23, %v6434_v4  ;;  %v891_v26 = vstv %s5501_s16  ;;  %v476_v27 = vmul.f32 %v474_v20, %v6431_v1  ;;  %s6510_s16 = sld [smem:[#allocation3 + $0xd]]  ;;  %s10805_s23 = smov 127  }
  0x57   : > { %v892_v28 = vmul.f32 %v891_v26, %v6428_v0  ;;  %v586_v29 = vstv %s6466_s22  ;;  %v685_v30 = vmul.f32 %v683_v23, %v6452_v14  ;;  %v794_v32 = vstv %s6472_s25  ;;  %s6517_s22 = sld [smem:[#allocation3 + $0x1c]]  ;;  %s6524_s25 = sld [smem:[#allocation3 + $0x2b]] }
  0x58   : > { %465 = vrot.lane.b32.xlu1 %v461_v9, %s10503_s2  ;;  %453 = vrot.lane.b32.xlu0 %v448_v8, %s10503_s2  ;;  %v587_v31 = vmul.f32 %v586_v29, %v6428_v0  ;;  %v893_v33 = vmul.f32 %v891_v26, %v6431_v1  ;;  %v795_v34 = vmul.f32 %v794_v32, %v6434_v4  ;;  %v488_v35 = vstv %s6479_s12  ;;  %s6531_s12 = sld [smem:[#allocation3 + $0x3a]]  ;;  %s8253_s28 = sld [smem:[#allocation3 + $0x29]] }
  0x59   : > { %v1002_v36 = vstv %s6481_s29  ;;  %v489_v37 = vmul.f32 %v488_v35, %v6434_v4  ;;  %v588_v41 = vmul.f32 %v586_v29, %v6431_v1  ;;  %v796_v44 = vmul.f32 %v794_v32, %v6452_v14  ;;  %s6538_s29 = sld [smem:[#allocation3 + $0x6]]  ;;  %s8262_s17 = sld [smem:[#allocation3 + $0xcf]] }
  0x5a   : > { %v1003_v38 = vmul.f32 %v1002_v36, %v6428_v0  ;;  %v697_v39 = vstv %s6488_s13  ;;  %v905_v42 = vstv %s6496_s14  ;;  %v1004_v47 = vmul.f32 %v1002_v36, %v6431_v1  ;;  %s6545_s13 = sld [smem:[#allocation3 + $0x15]]  ;;  %s6552_s14 = sld [smem:[#allocation3 + $0x24]] }
  0x5b   : > { %v698_v40 = vmul.f32 %v697_v39, %v6428_v0  ;;  %v906_v43 = vmul.f32 %v905_v42, %v6434_v4  ;;  %v1113_v45 = vstv %s6503_s15  ;;  %v490_v50 = vmul.f32 %v488_v35, %v6452_v14  ;;  %s6559_s15 = sld [smem:[#allocation3 + $0x33]]  ;;  %s8267_s20 = sld [smem:[#allocation3 + $0x30]] }
  0x5c   : > { %674 = vrot.lane.b32.xlu1 %v670_v12, %s10503_s2  ;;  %565 = vrot.lane.b32.xlu0 %v560_v11, %s10503_s2  ;;  %v1114_v46 = vmul.f32 %v1113_v45, %v6428_v0  ;;  %v600_v48 = vstv %s6510_s16  ;;  %v699_v53 = vmul.f32 %v697_v39, %v6431_v1  ;;  %v907_v56 = vmul.f32 %v905_v42, %v6452_v14  ;;  %s10500_s16 = smov 125   ;;  %s8269_s11 = sld [smem:[#allocation3 + $0x31]] }
  0x5d   : > { %v601_v49 = vmul.f32 %v600_v48, %v6434_v4  ;;  %v808_v51 = vstv %s6517_s22  ;;  %v1016_v54 = vstv %s6524_s25  ;;  %v1115_v59 = vmul.f32 %v1113_v45, %v6431_v1  ;;  %s6566_s22 = sld [smem:[#allocation3 + $0x42]]  ;;  %s6573_s25 = sld [smem:[#allocation3 + $0xe]] }
  0x5e   : > { %v809_v52 = vmul.f32 %v808_v51, %v6428_v0  ;;  %v1017_v55 = vmul.f32 %v1016_v54, %v6434_v4  ;;  %v1224_v57 = vstv %s6531_s12  ;;  %v602_v61 = vmul.f32 %v600_v48, %v6452_v14  ;;  %s6580_s12 = sld [smem:[#allocation3 + $0x1d]]  ;;  %p11293_p12 = scmp.ne.s32.totalorder %s10529_s27, 0 }
  0x5f   : > { %v1225_v58 = vmul.f32 %v1224_v57, %v6428_v0  ;;  %v502_v60 = vstv %s6538_s29  ;;  %v810_v2 = vmul.f32 %v808_v51, %v6431_v1  ;;  %v1018_v6 = vmul.f32 %v1016_v54, %v6452_v14  ;;  %s6587_s29 = sld [smem:[#allocation3 + $0x2c]] }
  0x60   : > { %577 = vrot.lane.b32.xlu1 %v573_v15, %s10503_s2  ;;  %467 = vrot.lane.b32.xlu0 %v462_v16, %s10503_s2  ;;  %v503_v62 = vmul.f32 %v502_v60, %v6428_v0  ;;  %v711_v63 = vstv %s6545_s13  ;;  %v919_v5 = vstv %s6552_s14  ;;  %v1226_v9 = vmul.f32 %v1224_v57, %v6431_v1  ;;  %s6594_s13 = sld [smem:[#allocation3 + $0x3b]]  ;;  %s6601_s14 = sld [smem:[#allocation3 + $0x7]] }
  0x61   : > { %v712_v3 = vmul.f32 %v711_v63, %v6434_v4  ;;  %v920_v7 = vmul.f32 %v919_v5, %v6428_v0  ;;  %v1127_v8 = vstv %s6559_s15  ;;  %v504_v12 = vmul.f32 %v502_v60, %v6431_v1  ;;  %s6603_s15 = sld [smem:[#allocation3 + $0x4a]] }
  0x62   : > { %v1128_v10 = vmul.f32 %v1127_v8, %v6434_v4  ;;  %v713_v16 = vmul.f32 %v711_v63, %v6452_v14 }
  0x63   : > { %v1335_v11 = vstv %s6566_s22  ;;  %v614_v15 = vstv %s6573_s25  ;;  %s6610_s22 = sld [smem:[#allocation3 + $0x16]]  ;;  %s6618_s25 = sld [smem:[#allocation3 + $0x25]] }
  0x64   : > { %785 = vrot.lane.b32.xlu1 %v781_v18, %s10503_s2  ;;  %676 = vrot.lane.b32.xlu0 %v671_v19, %s10503_s2  ;;  %v1336_v13 = vmul.f32 %v1335_v11, %v6428_v0  ;;  %v615_v17 = vmul.f32 %v614_v15, %v6428_v0  ;;  %v822_v18 = vstv %s6580_s12  ;;  %v921_v19 = vmul.f32 %v919_v5, %v6431_v1  ;;  %s6625_s12 = sld [smem:[#allocation3 + $0x34]] }
  0x65   : > { %v823_v20 = vmul.f32 %v822_v18, %v6434_v4  ;;  %v824_v36 = vmul.f32 %v822_v18, %v6452_v14 }
  0x68   : > { %579 = vrot.lane.b32.xlu1 %v574_v21, %s10503_s2  ;;  %479 = vrot.lane.b32.xlu0 %v475_v22, %s10505_s24  ;;  %v1030_v21 = vstv %s6587_s29  ;;  %v1129_v22 = vmul.f32 %v1127_v8, %v6452_v14  ;;  %s6632_s29 = sld [smem:[#allocation3 + $0x43]] }
  0x69   : > { %v1031_v23 = vmul.f32 %v1030_v21, %v6428_v0 }
  0x6c   : > { %787 = vrot.lane.b32.xlu1 %v782_v24, %s10503_s2  ;;  %688 = vrot.lane.b32.xlu0 %v684_v25, %s10503_s2  ;;  %v1238_v24 = vstv %s6594_s13  ;;  %v1337_v25 = vmul.f32 %v1335_v11, %v6431_v1  ;;  %s6639_s13 = sld [smem:[#allocation3 + $0x52]] }
  0x6d   : > { %v1239_v26 = vmul.f32 %v1238_v24, %v6434_v4 }
  0x6e   : > { %v1349_v42 = vstv %s6632_s29  ;;  %s6705_s29 = sld [smem:[#allocation3 + $0x5a]] }
  0x6f   : > { %v1350_v45 = vmul.f32 %v1349_v42, %v6434_v4 }
  0x70   : > { %481 = vrot.lane.b32.xlu1 %v476_v27, %s10505_s24  ;;  %896 = vrot.lane.b32.xlu0 %v892_v28, %s10503_s2  ;;  %v516_v27 = vstv %s6601_s14  ;;  %v1446_v28 = vstv %s6603_s15  ;;  %s6650_s14 = sld [smem:[#allocation3 + $0xf]]  ;;  %s6661_s15 = sld [smem:[#allocation3 + $0x1e]] }
  0x71   : > { %v517_v29 = vmul.f32 %v516_v27, %v6434_v4  ;;  %v1448_v51 = vmul.f32 %v1446_v28, %v6431_v1 }
  0x74   : > { %690 = vrot.lane.b32.xlu1 %v685_v30, %s10503_s2  ;;  %591 = vrot.lane.b32.xlu0 %v587_v31, %s10505_s24  ;;  %v1447_v30 = vmul.f32 %v1446_v28, %v6428_v0  ;;  %v725_v31 = vstv %s6610_s22  ;;  %s6672_s22 = sld [smem:[#allocation3 + $0x2d]] }
  0x75   : > { %v726_v32 = vmul.f32 %v725_v31, %v6428_v0 }
  0x76   : > { %v836_v57 = vstv %s6661_s15  ;;  %s6738_s15 = sld [smem:[#allocation3 + $0x35]] }
  0x77   : > { %v837_v60 = vmul.f32 %v836_v57, %v6428_v0 }
  0x78   : > { %898 = vrot.lane.b32.xlu1 %v893_v33, %s10503_s2  ;;  %799 = vrot.lane.b32.xlu0 %v795_v34, %s10503_s2  ;;  %v616_v33 = vmul.f32 %v614_v15, %v6431_v1  ;;  %v933_v34 = vstv %s6618_s25  ;;  %s6683_s25 = sld [smem:[#allocation3 + $0x3c]] }
  0x79   : > { %v934_v35 = vmul.f32 %v933_v34, %v6434_v4  ;;  %v935_v5 = vmul.f32 %v933_v34, %v6452_v14 }
  0x7c   : > { %493 = vrot.lane.b32.xlu1 %v489_v37, %s10505_s24  ;;  %1007 = vrot.lane.b32.xlu0 %v1003_v38, %s10503_s2  ;;  %v1141_v37 = vstv %s6625_s12  ;;  %s6694_s12 = sld [smem:[#allocation3 + $0x4b]] }
  0x80   : > { %702 = vrot.lane.b32.xlu1 %v698_v40, %s10505_s24  ;;  %593 = vrot.lane.b32.xlu0 %v588_v41, %s10505_s24  ;;  %v1142_v40 = vmul.f32 %v1141_v37, %v6428_v0  ;;  %v1032_v41 = vmul.f32 %v1030_v21, %v6431_v1 }
  0x82   : > { %v1460_v11 = vstv %s6694_s12  ;;  %s6771_s12 = sld [smem:[#allocation3 + $0x62]] }
  0x83   : > { %v1461_v15 = vmul.f32 %v1460_v11, %v6434_v4 }
  0x84   : > { %910 = vrot.lane.b32.xlu1 %v906_v43, %s10503_s2  ;;  %801 = vrot.lane.b32.xlu0 %v796_v44, %s10503_s2 }
  0x88   : > { %1118 = vrot.lane.b32.xlu1 %v1114_v46, %s10503_s2  ;;  %1009 = vrot.lane.b32.xlu0 %v1004_v47, %s10503_s2  ;;  %v1240_v46 = vmul.f32 %v1238_v24, %v6452_v14  ;;  %v1557_v47 = vstv %s6639_s13  ;;  %s6716_s13 = sld [smem:[#allocation3 + $0x17]] }
  0x89   : > { %v1559_v21 = vmul.f32 %v1557_v47, %v6431_v1 }
  0x8c   : > { %605 = vrot.lane.b32.xlu1 %v601_v49, %s10505_s24  ;;  %495 = vrot.lane.b32.xlu0 %v490_v50, %s10505_s24  ;;  %v1558_v50 = vmul.f32 %v1557_v47, %v6428_v0 }
  0x90   : > { %813 = vrot.lane.b32.xlu1 %v809_v52, %s10505_s24  ;;  %704 = vrot.lane.b32.xlu0 %v699_v53, %s10505_s24  ;;  %v628_v52 = vstv %s6650_s14  ;;  %s6727_s14 = sld [smem:[#allocation3 + $0x26]] }
  0x94   : > { %1021 = vrot.lane.b32.xlu1 %v1017_v55, %s10503_s2  ;;  %912 = vrot.lane.b32.xlu0 %v907_v56, %s10503_s2  ;;  %v629_v55 = vmul.f32 %v628_v52, %v6434_v4  ;;  %v518_v56 = vmul.f32 %v516_v27, %v6452_v14 }
  0x96   : > { %v947_v27 = vstv %s6727_s14  ;;  %s6804_s14 = sld [smem:[#allocation3 + $0x3d]] }
  0x98   : > { %1229 = vrot.lane.b32.xlu1 %v1225_v58, %s10503_s2  ;;  %1120 = vrot.lane.b32.xlu0 %v1115_v59, %s10503_s2 }
  0x9c   : > { %607 = vrot.lane.b32.xlu1 %v602_v61, %s10505_s24  ;;  %507 = vrot.lane.b32.xlu0 %v503_v62, %s10500_s16  ;;  %v727_v61 = vmul.f32 %v725_v31, %v6431_v1  ;;  %v1044_v62 = vstv %s6672_s22  ;;  %s6749_s22 = sld [smem:[#allocation3 + $0x44]]  ;;  %v838_v31 = vmul.f32 %v836_v57, %v6431_v1 }
  0xa0   : > { %815 = vrot.lane.b32.xlu1 %v810_v2, %s10505_s24  ;;  %716 = vrot.lane.b32.xlu0 %v712_v3, %s10505_s24  ;;  %v1045_v3 = vmul.f32 %v1044_v62, %v6434_v4 }
  0xa4   : > { %1023 = vrot.lane.b32.xlu1 %v1018_v6, %s10503_s2  ;;  %924 = vrot.lane.b32.xlu0 %v920_v7, %s10505_s24  ;;  %v1252_v6 = vstv %s6683_s25  ;;  %s6760_s25 = sld [smem:[#allocation3 + $0x53]] }
  0xa8   : > { %1231 = vrot.lane.b32.xlu1 %v1226_v9, %s10503_s2  ;;  %1132 = vrot.lane.b32.xlu0 %v1128_v10, %s10503_s2  ;;  %v1253_v9 = vmul.f32 %v1252_v6, %v6428_v0  ;;  %v1143_v10 = vmul.f32 %v1141_v37, %v6431_v1  ;;  %v1363_v37 = vstv %s6749_s22  ;;  %s6826_s22 = sld [smem:[#allocation3 + $0x5b]] }
  0xac   : > { %509 = vrot.lane.b32.xlu1 %v504_v12, %s10500_s16  ;;  %1340 = vrot.lane.b32.xlu0 %v1336_v13, %s10503_s2 }
  0xb0   : > { %718 = vrot.lane.b32.xlu1 %v713_v16, %s10505_s24  ;;  %619 = vrot.lane.b32.xlu0 %v615_v17, %s10500_s16  ;;  %v1351_v16 = vmul.f32 %v1349_v42, %v6452_v14  ;;  %v1668_v17 = vstv %s6705_s29  ;;  %v1364_v42 = vmul.f32 %v1363_v37, %v6428_v0  ;;  %s6782_s29 = sld [smem:[#allocation3 + $0x1f]] }
  0xb4   : > { %926 = vrot.lane.b32.xlu1 %v921_v19, %s10505_s24  ;;  %827 = vrot.lane.b32.xlu0 %v823_v20, %s10505_s24  ;;  %v1669_v20 = vmul.f32 %v1668_v17, %v6428_v0 }
  0xb8   : > { %1134 = vrot.lane.b32.xlu1 %v1129_v22, %s10503_s2  ;;  %1035 = vrot.lane.b32.xlu0 %v1031_v23, %s10505_s24  ;;  %v739_v22 = vstv %s6716_s13  ;;  %s6793_s13 = sld [smem:[#allocation3 + $0x2e]] }
  0xbc   : > { %1342 = vrot.lane.b32.xlu1 %v1337_v25, %s10503_s2  ;;  %1243 = vrot.lane.b32.xlu0 %v1239_v26, %s10503_s2  ;;  %v740_v25 = vmul.f32 %v739_v22, %v6434_v4  ;;  %v630_v26 = vmul.f32 %v628_v52, %v6452_v14  ;;  %v1462_v52 = vmul.f32 %v1460_v11, %v6452_v14 }
  0xc0   : > { %521 = vrot.lane.b32.xlu1 %v517_v29, %s10500_s16  ;;  %1451 = vrot.lane.b32.xlu0 %v1447_v30, %s10503_s2  ;;  %v948_v30 = vmul.f32 %v947_v27, %v6428_v0 }
  0xc4   : > { %730 = vrot.lane.b32.xlu1 %v726_v32, %s10500_s16  ;;  %621 = vrot.lane.b32.xlu0 %v616_v33, %s10500_s16  ;;  %v1155_v32 = vstv %s6738_s15  ;;  %s6815_s15 = sld [smem:[#allocation3 + $0x4c]] }
  0xc6   : > { %v6641_v38 = vpop.permute.xlu1 %563  ;;  %v6643_v39 = vpop.permute.xlu0 %451 }
  0xc8   : > { %938 = vrot.lane.b32.xlu1 %v934_v35, %s10505_s24  ;;  %829 = vrot.lane.b32.xlu0 %v824_v36, %s10505_s24  ;;  %v1156_v35 = vmul.f32 %v1155_v32, %v6434_v4  ;;  %v1046_v36 = vmul.f32 %v1044_v62, %v6452_v14  ;;  %v850_v62 = vstv %s6782_s29  ;;  %s6859_s29 = sld [smem:[#allocation3 + $0x36]] }
  0xca   : > { %v6652_v43 = vpop.permute.xlu1 %465  ;;  %v6654_v44 = vpop.permute.xlu0 %453 }
  0xcc   : > { %1146 = vrot.lane.b32.xlu1 %v1142_v40, %s10505_s24  ;;  %1037 = vrot.lane.b32.xlu0 %v1032_v41, %s10505_s24 }
  0xce   : > { %v6663_v48 = vpop.permute.xlu1 %674  ;;  %v6665_v49 = vpop.permute.xlu0 %565 }
  0xd0   : > { %1354 = vrot.lane.b32.xlu1 %v1350_v45, %s10503_s2  ;;  %1245 = vrot.lane.b32.xlu0 %v1240_v46, %s10503_s2  ;;  %v1254_v45 = vmul.f32 %v1252_v6, %v6431_v1  ;;  %v1571_v46 = vstv %s6760_s25  ;;  %v851_v6 = vmul.f32 %v850_v62, %v6434_v4  ;;  %s6837_s25 = sld [smem:[#allocation3 + $0x6a]] }
  0xd2   : > { %v6674_v53 = vpop.permute.xlu1 %577  ;;  %v6676_v54 = vpop.permute.xlu0 %467 }
  0xd4   : > { %1562 = vrot.lane.b32.xlu1 %v1558_v50, %s10503_s2  ;;  %1453 = vrot.lane.b32.xlu0 %v1448_v51, %s10503_s2  ;;  %v1572_v51 = vmul.f32 %v1571_v46, %v6434_v4 }
  0xd6   : > { %v6685_v58 = vpop.permute.xlu1 %785  ;;  %v6687_v59 = vpop.permute.xlu0 %676 }
  0xd8   : > { %633 = vrot.lane.b32.xlu1 %v629_v55, %s10500_s16  ;;  %523 = vrot.lane.b32.xlu0 %v518_v56, %s10500_s16  ;;  %v1779_v55 = vstv %s6771_s12  ;;  %s6848_s12 = sld [smem:[#allocation3 + $0x27]] }
  0xda   : > { %v6696_v63 = vpop.permute.xlu1 %579  ;;  %v6698_v2 = vpop.permute.xlu0 %479 }
  0xdc   : > { %841 = vrot.lane.b32.xlu1 %v837_v60, %s10500_s16  ;;  %732 = vrot.lane.b32.xlu0 %v727_v61, %s10500_s16  ;;  %v1780_v60 = vmul.f32 %v1779_v55, %v6428_v0  ;;  %v1670_v61 = vmul.f32 %v1668_v17, %v6431_v1  ;;  %v949_v17 = vmul.f32 %v947_v27, %v6431_v1 }
  0xde   : > { %v6707_v7 = vpop.permute.xlu1 %787  ;;  %v6709_v8 = vpop.permute.xlu0 %688 }
  0xe0   : > { %1049 = vrot.lane.b32.xlu1 %v1045_v3, %s10505_s24  ;;  %940 = vrot.lane.b32.xlu0 %v935_v5, %s10505_s24 }
  0xe2   : > { %v6718_v12 = vpop.permute.xlu1 %481  ;;  %v6720_v13 = vpop.permute.xlu0 %896 }
  0xe4   : > { %1257 = vrot.lane.b32.xlu1 %v1253_v9, %s10505_s24  ;;  %1148 = vrot.lane.b32.xlu0 %v1143_v10, %s10505_s24  ;;  %v741_v9 = vmul.f32 %v739_v22, %v6452_v14  ;;  %v1058_v10 = vstv %s6793_s13  ;;  %s6870_s13 = sld [smem:[#allocation3 + $0x45]] }
  0xe6   : > { %v6729_v18 = vpop.permute.xlu1 %690  ;;  %v6731_v19 = vpop.permute.xlu0 %591 }
  0xe8   : > { %1465 = vrot.lane.b32.xlu1 %v1461_v15, %s10503_s2  ;;  %1356 = vrot.lane.b32.xlu0 %v1351_v16, %s10503_s2  ;;  %v1059_v16 = vmul.f32 %v1058_v10, %v6428_v0 }
  0xea   : > { %v6740_v23 = vpop.permute.xlu1 %898  ;;  %v6742_v24 = vpop.permute.xlu0 %799 }
  0xec   : > { %1673 = vrot.lane.b32.xlu1 %v1669_v20, %s10503_s2  ;;  %1564 = vrot.lane.b32.xlu0 %v1559_v21, %s10503_s2  ;;  %v1266_v20 = vstv %s6804_s14  ;;  %s6881_s14 = sld [smem:[#allocation3 + $0x54]] }
  0xee   : > { %v6751_v28 = vpop.permute.xlu1 %493  ;;  %v6753_v29 = vpop.permute.xlu0 %1007 }
  0xef   : > { %10543 = vst [vmem:[#allocation18_spill] sm:$0xff] %v6753_v29 }
  0xf0   : > { %744 = vrot.lane.b32.xlu1 %v740_v25, %s10500_s16  ;;  %635 = vrot.lane.b32.xlu0 %v630_v26, %s10500_s16  ;;  %v1267_v25 = vmul.f32 %v1266_v20, %v6434_v4  ;;  %v1157_v26 = vmul.f32 %v1155_v32, %v6452_v14 }
  0xf2   : > { %v6762_v33 = vpop.permute.xlu1 %702  ;;  %v6764_v34 = vpop.permute.xlu0 %593 }
  0xf3   : > { %10544 = vst [vmem:[#allocation19_spill] sm:$0xff] %v6762_v33  ;;  %10545 = vst [vmem:[#allocation20_spill] sm:$0xff] %v6764_v34 }
  0xf4   : > { %952 = vrot.lane.b32.xlu1 %v948_v30, %s10500_s16  ;;  %843 = vrot.lane.b32.xlu0 %v838_v31, %s10500_s16  ;;  %v1474_v30 = vstv %s6815_s15  ;;  %s6892_s15 = sld [smem:[#allocation3 + $0x63]] }
  0xf6   : > { %v6773_v40 = vpop.permute.xlu1 %910  ;;  %v6775_v41 = vpop.permute.xlu0 %801 }
  0xf7   : > { %10546 = vst [vmem:[#allocation21_spill] sm:$0xff] %v6773_v40  ;;  %10547 = vst [vmem:[#allocation22_spill] sm:$0xff] %v6775_v41 }
  0xf8   : > { %1160 = vrot.lane.b32.xlu1 %v1156_v35, %s10505_s24  ;;  %1051 = vrot.lane.b32.xlu0 %v1046_v36, %s10505_s24  ;;  %v1475_v35 = vmul.f32 %v1474_v30, %v6428_v0  ;;  %v1365_v36 = vmul.f32 %v1363_v37, %v6431_v1 }
  0xfa   : > { %v6784_v47 = vpop.permute.xlu1 %1118  ;;  %v6786_v50 = vpop.permute.xlu0 %1009 }
  0xfb   : > { %10548 = vst [vmem:[#allocation23_spill] sm:$0xff] %v6784_v47  ;;  %10549 = vst [vmem:[#allocation24_spill] sm:$0xff] %v6786_v50 }
  0xfc   : > { %1368 = vrot.lane.b32.xlu1 %v1364_v42, %s10505_s24  ;;  %1259 = vrot.lane.b32.xlu0 %v1254_v45, %s10505_s24  ;;  %v1682_v42 = vstv %s6826_s22  ;;  %s6903_s22 = sld [smem:[#allocation3 + $0x72]] }
  0xfe   : > { %v6795_v56 = vpop.permute.xlu1 %605  ;;  %v6797_v57 = vpop.permute.xlu0 %495 }
  0xff   : > { %10550 = vst [vmem:[#allocation25_spill] sm:$0xff] %v6795_v56  ;;  %10551 = vst [vmem:[#allocation26_spill] sm:$0xff] %v6797_v57 }
 0x100   : > { %1576 = vrot.lane.b32.xlu1 %v1572_v51, %s10503_s2  ;;  %1467 = vrot.lane.b32.xlu0 %v1462_v52, %s10503_s2  ;;  %v1573_v51 = vmul.f32 %v1571_v46, %v6452_v14  ;;  %v1683_v52 = vmul.f32 %v1682_v42, %v6434_v4 }
 0x102   : > { %v6806_v3 = vpop.permute.xlu1 %813  ;;  %v6808_v5 = vpop.permute.xlu0 %704 }
 0x103   : > { %10552 = vst [vmem:[#allocation27_spill] sm:$0xff] %v6806_v3  ;;  %10553 = vst [vmem:[#allocation28_spill] sm:$0xff] %v6808_v5  ;;  %v1107_v3 = vstv %s8269_s11  ;;  %s8352_s11 = sld [smem:[#allocation3 + $0x50]] }
 0x104   : > { %1784 = vrot.lane.b32.xlu1 %v1780_v60, %s10503_s2  ;;  %1675 = vrot.lane.b32.xlu0 %v1670_v61, %s10503_s2  ;;  %v1890_v60 = vstv %s6837_s25  ;;  %s6914_s25 = sld [smem:[#allocation3 + $0x2f]] }
 0x105   : > { %v1891_v46 = vmul.f32 %v1890_v60, %v6428_v0 }
 0x106   : > { %v6817_v11 = vpop.permute.xlu1 %1021  ;;  %v6819_v15 = vpop.permute.xlu0 %912 }
 0x107   : > { %10554 = vst [vmem:[#allocation29_spill] sm:$0xff] %v6817_v11  ;;  %10555 = vst [vmem:[#allocation30_spill] sm:$0xff] %v6819_v15 }
 0x108   : > { %855 = vrot.lane.b32.xlu1 %v851_v6, %s10500_s16  ;;  %746 = vrot.lane.b32.xlu0 %v741_v9, %s10500_s16  ;;  %v1781_v6 = vmul.f32 %v1779_v55, %v6431_v1  ;;  %v961_v9 = vstv %s6848_s12  ;;  %s6925_s12 = sld [smem:[#allocation3 + $0x3e]] }
 0x109   : > { %v962_v55 = vmul.f32 %v961_v9, %v6434_v4 }
 0x10a   : > { %v6828_v21 = vpop.permute.xlu1 %1229  ;;  %v6830_v22 = vpop.permute.xlu0 %1120 }
 0x10b   : > { %10556 = vst [vmem:[#allocation31_spill] sm:$0xff] %v6828_v21  ;;  %10557 = vst [vmem:[#allocation32_spill] sm:$0xff] %v6830_v22  ;;  %v996_v22 = vstv %s8253_s28  ;;  %s8328_s28 = sld [smem:[#allocation3 + $0xed]] }
 0x10c   : > { %1063 = vrot.lane.b32.xlu1 %v1059_v16, %s10500_s16  ;;  %954 = vrot.lane.b32.xlu0 %v949_v17, %s10500_s16 }
 0x10e   : > { %v6839_v27 = vpop.permute.xlu1 %607  ;;  %v6841_v31 = vpop.permute.xlu0 %507 }
 0x10f   : > { %10558 = vst [vmem:[#allocation33_spill] sm:$0xff] %v6839_v27  ;;  %10559 = vst [vmem:[#allocation34_spill] sm:$0xff] %v6841_v31 }
 0x110   : > { %1271 = vrot.lane.b32.xlu1 %v1267_v25, %s10505_s24  ;;  %1162 = vrot.lane.b32.xlu0 %v1157_v26, %s10505_s24  ;;  %v852_v25 = vmul.f32 %v850_v62, %v6452_v14  ;;  %v1169_v26 = vstv %s6859_s29  ;;  %s6936_s29 = sld [smem:[#allocation3 + $0x4d]] }
 0x111   : > { %v1170_v62 = vmul.f32 %v1169_v26, %v6428_v0 }
 0x112   : > { %v6850_v32 = vpop.permute.xlu1 %815  ;;  %v6852_v45 = vpop.permute.xlu0 %716 }
 0x113   : > { %10560 = vst [vmem:[#allocation35_spill] sm:$0xff] %v6850_v32  ;;  %10561 = vst [vmem:[#allocation36_spill] sm:$0xff] %v6852_v45 }
 0x114   : > { %1479 = vrot.lane.b32.xlu1 %v1475_v35, %s10505_s24  ;;  %1370 = vrot.lane.b32.xlu0 %v1365_v36, %s10505_s24 }
 0x116   : > { %v6861_v37 = vpop.permute.xlu1 %1023  ;;  %v6863_v61 = vpop.permute.xlu0 %924 }
 0x117   : > { %10562 = vst [vmem:[#allocation37_spill] sm:$0xff] %v6861_v37  ;;  %10563 = vst [vmem:[#allocation38_spill] sm:$0xff] %v6863_v61 }
 0x118   : > { %1687 = vrot.lane.b32.xlu1 %v1683_v52, %s10503_s2  ;;  %1578 = vrot.lane.b32.xlu0 %v1573_v51, %s10503_s2  ;;  %v1060_v51 = vmul.f32 %v1058_v10, %v6431_v1  ;;  %v1377_v52 = vstv %s6870_s13  ;;  %s6947_s13 = sld [smem:[#allocation3 + $0x5c]] }
 0x119   : > { %v1378_v10 = vmul.f32 %v1377_v52, %v6434_v4 }
 0x11a   : > { %v6872_v16 = vpop.permute.xlu1 %1231  ;;  %v6874_v17 = vpop.permute.xlu0 %1132 }
 0x11b   : > { %10564 = vst [vmem:[#allocation39_spill] sm:$0xff] %v6872_v16  ;;  %10565 = vst [vmem:[#allocation40_spill] sm:$0xff] %v6874_v17  ;;  %v659_v16 = vstv %s8214_s1  ;;  %s10811_s1 = smov 126  }
 0x11c   : > { %1895 = vrot.lane.b32.xlu1 %v1891_v46, %s10503_s2  ;;  %1786 = vrot.lane.b32.xlu0 %v1781_v6, %s10503_s2 }
 0x11e   : > { %v6883_v35 = vpop.permute.xlu1 %509  ;;  %v6885_v36 = vpop.permute.xlu0 %1340 }
 0x11f   : > { %10566 = vst [vmem:[#allocation41_spill] sm:$0xff] %v6883_v35  ;;  %10567 = vst [vmem:[#allocation42_spill] sm:$0xff] %v6885_v36  ;;  %v1268_v35 = vmul.f32 %v1266_v20, %v6452_v14 }
 0x120   : > { %966 = vrot.lane.b32.xlu1 %v962_v55, %s10500_s16  ;;  %857 = vrot.lane.b32.xlu0 %v852_v25, %s10500_s16  ;;  %v1585_v55 = vstv %s6881_s14  ;;  %s6958_s14 = sld [smem:[#allocation3 + $0x6b]] }
 0x121   : > { %v1586_v20 = vmul.f32 %v1585_v55, %v6428_v0 }
 0x122   : > { %v6894_v6 = vpop.permute.xlu1 %718  ;;  %v6896_v46 = vpop.permute.xlu0 %619 }
 0x123   : > { %10568 = vst [vmem:[#allocation43_spill] sm:$0xff] %v6894_v6  ;;  %10569 = vst [vmem:[#allocation44_spill] sm:$0xff] %v6896_v46  ;;  %v1476_v6 = vmul.f32 %v1474_v30, %v6431_v1 }
 0x124   : > { %1174 = vrot.lane.b32.xlu1 %v1170_v62, %s10500_s16  ;;  %1065 = vrot.lane.b32.xlu0 %v1060_v51, %s10500_s16  ;;  %v1793_v62 = vstv %s6892_s15  ;;  %s6969_s15 = sld [smem:[#allocation3 + $0x7a]] }
 0x125   : > { %v1794_v30 = vmul.f32 %v1793_v62, %v6434_v4 }
 0x126   : > { %v6905_v25 = vpop.permute.xlu1 %926  ;;  %v6907_v36 = vpop.permute.xlu0 %827 }
 0x127   : > { %10570 = vst [vmem:[#allocation45_spill] sm:$0xff] %v6905_v25  ;;  %10571 = vst [vmem:[#allocation46_spill] sm:$0xff] %v6907_v36  ;;  %v2001_v36 = vstv %s6903_s22  ;;  %s6980_s22 = sld [smem:[#allocation3 + $0x37]] }
 0x128   : > { %1382 = vrot.lane.b32.xlu1 %v1378_v10, %s10505_s24  ;;  %1273 = vrot.lane.b32.xlu0 %v1268_v35, %s10505_s24  ;;  %v1684_v10 = vmul.f32 %v1682_v42, %v6452_v14 }
 0x12a   : > { %v6916_v51 = vpop.permute.xlu1 %1134  ;;  %v6918_v46 = vpop.permute.xlu0 %1035 }
 0x12b   : > { %10572 = vst [vmem:[#allocation47_spill] sm:$0xff] %v6916_v51  ;;  %10573 = vst [vmem:[#allocation48_spill] sm:$0xff] %v6918_v46  ;;  %v1072_v46 = vstv %s6914_s25  ;;  %s6991_s25 = sld [smem:[#allocation3 + $0x46]] }
 0x12c   : > { %1590 = vrot.lane.b32.xlu1 %v1586_v20, %s10505_s24  ;;  %1481 = vrot.lane.b32.xlu0 %v1476_v6, %s10505_s24  ;;  %v2002_v20 = vmul.f32 %v2001_v36, %v6428_v0  ;;  %v1892_v6 = vmul.f32 %v1890_v60, %v6431_v1 }
 0x12e   : > { %v6927_v35 = vpop.permute.xlu1 %1342  ;;  %v6929_v25 = vpop.permute.xlu0 %1243 }
 0x12f   : > { %10574 = vst [vmem:[#allocation49_spill] sm:$0xff] %v6927_v35  ;;  %10575 = vst [vmem:[#allocation50_spill] sm:$0xff] %v6929_v25  ;;  %v1280_v25 = vstv %s6925_s12  ;;  %s7002_s12 = sld [smem:[#allocation3 + $0x55]] }
 0x130   : > { %1798 = vrot.lane.b32.xlu1 %v1794_v30, %s10503_s2  ;;  %1689 = vrot.lane.b32.xlu0 %v1684_v10, %s10503_s2  ;;  %v1073_v30 = vmul.f32 %v1072_v46, %v6434_v4  ;;  %v963_v10 = vmul.f32 %v961_v9, %v6452_v14 }
 0x132   : > { %v6938_v42 = vpop.permute.xlu1 %521  ;;  %v6940_v51 = vpop.permute.xlu0 %1451 }
 0x133   : > { %10576 = vst [vmem:[#allocation51_spill] sm:$0xff] %v6938_v42  ;;  %10577 = vst [vmem:[#allocation52_spill] sm:$0xff] %v6940_v51  ;;  %v1488_v51 = vstv %s6936_s29  ;;  %s7013_s29 = sld [smem:[#allocation3 + $0x64]]  ;;  %v10813_v42 = vstv %s8212_s0 }
 0x134   : > { %2006 = vrot.lane.b32.xlu1 %v2002_v20, %s10503_s2  ;;  %1897 = vrot.lane.b32.xlu0 %v1892_v6, %s10503_s2  ;;  %v1281_v20 = vmul.f32 %v1280_v25, %v6428_v0  ;;  %v1171_v6 = vmul.f32 %v1169_v26, %v6431_v1 }
 0x136   : > { %v6949_v60 = vpop.permute.xlu1 %730  ;;  %v6951_v35 = vpop.permute.xlu0 %621 }
 0x137   : > { %10578 = vst [vmem:[#allocation53_spill] sm:$0xff] %v6949_v60  ;;  %10579 = vst [vmem:[#allocation54_spill] sm:$0xff] %v6951_v35  ;;  %v1696_v35 = vstv %s6947_s13  ;;  %s7024_s13 = sld [smem:[#allocation3 + $0x73]] }
 0x138   : > { %1077 = vrot.lane.b32.xlu1 %v1073_v30, %s10500_s16  ;;  %968 = vrot.lane.b32.xlu0 %v963_v10, %s10500_s16  ;;  %v1489_v30 = vmul.f32 %v1488_v51, %v6434_v4  ;;  %v1379_v10 = vmul.f32 %v1377_v52, %v6452_v14 }
 0x13a   : > { %v6960_v9 = vpop.permute.xlu1 %938  ;;  %v6962_v17 = vpop.permute.xlu0 %829 }
 0x13b   : > { %10580 = vst [vmem:[#allocation55_spill] sm:$0xff] %v6960_v9  ;;  %10581 = vst [vmem:[#allocation56_spill] sm:$0xff] %v6962_v17  ;;  %v1904_v17 = vstv %s6958_s14  ;;  %s7035_s14 = sld [smem:[#allocation3 + $0x82]] }
 0x13c   : > { %1285 = vrot.lane.b32.xlu1 %v1281_v20, %s10500_s16  ;;  %1176 = vrot.lane.b32.xlu0 %v1171_v6, %s10500_s16  ;;  %v1697_v20 = vmul.f32 %v1696_v35, %v6428_v0  ;;  %v1587_v6 = vmul.f32 %v1585_v55, %v6431_v1 }
 0x13e   : > { %v6971_v26 = vpop.permute.xlu1 %1146  ;;  %v6973_v60 = vpop.permute.xlu0 %1037 }
 0x13f   : > { %10582 = vst [vmem:[#allocation57_spill] sm:$0xff] %v6971_v26  ;;  %10583 = vst [vmem:[#allocation58_spill] sm:$0xff] %v6973_v60  ;;  %v2112_v60 = vstv %s6969_s15  ;;  %s7046_s15 = sld [smem:[#allocation3 + $0x3f]] }
 0x140   : > { %1493 = vrot.lane.b32.xlu1 %v1489_v30, %s10505_s24  ;;  %1384 = vrot.lane.b32.xlu0 %v1379_v10, %s10505_s24  ;;  %v1905_v30 = vmul.f32 %v1904_v17, %v6434_v4  ;;  %v1795_v10 = vmul.f32 %v1793_v62, %v6452_v14 }
 0x142   : > { %v6982_v52 = vpop.permute.xlu1 %1354  ;;  %v6984_v9 = vpop.permute.xlu0 %1245 }
 0x143   : > { %10584 = vst [vmem:[#allocation59_spill] sm:$0xff] %v6982_v52  ;;  %10585 = vst [vmem:[#allocation60_spill] sm:$0xff] %v6984_v9  ;;  %v1183_v9 = vstv %s6980_s22  ;;  %s7057_s22 = sld [smem:[#allocation3 + $0x4e]] }
 0x144   : > { %1701 = vrot.lane.b32.xlu1 %v1697_v20, %s10505_s24  ;;  %1592 = vrot.lane.b32.xlu0 %v1587_v6, %s10505_s24  ;;  %v2113_v20 = vmul.f32 %v2112_v60, %v6428_v0  ;;  %v2003_v6 = vmul.f32 %v2001_v36, %v6431_v1 }
 0x146   : > { %v6993_v55 = vpop.permute.xlu1 %1562  ;;  %v6995_v26 = vpop.permute.xlu0 %1453 }
 0x147   : > { %10586 = vst [vmem:[#allocation61_spill] sm:$0xff] %v6993_v55  ;;  %10587 = vst [vmem:[#allocation62_spill] sm:$0xff] %v6995_v26  ;;  %v1391_v26 = vstv %s6991_s25  ;;  %s7068_s25 = sld [smem:[#allocation3 + $0x5d]] }
 0x148   : > { %1909 = vrot.lane.b32.xlu1 %v1905_v30, %s10503_s2  ;;  %1800 = vrot.lane.b32.xlu0 %v1795_v10, %s10503_s2  ;;  %v1184_v30 = vmul.f32 %v1183_v9, %v6434_v4  ;;  %v1074_v10 = vmul.f32 %v1072_v46, %v6452_v14 }
 0x14a   : > { %v7004_v62 = vpop.permute.xlu1 %633  ;;  %v7006_v52 = vpop.permute.xlu0 %523 }
 0x14b   : > { %10588 = vst [vmem:[#allocation63_spill] sm:$0xff] %v7004_v62  ;;  %10589 = vst [vmem:[#allocation64_spill] sm:$0xff] %v7006_v52  ;;  %v1599_v52 = vstv %s7002_s12  ;;  %s7079_s12 = sld [smem:[#allocation3 + $0x6c]] }
 0x14c   : > { %2117 = vrot.lane.b32.xlu1 %v2113_v20, %s10503_s2  ;;  %2008 = vrot.lane.b32.xlu0 %v2003_v6, %s10503_s2  ;;  %v1392_v20 = vmul.f32 %v1391_v26, %v6428_v0  ;;  %v1282_v6 = vmul.f32 %v1280_v25, %v6431_v1 }
 0x14e   : > { %v7015_v36 = vpop.permute.xlu1 %841  ;;  %v7017_v55 = vpop.permute.xlu0 %732 }
 0x14f   : > { %10590 = vst [vmem:[#allocation65_spill] sm:$0xff] %v7015_v36  ;;  %10591 = vst [vmem:[#allocation66_spill] sm:$0xff] %v7017_v55  ;;  %v1807_v55 = vstv %s7013_s29  ;;  %s7096_s29 = sld [smem:[#allocation3 + $0x7b]] }
 0x150   : > { %1188 = vrot.lane.b32.xlu1 %v1184_v30, %s10500_s16  ;;  %1079 = vrot.lane.b32.xlu0 %v1074_v10, %s10500_s16  ;;  %v1600_v30 = vmul.f32 %v1599_v52, %v6434_v4  ;;  %v1490_v10 = vmul.f32 %v1488_v51, %v6452_v14 }
 0x152   : > { %v7026_v46 = vpop.permute.xlu1 %1049  ;;  %v7028_v62 = vpop.permute.xlu0 %940 }
 0x153   : > { %10592 = vst [vmem:[#allocation67_spill] sm:$0xff] %v7026_v46  ;;  %10593 = vst [vmem:[#allocation68_spill] sm:$0xff] %v7028_v62  ;;  %v2015_v62 = vstv %s7024_s13  ;;  %s7110_s13 = sld [smem:[#allocation3 + $0x8a]] }
 0x154   : > { %1396 = vrot.lane.b32.xlu1 %v1392_v20, %s10500_s16  ;;  %1287 = vrot.lane.b32.xlu0 %v1282_v6, %s10500_s16  ;;  %v1808_v20 = vmul.f32 %v1807_v55, %v6428_v0  ;;  %v1698_v6 = vmul.f32 %v1696_v35, %v6431_v1 }
 0x156   : > { %v7037_v25 = vpop.permute.xlu1 %1257  ;;  %v7039_v36 = vpop.permute.xlu0 %1148 }
 0x157   : > { %10594 = vst [vmem:[#allocation69_spill] sm:$0xff] %v7037_v25  ;;  %10595 = vst [vmem:[#allocation70_spill] sm:$0xff] %v7039_v36  ;;  %v2223_v36 = vstv %s7035_s14  ;;  %s7121_s14 = sld [smem:[#allocation3 + $0x47]] }
 0x158   : > { %1604 = vrot.lane.b32.xlu1 %v1600_v30, %s10505_s24  ;;  %1495 = vrot.lane.b32.xlu0 %v1490_v10, %s10505_s24  ;;  %v2016_v30 = vmul.f32 %v2015_v62, %v6434_v4  ;;  %v1906_v10 = vmul.f32 %v1904_v17, %v6452_v14 }
 0x15a   : > { %v7048_v51 = vpop.permute.xlu1 %1465  ;;  %v7050_v46 = vpop.permute.xlu0 %1356 }
 0x15b   : > { %10596 = vst [vmem:[#allocation71_spill] sm:$0xff] %v7048_v51  ;;  %10597 = vst [vmem:[#allocation72_spill] sm:$0xff] %v7050_v46  ;;  %v1294_v46 = vstv %s7046_s15  ;;  %s7135_s15 = sld [smem:[#allocation3 + $0x56]] }
 0x15c   : > { %1812 = vrot.lane.b32.xlu1 %v1808_v20, %s10505_s24  ;;  %1703 = vrot.lane.b32.xlu0 %v1698_v6, %s10505_s24  ;;  %v2224_v20 = vmul.f32 %v2223_v36, %v6428_v0  ;;  %v2114_v6 = vmul.f32 %v2112_v60, %v6431_v1  ;;  %v1185_v0 = vmul.f32 %v1183_v9, %v6452_v14 }
 0x15e   : > { %v7059_v35 = vpop.permute.xlu1 %1673  ;;  %v7061_v25 = vpop.permute.xlu0 %1564 }
 0x15f   : > { %10598 = vst [vmem:[#allocation73_spill] sm:$0xff] %v7059_v35  ;;  %10599 = vst [vmem:[#allocation74_spill] sm:$0xff] %v7061_v25  ;;  %v1710_v25 = vstv %s7068_s25  ;;  %v1601_v35 = vmul.f32 %v1599_v52, %v6452_v14  ;;  %s7157_s25 = sld [smem:[#allocation3 + $0x74]] }
 0x160   : > { %2020 = vrot.lane.b32.xlu1 %v2016_v30, %s10503_s2  ;;  %1911 = vrot.lane.b32.xlu0 %v1906_v10, %s10503_s2  ;;  %v1295_v30 = vmul.f32 %v1294_v46, %v6434_v4  ;;  %v1502_v10 = vstv %s7057_s22  ;;  %v7092_v4 = vld [vmem:[%s6420_s30 + $0x8] sm:$0xff]  ;;  %s7146_s22 = sld [smem:[#allocation3 + $0x65]] }
 0x161   : > { %v1393_v9 = vmul.f32 %v7092_v4, %v1391_v26  ;;  %v1918_v26 = vstv %s7079_s12  ;;  %s7168_s12 = sld [smem:[#allocation3 + $0x83]] }
 0x162   : > { %v7070_v17 = vpop.permute.xlu1 %744  ;;  %v7072_v51 = vpop.permute.xlu0 %635 }
 0x163   : > { %10600 = vst [vmem:[#allocation75_spill] sm:$0xff] %v7070_v17  ;;  %10601 = vst [vmem:[#allocation76_spill] sm:$0xff] %v7072_v51 }
 0x164   : > { %2228 = vrot.lane.b32.xlu1 %v2224_v20, %s10503_s2  ;;  %2119 = vrot.lane.b32.xlu0 %v2114_v6, %s10503_s2  ;;  %v7088_v20 = vld [vmem:[%s6420_s30] sm:$0xff] }
 0x165   : > { %v1503_v6 = vmul.f32 %v7088_v20, %v1502_v10 }
 0x166   : > { %v7081_v1 = vpop.permute.xlu1 %952  ;;  %v7083_v60 = vpop.permute.xlu0 %843 }
 0x167   : > { %10602 = vst [vmem:[#allocation77_spill] sm:$0xff] %v7081_v1  ;;  %10603 = vst [vmem:[#allocation78_spill] sm:$0xff] %v7083_v60 }
 0x168   : > { %1299 = vrot.lane.b32.xlu1 %v1295_v30, %s10500_s16  ;;  %1190 = vrot.lane.b32.xlu0 %v1185_v0, %s10500_s16  ;;  %v7105_v30 = vld [vmem:[%s6425_s3] sm:$0xff] }
 0x169   : > { %v1711_v0 = vmul.f32 %v7105_v30, %v1710_v25 }
 0x16a   : > { %v7098_v1 = vpop.permute.xlu1 %1160  ;;  %v7100_v60 = vpop.permute.xlu0 %1051 }
 0x16b   : > { %10604 = vst [vmem:[#allocation79_spill] sm:$0xff] %v7098_v1  ;;  %10605 = vst [vmem:[#allocation80_spill] sm:$0xff] %v7100_v60  ;;  %v2126_v60 = vstv %s7096_s29  ;;  %s7179_s29 = sld [smem:[#allocation3 + $0x92]] }
 0x16c   : > { %1507 = vrot.lane.b32.xlu1 %v1503_v6, %s10500_s16  ;;  %1398 = vrot.lane.b32.xlu0 %v1393_v9, %s10500_s16  ;;  %v1919_v6 = vmul.f32 %v7088_v20, %v1918_v26  ;;  %v1809_v9 = vmul.f32 %v7092_v4, %v1807_v55 }
 0x16e   : > { %v7112_v51 = vpop.permute.xlu1 %1368  ;;  %v7114_v1 = vpop.permute.xlu0 %1259 }
 0x16f   : > { %10606 = vst [vmem:[#allocation81_spill] sm:$0xff] %v7112_v51  ;;  %10607 = vst [vmem:[#allocation82_spill] sm:$0xff] %v7114_v1  ;;  %v7131_v1 = vld [vmem:[%s6425_s3 + $0x8] sm:$0xff]  ;;  %v2334_v51 = vstv %s7110_s13  ;;  %s7190_s13 = sld [smem:[#allocation3 + $0x4f]] }
 0x170   : > { %1715 = vrot.lane.b32.xlu1 %v1711_v0, %s10505_s24  ;;  %1606 = vrot.lane.b32.xlu0 %v1601_v35, %s10505_s24  ;;  %v2127_v0 = vmul.f32 %v7105_v30, %v2126_v60  ;;  %v2017_v35 = vmul.f32 %v7131_v1, %v2015_v62 }
 0x172   : > { %v7123_v14 = vpop.permute.xlu1 %1576  ;;  %v7125_v52 = vpop.permute.xlu0 %1467 }
 0x173   : > { %10608 = vst [vmem:[#allocation83_spill] sm:$0xff] %v7123_v14  ;;  %10609 = vst [vmem:[#allocation84_spill] sm:$0xff] %v7125_v52  ;;  %v1405_v52 = vstv %s7121_s14  ;;  %s7201_s14 = sld [smem:[#allocation3 + $0x5e]] }
 0x174   : > { %1923 = vrot.lane.b32.xlu1 %v1919_v6, %s10505_s24  ;;  %1814 = vrot.lane.b32.xlu0 %v1809_v9, %s10505_s24  ;;  %v2335_v6 = vmul.f32 %v7088_v20, %v2334_v51  ;;  %v2225_v9 = vmul.f32 %v7092_v4, %v2223_v36 }
 0x176   : > { %v7137_v55 = vpop.permute.xlu1 %1784  ;;  %v7139_v17 = vpop.permute.xlu0 %1675 }
 0x177   : > { %10610 = vst [vmem:[#allocation85_spill] sm:$0xff] %v7137_v55  ;;  %10611 = vst [vmem:[#allocation86_spill] sm:$0xff] %v7139_v17  ;;  %v1613_v17 = vstv %s7135_s15  ;;  %s7212_s15 = sld [smem:[#allocation3 + $0x6d]] }
 0x178   : > { %2131 = vrot.lane.b32.xlu1 %v2127_v0, %s10503_s2  ;;  %2022 = vrot.lane.b32.xlu0 %v2017_v35, %s10503_s2  ;;  %v1406_v0 = vmul.f32 %v7105_v30, %v1405_v52  ;;  %v1296_v35 = vmul.f32 %v7131_v1, %v1294_v46 }
 0x17a   : > { %v7148_v62 = vpop.permute.xlu1 %855  ;;  %v7150_v14 = vpop.permute.xlu0 %746 }
 0x17b   : > { %10612 = vst [vmem:[#allocation87_spill] sm:$0xff] %v7148_v62  ;;  %10613 = vst [vmem:[#allocation88_spill] sm:$0xff] %v7150_v14  ;;  %v1821_v14 = vstv %s7146_s22  ;;  %s7223_s22 = sld [smem:[#allocation3 + $0x7c]] }
 0x17c   : > { %2339 = vrot.lane.b32.xlu1 %v2335_v6, %s10503_s2  ;;  %2230 = vrot.lane.b32.xlu0 %v2225_v9, %s10503_s2  ;;  %v1614_v6 = vmul.f32 %v7088_v20, %v1613_v17  ;;  %v1504_v9 = vmul.f32 %v7092_v4, %v1502_v10 }
 0x17e   : > { %v7159_v36 = vpop.permute.xlu1 %1063  ;;  %v7161_v55 = vpop.permute.xlu0 %954 }
 0x17f   : > { %10614 = vst [vmem:[#allocation89_spill] sm:$0xff] %v7159_v36  ;;  %10615 = vst [vmem:[#allocation90_spill] sm:$0xff] %v7161_v55  ;;  %v2029_v55 = vstv %s7157_s25  ;;  %s7234_s25 = sld [smem:[#allocation3 + $0x8b]] }
 0x180   : > { %1410 = vrot.lane.b32.xlu1 %v1406_v0, %s10500_s16  ;;  %1301 = vrot.lane.b32.xlu0 %v1296_v35, %s10500_s16  ;;  %v1822_v0 = vmul.f32 %v7105_v30, %v1821_v14  ;;  %v1712_v35 = vmul.f32 %v7131_v1, %v1710_v25 }
 0x182   : > { %v7170_v46 = vpop.permute.xlu1 %1271  ;;  %v7172_v62 = vpop.permute.xlu0 %1162 }
 0x183   : > { %10616 = vst [vmem:[#allocation91_spill] sm:$0xff] %v7170_v46  ;;  %10617 = vst [vmem:[#allocation92_spill] sm:$0xff] %v7172_v62  ;;  %v2237_v62 = vstv %s7168_s12  ;;  %s7245_s12 = sld [smem:[#allocation3 + $0x9a]] }
 0x184   : > { %1618 = vrot.lane.b32.xlu1 %v1614_v6, %s10500_s16  ;;  %1509 = vrot.lane.b32.xlu0 %v1504_v9, %s10500_s16  ;;  %v2030_v6 = vmul.f32 %v7088_v20, %v2029_v55  ;;  %v1920_v9 = vmul.f32 %v7092_v4, %v1918_v26 }
 0x186   : > { %v7181_v10 = vpop.permute.xlu1 %1479  ;;  %v7183_v36 = vpop.permute.xlu0 %1370 }
 0x187   : > { %10618 = vst [vmem:[#allocation93_spill] sm:$0xff] %v7181_v10  ;;  %10619 = vst [vmem:[#allocation94_spill] sm:$0xff] %v7183_v36  ;;  %v2445_v36 = vstv %s7179_s29  ;;  %s7256_s29 = sld [smem:[#allocation3 + $0x57]] }
 0x188   : > { %1826 = vrot.lane.b32.xlu1 %v1822_v0, %s10505_s24  ;;  %1717 = vrot.lane.b32.xlu0 %v1712_v35, %s10505_s24  ;;  %v2238_v0 = vmul.f32 %v7105_v30, %v2237_v62  ;;  %v2128_v35 = vmul.f32 %v7131_v1, %v2126_v60 }
 0x18a   : > { %v7192_v25 = vpop.permute.xlu1 %1687  ;;  %v7194_v46 = vpop.permute.xlu0 %1578 }
 0x18b   : > { %10620 = vst [vmem:[#allocation95_spill] sm:$0xff] %v7192_v25  ;;  %10621 = vst [vmem:[#allocation96_spill] sm:$0xff] %v7194_v46  ;;  %v1516_v46 = vstv %s7190_s13  ;;  %s7267_s13 = sld [smem:[#allocation3 + $0x66]] }
 0x18c   : > { %2034 = vrot.lane.b32.xlu1 %v2030_v6, %s10505_s24  ;;  %1925 = vrot.lane.b32.xlu0 %v1920_v9, %s10505_s24  ;;  %v2446_v6 = vmul.f32 %v7088_v20, %v2445_v36  ;;  %v2336_v9 = vmul.f32 %v7092_v4, %v2334_v51 }
 0x18e   : > { %v7203_v26 = vpop.permute.xlu1 %1895  ;;  %v7205_v10 = vpop.permute.xlu0 %1786 }
 0x18f   : > { %10622 = vst [vmem:[#allocation97_spill] sm:$0xff] %v7203_v26  ;;  %10623 = vst [vmem:[#allocation98_spill] sm:$0xff] %v7205_v10  ;;  %v1724_v10 = vstv %s7201_s14  ;;  %s7278_s14 = sld [smem:[#allocation3 + $0x75]] }
 0x190   : > { %2242 = vrot.lane.b32.xlu1 %v2238_v0, %s10503_s2  ;;  %2133 = vrot.lane.b32.xlu0 %v2128_v35, %s10503_s2  ;;  %v1517_v0 = vmul.f32 %v7105_v30, %v1516_v46  ;;  %v1407_v35 = vmul.f32 %v7131_v1, %v1405_v52 }
 0x192   : > { %v7214_v60 = vpop.permute.xlu1 %966  ;;  %v7216_v25 = vpop.permute.xlu0 %857 }
 0x193   : > { %10624 = vst [vmem:[#allocation99_spill] sm:$0xff] %v7214_v60  ;;  %10625 = vst [vmem:[#allocation100_spill] sm:$0xff] %v7216_v25  ;;  %v1932_v25 = vstv %s7212_s15  ;;  %s7289_s15 = sld [smem:[#allocation3 + $0x84]] }
 0x194   : > { %2450 = vrot.lane.b32.xlu1 %v2446_v6, %s10503_s2  ;;  %2341 = vrot.lane.b32.xlu0 %v2336_v9, %s10503_s2  ;;  %v1725_v6 = vmul.f32 %v7088_v20, %v1724_v10  ;;  %v1615_v9 = vmul.f32 %v7092_v4, %v1613_v17 }
 0x196   : > { %v7225_v51 = vpop.permute.xlu1 %1174  ;;  %v7227_v26 = vpop.permute.xlu0 %1065 }
 0x197   : > { %10626 = vst [vmem:[#allocation101_spill] sm:$0xff] %v7225_v51  ;;  %10627 = vst [vmem:[#allocation102_spill] sm:$0xff] %v7227_v26  ;;  %v2140_v26 = vstv %s7223_s22  ;;  %s7300_s22 = sld [smem:[#allocation3 + $0x93]] }
 0x198   : > { %1521 = vrot.lane.b32.xlu1 %v1517_v0, %s10500_s16  ;;  %1412 = vrot.lane.b32.xlu0 %v1407_v35, %s10500_s16  ;;  %v1933_v0 = vmul.f32 %v7105_v30, %v1932_v25  ;;  %v1823_v35 = vmul.f32 %v7131_v1, %v1821_v14 }
 0x19a   : > { %v7236_v52 = vpop.permute.xlu1 %1382  ;;  %v7238_v60 = vpop.permute.xlu0 %1273 }
 0x19b   : > { %10628 = vst [vmem:[#allocation103_spill] sm:$0xff] %v7236_v52  ;;  %10629 = vst [vmem:[#allocation104_spill] sm:$0xff] %v7238_v60  ;;  %v2348_v60 = vstv %s7234_s25  ;;  %s7311_s25 = sld [smem:[#allocation3 + $0xa2]] }
 0x19c   : > { %1729 = vrot.lane.b32.xlu1 %v1725_v6, %s10500_s16  ;;  %1620 = vrot.lane.b32.xlu0 %v1615_v9, %s10500_s16  ;;  %v2141_v6 = vmul.f32 %v7088_v20, %v2140_v26  ;;  %v2031_v9 = vmul.f32 %v7092_v4, %v2029_v55 }
 0x19e   : > { %v7247_v17 = vpop.permute.xlu1 %1590  ;;  %v7249_v51 = vpop.permute.xlu0 %1481 }
 0x19f   : > { %10630 = vst [vmem:[#allocation105_spill] sm:$0xff] %v7247_v17  ;;  %10631 = vst [vmem:[#allocation106_spill] sm:$0xff] %v7249_v51  ;;  %v2556_v51 = vstv %s7245_s12  ;;  %s7322_s12 = sld [smem:[#allocation3 + $0x5f]] }
 0x1a0   : > { %1937 = vrot.lane.b32.xlu1 %v1933_v0, %s10505_s24  ;;  %1828 = vrot.lane.b32.xlu0 %v1823_v35, %s10505_s24  ;;  %v2349_v0 = vmul.f32 %v7105_v30, %v2348_v60  ;;  %v2239_v35 = vmul.f32 %v7131_v1, %v2237_v62 }
 0x1a2   : > { %v7258_v14 = vpop.permute.xlu1 %1798  ;;  %v7260_v52 = vpop.permute.xlu0 %1689 }
 0x1a3   : > { %10632 = vst [vmem:[#allocation107_spill] sm:$0xff] %v7258_v14  ;;  %10633 = vst [vmem:[#allocation108_spill] sm:$0xff] %v7260_v52  ;;  %v1627_v52 = vstv %s7256_s29  ;;  %s7333_s29 = sld [smem:[#allocation3 + $0x6e]] }
 0x1a4   : > { %2145 = vrot.lane.b32.xlu1 %v2141_v6, %s10505_s24  ;;  %2036 = vrot.lane.b32.xlu0 %v2031_v9, %s10505_s24  ;;  %v2557_v6 = vmul.f32 %v7088_v20, %v2556_v51  ;;  %v2447_v9 = vmul.f32 %v7092_v4, %v2445_v36 }
 0x1a6   : > { %v7269_v55 = vpop.permute.xlu1 %2006  ;;  %v7271_v17 = vpop.permute.xlu0 %1897 }
 0x1a7   : > { %10634 = vst [vmem:[#allocation109_spill] sm:$0xff] %v7269_v55  ;;  %10635 = vst [vmem:[#allocation110_spill] sm:$0xff] %v7271_v17  ;;  %v1835_v17 = vstv %s7267_s13  ;;  %s7344_s13 = sld [smem:[#allocation3 + $0x7d]] }
 0x1a8   : > { %2353 = vrot.lane.b32.xlu1 %v2349_v0, %s10503_s2  ;;  %2244 = vrot.lane.b32.xlu0 %v2239_v35, %s10503_s2  ;;  %v1628_v0 = vmul.f32 %v7105_v30, %v1627_v52  ;;  %v1518_v35 = vmul.f32 %v7131_v1, %v1516_v46 }
 0x1aa   : > { %v7280_v62 = vpop.permute.xlu1 %1077  ;;  %v7282_v14 = vpop.permute.xlu0 %968 }
 0x1ab   : > { %10636 = vst [vmem:[#allocation111_spill] sm:$0xff] %v7280_v62  ;;  %10637 = vst [vmem:[#allocation112_spill] sm:$0xff] %v7282_v14  ;;  %v2043_v14 = vstv %s7278_s14  ;;  %s7355_s14 = sld [smem:[#allocation3 + $0x8c]] }
 0x1ac   : > { %2561 = vrot.lane.b32.xlu1 %v2557_v6, %s10503_s2  ;;  %2452 = vrot.lane.b32.xlu0 %v2447_v9, %s10503_s2  ;;  %v1836_v6 = vmul.f32 %v7088_v20, %v1835_v17  ;;  %v1726_v9 = vmul.f32 %v7092_v4, %v1724_v10 }
 0x1ae   : > { %v7291_v36 = vpop.permute.xlu1 %1285  ;;  %v7293_v55 = vpop.permute.xlu0 %1176 }
 0x1af   : > { %10638 = vst [vmem:[#allocation113_spill] sm:$0xff] %v7291_v36  ;;  %10639 = vst [vmem:[#allocation114_spill] sm:$0xff] %v7293_v55  ;;  %v2251_v55 = vstv %s7289_s15  ;;  %s7366_s15 = sld [smem:[#allocation3 + $0x9b]] }
 0x1b0   : > { %1632 = vrot.lane.b32.xlu1 %v1628_v0, %s10500_s16  ;;  %1523 = vrot.lane.b32.xlu0 %v1518_v35, %s10500_s16  ;;  %v2044_v0 = vmul.f32 %v7105_v30, %v2043_v14  ;;  %v1934_v35 = vmul.f32 %v7131_v1, %v1932_v25 }
 0x1b2   : > { %v7302_v46 = vpop.permute.xlu1 %1493  ;;  %v7304_v62 = vpop.permute.xlu0 %1384 }
 0x1b3   : > { %10640 = vst [vmem:[#allocation115_spill] sm:$0xff] %v7302_v46  ;;  %10641 = vst [vmem:[#allocation116_spill] sm:$0xff] %v7304_v62  ;;  %v2459_v62 = vstv %s7300_s22  ;;  %s7377_s22 = sld [smem:[#allocation3 + $0xaa]] }
 0x1b4   : > { %1840 = vrot.lane.b32.xlu1 %v1836_v6, %s10500_s16  ;;  %1731 = vrot.lane.b32.xlu0 %v1726_v9, %s10500_s16  ;;  %v2252_v6 = vmul.f32 %v7088_v20, %v2251_v55  ;;  %v2142_v9 = vmul.f32 %v7092_v4, %v2140_v26 }
 0x1b6   : > { %v7313_v10 = vpop.permute.xlu1 %1701  ;;  %v7315_v36 = vpop.permute.xlu0 %1592 }
 0x1b7   : > { %10642 = vst [vmem:[#allocation117_spill] sm:$0xff] %v7313_v10  ;;  %10643 = vst [vmem:[#allocation118_spill] sm:$0xff] %v7315_v36  ;;  %v2667_v36 = vstv %s7311_s25  ;;  %s7388_s25 = sld [smem:[#allocation3 + $0x67]] }
 0x1b8   : > { %2048 = vrot.lane.b32.xlu1 %v2044_v0, %s10505_s24  ;;  %1939 = vrot.lane.b32.xlu0 %v1934_v35, %s10505_s24  ;;  %v2460_v0 = vmul.f32 %v7105_v30, %v2459_v62  ;;  %v2350_v35 = vmul.f32 %v7131_v1, %v2348_v60 }
 0x1ba   : > { %v7324_v25 = vpop.permute.xlu1 %1909  ;;  %v7326_v46 = vpop.permute.xlu0 %1800 }
 0x1bb   : > { %10644 = vst [vmem:[#allocation119_spill] sm:$0xff] %v7324_v25  ;;  %10645 = vst [vmem:[#allocation120_spill] sm:$0xff] %v7326_v46  ;;  %v1738_v46 = vstv %s7322_s12  ;;  %s7399_s12 = sld [smem:[#allocation3 + $0x76]] }
 0x1bc   : > { %2256 = vrot.lane.b32.xlu1 %v2252_v6, %s10505_s24  ;;  %2147 = vrot.lane.b32.xlu0 %v2142_v9, %s10505_s24  ;;  %v2668_v6 = vmul.f32 %v7088_v20, %v2667_v36  ;;  %v2558_v9 = vmul.f32 %v7092_v4, %v2556_v51 }
 0x1be   : > { %v7335_v26 = vpop.permute.xlu1 %2117  ;;  %v7337_v10 = vpop.permute.xlu0 %2008 }
 0x1bf   : > { %10646 = vst [vmem:[#allocation121_spill] sm:$0xff] %v7335_v26  ;;  %10647 = vst [vmem:[#allocation122_spill] sm:$0xff] %v7337_v10  ;;  %v1946_v10 = vstv %s7333_s29  ;;  %s7410_s29 = sld [smem:[#allocation3 + $0x85]] }
 0x1c0   : > { %2464 = vrot.lane.b32.xlu1 %v2460_v0, %s10503_s2  ;;  %2355 = vrot.lane.b32.xlu0 %v2350_v35, %s10503_s2  ;;  %v1739_v0 = vmul.f32 %v7105_v30, %v1738_v46  ;;  %v1629_v35 = vmul.f32 %v7131_v1, %v1627_v52 }
 0x1c2   : > { %v7346_v60 = vpop.permute.xlu1 %1188  ;;  %v7348_v25 = vpop.permute.xlu0 %1079 }
 0x1c3   : > { %10648 = vst [vmem:[#allocation123_spill] sm:$0xff] %v7346_v60  ;;  %10649 = vst [vmem:[#allocation124_spill] sm:$0xff] %v7348_v25  ;;  %v2154_v25 = vstv %s7344_s13  ;;  %s7421_s13 = sld [smem:[#allocation3 + $0x94]] }
 0x1c4   : > { %2672 = vrot.lane.b32.xlu1 %v2668_v6, %s10503_s2  ;;  %2563 = vrot.lane.b32.xlu0 %v2558_v9, %s10503_s2  ;;  %v1947_v6 = vmul.f32 %v7088_v20, %v1946_v10  ;;  %v1837_v9 = vmul.f32 %v7092_v4, %v1835_v17 }
 0x1c6   : > { %v7357_v51 = vpop.permute.xlu1 %1396  ;;  %v7359_v26 = vpop.permute.xlu0 %1287 }
 0x1c7   : > { %10650 = vst [vmem:[#allocation125_spill] sm:$0xff] %v7357_v51  ;;  %10651 = vst [vmem:[#allocation126_spill] sm:$0xff] %v7359_v26  ;;  %v2362_v26 = vstv %s7355_s14  ;;  %s7432_s14 = sld [smem:[#allocation3 + $0xa3]] }
 0x1c8   : > { %1743 = vrot.lane.b32.xlu1 %v1739_v0, %s10500_s16  ;;  %1634 = vrot.lane.b32.xlu0 %v1629_v35, %s10500_s16  ;;  %v2155_v0 = vmul.f32 %v7105_v30, %v2154_v25  ;;  %v2045_v35 = vmul.f32 %v7131_v1, %v2043_v14 }
 0x1ca   : > { %v7368_v52 = vpop.permute.xlu1 %1604  ;;  %v7370_v60 = vpop.permute.xlu0 %1495 }
 0x1cb   : > { %10652 = vst [vmem:[#allocation127_spill] sm:$0xff] %v7368_v52  ;;  %10653 = vst [vmem:[#allocation128_spill] sm:$0xff] %v7370_v60  ;;  %v2570_v60 = vstv %s7366_s15  ;;  %s7443_s15 = sld [smem:[#allocation3 + $0xb2]] }
 0x1cc   : > { %1951 = vrot.lane.b32.xlu1 %v1947_v6, %s10500_s16  ;;  %1842 = vrot.lane.b32.xlu0 %v1837_v9, %s10500_s16  ;;  %v2363_v6 = vmul.f32 %v7088_v20, %v2362_v26  ;;  %v2253_v9 = vmul.f32 %v7092_v4, %v2251_v55 }
 0x1ce   : > { %v7379_v17 = vpop.permute.xlu1 %1812  ;;  %v7381_v51 = vpop.permute.xlu0 %1703 }
 0x1cf   : > { %10654 = vst [vmem:[#allocation129_spill] sm:$0xff] %v7379_v17  ;;  %10655 = vst [vmem:[#allocation130_spill] sm:$0xff] %v7381_v51  ;;  %v2778_v51 = vstv %s7377_s22  ;;  %s7454_s22 = sld [smem:[#allocation3 + $0x6f]] }
 0x1d0   : > { %2159 = vrot.lane.b32.xlu1 %v2155_v0, %s10505_s24  ;;  %2050 = vrot.lane.b32.xlu0 %v2045_v35, %s10505_s24  ;;  %v2571_v0 = vmul.f32 %v7105_v30, %v2570_v60  ;;  %v2461_v35 = vmul.f32 %v7131_v1, %v2459_v62 }
 0x1d2   : > { %v7390_v14 = vpop.permute.xlu1 %2020  ;;  %v7392_v52 = vpop.permute.xlu0 %1911 }
 0x1d3   : > { %10656 = vst [vmem:[#allocation131_spill] sm:$0xff] %v7390_v14  ;;  %10657 = vst [vmem:[#allocation132_spill] sm:$0xff] %v7392_v52  ;;  %v1849_v52 = vstv %s7388_s25  ;;  %s7465_s25 = sld [smem:[#allocation3 + $0x7e]] }
 0x1d4   : > { %2367 = vrot.lane.b32.xlu1 %v2363_v6, %s10505_s24  ;;  %2258 = vrot.lane.b32.xlu0 %v2253_v9, %s10505_s24  ;;  %v2779_v6 = vmul.f32 %v7088_v20, %v2778_v51  ;;  %v2669_v9 = vmul.f32 %v7092_v4, %v2667_v36 }
 0x1d6   : > { %v7401_v55 = vpop.permute.xlu1 %2228  ;;  %v7403_v17 = vpop.permute.xlu0 %2119 }
 0x1d7   : > { %10658 = vst [vmem:[#allocation133_spill] sm:$0xff] %v7401_v55  ;;  %10659 = vst [vmem:[#allocation134_spill] sm:$0xff] %v7403_v17  ;;  %v2057_v17 = vstv %s7399_s12  ;;  %s7476_s12 = sld [smem:[#allocation3 + $0x8d]] }
 0x1d8   : > { %2575 = vrot.lane.b32.xlu1 %v2571_v0, %s10503_s2  ;;  %2466 = vrot.lane.b32.xlu0 %v2461_v35, %s10503_s2  ;;  %v1850_v0 = vmul.f32 %v7105_v30, %v1849_v52  ;;  %v1740_v35 = vmul.f32 %v7131_v1, %v1738_v46 }
 0x1da   : > { %v7412_v62 = vpop.permute.xlu1 %1299  ;;  %v7414_v14 = vpop.permute.xlu0 %1190 }
 0x1db   : > { %10660 = vst [vmem:[#allocation135_spill] sm:$0xff] %v7412_v62  ;;  %10661 = vst [vmem:[#allocation136_spill] sm:$0xff] %v7414_v14  ;;  %v2265_v14 = vstv %s7410_s29  ;;  %s7487_s29 = sld [smem:[#allocation3 + $0x9c]] }
 0x1dc   : > { %2783 = vrot.lane.b32.xlu1 %v2779_v6, %s10503_s2  ;;  %2674 = vrot.lane.b32.xlu0 %v2669_v9, %s10503_s2  ;;  %v2058_v6 = vmul.f32 %v7088_v20, %v2057_v17  ;;  %v1948_v9 = vmul.f32 %v7092_v4, %v1946_v10 }
 0x1de   : > { %v7423_v36 = vpop.permute.xlu1 %1507  ;;  %v7425_v55 = vpop.permute.xlu0 %1398 }
 0x1df   : > { %10662 = vst [vmem:[#allocation137_spill] sm:$0xff] %v7423_v36  ;;  %10663 = vst [vmem:[#allocation138_spill] sm:$0xff] %v7425_v55  ;;  %v2473_v55 = vstv %s7421_s13  ;;  %s7498_s13 = sld [smem:[#allocation3 + $0xab]] }
 0x1e0   : > { %1854 = vrot.lane.b32.xlu1 %v1850_v0, %s10500_s16  ;;  %1745 = vrot.lane.b32.xlu0 %v1740_v35, %s10500_s16  ;;  %v2266_v0 = vmul.f32 %v7105_v30, %v2265_v14  ;;  %v2156_v35 = vmul.f32 %v7131_v1, %v2154_v25 }
 0x1e2   : > { %v7434_v46 = vpop.permute.xlu1 %1715  ;;  %v7436_v62 = vpop.permute.xlu0 %1606 }
 0x1e3   : > { %10664 = vst [vmem:[#allocation139_spill] sm:$0xff] %v7434_v46  ;;  %10665 = vst [vmem:[#allocation140_spill] sm:$0xff] %v7436_v62  ;;  %v2681_v62 = vstv %s7432_s14  ;;  %s7509_s14 = sld [smem:[#allocation3 + $0xba]] }
 0x1e4   : > { %2062 = vrot.lane.b32.xlu1 %v2058_v6, %s10500_s16  ;;  %1953 = vrot.lane.b32.xlu0 %v1948_v9, %s10500_s16  ;;  %v2474_v6 = vmul.f32 %v7088_v20, %v2473_v55  ;;  %v2364_v9 = vmul.f32 %v7092_v4, %v2362_v26 }
 0x1e6   : > { %v7445_v10 = vpop.permute.xlu1 %1923  ;;  %v7447_v36 = vpop.permute.xlu0 %1814 }
 0x1e7   : > { %10666 = vst [vmem:[#allocation141_spill] sm:$0xff] %v7445_v10  ;;  %10667 = vst [vmem:[#allocation142_spill] sm:$0xff] %v7447_v36  ;;  %v2889_v36 = vstv %s7443_s15  ;;  %s7520_s15 = sld [smem:[#allocation3 + $0x77]] }
 0x1e8   : > { %2270 = vrot.lane.b32.xlu1 %v2266_v0, %s10505_s24  ;;  %2161 = vrot.lane.b32.xlu0 %v2156_v35, %s10505_s24  ;;  %v2682_v0 = vmul.f32 %v7105_v30, %v2681_v62  ;;  %v2572_v35 = vmul.f32 %v7131_v1, %v2570_v60 }
 0x1ea   : > { %v7456_v25 = vpop.permute.xlu1 %2131  ;;  %v7458_v46 = vpop.permute.xlu0 %2022 }
 0x1eb   : > { %10668 = vst [vmem:[#allocation143_spill] sm:$0xff] %v7456_v25  ;;  %10669 = vst [vmem:[#allocation144_spill] sm:$0xff] %v7458_v46  ;;  %v1960_v46 = vstv %s7454_s22  ;;  %s7531_s22 = sld [smem:[#allocation3 + $0x86]] }
 0x1ec   : > { %2478 = vrot.lane.b32.xlu1 %v2474_v6, %s10505_s24  ;;  %2369 = vrot.lane.b32.xlu0 %v2364_v9, %s10505_s24  ;;  %v2890_v6 = vmul.f32 %v7088_v20, %v2889_v36  ;;  %v2780_v9 = vmul.f32 %v7092_v4, %v2778_v51 }
 0x1ee   : > { %v7467_v26 = vpop.permute.xlu1 %2339  ;;  %v7469_v10 = vpop.permute.xlu0 %2230 }
 0x1ef   : > { %10670 = vst [vmem:[#allocation145_spill] sm:$0xff] %v7467_v26  ;;  %10671 = vst [vmem:[#allocation146_spill] sm:$0xff] %v7469_v10  ;;  %v2168_v10 = vstv %s7465_s25  ;;  %s7542_s25 = sld [smem:[#allocation3 + $0x95]] }
 0x1f0   : > { %2686 = vrot.lane.b32.xlu1 %v2682_v0, %s10503_s2  ;;  %2577 = vrot.lane.b32.xlu0 %v2572_v35, %s10503_s2  ;;  %v1961_v0 = vmul.f32 %v7105_v30, %v1960_v46  ;;  %v1851_v35 = vmul.f32 %v7131_v1, %v1849_v52 }
 0x1f2   : > { %v7478_v60 = vpop.permute.xlu1 %1410  ;;  %v7480_v25 = vpop.permute.xlu0 %1301 }
 0x1f3   : > { %10672 = vst [vmem:[#allocation147_spill] sm:$0xff] %v7478_v60  ;;  %10673 = vst [vmem:[#allocation148_spill] sm:$0xff] %v7480_v25  ;;  %v2376_v25 = vstv %s7476_s12  ;;  %s7553_s12 = sld [smem:[#allocation3 + $0xa4]] }
 0x1f4   : > { %2894 = vrot.lane.b32.xlu1 %v2890_v6, %s10503_s2  ;;  %2785 = vrot.lane.b32.xlu0 %v2780_v9, %s10503_s2  ;;  %v2169_v6 = vmul.f32 %v7088_v20, %v2168_v10  ;;  %v2059_v9 = vmul.f32 %v7092_v4, %v2057_v17 }
 0x1f6   : > { %v7489_v51 = vpop.permute.xlu1 %1618  ;;  %v7491_v26 = vpop.permute.xlu0 %1509 }
 0x1f7   : > { %10674 = vst [vmem:[#allocation149_spill] sm:$0xff] %v7489_v51  ;;  %10675 = vst [vmem:[#allocation150_spill] sm:$0xff] %v7491_v26  ;;  %v2584_v26 = vstv %s7487_s29  ;;  %s7564_s29 = sld [smem:[#allocation3 + $0xb3]] }
 0x1f8   : > { %1965 = vrot.lane.b32.xlu1 %v1961_v0, %s10500_s16  ;;  %1856 = vrot.lane.b32.xlu0 %v1851_v35, %s10500_s16  ;;  %v2377_v0 = vmul.f32 %v7105_v30, %v2376_v25  ;;  %v2267_v35 = vmul.f32 %v7131_v1, %v2265_v14 }
 0x1fa   : > { %v7500_v52 = vpop.permute.xlu1 %1826  ;;  %v7502_v60 = vpop.permute.xlu0 %1717 }
 0x1fb   : > { %10676 = vst [vmem:[#allocation151_spill] sm:$0xff] %v7500_v52  ;;  %10677 = vst [vmem:[#allocation152_spill] sm:$0xff] %v7502_v60  ;;  %v2792_v60 = vstv %s7498_s13  ;;  %s7575_s13 = sld [smem:[#allocation3 + $0xc2]] }
 0x1fc   : > { %2173 = vrot.lane.b32.xlu1 %v2169_v6, %s10500_s16  ;;  %2064 = vrot.lane.b32.xlu0 %v2059_v9, %s10500_s16  ;;  %v2585_v6 = vmul.f32 %v7088_v20, %v2584_v26  ;;  %v2475_v9 = vmul.f32 %v7092_v4, %v2473_v55 }
 0x1fe   : > { %v7511_v17 = vpop.permute.xlu1 %2034  ;;  %v7513_v51 = vpop.permute.xlu0 %1925 }
 0x1ff   : > { %10678 = vst [vmem:[#allocation153_spill] sm:$0xff] %v7511_v17  ;;  %10679 = vst [vmem:[#allocation154_spill] sm:$0xff] %v7513_v51  ;;  %v3000_v51 = vstv %s7509_s14  ;;  %s7586_s14 = sld [smem:[#allocation3 + $0x7f]] }
 0x200   : > { %2381 = vrot.lane.b32.xlu1 %v2377_v0, %s10505_s24  ;;  %2272 = vrot.lane.b32.xlu0 %v2267_v35, %s10505_s24  ;;  %v2793_v0 = vmul.f32 %v7105_v30, %v2792_v60  ;;  %v2683_v35 = vmul.f32 %v7131_v1, %v2681_v62 }
 0x202   : > { %v7522_v14 = vpop.permute.xlu1 %2242  ;;  %v7524_v52 = vpop.permute.xlu0 %2133 }
 0x203   : > { %10680 = vst [vmem:[#allocation155_spill] sm:$0xff] %v7522_v14  ;;  %10681 = vst [vmem:[#allocation156_spill] sm:$0xff] %v7524_v52  ;;  %v2071_v52 = vstv %s7520_s15  ;;  %s7597_s15 = sld [smem:[#allocation3 + $0x8e]] }
 0x204   : > { %2589 = vrot.lane.b32.xlu1 %v2585_v6, %s10505_s24  ;;  %2480 = vrot.lane.b32.xlu0 %v2475_v9, %s10505_s24  ;;  %v3001_v6 = vmul.f32 %v7088_v20, %v3000_v51  ;;  %v2891_v9 = vmul.f32 %v7092_v4, %v2889_v36 }
 0x206   : > { %v7533_v55 = vpop.permute.xlu1 %2450  ;;  %v7535_v17 = vpop.permute.xlu0 %2341 }
 0x207   : > { %10682 = vst [vmem:[#allocation157_spill] sm:$0xff] %v7533_v55  ;;  %10683 = vst [vmem:[#allocation158_spill] sm:$0xff] %v7535_v17  ;;  %v2279_v17 = vstv %s7531_s22  ;;  %s7608_s22 = sld [smem:[#allocation3 + $0x9d]] }
 0x208   : > { %2797 = vrot.lane.b32.xlu1 %v2793_v0, %s10503_s2  ;;  %2688 = vrot.lane.b32.xlu0 %v2683_v35, %s10503_s2  ;;  %v2072_v0 = vmul.f32 %v7105_v30, %v2071_v52  ;;  %v1962_v35 = vmul.f32 %v7131_v1, %v1960_v46 }
 0x20a   : > { %v7544_v62 = vpop.permute.xlu1 %1521  ;;  %v7546_v14 = vpop.permute.xlu0 %1412 }
 0x20b   : > { %10684 = vst [vmem:[#allocation159_spill] sm:$0xff] %v7544_v62  ;;  %10685 = vst [vmem:[#allocation160_spill] sm:$0xff] %v7546_v14  ;;  %v2487_v14 = vstv %s7542_s25  ;;  %s7619_s25 = sld [smem:[#allocation3 + $0xac]] }
 0x20c   : > { %3005 = vrot.lane.b32.xlu1 %v3001_v6, %s10503_s2  ;;  %2896 = vrot.lane.b32.xlu0 %v2891_v9, %s10503_s2  ;;  %v2280_v6 = vmul.f32 %v7088_v20, %v2279_v17  ;;  %v2170_v9 = vmul.f32 %v7092_v4, %v2168_v10 }
 0x20e   : > { %v7555_v36 = vpop.permute.xlu1 %1729  ;;  %v7557_v55 = vpop.permute.xlu0 %1620 }
 0x20f   : > { %10686 = vst [vmem:[#allocation161_spill] sm:$0xff] %v7555_v36  ;;  %10687 = vst [vmem:[#allocation162_spill] sm:$0xff] %v7557_v55  ;;  %v2695_v55 = vstv %s7553_s12  ;;  %s7630_s12 = sld [smem:[#allocation3 + $0xbb]] }
 0x210   : > { %2076 = vrot.lane.b32.xlu1 %v2072_v0, %s10500_s16  ;;  %1967 = vrot.lane.b32.xlu0 %v1962_v35, %s10500_s16  ;;  %v2488_v0 = vmul.f32 %v7105_v30, %v2487_v14  ;;  %v2378_v35 = vmul.f32 %v7131_v1, %v2376_v25 }
 0x212   : > { %v7566_v46 = vpop.permute.xlu1 %1937  ;;  %v7568_v62 = vpop.permute.xlu0 %1828 }
 0x213   : > { %10688 = vst [vmem:[#allocation163_spill] sm:$0xff] %v7566_v46  ;;  %10689 = vst [vmem:[#allocation164_spill] sm:$0xff] %v7568_v62  ;;  %v2903_v62 = vstv %s7564_s29  ;;  %s7641_s29 = sld [smem:[#allocation3 + $0xca]] }
 0x214   : > { %2284 = vrot.lane.b32.xlu1 %v2280_v6, %s10500_s16  ;;  %2175 = vrot.lane.b32.xlu0 %v2170_v9, %s10500_s16  ;;  %v2696_v6 = vmul.f32 %v7088_v20, %v2695_v55  ;;  %v2586_v9 = vmul.f32 %v7092_v4, %v2584_v26 }
 0x216   : > { %v7577_v10 = vpop.permute.xlu1 %2145  ;;  %v7579_v36 = vpop.permute.xlu0 %2036 }
 0x217   : > { %10690 = vst [vmem:[#allocation165_spill] sm:$0xff] %v7577_v10  ;;  %10691 = vst [vmem:[#allocation166_spill] sm:$0xff] %v7579_v36  ;;  %v3111_v36 = vstv %s7575_s13  ;;  %s7652_s13 = sld [smem:[#allocation3 + $0x87]] }
 0x218   : > { %2492 = vrot.lane.b32.xlu1 %v2488_v0, %s10505_s24  ;;  %2383 = vrot.lane.b32.xlu0 %v2378_v35, %s10505_s24  ;;  %v2904_v0 = vmul.f32 %v7105_v30, %v2903_v62  ;;  %v2794_v35 = vmul.f32 %v7131_v1, %v2792_v60 }
 0x21a   : > { %v7588_v25 = vpop.permute.xlu1 %2353  ;;  %v7590_v46 = vpop.permute.xlu0 %2244 }
 0x21b   : > { %10692 = vst [vmem:[#allocation167_spill] sm:$0xff] %v7588_v25  ;;  %10693 = vst [vmem:[#allocation168_spill] sm:$0xff] %v7590_v46  ;;  %v2182_v46 = vstv %s7586_s14  ;;  %s7663_s14 = sld [smem:[#allocation3 + $0x96]] }
 0x21c   : > { %2700 = vrot.lane.b32.xlu1 %v2696_v6, %s10505_s24  ;;  %2591 = vrot.lane.b32.xlu0 %v2586_v9, %s10505_s24  ;;  %v3112_v6 = vmul.f32 %v7088_v20, %v3111_v36  ;;  %v3002_v9 = vmul.f32 %v7092_v4, %v3000_v51 }
 0x21e   : > { %v7599_v26 = vpop.permute.xlu1 %2561  ;;  %v7601_v10 = vpop.permute.xlu0 %2452 }
 0x21f   : > { %10694 = vst [vmem:[#allocation169_spill] sm:$0xff] %v7599_v26  ;;  %10695 = vst [vmem:[#allocation170_spill] sm:$0xff] %v7601_v10  ;;  %v2390_v10 = vstv %s7597_s15  ;;  %s7674_s15 = sld [smem:[#allocation3 + $0xa5]] }
 0x220   : > { %2908 = vrot.lane.b32.xlu1 %v2904_v0, %s10503_s2  ;;  %2799 = vrot.lane.b32.xlu0 %v2794_v35, %s10503_s2  ;;  %v2183_v0 = vmul.f32 %v7105_v30, %v2182_v46  ;;  %v2073_v35 = vmul.f32 %v7131_v1, %v2071_v52 }
 0x222   : > { %v7610_v60 = vpop.permute.xlu1 %1632  ;;  %v7612_v25 = vpop.permute.xlu0 %1523 }
 0x223   : > { %10696 = vst [vmem:[#allocation171_spill] sm:$0xff] %v7610_v60  ;;  %10697 = vst [vmem:[#allocation172_spill] sm:$0xff] %v7612_v25  ;;  %v2598_v25 = vstv %s7608_s22  ;;  %s7685_s22 = sld [smem:[#allocation3 + $0xb4]] }
 0x224   : > { %3116 = vrot.lane.b32.xlu1 %v3112_v6, %s10503_s2  ;;  %3007 = vrot.lane.b32.xlu0 %v3002_v9, %s10503_s2  ;;  %v2391_v6 = vmul.f32 %v7088_v20, %v2390_v10  ;;  %v2281_v9 = vmul.f32 %v7092_v4, %v2279_v17 }
 0x226   : > { %v7621_v51 = vpop.permute.xlu1 %1840  ;;  %v7623_v26 = vpop.permute.xlu0 %1731 }
 0x227   : > { %10698 = vst [vmem:[#allocation173_spill] sm:$0xff] %v7621_v51  ;;  %10699 = vst [vmem:[#allocation174_spill] sm:$0xff] %v7623_v26  ;;  %v2806_v26 = vstv %s7619_s25  ;;  %s7696_s25 = sld [smem:[#allocation3 + $0xc3]] }
 0x228   : > { %2187 = vrot.lane.b32.xlu1 %v2183_v0, %s10500_s16  ;;  %2078 = vrot.lane.b32.xlu0 %v2073_v35, %s10500_s16  ;;  %v2599_v0 = vmul.f32 %v7105_v30, %v2598_v25  ;;  %v2489_v35 = vmul.f32 %v7131_v1, %v2487_v14 }
 0x22a   : > { %v7632_v52 = vpop.permute.xlu1 %2048  ;;  %v7634_v60 = vpop.permute.xlu0 %1939 }
 0x22b   : > { %10700 = vst [vmem:[#allocation175_spill] sm:$0xff] %v7632_v52  ;;  %10701 = vst [vmem:[#allocation176_spill] sm:$0xff] %v7634_v60  ;;  %v3014_v60 = vstv %s7630_s12  ;;  %s7707_s12 = sld [smem:[#allocation3 + $0xd2]] }
 0x22c   : > { %2395 = vrot.lane.b32.xlu1 %v2391_v6, %s10500_s16  ;;  %2286 = vrot.lane.b32.xlu0 %v2281_v9, %s10500_s16  ;;  %v2807_v6 = vmul.f32 %v7088_v20, %v2806_v26  ;;  %v2697_v9 = vmul.f32 %v7092_v4, %v2695_v55 }
 0x22e   : > { %v7643_v17 = vpop.permute.xlu1 %2256  ;;  %v7645_v51 = vpop.permute.xlu0 %2147 }
 0x22f   : > { %10702 = vst [vmem:[#allocation177_spill] sm:$0xff] %v7643_v17  ;;  %10703 = vst [vmem:[#allocation178_spill] sm:$0xff] %v7645_v51  ;;  %v3222_v51 = vstv %s7641_s29  ;;  %s7718_s29 = sld [smem:[#allocation3 + $0x8f]] }
 0x230   : > { %2603 = vrot.lane.b32.xlu1 %v2599_v0, %s10505_s24  ;;  %2494 = vrot.lane.b32.xlu0 %v2489_v35, %s10505_s24  ;;  %v3015_v0 = vmul.f32 %v7105_v30, %v3014_v60  ;;  %v2905_v35 = vmul.f32 %v7131_v1, %v2903_v62 }
 0x232   : > { %v7654_v14 = vpop.permute.xlu1 %2464  ;;  %v7656_v52 = vpop.permute.xlu0 %2355 }
 0x233   : > { %10704 = vst [vmem:[#allocation179_spill] sm:$0xff] %v7654_v14  ;;  %10705 = vst [vmem:[#allocation180_spill] sm:$0xff] %v7656_v52  ;;  %v2293_v52 = vstv %s7652_s13  ;;  %s7729_s13 = sld [smem:[#allocation3 + $0x9e]] }
 0x234   : > { %2811 = vrot.lane.b32.xlu1 %v2807_v6, %s10505_s24  ;;  %2702 = vrot.lane.b32.xlu0 %v2697_v9, %s10505_s24  ;;  %v3223_v6 = vmul.f32 %v7088_v20, %v3222_v51  ;;  %v3113_v9 = vmul.f32 %v7092_v4, %v3111_v36 }
 0x236   : > { %v7665_v55 = vpop.permute.xlu1 %2672  ;;  %v7667_v17 = vpop.permute.xlu0 %2563 }
 0x237   : > { %10706 = vst [vmem:[#allocation181_spill] sm:$0xff] %v7665_v55  ;;  %10707 = vst [vmem:[#allocation182_spill] sm:$0xff] %v7667_v17  ;;  %v2501_v17 = vstv %s7663_s14  ;;  %s7740_s14 = sld [smem:[#allocation3 + $0xad]] }
 0x238   : > { %3019 = vrot.lane.b32.xlu1 %v3015_v0, %s10503_s2  ;;  %2910 = vrot.lane.b32.xlu0 %v2905_v35, %s10503_s2  ;;  %v2294_v0 = vmul.f32 %v7105_v30, %v2293_v52  ;;  %v2184_v35 = vmul.f32 %v7131_v1, %v2182_v46 }
 0x23a   : > { %v7676_v62 = vpop.permute.xlu1 %1743  ;;  %v7678_v14 = vpop.permute.xlu0 %1634 }
 0x23b   : > { %10708 = vst [vmem:[#allocation183_spill] sm:$0xff] %v7676_v62  ;;  %10709 = vst [vmem:[#allocation184_spill] sm:$0xff] %v7678_v14  ;;  %v2709_v14 = vstv %s7674_s15  ;;  %s7751_s15 = sld [smem:[#allocation3 + $0xbc]] }
 0x23c   : > { %3227 = vrot.lane.b32.xlu1 %v3223_v6, %s10503_s2  ;;  %3118 = vrot.lane.b32.xlu0 %v3113_v9, %s10503_s2  ;;  %v2502_v6 = vmul.f32 %v7088_v20, %v2501_v17  ;;  %v2392_v9 = vmul.f32 %v7092_v4, %v2390_v10 }
 0x23e   : > { %v7687_v36 = vpop.permute.xlu1 %1951  ;;  %v7689_v55 = vpop.permute.xlu0 %1842 }
 0x23f   : > { %10710 = vst [vmem:[#allocation185_spill] sm:$0xff] %v7687_v36  ;;  %10711 = vst [vmem:[#allocation186_spill] sm:$0xff] %v7689_v55  ;;  %v2917_v55 = vstv %s7685_s22  ;;  %s7762_s22 = sld [smem:[#allocation3 + $0xcb]] }
 0x240   : > { %2298 = vrot.lane.b32.xlu1 %v2294_v0, %s10500_s16  ;;  %2189 = vrot.lane.b32.xlu0 %v2184_v35, %s10500_s16  ;;  %v2710_v0 = vmul.f32 %v7105_v30, %v2709_v14  ;;  %v2600_v35 = vmul.f32 %v7131_v1, %v2598_v25 }
 0x242   : > { %v7698_v46 = vpop.permute.xlu1 %2159  ;;  %v7700_v62 = vpop.permute.xlu0 %2050 }
 0x243   : > { %10712 = vst [vmem:[#allocation187_spill] sm:$0xff] %v7698_v46  ;;  %10713 = vst [vmem:[#allocation188_spill] sm:$0xff] %v7700_v62  ;;  %v3125_v62 = vstv %s7696_s25  ;;  %s7773_s25 = sld [smem:[#allocation3 + $0xda]] }
 0x244   : > { %2506 = vrot.lane.b32.xlu1 %v2502_v6, %s10500_s16  ;;  %2397 = vrot.lane.b32.xlu0 %v2392_v9, %s10500_s16  ;;  %v2918_v6 = vmul.f32 %v7088_v20, %v2917_v55  ;;  %v2808_v9 = vmul.f32 %v7092_v4, %v2806_v26 }
 0x246   : > { %v7709_v10 = vpop.permute.xlu1 %2367  ;;  %v7711_v36 = vpop.permute.xlu0 %2258 }
 0x247   : > { %10714 = vst [vmem:[#allocation189_spill] sm:$0xff] %v7709_v10  ;;  %10715 = vst [vmem:[#allocation190_spill] sm:$0xff] %v7711_v36  ;;  %v3333_v36 = vstv %s7707_s12  ;;  %s7784_s12 = sld [smem:[#allocation3 + $0x97]] }
 0x248   : > { %2714 = vrot.lane.b32.xlu1 %v2710_v0, %s10505_s24  ;;  %2605 = vrot.lane.b32.xlu0 %v2600_v35, %s10505_s24  ;;  %v3126_v0 = vmul.f32 %v7105_v30, %v3125_v62  ;;  %v3016_v35 = vmul.f32 %v7131_v1, %v3014_v60 }
 0x24a   : > { %v7720_v25 = vpop.permute.xlu1 %2575  ;;  %v7722_v46 = vpop.permute.xlu0 %2466 }
 0x24b   : > { %10716 = vst [vmem:[#allocation191_spill] sm:$0xff] %v7720_v25  ;;  %10717 = vst [vmem:[#allocation192_spill] sm:$0xff] %v7722_v46  ;;  %v2404_v46 = vstv %s7718_s29  ;;  %s7795_s29 = sld [smem:[#allocation3 + $0xa6]] }
 0x24c   : > { %2922 = vrot.lane.b32.xlu1 %v2918_v6, %s10505_s24  ;;  %2813 = vrot.lane.b32.xlu0 %v2808_v9, %s10505_s24  ;;  %v3334_v6 = vmul.f32 %v7088_v20, %v3333_v36  ;;  %v3224_v9 = vmul.f32 %v7092_v4, %v3222_v51 }
 0x24e   : > { %v7731_v26 = vpop.permute.xlu1 %2783  ;;  %v7733_v10 = vpop.permute.xlu0 %2674 }
 0x24f   : > { %10718 = vst [vmem:[#allocation193_spill] sm:$0xff] %v7731_v26  ;;  %10719 = vst [vmem:[#allocation194_spill] sm:$0xff] %v7733_v10  ;;  %v2612_v10 = vstv %s7729_s13  ;;  %s7812_s13 = sld [smem:[#allocation3 + $0xb5]] }
 0x250   : > { %3130 = vrot.lane.b32.xlu1 %v3126_v0, %s10503_s2  ;;  %3021 = vrot.lane.b32.xlu0 %v3016_v35, %s10503_s2  ;;  %v2405_v0 = vmul.f32 %v7105_v30, %v2404_v46  ;;  %v2295_v35 = vmul.f32 %v7131_v1, %v2293_v52 }
 0x252   : > { %v7742_v60 = vpop.permute.xlu1 %1854  ;;  %v7744_v25 = vpop.permute.xlu0 %1745 }
 0x253   : > { %10720 = vst [vmem:[#allocation195_spill] sm:$0xff] %v7742_v60  ;;  %10721 = vst [vmem:[#allocation196_spill] sm:$0xff] %v7744_v25  ;;  %v2820_v25 = vstv %s7740_s14  ;;  %s7826_s14 = sld [smem:[#allocation3 + $0xc4]] }
 0x254   : > { %3338 = vrot.lane.b32.xlu1 %v3334_v6, %s10503_s2  ;;  %3229 = vrot.lane.b32.xlu0 %v3224_v9, %s10503_s2  ;;  %v2613_v6 = vmul.f32 %v7088_v20, %v2612_v10  ;;  %v2503_v9 = vmul.f32 %v7092_v4, %v2501_v17 }
 0x256   : > { %v7753_v51 = vpop.permute.xlu1 %2062  ;;  %v7755_v26 = vpop.permute.xlu0 %1953 }
 0x257   : > { %10722 = vst [vmem:[#allocation197_spill] sm:$0xff] %v7753_v51  ;;  %10723 = vst [vmem:[#allocation198_spill] sm:$0xff] %v7755_v26  ;;  %v3028_v26 = vstv %s7751_s15  ;;  %s7837_s15 = sld [smem:[#allocation3 + $0xd3]] }
 0x258   : > { %2409 = vrot.lane.b32.xlu1 %v2405_v0, %s10500_s16  ;;  %2300 = vrot.lane.b32.xlu0 %v2295_v35, %s10500_s16  ;;  %v2821_v0 = vmul.f32 %v7105_v30, %v2820_v25  ;;  %v2711_v35 = vmul.f32 %v7131_v1, %v2709_v14 }
 0x25a   : > { %v7764_v52 = vpop.permute.xlu1 %2270  ;;  %v7766_v60 = vpop.permute.xlu0 %2161 }
 0x25b   : > { %10724 = vst [vmem:[#allocation199_spill] sm:$0xff] %v7764_v52  ;;  %10725 = vst [vmem:[#allocation200_spill] sm:$0xff] %v7766_v60  ;;  %v3236_v60 = vstv %s7762_s22  ;;  %s7851_s22 = sld [smem:[#allocation3 + $0xe2]] }
 0x25c   : > { %2617 = vrot.lane.b32.xlu1 %v2613_v6, %s10500_s16  ;;  %2508 = vrot.lane.b32.xlu0 %v2503_v9, %s10500_s16  ;;  %v3029_v6 = vmul.f32 %v7088_v20, %v3028_v26  ;;  %v2919_v9 = vmul.f32 %v7092_v4, %v2917_v55  ;;  %v3127_v20 = vmul.f32 %v7131_v1, %v3125_v62 }
 0x25e   : > { %v7775_v17 = vpop.permute.xlu1 %2478  ;;  %v7777_v51 = vpop.permute.xlu0 %2369 }
 0x25f   : > { %10726 = vst [vmem:[#allocation201_spill] sm:$0xff] %v7775_v17  ;;  %10727 = vst [vmem:[#allocation202_spill] sm:$0xff] %v7777_v51 }
 0x260   : > { %2825 = vrot.lane.b32.xlu1 %v2821_v0, %s10505_s24  ;;  %2716 = vrot.lane.b32.xlu0 %v2711_v35, %s10505_s24  ;;  %v3237_v0 = vmul.f32 %v7105_v30, %v3236_v60  ;;  %v3444_v35 = vstv %s7773_s25  ;;  %v7808_v30 = vld [vmem:[%s6420_s30 + $0x8] sm:$0xff]  ;;  %s7862_s25 = sld [smem:[#allocation3 + $0x9f]] }
 0x261   : > { %v3335_v62 = vmul.f32 %v7808_v30, %v3333_v36  ;;  %v2723_v36 = vstv %s7795_s29  ;;  %s7884_s29 = sld [smem:[#allocation3 + $0xbd]] }
 0x262   : > { %v7786_v14 = vpop.permute.xlu1 %2686  ;;  %v7788_v52 = vpop.permute.xlu0 %2577 }
 0x263   : > { %10728 = vst [vmem:[#allocation203_spill] sm:$0xff] %v7786_v14  ;;  %10729 = vst [vmem:[#allocation204_spill] sm:$0xff] %v7788_v52  ;;  %v2515_v52 = vstv %s7784_s12  ;;  %v2406_v14 = vmul.f32 %v7131_v1, %v2404_v46  ;;  %s7873_s12 = sld [smem:[#allocation3 + $0xae]] }
 0x264   : > { %3033 = vrot.lane.b32.xlu1 %v3029_v6, %s10505_s24  ;;  %2924 = vrot.lane.b32.xlu0 %v2919_v9, %s10505_s24  ;;  %v7804_v6 = vld [vmem:[%s6420_s30] sm:$0xff] }
 0x265   : > { %v3445_v9 = vmul.f32 %v7804_v6, %v3444_v35 }
 0x266   : > { %v7797_v4 = vpop.permute.xlu1 %2894  ;;  %v7799_v55 = vpop.permute.xlu0 %2785 }
 0x267   : > { %10730 = vst [vmem:[#allocation205_spill] sm:$0xff] %v7797_v4  ;;  %10731 = vst [vmem:[#allocation206_spill] sm:$0xff] %v7799_v55 }
 0x268   : > { %3241 = vrot.lane.b32.xlu1 %v3237_v0, %s10503_s2  ;;  %3132 = vrot.lane.b32.xlu0 %v3127_v20, %s10503_s2  ;;  %v7821_v0 = vld [vmem:[%s6425_s3] sm:$0xff] }
 0x269   : > { %v2516_v20 = vmul.f32 %v7821_v0, %v2515_v52 }
 0x26a   : > { %v7814_v4 = vpop.permute.xlu1 %1965  ;;  %v7816_v55 = vpop.permute.xlu0 %1856 }
 0x26b   : > { %10732 = vst [vmem:[#allocation207_spill] sm:$0xff] %v7814_v4  ;;  %10733 = vst [vmem:[#allocation208_spill] sm:$0xff] %v7816_v55  ;;  %v2931_v55 = vstv %s7812_s13  ;;  %s7895_s13 = sld [smem:[#allocation3 + $0xcc]] }
 0x26c   : > { %3449 = vrot.lane.b32.xlu1 %v3445_v9, %s10503_s2  ;;  %3340 = vrot.lane.b32.xlu0 %v3335_v62, %s10503_s2  ;;  %v2724_v9 = vmul.f32 %v7804_v6, %v2723_v36  ;;  %v2614_v62 = vmul.f32 %v7808_v30, %v2612_v10 }
 0x26e   : > { %v7828_v51 = vpop.permute.xlu1 %2173  ;;  %v7830_v17 = vpop.permute.xlu0 %2064 }
 0x26f   : > { %10734 = vst [vmem:[#allocation209_spill] sm:$0xff] %v7828_v51  ;;  %10735 = vst [vmem:[#allocation210_spill] sm:$0xff] %v7830_v17  ;;  %v7847_v17 = vld [vmem:[%s6425_s3 + $0x8] sm:$0xff]  ;;  %v3139_v51 = vstv %s7826_s14  ;;  %s7906_s14 = sld [smem:[#allocation3 + $0xdb]] }
 0x270   : > { %2520 = vrot.lane.b32.xlu1 %v2516_v20, %s10500_s16  ;;  %2411 = vrot.lane.b32.xlu0 %v2406_v14, %s10500_s16  ;;  %v2932_v20 = vmul.f32 %v7821_v0, %v2931_v55  ;;  %v2822_v14 = vmul.f32 %v7847_v17, %v2820_v25 }
 0x272   : > { %v7839_v1 = vpop.permute.xlu1 %2381  ;;  %v7841_v46 = vpop.permute.xlu0 %2272 }
 0x273   : > { %10736 = vst [vmem:[#allocation211_spill] sm:$0xff] %v7839_v1  ;;  %10737 = vst [vmem:[#allocation212_spill] sm:$0xff] %v7841_v46  ;;  %v3347_v46 = vstv %s7837_s15  ;;  %s7917_s15 = sld [smem:[#allocation3 + $0xea]] }
 0x274   : > { %2728 = vrot.lane.b32.xlu1 %v2724_v9, %s10500_s16  ;;  %2619 = vrot.lane.b32.xlu0 %v2614_v62, %s10500_s16  ;;  %v3140_v9 = vmul.f32 %v7804_v6, %v3139_v51  ;;  %v3030_v62 = vmul.f32 %v7808_v30, %v3028_v26 }
 0x276   : > { %v7853_v10 = vpop.permute.xlu1 %2589  ;;  %v7855_v4 = vpop.permute.xlu0 %2480 }
 0x277   : > { %10738 = vst [vmem:[#allocation213_spill] sm:$0xff] %v7853_v10  ;;  %10739 = vst [vmem:[#allocation214_spill] sm:$0xff] %v7855_v4  ;;  %v3555_v4 = vstv %s7851_s22  ;;  %s7928_s22 = sld [smem:[#allocation3 + $0xa7]] }
 0x278   : > { %2936 = vrot.lane.b32.xlu1 %v2932_v20, %s10505_s24  ;;  %2827 = vrot.lane.b32.xlu0 %v2822_v14, %s10505_s24  ;;  %v3348_v20 = vmul.f32 %v7821_v0, %v3347_v46  ;;  %v3238_v14 = vmul.f32 %v7847_v17, %v3236_v60 }
 0x27a   : > { %v7864_v25 = vpop.permute.xlu1 %2797  ;;  %v7866_v1 = vpop.permute.xlu0 %2688 }
 0x27b   : > { %10740 = vst [vmem:[#allocation215_spill] sm:$0xff] %v7864_v25  ;;  %10741 = vst [vmem:[#allocation216_spill] sm:$0xff] %v7866_v1  ;;  %v2626_v1 = vstv %s7862_s25  ;;  %s7939_s25 = sld [smem:[#allocation3 + $0xb6]] }
 0x27c   : > { %3144 = vrot.lane.b32.xlu1 %v3140_v9, %s10505_s24  ;;  %3035 = vrot.lane.b32.xlu0 %v3030_v62, %s10505_s24  ;;  %v3556_v9 = vmul.f32 %v7804_v6, %v3555_v4  ;;  %v3446_v62 = vmul.f32 %v7808_v30, %v3444_v35 }
 0x27e   : > { %v7875_v26 = vpop.permute.xlu1 %3005  ;;  %v7877_v10 = vpop.permute.xlu0 %2896 }
 0x27f   : > { %10742 = vst [vmem:[#allocation217_spill] sm:$0xff] %v7875_v26  ;;  %10743 = vst [vmem:[#allocation218_spill] sm:$0xff] %v7877_v10  ;;  %v2834_v10 = vstv %s7873_s12  ;;  %s7950_s12 = sld [smem:[#allocation3 + $0xc5]] }
 0x280   : > { %3352 = vrot.lane.b32.xlu1 %v3348_v20, %s10503_s2  ;;  %3243 = vrot.lane.b32.xlu0 %v3238_v14, %s10503_s2  ;;  %v2627_v20 = vmul.f32 %v7821_v0, %v2626_v1  ;;  %v2517_v14 = vmul.f32 %v7847_v17, %v2515_v52 }
 0x282   : > { %v7886_v60 = vpop.permute.xlu1 %2076  ;;  %v7888_v25 = vpop.permute.xlu0 %1967 }
 0x283   : > { %10744 = vst [vmem:[#allocation219_spill] sm:$0xff] %v7886_v60  ;;  %10745 = vst [vmem:[#allocation220_spill] sm:$0xff] %v7888_v25  ;;  %v3042_v25 = vstv %s7884_s29  ;;  %s7961_s29 = sld [smem:[#allocation3 + $0xd4]] }
 0x284   : > { %3560 = vrot.lane.b32.xlu1 %v3556_v9, %s10503_s2  ;;  %3451 = vrot.lane.b32.xlu0 %v3446_v62, %s10503_s2  ;;  %v2835_v9 = vmul.f32 %v7804_v6, %v2834_v10  ;;  %v2725_v62 = vmul.f32 %v7808_v30, %v2723_v36 }
 0x286   : > { %v7897_v35 = vpop.permute.xlu1 %2284  ;;  %v7899_v26 = vpop.permute.xlu0 %2175 }
 0x287   : > { %10746 = vst [vmem:[#allocation221_spill] sm:$0xff] %v7897_v35  ;;  %10747 = vst [vmem:[#allocation222_spill] sm:$0xff] %v7899_v26  ;;  %v3250_v35 = vstv %s7895_s13  ;;  %s7972_s13 = sld [smem:[#allocation3 + $0xe3]] }
 0x288   : > { %2631 = vrot.lane.b32.xlu1 %v2627_v20, %s10500_s16  ;;  %2522 = vrot.lane.b32.xlu0 %v2517_v14, %s10500_s16  ;;  %v3043_v20 = vmul.f32 %v7821_v0, %v3042_v25  ;;  %v2933_v14 = vmul.f32 %v7847_v17, %v2931_v55 }
 0x28a   : > { %v7908_v52 = vpop.permute.xlu1 %2492  ;;  %v7910_v60 = vpop.permute.xlu0 %2383 }
 0x28b   : > { %10748 = vst [vmem:[#allocation223_spill] sm:$0xff] %v7908_v52  ;;  %10749 = vst [vmem:[#allocation224_spill] sm:$0xff] %v7910_v60  ;;  %v3458_v60 = vstv %s7906_s14  ;;  %s7983_s14 = sld [smem:[#allocation3 + $0xf2]] }
 0x28c   : > { %2839 = vrot.lane.b32.xlu1 %v2835_v9, %s10500_s16  ;;  %2730 = vrot.lane.b32.xlu0 %v2725_v62, %s10500_s16  ;;  %v3251_v9 = vmul.f32 %v7804_v6, %v3250_v35  ;;  %v3141_v62 = vmul.f32 %v7808_v30, %v3139_v51 }
 0x28e   : > { %v7919_v36 = vpop.permute.xlu1 %2700  ;;  %v7921_v26 = vpop.permute.xlu0 %2591 }
 0x28f   : > { %10750 = vst [vmem:[#allocation225_spill] sm:$0xff] %v7919_v36  ;;  %10751 = vst [vmem:[#allocation226_spill] sm:$0xff] %v7921_v26  ;;  %v3666_v26 = vstv %s7917_s15  ;;  %s7994_s15 = sld [smem:[#allocation3 + $0xaf]] }
 0x290   : > { %3047 = vrot.lane.b32.xlu1 %v3043_v20, %s10505_s24  ;;  %2938 = vrot.lane.b32.xlu0 %v2933_v14, %s10505_s24  ;;  %v3459_v20 = vmul.f32 %v7821_v0, %v3458_v60  ;;  %v3349_v14 = vmul.f32 %v7847_v17, %v3347_v46 }
 0x292   : > { %v7930_v55 = vpop.permute.xlu1 %2908  ;;  %v7932_v52 = vpop.permute.xlu0 %2799 }
 0x293   : > { %10752 = vst [vmem:[#allocation227_spill] sm:$0xff] %v7930_v55  ;;  %10753 = vst [vmem:[#allocation228_spill] sm:$0xff] %v7932_v52  ;;  %v2737_v52 = vstv %s7928_s22  ;;  %s8005_s22 = sld [smem:[#allocation3 + $0xbe]] }
 0x294   : > { %3255 = vrot.lane.b32.xlu1 %v3251_v9, %s10505_s24  ;;  %3146 = vrot.lane.b32.xlu0 %v3141_v62, %s10505_s24  ;;  %v3667_v9 = vmul.f32 %v7804_v6, %v3666_v26  ;;  %v3557_v62 = vmul.f32 %v7808_v30, %v3555_v4 }
 0x296   : > { %v7941_v51 = vpop.permute.xlu1 %3116  ;;  %v7943_v36 = vpop.permute.xlu0 %3007 }
 0x297   : > { %10754 = vst [vmem:[#allocation229_spill] sm:$0xff] %v7941_v51  ;;  %10755 = vst [vmem:[#allocation230_spill] sm:$0xff] %v7943_v36  ;;  %v2945_v36 = vstv %s7939_s25  ;;  %s8016_s25 = sld [smem:[#allocation3 + $0xcd]] }
 0x298   : > { %3463 = vrot.lane.b32.xlu1 %v3459_v20, %s10503_s2  ;;  %3354 = vrot.lane.b32.xlu0 %v3349_v14, %s10503_s2  ;;  %v2738_v20 = vmul.f32 %v7821_v0, %v2737_v52  ;;  %v2628_v14 = vmul.f32 %v7847_v17, %v2626_v1 }
 0x29a   : > { %v7952_v46 = vpop.permute.xlu1 %2187  ;;  %v7954_v55 = vpop.permute.xlu0 %2078 }
 0x29b   : > { %10756 = vst [vmem:[#allocation231_spill] sm:$0xff] %v7952_v46  ;;  %10757 = vst [vmem:[#allocation232_spill] sm:$0xff] %v7954_v55  ;;  %v3153_v55 = vstv %s7950_s12  ;;  %s8027_s12 = sld [smem:[#allocation3 + $0xdc]] }
 0x29c   : > { %3671 = vrot.lane.b32.xlu1 %v3667_v9, %s10503_s2  ;;  %3562 = vrot.lane.b32.xlu0 %v3557_v62, %s10503_s2  ;;  %v2946_v9 = vmul.f32 %v7804_v6, %v2945_v36  ;;  %v2836_v62 = vmul.f32 %v7808_v30, %v2834_v10 }
 0x29e   : > { %v7963_v4 = vpop.permute.xlu1 %2395  ;;  %v7965_v51 = vpop.permute.xlu0 %2286 }
 0x29f   : > { %10758 = vst [vmem:[#allocation233_spill] sm:$0xff] %v7963_v4  ;;  %10759 = vst [vmem:[#allocation234_spill] sm:$0xff] %v7965_v51  ;;  %v3361_v51 = vstv %s7961_s29  ;;  %s8038_s29 = sld [smem:[#allocation3 + $0xeb]] }
 0x2a0   : > { %2742 = vrot.lane.b32.xlu1 %v2738_v20, %s10500_s16  ;;  %2633 = vrot.lane.b32.xlu0 %v2628_v14, %s10500_s16  ;;  %v3154_v20 = vmul.f32 %v7821_v0, %v3153_v55  ;;  %v3044_v14 = vmul.f32 %v7847_v17, %v3042_v25 }
 0x2a2   : > { %v7974_v1 = vpop.permute.xlu1 %2603  ;;  %v7976_v46 = vpop.permute.xlu0 %2494 }
 0x2a3   : > { %10760 = vst [vmem:[#allocation235_spill] sm:$0xff] %v7974_v1  ;;  %10761 = vst [vmem:[#allocation236_spill] sm:$0xff] %v7976_v46  ;;  %v3569_v46 = vstv %s7972_s13  ;;  %s8049_s13 = sld [smem:[#allocation3 + $0xfa]] }
 0x2a4   : > { %2950 = vrot.lane.b32.xlu1 %v2946_v9, %s10500_s16  ;;  %2841 = vrot.lane.b32.xlu0 %v2836_v62, %s10500_s16  ;;  %v3362_v9 = vmul.f32 %v7804_v6, %v3361_v51  ;;  %v3252_v62 = vmul.f32 %v7808_v30, %v3250_v35 }
 0x2a6   : > { %v7985_v10 = vpop.permute.xlu1 %2811  ;;  %v7987_v4 = vpop.permute.xlu0 %2702 }
 0x2a7   : > { %10762 = vst [vmem:[#allocation237_spill] sm:$0xff] %v7985_v10  ;;  %10763 = vst [vmem:[#allocation238_spill] sm:$0xff] %v7987_v4  ;;  %v3777_v4 = vstv %s7983_s14  ;;  %s8060_s14 = sld [smem:[#allocation3 + $0xb7]] }
 0x2a8   : > { %3158 = vrot.lane.b32.xlu1 %v3154_v20, %s10505_s24  ;;  %3049 = vrot.lane.b32.xlu0 %v3044_v14, %s10505_s24  ;;  %v3570_v20 = vmul.f32 %v7821_v0, %v3569_v46  ;;  %v3460_v14 = vmul.f32 %v7847_v17, %v3458_v60 }
 0x2aa   : > { %v7996_v25 = vpop.permute.xlu1 %3019  ;;  %v7998_v1 = vpop.permute.xlu0 %2910 }
 0x2ab   : > { %10764 = vst [vmem:[#allocation239_spill] sm:$0xff] %v7996_v25  ;;  %10765 = vst [vmem:[#allocation240_spill] sm:$0xff] %v7998_v1  ;;  %v2848_v1 = vstv %s7994_s15  ;;  %s8071_s15 = sld [smem:[#allocation3 + $0xc6]] }
 0x2ac   : > { %3366 = vrot.lane.b32.xlu1 %v3362_v9, %s10505_s24  ;;  %3257 = vrot.lane.b32.xlu0 %v3252_v62, %s10505_s24  ;;  %v3778_v9 = vmul.f32 %v7804_v6, %v3777_v4  ;;  %v3668_v62 = vmul.f32 %v7808_v30, %v3666_v26 }
 0x2ae   : > { %v8007_v35 = vpop.permute.xlu1 %3227  ;;  %v8009_v10 = vpop.permute.xlu0 %3118 }
 0x2af   : > { %10766 = vst [vmem:[#allocation241_spill] sm:$0xff] %v8007_v35  ;;  %10767 = vst [vmem:[#allocation242_spill] sm:$0xff] %v8009_v10  ;;  %v3056_v10 = vstv %s8005_s22  ;;  %s8082_s22 = sld [smem:[#allocation3 + $0xd5]] }
 0x2b0   : > { %3574 = vrot.lane.b32.xlu1 %v3570_v20, %s10503_s2  ;;  %3465 = vrot.lane.b32.xlu0 %v3460_v14, %s10503_s2  ;;  %v2849_v20 = vmul.f32 %v7821_v0, %v2848_v1  ;;  %v2739_v14 = vmul.f32 %v7847_v17, %v2737_v52 }
 0x2b2   : > { %v8018_v60 = vpop.permute.xlu1 %2298  ;;  %v8020_v25 = vpop.permute.xlu0 %2189 }
 0x2b3   : > { %10768 = vst [vmem:[#allocation243_spill] sm:$0xff] %v8018_v60  ;;  %10769 = vst [vmem:[#allocation244_spill] sm:$0xff] %v8020_v25  ;;  %v3264_v60 = vstv %s8016_s25  ;;  %s8093_s25 = sld [smem:[#allocation3 + $0xe4]] }
 0x2b4   : > { %3782 = vrot.lane.b32.xlu1 %v3778_v9, %s10503_s2  ;;  %3673 = vrot.lane.b32.xlu0 %v3668_v62, %s10503_s2  ;;  %v3057_v9 = vmul.f32 %v7804_v6, %v3056_v10  ;;  %v2947_v62 = vmul.f32 %v7808_v30, %v2945_v36 }
 0x2b6   : > { %v8029_v26 = vpop.permute.xlu1 %2506  ;;  %v8031_v35 = vpop.permute.xlu0 %2397 }
 0x2b7   : > { %10770 = vst [vmem:[#allocation245_spill] sm:$0xff] %v8029_v26  ;;  %10771 = vst [vmem:[#allocation246_spill] sm:$0xff] %v8031_v35  ;;  %v3472_v35 = vstv %s8027_s12  ;;  %s8104_s12 = sld [smem:[#allocation3 + $0xf3]] }
 0x2b8   : > { %2853 = vrot.lane.b32.xlu1 %v2849_v20, %s10500_s16  ;;  %2744 = vrot.lane.b32.xlu0 %v2739_v14, %s10500_s16  ;;  %v3265_v20 = vmul.f32 %v7821_v0, %v3264_v60  ;;  %v3155_v14 = vmul.f32 %v7847_v17, %v3153_v55 }
 0x2ba   : > { %v8040_v52 = vpop.permute.xlu1 %2714  ;;  %v8042_v25 = vpop.permute.xlu0 %2605 }
 0x2bb   : > { %10772 = vst [vmem:[#allocation247_spill] sm:$0xff] %v8040_v52  ;;  %10773 = vst [vmem:[#allocation248_spill] sm:$0xff] %v8042_v25  ;;  %v3680_v25 = vstv %s8038_s29  ;;  %s8124_s29 = sld [smem:[#allocation3 + $0xbf]] }
 0x2bc   : > { %3061 = vrot.lane.b32.xlu1 %v3057_v9, %s10500_s16  ;;  %2952 = vrot.lane.b32.xlu0 %v2947_v62, %s10500_s16  ;;  %v3473_v9 = vmul.f32 %v7804_v6, %v3472_v35  ;;  %v3363_v62 = vmul.f32 %v7808_v30, %v3361_v51 }
 0x2be   : > { %v8051_v36 = vpop.permute.xlu1 %2922  ;;  %v8053_v26 = vpop.permute.xlu0 %2813 }
 0x2bf   : > { %10774 = vst [vmem:[#allocation249_spill] sm:$0xff] %v8051_v36  ;;  %10775 = vst [vmem:[#allocation250_spill] sm:$0xff] %v8053_v26  ;;  %v3888_v26 = vstv %s8049_s13  ;;  %s8134_s13 = sld [smem:[#allocation3 + $0xce]] }
 0x2c0   : > { %3269 = vrot.lane.b32.xlu1 %v3265_v20, %s10505_s24  ;;  %3160 = vrot.lane.b32.xlu0 %v3155_v14, %s10505_s24  ;;  %v3681_v20 = vmul.f32 %v7821_v0, %v3680_v25  ;;  %v3571_v14 = vmul.f32 %v7847_v17, %v3569_v46 }
 0x2c2   : > { %v8062_v55 = vpop.permute.xlu1 %3130  ;;  %v8064_v52 = vpop.permute.xlu0 %3021 }
 0x2c3   : > { %10776 = vst [vmem:[#allocation251_spill] sm:$0xff] %v8062_v55  ;;  %10777 = vst [vmem:[#allocation252_spill] sm:$0xff] %v8064_v52  ;;  %v2959_v52 = vstv %s8060_s14  ;;  %s8145_s14 = sld [smem:[#allocation3 + $0xdd]] }
 0x2c4   : > { %3477 = vrot.lane.b32.xlu1 %v3473_v9, %s10505_s24  ;;  %3368 = vrot.lane.b32.xlu0 %v3363_v62, %s10505_s24  ;;  %v3889_v9 = vmul.f32 %v7804_v6, %v3888_v26  ;;  %v3779_v62 = vmul.f32 %v7808_v30, %v3777_v4 }
 0x2c6   : > { %v8073_v51 = vpop.permute.xlu1 %3338  ;;  %v8075_v36 = vpop.permute.xlu0 %3229 }
 0x2c7   : > { %10778 = vst [vmem:[#allocation253_spill] sm:$0xff] %v8073_v51  ;;  %10779 = vst [vmem:[#allocation254_spill] sm:$0xff] %v8075_v36  ;;  %v3167_v36 = vstv %s8071_s15  ;;  %s8156_s15 = sld [smem:[#allocation3 + $0xec]] }
 0x2c8   : > { %3685 = vrot.lane.b32.xlu1 %v3681_v20, %s10503_s2  ;;  %3576 = vrot.lane.b32.xlu0 %v3571_v14, %s10503_s2  ;;  %v2960_v20 = vmul.f32 %v7821_v0, %v2959_v52  ;;  %v2850_v14 = vmul.f32 %v7847_v17, %v2848_v1 }
 0x2ca   : > { %v8084_v46 = vpop.permute.xlu1 %2409  ;;  %v8086_v55 = vpop.permute.xlu0 %2300 }
 0x2cb   : > { %10780 = vst [vmem:[#allocation255_spill] sm:$0xff] %v8084_v46  ;;  %10781 = vst [vmem:[#allocation256_spill] sm:$0xff] %v8086_v55  ;;  %v3375_v55 = vstv %s8082_s22  ;;  %s8167_s22 = sld [smem:[#allocation3 + $0xfb]] }
 0x2cc   : > { %3893 = vrot.lane.b32.xlu1 %v3889_v9, %s10503_s2  ;;  %3784 = vrot.lane.b32.xlu0 %v3779_v62, %s10503_s2  ;;  %v3168_v9 = vmul.f32 %v7804_v6, %v3167_v36  ;;  %v3058_v62 = vmul.f32 %v7808_v30, %v3056_v10 }
 0x2cd   : > { %v10812_v37 = vstv %s8156_s15 }
 0x2ce   : > { %v8095_v4 = vpop.permute.xlu1 %2617  ;;  %v8097_v51 = vpop.permute.xlu0 %2508 }
 0x2cf   : > { %10782 = vst [vmem:[#allocation257_spill] sm:$0xff] %v8095_v4  ;;  %10783 = vst [vmem:[#allocation258_spill] sm:$0xff] %v8097_v51  ;;  %v3583_v51 = vstv %s8093_s25  ;;  %s8178_s25 = sld [smem:[#allocation3 + $0xc7]] }
 0x2d0   : > { %2964 = vrot.lane.b32.xlu1 %v2960_v20, %s10500_s16  ;;  %2855 = vrot.lane.b32.xlu0 %v2850_v14, %s10500_s16  ;;  %v3376_v20 = vmul.f32 %v7821_v0, %v3375_v55  ;;  %v3266_v14 = vmul.f32 %v7847_v17, %v3264_v60 }
 0x2d2   : > { %v8106_v1 = vpop.permute.xlu1 %2825  ;;  %v8108_v46 = vpop.permute.xlu0 %2716 }
 0x2d3   : > { %10784 = vst [vmem:[#allocation259_spill] sm:$0xff] %v8106_v1  ;;  %10785 = vst [vmem:[#allocation260_spill] sm:$0xff] %v8108_v46  ;;  %v3584_v1 = vmul.f32 %v7804_v6, %v3583_v51  ;;  %v3474_v46 = vmul.f32 %v7808_v30, %v3472_v35 }
 0x2d4   : > { %3172 = vrot.lane.b32.xlu1 %v3168_v9, %s10500_s16  ;;  %3063 = vrot.lane.b32.xlu0 %v3058_v62, %s10500_s16  ;;  %v3791_v9 = vstv %s8104_s12  ;;  %s8184_s12 = sld [smem:[#allocation3 + $0x8]] }
 0x2d6   : > { %v8115_v4 = vpop.permute.xlu1 %3033  ;;  %v8117_v10 = vpop.permute.xlu0 %2924 }
 0x2d7   : > { %10786 = vst [vmem:[#allocation261_spill] sm:$0xff] %v8115_v4  ;;  %10787 = vst [vmem:[#allocation262_spill] sm:$0xff] %v8117_v10 }
 0x2d8   : > { %3380 = vrot.lane.b32.xlu1 %v3376_v20, %s10505_s24  ;;  %3271 = vrot.lane.b32.xlu0 %v3266_v14, %s10505_s24  ;;  %v3792_v20 = vmul.f32 %v7821_v0, %v3791_v9  ;;  %v3682_v14 = vmul.f32 %v7847_v17, %v3680_v25 }
 0x2da   : > { %v8126_v62 = vpop.permute.xlu1 %3241  ;;  %v8128_v60 = vpop.permute.xlu0 %3132 }
 0x2db   : > { %10788 = vst [vmem:[#allocation263_spill] sm:$0xff] %v8126_v62  ;;  %10789 = vst [vmem:[#allocation264_spill] sm:$0xff] %v8128_v60  ;;  %v2961_v60 = vmul.f32 %v7847_v17, %v2959_v52 }
 0x2dc   : > { %3588 = vrot.lane.b32.xlu1 %v3584_v1, %s10505_s24  ;;  %3479 = vrot.lane.b32.xlu0 %v3474_v46, %s10505_s24  ;;  %v3890_v1 = vmul.f32 %v7808_v30, %v3888_v26  ;;  %v3070_v46 = vstv %s8124_s29  ;;  %s8186_s29 = sld [smem:[#allocation3 + $0x9]] }
 0x2de   : > { %v8136_v35 = vpop.permute.xlu1 %3449  ;;  %v8138_v10 = vpop.permute.xlu0 %3340 }
 0x2df   : > { %10790 = vst [vmem:[#allocation265_spill] sm:$0xff] %v8136_v35  ;;  %10791 = vst [vmem:[#allocation266_spill] sm:$0xff] %v8138_v10  ;;  %v3278_v10 = vstv %s8134_s13  ;;  %v3486_v35 = vstv %s8145_s14  ;;  %s8188_s13 = sld [smem:[#allocation3]]  ;;  %s8190_s14 = sld [smem:[#allocation3 + $0x1]] }
 0x2e0   : > { %3796 = vrot.lane.b32.xlu1 %v3792_v20, %s10503_s2  ;;  %3687 = vrot.lane.b32.xlu0 %v3682_v14, %s10503_s2  ;;  %v3169_v20 = vmul.f32 %v7808_v30, %v3167_v36  ;;  %v3071_v14 = vmul.f32 %v7821_v0, %v3070_v46 }
 0x2e2   : > { %v8147_v25 = vpop.permute.xlu1 %2520  ;;  %v8149_v62 = vpop.permute.xlu0 %2411 }
 0x2e3   : > { %10792 = vst [vmem:[#allocation267_spill] sm:$0xff] %v8147_v25  ;;  %10793 = vst [vmem:[#allocation268_spill] sm:$0xff] %v8149_v62 }
 0x2e4   : > { %2966 = vrot.lane.b32.xlu1 %v2961_v60, %s10500_s16  ;;  %3895 = vrot.lane.b32.xlu0 %v3890_v1, %s10503_s2  ;;  %v3377_v60 = vmul.f32 %v7847_v17, %v3375_v55  ;;  %v3279_v1 = vmul.f32 %v7804_v6, %v3278_v10  ;;  %v10502_v55 = vstv %s8156_s15  ;;  %s8314_s15 = sld [smem:[#allocation3 + $0x40]] }
 0x2e6   : > { %v8158_v26 = vpop.permute.xlu1 %2728  ;;  %v8160_v52 = vpop.permute.xlu0 %2619 }
 0x2e7   : > { %10794 = vst [vmem:[#allocation269_spill] sm:$0xff] %v8158_v26  ;;  %10795 = vst [vmem:[#allocation270_spill] sm:$0xff] %v8160_v52 }
 0x2e8   : > { %3174 = vrot.lane.b32.xlu1 %v3169_v20, %s10500_s16  ;;  %3075 = vrot.lane.b32.xlu0 %v3071_v14, %s10500_s16  ;;  %v3585_v20 = vmul.f32 %v7808_v30, %v3583_v51  ;;  %v3487_v14 = vmul.f32 %v7821_v0, %v3486_v35  ;;  %v3793_v51 = vmul.f32 %v7847_v17, %v3791_v9 }
 0x2ea   : > { %v8169_v36 = vpop.permute.xlu1 %2936  ;;  %v8171_v4 = vpop.permute.xlu0 %2827 }
 0x2eb   : > { %10796 = vst [vmem:[#allocation271_spill] sm:$0xff] %v8169_v36  ;;  %10797 = vst [vmem:[#allocation272_spill] sm:$0xff] %v8171_v4 }
 0x2ec   : > { %3382 = vrot.lane.b32.xlu1 %v3377_v60, %s10505_s24  ;;  %3283 = vrot.lane.b32.xlu0 %v3279_v1, %s10500_s16  ;;  %v3695_v60 = vmul.f32 %v7804_v6, %v10502_v55  ;;  %v10510_v1 = vstv %s8167_s22  ;;  %s8199_s16 = sld [smem:[#allocation3 + $0xd6]] }
 0x2ed   : > { %v3903_v9 = vmul.f32 %v7821_v0, %v10510_v1  ;;  %v3280_v1 = vmul.f32 %v7808_v30, %v3278_v10 }
 0x2ee   : > { %v8180_v26 = vpop.permute.xlu1 %3144  ;;  %v8182_v52 = vpop.permute.xlu0 %3035 }
 0x2ef   : > { %10798 = vst [vmem:[#allocation273_spill] sm:$0xff] %v8180_v26  ;;  %10799 = vst [vmem:[#allocation274_spill] sm:$0xff] %v8182_v52 }
 0x2f0   : > { %3590 = vrot.lane.b32.xlu1 %v3585_v20, %s10505_s24  ;;  %3491 = vrot.lane.b32.xlu0 %v3487_v14, %s10505_s24  ;;  %v3072_v20 = vmul.f32 %v7847_v17, %v3070_v46  ;;  %v10511_v14 = vstv %s8178_s25  ;;  %v436_v46 = vstv %s8188_s13  ;;  %s8243_s13 = sld [smem:[#allocation3 + $0x21]] }
 0x2f2   : > { %v8201_v52 = vpop.permute.xlu1 %3352  ;;  %v8203_v26 = vpop.permute.xlu0 %3243 }
 0x2f3   : > { %10800 = vst [vmem:[#allocation275_spill] sm:$0xff] %v8201_v52  ;;  %10801 = vst [vmem:[#allocation276_spill] sm:$0xff] %v8203_v26  ;;  %v548_v26 = vstv %s8184_s12  ;;  %s8237_s12 = sld [smem:[#allocation3 + $0xf4]] }
 0x2f4   : > { %3798 = vrot.lane.b32.xlu1 %v3793_v51, %s10503_s2  ;;  %3699 = vrot.lane.b32.xlu0 %v3695_v60, %s10505_s24  ;;  %v552_v51 = vstv %s8186_s29  ;;  %s8222_s2 = sld [smem:[#allocation3 + $0x11]]  ;;  %s8224_s24 = sld [smem:[#allocation3 + $0x18]]  ;;  %v440_v60 = vstv %s8190_s14  ;;  %v549_v36 = vmul.f32 %v7804_v6, %v548_v26 }
 0x2f5   : > { %v553_v4 = vmul.f32 %v7821_v0, %v552_v51  ;;  %s8241_s29 = sld [smem:[#allocation3 + $0x20]] }
 0x2f6   : > { %v8216_v55 = vpop.permute.xlu1 %3560  ;;  %v8218_v52 = vpop.permute.xlu0 %3451  ;;  %s8251_s14 = sld [smem:[#allocation3 + $0x28]]  ;;  %v885_v45 = vstv %s8243_s13  ;;  %s8354_s13 = sld [smem:[#allocation3 + $0x51]] }
 0x2f7   : > { %10802 = vst [vmem:[#allocation277_spill] sm:$0xff] %v8216_v55  ;;  %10803 = vst [vmem:[#allocation278_spill] sm:$0xff] %v8218_v52  ;;  %v3182_v55 = vmul.f32 %v7821_v0, %v10511_v14  ;;  %v437_v14 = vmul.f32 %v7804_v6, %v436_v46  ;;  %v3488_v52 = vmul.f32 %v7847_v17, %v3486_v35 }
 0x2f8   : > { %3077 = vrot.lane.b32.xlu1 %v3072_v20, %s10804_s19  ;;  %3907 = vrot.lane.b32.xlu0 %v3903_v9, %s10805_s23  ;;  %v441_v9 = vmul.f32 %v7821_v0, %v440_v60  ;;  %v8264_v25 = vadd.f32 %v553_v4, %v549_v36  ;;  %v442_v4 = vmul.f32 %v7847_v17, %v440_v60  ;;  %v774_v36 = vstv %s8228_s26  ;;  %s8294_s26 = sld [smem:[#allocation3 + $0xde]] }
 0x2f9   : > { %v886_v15 = vmul.f32 %v7821_v0, %v885_v45 }
 0x2fa   : > { %v8245_v20 = vpop.permute.xlu1 %2631  ;;  %v8247_v10 = vpop.permute.xlu0 %2522  ;;  %v8275_v35 = vadd.f32 %v441_v9, %v437_v14  ;;  %v663_v62 = vstv %s8222_s2  ;;  %v770_v61 = vstv %s8224_s24  ;;  %v3598_v14 = vmul.f32 %v7821_v0, %v10813_v42  ;;  %s8308_s2 = sld [smem:[#allocation3 + $0x38]]  ;;  %s8310_s24 = sld [smem:[#allocation3 + $0x39]] }
 0x2fb   : > { %10806 = vst [vmem:[#allocation279_spill] sm:$0xff] %v8245_v20  ;;  %10807 = vst [vmem:[#allocation280_spill] sm:$0xff] %v8247_v10  ;;  %v10808_v20 = vstv %s8199_s16  ;;  %v660_v9 = vmul.f32 %v7804_v6, %v659_v16  ;;  %v665_v60 = vmul.f32 %v7847_v17, %v663_v62  ;;  %v772_v31 = vmul.f32 %v7808_v30, %v770_v61 }
 0x2fc   : > { %3285 = vrot.lane.b32.xlu1 %v3280_v1, %s10804_s19  ;;  %3186 = vrot.lane.b32.xlu0 %v3182_v55, %s10804_s19  ;;  %v3390_v10 = vmul.f32 %v7804_v6, %v10808_v20  ;;  %v438_v20 = vmul.f32 %v7808_v30, %v436_v46  ;;  %v550_v46 = vmul.f32 %v7808_v30, %v548_v26  ;;  %v992_v27 = vstv %s8251_s14  ;;  %s8419_s14 = sld [smem:[#allocation3 + $0x59]] }
 0x2fd   : > { %v775_v26 = vmul.f32 %v7821_v0, %v774_v36  ;;  %v993_v57 = vmul.f32 %v7804_v6, %v992_v27 }
 0x2fe   : > { %v8271_v55 = vpop.permute.xlu1 %2839  ;;  %v8273_v1 = vpop.permute.xlu0 %2730 }
 0x2ff   : > { %10809 = vst [vmem:[#allocation281_spill] sm:$0xff] %v8271_v55  ;;  %10810 = vst [vmem:[#allocation282_spill] sm:$0xff] %v8273_v1  ;;  %v3696_v55 = vmul.f32 %v7808_v30, %v10812_v37  ;;  %v554_v1 = vmul.f32 %v7847_v17, %v552_v51  ;;  %v881_v37 = vstv %s8241_s29  ;;  %v661_v51 = vmul.f32 %v7808_v30, %v659_v16  ;;  %s8346_s29 = sld [smem:[#allocation3 + $0x48]] }
 0x300   : > { %3493 = vrot.lane.b32.xlu1 %v3488_v52, %s10811_s1  ;;  %3394 = vrot.lane.b32.xlu0 %v3390_v10, %s10804_s19  ;;  %v664_v52 = vmul.f32 %v7821_v0, %v663_v62  ;;  %v771_v10 = vmul.f32 %v7804_v6, %v770_v61  ;;  %v10817_v62 = vstv %s8237_s12  ;;  %v882_v21 = vmul.f32 %v7804_v6, %v881_v37 }
 0x301   : > { %v3806_v61 = vmul.f32 %v7804_v6, %v10817_v62  ;;  %v883_v5 = vmul.f32 %v7808_v30, %v881_v37  ;;  %v8340_v62 = vadd.f32 %v442_v4, %v438_v20  ;;  %v8342_v11 = vadd.f32 %v554_v1, %v550_v46 }
 0x302   : > { %v8300_v42 = vpop.permute.xlu1 %3047  ;;  %v8302_v32 = vpop.permute.xlu0 %2938  ;;  %v997_v37 = vmul.f32 %v7821_v0, %v996_v22  ;;  %v10820_v1 = vstv %s8262_s17  ;;  %v10821_v4 = vstv %s8178_s25  ;;  %v1214_v50 = vstv %s8308_s2  ;;  %s8403_s25 = sld [smem:[#allocation3 + $0xd7]]  ;;  %s8435_s2 = sld [smem:[#allocation3 + $0xe6]] }
 0x303   : > { %10814 = vst [vmem:[#allocation283_spill] sm:$0xff] %v8300_v42  ;;  %10815 = vst [vmem:[#allocation284_spill] sm:$0xff] %v8302_v32  ;;  %v10816_v32 = vstv %s8167_s22  ;;  %v776_v42 = vmul.f32 %v7847_v17, %v774_v36  ;;  %s8334_s22 = sld [smem:[#allocation3 + $0x41]]  ;;  %v3293_v20 = vmul.f32 %v7821_v0, %v10820_v1  ;;  %v3183_v46 = vmul.f32 %v7847_v17, %v10821_v4 }
 0x304   : > { %3701 = vrot.lane.b32.xlu1 %v3696_v55, %s10811_s1  ;;  %3602 = vrot.lane.b32.xlu0 %v3598_v14, %s10811_s1  ;;  %v3904_v16 = vmul.f32 %v7847_v17, %v10816_v32  ;;  %v887_v55 = vmul.f32 %v7847_v17, %v885_v45  ;;  %v1103_v14 = vstv %s8267_s20  ;;  %s8348_s20 = sld [smem:[#allocation3 + $0x49]]  ;;  %v8350_v45 = vadd.f32 %v664_v52, %v660_v9 }
 0x305   : > { %v1104_v9 = vmul.f32 %v7804_v6, %v1103_v14  ;;  %v1108_v52 = vmul.f32 %v7821_v0, %v1107_v3  ;;  %v8375_v1 = vadd.f32 %v886_v15, %v882_v21  ;;  %v8383_v4 = vadd.f32 %v997_v37, %v993_v57 }
 0x306   : > { %v8336_v32 = vpop.permute.xlu1 %3255  ;;  %v8338_v36 = vpop.permute.xlu0 %3146  ;;  %v8377_v56 = vadd.f32 %v887_v55, %v883_v5  ;;  %v1218_v47 = vstv %s8310_s24  ;;  %v10825_v5 = vstv %s8294_s26  ;;  %v10826_v21 = vstv %s8199_s16  ;;  %s8417_s16 = sld [smem:[#allocation3 + $0x58]]  ;;  %s8480_s24 = sld [smem:[#allocation3 + $0x61]] }
 0x307   : > { %10818 = vst [vmem:[#allocation285_spill] sm:$0xff] %v8336_v32  ;;  %10819 = vst [vmem:[#allocation286_spill] sm:$0xff] %v8338_v36  ;;  %v8364_v36 = vadd.f32 %v665_v60, %v661_v51  ;;  %v994_v32 = vmul.f32 %v7808_v30, %v992_v27  ;;  %v3501_v15 = vmul.f32 %v7804_v6, %v10825_v5  ;;  %v1436_v5 = vstv %s8346_s29  ;;  %s8528_s29 = sld [smem:[#allocation6 + $0x1]] }
 0x308   : > { %3909 = vrot.lane.b32.xlu1 %v3904_v16, %s10805_s23  ;;  %3810 = vrot.lane.b32.xlu0 %v3806_v61, %s10811_s1  ;;  %s8369_s23 = sld [smem:[#allocation3 + $0xfc]]  ;;  %v8371_v16 = vadd.f32 %v775_v26, %v771_v10  ;;  %v8373_v61 = vadd.f32 %v776_v42, %v772_v31  ;;  %10824 = vst [vmem:[#allocation289_spill] sm:$0xff] %v8383_v4  ;;  %v1325_v31 = vstv %s8314_s15  ;;  %v1547_v26 = vstv %s8352_s11  ;;  %s8493_s15 = sld [smem:[#allocation6]] }
 0x309   : > { %v998_v10 = vmul.f32 %v7847_v17, %v996_v22  ;;  %v3391_v57 = vmul.f32 %v7808_v30, %v10826_v21  ;;  %v8398_v42 = vadd.f32 %v1108_v52, %v1104_v9  ;;  %v1105_v27 = vmul.f32 %v7808_v30, %v1103_v14  ;;  %s8580_s11 = sld [smem:[#allocation3 + $0xee]] }
 0x30a   : > { %v8379_v60 = vpop.permute.xlu1 %3463  ;;  %v8381_v51 = vpop.permute.xlu0 %3354  ;;  %v1109_v22 = vmul.f32 %v7847_v17, %v1107_v3  ;;  %v1215_v55 = vmul.f32 %v7804_v6, %v1214_v50  ;;  %v1219_v37 = vmul.f32 %v7821_v0, %v1218_v47  ;;  %v1220_v3 = vmul.f32 %v7847_v17, %v1218_v47 }
 0x30b   : > { %10822 = vst [vmem:[#allocation287_spill] sm:$0xff] %v8379_v60  ;;  %10823 = vst [vmem:[#allocation288_spill] sm:$0xff] %v8381_v51  ;;  %v1326_v14 = vmul.f32 %v7804_v6, %v1325_v31  ;;  %v1440_v21 = vstv %s8348_s20  ;;  %v1551_v51 = vstv %s8354_s13  ;;  %v1548_v40 = vmul.f32 %v7804_v6, %v1547_v26  ;;  %s8544_s20 = sld [smem:[#allocation3 + $0xdf]]  ;;  %s8600_s13 = sld [smem:[#allocation3 + $0x71]] }
 0x30c   : > { %3297 = vrot.lane.b32.xlu1 %v3293_v20, %s10804_s19  ;;  %3188 = vrot.lane.b32.xlu0 %v3183_v46, %s10804_s19  ;;  %10827 = vst [vmem:[#allocation290_spill] sm:$0xff] %v8398_v42  ;;  %v1216_v20 = vmul.f32 %v7808_v30, %v1214_v50  ;;  %v1329_v46 = vstv %s8334_s22  ;;  %v10830_v50 = vstv %s8328_s28  ;;  %v1327_v42 = vmul.f32 %v7808_v30, %v1325_v31  ;;  %s8525_s22 = sld [smem:[#allocation3 + $0x69]] }
 0x30d   : > { %v1330_v60 = vmul.f32 %v7821_v0, %v1329_v46  ;;  %v1331_v41 = vmul.f32 %v7847_v17, %v1329_v46  ;;  %v8445_v31 = vadd.f32 %v998_v10, %v994_v32  ;;  %v8447_v46 = vadd.f32 %v1109_v22, %v1105_v27 }
 0x30e   : > { %v8409_v9 = vpop.permute.xlu1 %3671  ;;  %v8411_v52 = vpop.permute.xlu0 %3562  ;;  %v1552_v29 = vmul.f32 %v7821_v0, %v1551_v51  ;;  %v8451_v4 = vadd.f32 %v1219_v37, %v1215_v55  ;;  %v457_v32 = vadd.f32 %v6643_v39, %v8275_v35  ;;  %v8463_v10 = vadd.f32 %v1220_v3, %v1216_v20 }
 0x30f   : > { %10828 = vst [vmem:[#allocation291_spill] sm:$0xff] %v8409_v9  ;;  %10829 = vst [vmem:[#allocation292_spill] sm:$0xff] %v8411_v52  ;;  %v3709_v52 = vmul.f32 %v7821_v0, %v10830_v50  ;;  %v10831_v9 = vstv %s8212_s0  ;;  %v1438_v50 = vmul.f32 %v7808_v30, %v1436_v5  ;;  %v8465_v27 = vadd.f32 %v1330_v60, %v1326_v14  ;;  %s8468_s0 = sld [smem:[#allocation3 + $0xf5]] }
 0x310   : > { %3505 = vrot.lane.b32.xlu1 %v3501_v15, %s10804_s19  ;;  %3396 = vrot.lane.b32.xlu0 %v3391_v57, %s10804_s19  ;;  %v3599_v47 = vmul.f32 %v7847_v17, %v10831_v9  ;;  %v1437_v15 = vmul.f32 %v7804_v6, %v1436_v5  ;;  %v1441_v57 = vmul.f32 %v7821_v0, %v1440_v21  ;;  %v10834_v5 = vstv %s8369_s23 }
 0x311   : > { %v1442_v9 = vmul.f32 %v7847_v17, %v1440_v21  ;;  %v3917_v21 = vmul.f32 %v7804_v6, %v10834_v5  ;;  %v3403_v22 = vstv %s8403_s25  ;;  %v569_v55 = vadd.f32 %v6641_v38, %v8264_v25  ;;  %s8664_s25 = sld [smem:[#allocation3 + $0xe7]] }
 0x312   : > { %v8441_v34 = vpop.permute.xlu1 %2742  ;;  %v8443_v33 = vpop.permute.xlu0 %2633  ;;  %v8472_v37 = vadd.f32 %v1331_v41, %v1327_v42  ;;  %v471_v60 = vadd.f32 %v6652_v43, %v457_v32  ;;  %v8487_v38 = vadd.f32 %v1552_v29, %v1548_v40  ;;  %v1658_v41 = vstv %s8417_s16  ;;  %s8604_s16 = sld [smem:[#allocation6 + $0x3]] }
 0x313   : > { %10832 = vst [vmem:[#allocation293_spill] sm:$0xff] %v8441_v34  ;;  %10833 = vst [vmem:[#allocation294_spill] sm:$0xff] %v8443_v33  ;;  %v10835_v34 = vstv %s8237_s12  ;;  %s8478_s12 = sld [smem:[#allocation3 + $0x60]]  ;;  %v1662_v25 = vstv %s8419_s14  ;;  %v458_v42 = vadd.f32 %v6654_v44, %v8340_v62  ;;  %v3404_v20 = vmul.f32 %v7821_v0, %v3403_v22  ;;  %s8624_s14 = sld [smem:[#allocation3 + $0xfd]] }
 0x314   : > { %3713 = vrot.lane.b32.xlu1 %v3709_v52, %s10811_s1  ;;  %3604 = vrot.lane.b32.xlu0 %v3599_v47, %s10811_s1  ;;  %v3807_v33 = vmul.f32 %v7808_v30, %v10835_v34  ;;  %v8474_v34 = vadd.f32 %v1441_v57, %v1437_v15  ;;  %v8476_v52 = vadd.f32 %v1442_v9, %v1438_v50  ;;  %v10838_v3 = vstv %s8262_s17  ;;  %s8523_s17 = sld [smem:[#allocation3 + $0x68]] }
 0x315   : > { %v3294_v14 = vmul.f32 %v7847_v17, %v10838_v3  ;;  %v570_v43 = vadd.f32 %v6665_v49, %v8342_v11  ;;  %v1549_v29 = vmul.f32 %v7808_v30, %v1547_v26  ;;  %v1553_v40 = vmul.f32 %v7847_v17, %v1551_v51  ;;  %v10846_v3 = vld [vmem:[#allocation18_spill] sm:$0xff] }
 0x316   : > { %v8482_v39 = vpop.permute.xlu1 %2950  ;;  %v8484_v35 = vpop.permute.xlu0 %2841  ;;  %v3611_v44 = vstv %s8435_s2  ;;  %v680_v62 = vadd.f32 %v6663_v48, %v8350_v45  ;;  %v1659_v47 = vmul.f32 %v7804_v6, %v1658_v41  ;;  %v1663_v15 = vmul.f32 %v7821_v0, %v1662_v25  ;;  %s8674_s2 = sld [smem:[#allocation6 + $0x5]] }
 0x317   : > { %10836 = vst [vmem:[#allocation295_spill] sm:$0xff] %v8482_v39  ;;  %10837 = vst [vmem:[#allocation296_spill] sm:$0xff] %v8484_v35  ;;  %v472_v49 = vadd.f32 %v6676_v54, %v458_v42  ;;  %v791_v11 = vadd.f32 %v6685_v58, %v8371_v16  ;;  %v681_v48 = vadd.f32 %v6687_v59, %v8364_v36  ;;  %v10841_v58 = vstv %s8294_s26  ;;  %s8562_s26 = sld [smem:[#allocation6 + $0x2]] }
 0x318   : > { %3921 = vrot.lane.b32.xlu1 %v3917_v21, %s10811_s1  ;;  %3812 = vrot.lane.b32.xlu0 %v3807_v33, %s10811_s1  ;;  %v583_v33 = vadd.f32 %v6674_v53, %v569_v55  ;;  %v584_v53 = vadd.f32 %v6696_v63, %v570_v43  ;;  %v485_v45 = vadd.f32 %v6698_v2, %v471_v60  ;;  %v3819_v2 = vstv %s8468_s0  ;;  %v10847_v43 = vld [vmem:[#allocation19_spill] sm:$0xff]  ;;  %s8745_s0 = sld [smem:[#allocation3 + $0xef]] }
 0x319   : > { %v3612_v54 = vmul.f32 %v7804_v6, %v3611_v44  ;;  %v3502_v59 = vmul.f32 %v7808_v30, %v10841_v58  ;;  %v792_v63 = vadd.f32 %v6707_v7, %v8373_v61  ;;  %v694_v36 = vadd.f32 %v6709_v8, %v680_v62  ;;  %v10851_v62 = vld [vmem:[#allocation21_spill] sm:$0xff]  ;;  %v10854_v58 = vld [vmem:[#allocation290_spill] sm:$0xff] }
 0x31a   : > { %v8513_v57 = vpop.permute.xlu1 %3158  ;;  %v8515_v50 = vpop.permute.xlu0 %3049  ;;  %v8541_v16 = vadd.f32 %v1553_v40, %v1549_v29  ;;  %v486_v51 = vadd.f32 %v6718_v12, %v472_v49  ;;  %v8547_v26 = vadd.f32 %v1663_v15, %v1659_v47  ;;  %v1769_v6 = vstv %s8478_s12  ;;  %v10852_v15 = vld [vmem:[#allocation22_spill] sm:$0xff]  ;;  %s8688_s12 = sld [smem:[#allocation3 + $0x78]] }
 0x31b   : > { %10839 = vst [vmem:[#allocation297_spill] sm:$0xff] %v8513_v57  ;;  %10840 = vst [vmem:[#allocation298_spill] sm:$0xff] %v8515_v50  ;;  %v1773_v9 = vstv %s8480_s24  ;;  %v902_v8 = vadd.f32 %v6720_v13, %v8375_v1  ;;  %v695_v61 = vadd.f32 %v6729_v18, %v681_v48  ;;  %v1660_v21 = vmul.f32 %v7808_v30, %v1658_v41  ;;  %v8576_v30 = vld [vmem:[%s6420_s30] sm:$0xff]  ;;  %s8690_s24 = sld [smem:[#allocation3 + $0x79]] }
 0x31c   : > { %3408 = vrot.lane.b32.xlu1 %v3404_v20, %s10804_s19  ;;  %3299 = vrot.lane.b32.xlu0 %v3294_v14, %s10804_s19  ;;  %v1664_v32 = vmul.f32 %v7847_v17, %v1662_v25  ;;  %v597_v12 = vadd.f32 %v6731_v19, %v583_v33  ;;  %v3820_v60 = vmul.f32 %v7821_v0, %v3819_v2  ;;  %v10844_v42 = vstv %s8328_s28  ;;  %v10845_v20 = vld [vmem:[#allocation289_spill] sm:$0xff]  ;;  %s8598_s28 = sld [smem:[#allocation3 + $0x70]] }
 0x31d   : > { %v3710_v13 = vmul.f32 %v7847_v17, %v10844_v42  ;;  %v903_v18 = vadd.f32 %v6740_v23, %v8377_v56  ;;  %v805_v19 = vadd.f32 %v6742_v24, %v791_v11  ;;  %v1770_v1 = vmul.f32 %v8576_v30, %v1769_v6  ;;  %v10848_v23 = vld [vmem:[#allocation20_spill] sm:$0xff]  ;;  %v10880_v11 = vld [vmem:[#allocation41_spill] sm:$0xff] }
 0x31e   : > { %v8551_v5 = vpop.permute.xlu1 %3366  ;;  %v8553_v7 = vpop.permute.xlu0 %3257  ;;  %v1774_v41 = vmul.f32 %v7821_v0, %v1773_v9  ;;  %v499_v25 = vadd.f32 %v6751_v28, %v485_v45  ;;  %v1013_v14 = vadd.f32 %v10846_v3, %v10845_v20  ;;  %v708_v29 = vadd.f32 %v10847_v43, %v694_v36  ;;  %v10859_v20 = vld [vmem:[#allocation25_spill] sm:$0xff]  ;;  %v10860_v43 = vld [vmem:[#allocation26_spill] sm:$0xff] }
 0x31f   : > { %10842 = vst [vmem:[#allocation299_spill] sm:$0xff] %v8551_v5  ;;  %10843 = vst [vmem:[#allocation300_spill] sm:$0xff] %v8553_v7  ;;  %v598_v24 = vadd.f32 %v10848_v23, %v584_v53  ;;  %v8592_v0 = vadd.f32 %v10851_v62, %v902_v8  ;;  %v8594_v33 = vadd.f32 %v1664_v32, %v1660_v21  ;;  %v1880_v28 = vstv %s8523_s17  ;;  %v8612_v53 = vld [vmem:[%s6420_s30 + $0x8] sm:$0xff]  ;;  %v10861_v62 = vld [vmem:[#allocation27_spill] sm:$0xff]  ;;  %s8708_s17 = sld [smem:[#allocation3 + $0xf6]] }
 0x320   : > { %3616 = vrot.lane.b32.xlu1 %v3612_v54, %s10804_s19  ;;  %3507 = vrot.lane.b32.xlu0 %v3502_v59, %s10804_s19  ;;  %v1884_v47 = vstv %s8525_s22  ;;  %v806_v49 = vadd.f32 %v10852_v15, %v792_v63  ;;  %v3405_v48 = vmul.f32 %v7847_v17, %v3403_v22  ;;  %v10853_v45 = vstv %s8369_s23  ;;  %v10855_v59 = vld [vmem:[#allocation23_spill] sm:$0xff]  ;;  %v10856_v63 = vld [vmem:[#allocation24_spill] sm:$0xff]  ;;  %s8646_s23 = sld [smem:[#allocation6 + $0x4]]  ;;  %s8766_s22 = sld [smem:[#allocation3 + $0x80]] }
 0x321   : > { %v3918_v54 = vmul.f32 %v8612_v53, %v10853_v45  ;;  %v1124_v36 = vadd.f32 %v10855_v59, %v10854_v58  ;;  %v1014_v8 = vadd.f32 %v10856_v63, %v8445_v31  ;;  %v8621_v21 = vadd.f32 %v1774_v41, %v1770_v1  ;;  %v8628_v17 = vld [vmem:[%s6425_s3] sm:$0xff]  ;;  %v10863_v59 = vld [vmem:[#allocation29_spill] sm:$0xff] }
 0x322   : > { %v8587_v56 = vpop.permute.xlu1 %3574  ;;  %v8589_v40 = vpop.permute.xlu0 %3465  ;;  %v10517_v32 = vstv %s8544_s20  ;;  %v1885_v22 = vmul.f32 %v8628_v17, %v1884_v47  ;;  %v1771_v42 = vmul.f32 %v8612_v53, %v1769_v6  ;;  %v611_v3 = vadd.f32 %v10859_v20, %v597_v12  ;;  %v10862_v45 = vld [vmem:[#allocation28_spill] sm:$0xff]  ;;  %v10864_v12 = vld [vmem:[#allocation30_spill] sm:$0xff] }
 0x323   : > { %10849 = vst [vmem:[#allocation289_spill] sm:$0xff] %v8587_v56  ;;  %10850 = vst [vmem:[#allocation18_spill] sm:$0xff] %v8589_v40  ;;  %v500_v23 = vadd.f32 %v10860_v43, %v486_v51  ;;  %v819_v15 = vadd.f32 %v10861_v62, %v805_v19  ;;  %v709_v58 = vadd.f32 %v10862_v45, %v695_v61  ;;  %v10865_v61 = vld [vmem:[#allocation31_spill] sm:$0xff]  ;;  %v10866_v20 = vld [vmem:[#allocation32_spill] sm:$0xff]  ;;  %v2106_v56 = vstv %s8690_s24  ;;  %s8953_s24 = sld [smem:[#allocation6 + $0x8]] }
 0x324   : > { %3824 = vrot.lane.b32.xlu1 %v3820_v60, %s10811_s1  ;;  %3715 = vrot.lane.b32.xlu0 %v3710_v13, %s10811_s1  ;;  %v1881_v60 = vmul.f32 %v8576_v30, %v1880_v28  ;;  %v8633_v13 = vld [vmem:[%s6425_s3 + $0x8] sm:$0xff]  ;;  %v1027_v63 = vadd.f32 %v10863_v59, %v1013_v14  ;;  %v3515_v51 = vmul.f32 %v8628_v17, %v10517_v32  ;;  %v10868_v62 = vld [vmem:[#allocation34_spill] sm:$0xff]  ;;  %v10904_v7 = vstv %s8493_s15 }
 0x325   : > { %v1775_v31 = vmul.f32 %v8633_v13, %v1773_v9  ;;  %v3613_v9 = vmul.f32 %v8612_v53, %v3611_v44  ;;  %v917_v19 = vadd.f32 %v10864_v12, %v903_v18  ;;  %v8659_v14 = vadd.f32 %v10865_v61, %v8451_v4  ;;  %v10871_v12 = vld [vmem:[#allocation35_spill] sm:$0xff]  ;;  %v10881_v32 = vld [vmem:[#allocation42_spill] sm:$0xff] }
 0x326   : > { %v8636_v1 = vpop.permute.xlu1 %3782  ;;  %v8638_v41 = vpop.permute.xlu0 %3673  ;;  %v1125_v43 = vadd.f32 %v10866_v20, %v8447_v46  ;;  %v513_v45 = vadd.f32 %v10868_v62, %v499_v25  ;;  %v8670_v59 = vadd.f32 %v1885_v22, %v1881_v60  ;;  %v8681_v61 = vadd.f32 %v10871_v12, %v806_v49  ;;  %v10873_v60 = vld [vmem:[#allocation51_spill] sm:$0xff] }
 0x327   : > { %10857 = vst [vmem:[#allocation19_spill] sm:$0xff] %v8636_v1  ;;  %10858 = vst [vmem:[#allocation20_spill] sm:$0xff] %v8638_v41  ;;  %v8672_v18 = vadd.f32 %v1775_v31, %v1771_v42  ;;  %v1991_v25 = vstv %s8598_s28  ;;  %v3821_v49 = vmul.f32 %v8633_v13, %v3819_v2  ;;  %v10874_v31 = vld [vmem:[#allocation37_spill] sm:$0xff]  ;;  %v1882_v12 = vmul.f32 %v8612_v53, %v1880_v28  ;;  %v10879_v42 = vld [vmem:[#allocation40_spill] sm:$0xff]  ;;  %s8783_s28 = sld [smem:[#allocation6 + $0x6]] }
 0x328   : > { %3410 = vrot.lane.b32.xlu1 %v3405_v48, %s10804_s19  ;;  %3923 = vrot.lane.b32.xlu0 %v3918_v54, %s10811_s1  ;;  %v10516_v48 = vstv %s8580_s11  ;;  %v10867_v54 = vld [vmem:[#allocation33_spill] sm:$0xff]  ;;  %v527_v22 = vadd.f32 %v10873_v60, %v513_v45  ;;  %v8703_v62 = vadd.f32 %v10874_v31, %v1014_v8  ;;  %v1886_v45 = vmul.f32 %v8633_v13, %v1884_v47 }
 0x329   : > { %v8667_v44 = vadd.f32 %v10867_v54, %v598_v24  ;;  %v10872_v24 = vld [vmem:[#allocation36_spill] sm:$0xff]  ;;  %v1995_v54 = vstv %s8600_s13  ;;  %v1992_v8 = vmul.f32 %v8576_v30, %v1991_v25  ;;  %v1138_v6 = vadd.f32 %v10879_v42, %v1124_v36  ;;  %s8786_s13 = sld [smem:[#allocation3 + $0xfe]] }
 0x32a   : > { %v8676_v4 = vpop.permute.xlu1 %2853  ;;  %v8678_v46 = vpop.permute.xlu0 %2744  ;;  %v8684_v20 = vadd.f32 %v10872_v24, %v708_v29  ;;  %v3723_v29 = vmul.f32 %v8576_v30, %v10516_v48  ;;  %v3930_v24 = vstv %s8624_s14  ;;  %v1996_v31 = vmul.f32 %v8628_v17, %v1995_v54  ;;  %s8855_s14 = sld [smem:[#allocation3 + $0x89]] }
 0x32b   : > { %10869 = vst [vmem:[#allocation21_spill] sm:$0xff] %v8676_v4  ;;  %10870 = vst [vmem:[#allocation22_spill] sm:$0xff] %v8678_v46  ;;  %v514_v48 = vadd.f32 %v10880_v11, %v500_v23  ;;  %v10884_v1 = vstv %s8544_s20  ;;  %v3931_v11 = vmul.f32 %v8628_v17, %v3930_v24  ;;  %v10885_v23 = vld [vmem:[#allocation44_spill] sm:$0xff]  ;;  %v8742_v42 = vadd.f32 %v1886_v45, %v1882_v12  ;;  %v10892_v12 = vld [vmem:[#allocation63_spill] sm:$0xff]  ;;  %s8768_s20 = sld [smem:[#allocation3 + $0x81]] }
 0x32c   : > { %3618 = vrot.lane.b32.xlu1 %v3613_v9, %s10804_s19  ;;  %3519 = vrot.lane.b32.xlu0 %v3515_v51, %s10804_s19  ;;  %v10875_v9 = vld [vmem:[#allocation38_spill] sm:$0xff]  ;;  %v10876_v51 = vld [vmem:[#allocation39_spill] sm:$0xff]  ;;  %v3516_v36 = vmul.f32 %v8633_v13, %v10884_v1  ;;  %v10889_v1 = vld [vmem:[#allocation48_spill] sm:$0xff]  ;;  %v8756_v40 = vadd.f32 %v1996_v31, %v1992_v8 }
 0x32d   : > { %v930_v2 = vadd.f32 %v10875_v9, %v8592_v0  ;;  %v8714_v60 = vadd.f32 %v10876_v51, %v8463_v10  ;;  %v1346_v0 = vadd.f32 %v10881_v32, %v8465_v27  ;;  %v10882_v9 = vld [vmem:[#allocation43_spill] sm:$0xff]  ;;  %v10883_v10 = vstv %s8493_s15  ;;  %v10886_v32 = vld [vmem:[#allocation45_spill] sm:$0xff]  ;;  %s8830_s15 = sld [smem:[#allocation3 + $0xf7]] }
 0x32e   : > { %v8718_v28 = vpop.permute.xlu1 %3061  ;;  %v8720_v47 = vpop.permute.xlu0 %2952  ;;  %v8727_v55 = vadd.f32 %v10882_v9, %v709_v58  ;;  %v531_v51 = vadd.f32 %v10883_v10, %v527_v22  ;;  %v625_v27 = vadd.f32 %v10885_v23, %v611_v3  ;;  %v8740_v58 = vadd.f32 %v10886_v32, %v917_v19  ;;  %v10888_v9 = vld [vmem:[#allocation47_spill] sm:$0xff] }
 0x32f   : > { %10877 = vst [vmem:[#allocation290_spill] sm:$0xff] %v8718_v28  ;;  %10878 = vst [vmem:[#allocation23_spill] sm:$0xff] %v8720_v47  ;;  %v3625_v22 = vstv %s8664_s25  ;;  %v8751_v10 = vadd.f32 %v10888_v9, %v1125_v43  ;;  %v8754_v41 = vadd.f32 %v10889_v1, %v1027_v63  ;;  %v2102_v32 = vstv %s8688_s12  ;;  %s8866_s25 = sld [smem:[#allocation6 + $0x7]]  ;;  %s8936_s12 = sld [smem:[#allocation3 + $0x91]] }
 0x330   : > { %3826 = vrot.lane.b32.xlu1 %v3821_v49, %s10811_s1  ;;  %3727 = vrot.lane.b32.xlu0 %v3723_v29, %s10804_s19  ;;  %v10887_v49 = vld [vmem:[#allocation46_spill] sm:$0xff]  ;;  %v639_v45 = vadd.f32 %v10892_v12, %v625_v27  ;;  %v10894_v63 = vstv %s8580_s11  ;;  %v3626_v31 = vmul.f32 %v8628_v17, %v3625_v22  ;;  %v533_v27 = vmax.f32 %v531_v51, 0.0  ;;  %v10897_v51 = vld [vmem:[#allocation52_spill] sm:$0xff]  ;;  %s8853_s11 = sld [smem:[#allocation3 + $0x88]] }
 0x331   : > { %v8748_v29 = vadd.f32 %v10887_v49, %v819_v15  ;;  %v10893_v15 = vld [vmem:[#allocation64_spill] sm:$0xff]  ;;  %v3724_v8 = vmul.f32 %v8612_v53, %v10894_v63  ;;  %v10895_v49 = vld [vmem:[#allocation49_spill] sm:$0xff]  ;;  %v1993_v1 = vmul.f32 %v8612_v53, %v1991_v25  ;;  %v2107_v63 = vmul.f32 %v8628_v17, %v2106_v56 }
 0x332   : > { %v8758_v3 = vpop.permute.xlu1 %3269  ;;  %v8760_v19 = vpop.permute.xlu0 %3160  ;;  %v528_v43 = vadd.f32 %v10893_v15, %v514_v48  ;;  %v8779_v9 = vadd.f32 %v10895_v49, %v8472_v37  ;;  %v1997_v48 = vmul.f32 %v8633_v13, %v1995_v54  ;;  %v8794_v15 = vadd.f32 %v10897_v51, %v8474_v34  ;;  %v10900_v49 = vld [vmem:[#allocation53_spill] sm:$0xff] }
 0x333   : > { %10890 = vst [vmem:[#allocation24_spill] sm:$0xff] %v8758_v3  ;;  %10891 = vst [vmem:[#allocation25_spill] sm:$0xff] %v8760_v19  ;;  %v2103_v37 = vmul.f32 %v8576_v30, %v2102_v32  ;;  %v736_v23 = vadd.f32 %v10900_v49, %v8684_v20  ;;  %v10901_v3 = vld [vmem:[#allocation54_spill] sm:$0xff]  ;;  %v10903_v34 = vstv %s8528_s29  ;;  %v8818_v20 = vsel %vm535_vm0, %v533_v27, 0.0  ;;  %v10909_v49 = vld [vmem:[#allocation60_spill] sm:$0xff] }
 0x334   : > { %3521 = vrot.lane.b32.xlu1 %v3516_v36, %s10804_s19  ;;  %3935 = vrot.lane.b32.xlu0 %v3931_v11, %s10811_s1  ;;  %v3833_v36 = vstv %s8708_s17  ;;  %v10896_v11 = vld [vmem:[#allocation50_spill] sm:$0xff]  ;;  %v643_v51 = vadd.f32 %v10903_v34, %v639_v45  ;;  %v532_v5 = vadd.f32 %v10904_v7, %v528_v43  ;;  %v8827_v7 = vadd.f32 %v1997_v48, %v1993_v1  ;;  %s9022_s17 = sld [smem:[#allocation3 + $0x99]] }
 0x335   : > { %v8790_v12 = vadd.f32 %v10896_v11, %v8659_v14  ;;  %v626_v14 = vadd.f32 %v10901_v3, %v8667_v44  ;;  %v10902_v11 = vld [vmem:[#allocation55_spill] sm:$0xff]  ;;  %v10905_v44 = vld [vmem:[#allocation56_spill] sm:$0xff]  ;;  %v10906_v3 = vld [vmem:[#allocation57_spill] sm:$0xff]  ;;  %v10518_v43 = vstv %s8745_s0 }
 0x336   : > { %v8798_v25 = vpop.permute.xlu1 %3477  ;;  %v8800_v54 = vpop.permute.xlu0 %3368  ;;  %v8807_v19 = vadd.f32 %v10902_v11, %v930_v2  ;;  %v8822_v2 = vadd.f32 %v10905_v44, %v8681_v61  ;;  %v8825_v45 = vadd.f32 %v10906_v3, %v1138_v6  ;;  %v8841_v61 = vadd.f32 %v10909_v49, %v8714_v60  ;;  %v10912_v11 = vld [vmem:[#allocation75_spill] sm:$0xff]  ;;  %v10913_v44 = vld [vmem:[#allocation76_spill] sm:$0xff] }
 0x337   : > { %10898 = vst [vmem:[#allocation26_spill] sm:$0xff] %v8798_v25  ;;  %10899 = vst [vmem:[#allocation27_spill] sm:$0xff] %v8800_v54  ;;  %v3932_v25 = vmul.f32 %v8633_v13, %v3930_v24  ;;  %v3834_v54 = vmul.f32 %v8576_v30, %v3833_v36  ;;  %v10907_v24 = vld [vmem:[#allocation58_spill] sm:$0xff]  ;;  %v8843_v6 = vadd.f32 %v2107_v63, %v2103_v37  ;;  %v2213_v3 = vstv %s8766_s22  ;;  %s9063_s22 = sld [smem:[#allocation3 + $0xa1]] }
 0x338   : > { %3729 = vrot.lane.b32.xlu1 %v3724_v8, %s10804_s19  ;;  %3630 = vrot.lane.b32.xlu0 %v3626_v31, %s10804_s19  ;;  %v8834_v8 = vadd.f32 %v10907_v24, %v8703_v62  ;;  %v10908_v31 = vld [vmem:[#allocation59_spill] sm:$0xff]  ;;  %v750_v34 = vadd.f32 %v10912_v11, %v736_v23  ;;  %v640_v62 = vadd.f32 %v10913_v44, %v626_v14  ;;  %v2217_v24 = vstv %s8768_s20  ;;  %v10915_v11 = vld [vmem:[#allocation62_spill] sm:$0xff]  ;;  %s9134_s20 = sld [smem:[#allocation3 + $0xa9]] }
 0x339   : > { %v8837_v27 = vadd.f32 %v10908_v31, %v1346_v0  ;;  %v3737_v60 = vmul.f32 %v8628_v17, %v10518_v43  ;;  %v3627_v0 = vmul.f32 %v8633_v13, %v3625_v22  ;;  %v645_v23 = vmax.f32 %v643_v51, 0.0  ;;  %v10919_v43 = vld [vmem:[#allocation66_spill] sm:$0xff] }
 0x33a   : > { %v8845_v1 = vpop.permute.xlu1 %3685  ;;  %v8847_v48 = vpop.permute.xlu0 %3576  ;;  %v534_v37 = vmax.f32 %v532_v5, 0.0  ;;  %v2104_v14 = vmul.f32 %v8612_v53, %v2102_v32  ;;  %v2108_v31 = vmul.f32 %v8633_v13, %v2106_v56  ;;  %v3944_v49 = vstv %s8786_s13  ;;  %v10918_v56 = vld [vmem:[#allocation65_spill] sm:$0xff]  ;;  %s9144_s13 = sld [smem:[#allocation6 + $0xb]] }
 0x33b   : > { %10910 = vst [vmem:[#allocation28_spill] sm:$0xff] %v8845_v1  ;;  %10911 = vst [vmem:[#allocation29_spill] sm:$0xff] %v8847_v48  ;;  %v8875_v44 = vadd.f32 %v10915_v11, %v8476_v52  ;;  %v2214_v22 = vmul.f32 %v8576_v30, %v2213_v3  ;;  %v2218_v5 = vmul.f32 %v8628_v17, %v2217_v24  ;;  %v10921_v1 = vstv %s8528_s29  ;;  %s8934_s29 = sld [smem:[#allocation3 + $0x90]] }
 0x33c   : > { %3937 = vrot.lane.b32.xlu1 %v3932_v25, %s10811_s1  ;;  %3838 = vrot.lane.b32.xlu0 %v3834_v54, %s10804_s19  ;;  %v10914_v25 = vld [vmem:[#allocation61_spill] sm:$0xff]  ;;  %v847_v63 = vadd.f32 %v10918_v56, %v8748_v29  ;;  %v644_v52 = vadd.f32 %v10921_v1, %v640_v62  ;;  %v3945_v11 = vmul.f32 %v8576_v30, %v3944_v49  ;;  %v8899_v29 = vsel %vm535_vm0, %v534_v37, 0.0  ;;  %v10923_v1 = vld [vmem:[#allocation68_spill] sm:$0xff]  ;;  %s8912_s1 = sld [smem:[#allocation3 + $0xff]] }
 0x33d   : > { %v8871_v54 = vadd.f32 %v10914_v25, %v8487_v38  ;;  %v737_v38 = vadd.f32 %v10919_v43, %v8727_v55  ;;  %v10920_v25 = vstv %s8562_s26  ;;  %v10922_v55 = vld [vmem:[#allocation67_spill] sm:$0xff]  ;;  %v8909_v62 = vadd.f32 %v2108_v31, %v2104_v14 }
 0x33e   : > { %v8879_v51 = vpop.permute.xlu1 %3893  ;;  %v8881_v32 = vpop.permute.xlu0 %3784  ;;  %v754_v48 = vadd.f32 %v10920_v25, %v750_v34  ;;  %v8903_v43 = vadd.f32 %v10922_v55, %v8754_v41  ;;  %v8907_v34 = vadd.f32 %v10923_v1, %v8740_v58  ;;  %v10926_v41 = vld [vmem:[#allocation71_spill] sm:$0xff]  ;;  %v8926_v58 = vadd.f32 %v2218_v5, %v2214_v22 }
 0x33f   : > { %10916 = vst [vmem:[#allocation30_spill] sm:$0xff] %v8879_v51  ;;  %10917 = vst [vmem:[#allocation31_spill] sm:$0xff] %v8881_v32  ;;  %v3835_v51 = vmul.f32 %v8612_v53, %v3833_v36  ;;  %v8896_v32 = vsel %vm535_vm0, %v645_v23, 0.0  ;;  %v10924_v36 = vld [vmem:[#allocation69_spill] sm:$0xff]  ;;  %v10925_v23 = vld [vmem:[#allocation70_spill] sm:$0xff]  ;;  %v8924_v56 = vadd.f32 %v10926_v41, %v8794_v15  ;;  %v2328_v15 = vstv %s8855_s14  ;;  %s9237_s14 = sld [smem:[#allocation3 + $0xb9]] }
 0x340   : > { %3741 = vrot.lane.b32.xlu1 %v3737_v60, %s10804_s19  ;;  %3632 = vrot.lane.b32.xlu0 %v3627_v0, %s10804_s19  ;;  %v3847_v60 = vstv %s8830_s15  ;;  %v8916_v0 = vadd.f32 %v10924_v36, %v8790_v12  ;;  %v8920_v37 = vadd.f32 %v10925_v23, %v8751_v10  ;;  %v10929_v25 = vld [vmem:[#allocation87_spill] sm:$0xff]  ;;  %v2324_v12 = vstv %s8853_s11  ;;  %v10930_v36 = vld [vmem:[#allocation88_spill] sm:$0xff]  ;;  %s9181_s15 = sld [smem:[#allocation3 + $0xb1]]  ;;  %s9194_s11 = sld [smem:[#allocation6 + $0xc]] }
 0x341   : > { %v861_v55 = vadd.f32 %v10929_v25, %v847_v63  ;;  %v646_v10 = vmax.f32 %v644_v52, 0.0  ;;  %v756_v1 = vmax.f32 %v754_v48, 0.0  ;;  %v751_v23 = vadd.f32 %v10930_v36, %v737_v38  ;;  %v10932_v41 = vld [vmem:[#allocation72_spill] sm:$0xff]  ;;  %v10934_v36 = vld [vmem:[#allocation74_spill] sm:$0xff] }
 0x342   : > { %v8928_v14 = vpop.permute.xlu1 %2964  ;;  %v8930_v31 = vpop.permute.xlu0 %2855  ;;  %v3848_v22 = vmul.f32 %v8628_v17, %v3847_v60  ;;  %v10931_v5 = vstv %s8745_s0  ;;  %v8948_v25 = vadd.f32 %v10932_v41, %v8779_v9  ;;  %v2215_v48 = vmul.f32 %v8612_v53, %v2213_v3  ;;  %v10936_v9 = vld [vmem:[#allocation78_spill] sm:$0xff]  ;;  %s9024_s0 = sld [smem:[#allocation6 + $0x9]] }
 0x343   : > { %10927 = vst [vmem:[#allocation32_spill] sm:$0xff] %v8928_v14  ;;  %10928 = vst [vmem:[#allocation33_spill] sm:$0xff] %v8930_v31  ;;  %v3738_v63 = vmul.f32 %v8633_v13, %v10931_v5  ;;  %v2219_v38 = vmul.f32 %v8633_v13, %v2217_v24  ;;  %v8961_v57 = vadd.f32 %v10934_v36, %v8541_v16  ;;  %v10935_v5 = vld [vmem:[#allocation77_spill] sm:$0xff]  ;;  %v10939_v52 = vstv %s8604_s16 }
 0x344   : > { %3949 = vrot.lane.b32.xlu1 %v3945_v11, %s10804_s19  ;;  %3840 = vrot.lane.b32.xlu0 %v3835_v51, %s10804_s19  ;;  %v10933_v11 = vld [vmem:[#allocation73_spill] sm:$0xff]  ;;  %v958_v28 = vadd.f32 %v10935_v5, %v8807_v19  ;;  %v848_v41 = vadd.f32 %v10936_v9, %v8822_v2  ;;  %v865_v50 = vadd.f32 %v10939_v52, %v861_v55  ;;  %v8976_v16 = vsel %vm535_vm0, %v646_v10, 0.0  ;;  %v10941_v52 = vld [vmem:[#allocation79_spill] sm:$0xff]  ;;  %v10942_v10 = vld [vmem:[#allocation80_spill] sm:$0xff] }
 0x345   : > { %v8957_v51 = vadd.f32 %v10933_v11, %v8547_v26  ;;  %v2325_v26 = vmul.f32 %v8576_v30, %v2324_v12  ;;  %v2329_v11 = vmul.f32 %v8628_v17, %v2328_v15  ;;  %v10940_v36 = vstv %s8562_s26  ;;  %v10943_v9 = vld [vmem:[#allocation81_spill] sm:$0xff]  ;;  %s9020_s26 = sld [smem:[#allocation3 + $0x98]] }
 0x346   : > { %v8967_v3 = vpop.permute.xlu1 %3172  ;;  %v8969_v24 = vpop.permute.xlu0 %3063  ;;  %v755_v14 = vadd.f32 %v10940_v36, %v751_v23  ;;  %v3849_v19 = vmul.f32 %v8633_v13, %v3847_v60  ;;  %v3946_v2 = vmul.f32 %v8612_v53, %v3944_v49  ;;  %v8985_v55 = vsel %vm535_vm0, %v756_v1, 0.0  ;;  %v10944_v49 = vld [vmem:[#allocation82_spill] sm:$0xff]  ;;  %v10945_v1 = vld [vmem:[#allocation99_spill] sm:$0xff] }
 0x347   : > { %10937 = vst [vmem:[#allocation34_spill] sm:$0xff] %v8967_v3  ;;  %10938 = vst [vmem:[#allocation35_spill] sm:$0xff] %v8969_v24  ;;  %v8989_v5 = vadd.f32 %v10941_v52, %v8825_v45  ;;  %v8993_v23 = vadd.f32 %v10942_v10, %v8834_v8  ;;  %v9000_v60 = vadd.f32 %v10943_v9, %v8837_v27  ;;  %v10946_v24 = vld [vmem:[#allocation100_spill] sm:$0xff]  ;;  %v2435_v27 = vstv %s8934_s29  ;;  %s9279_s29 = sld [smem:[#allocation3 + $0xc1]] }
 0x348   : > { %3852 = vrot.lane.b32.xlu1 %v3848_v22, %s10804_s19  ;;  %3743 = vrot.lane.b32.xlu0 %v3738_v63, %s10804_s19  ;;  %v8995_v22 = vadd.f32 %v2219_v38, %v2215_v48  ;;  %v3958_v63 = vstv %s8912_s1  ;;  %v9004_v36 = vadd.f32 %v10944_v49, %v8841_v61  ;;  %v972_v3 = vadd.f32 %v10945_v1, %v958_v28  ;;  %v10949_v48 = vld [vmem:[#allocation83_spill] sm:$0xff]  ;;  %v10960_v9 = vld [vmem:[#allocation92_spill] sm:$0xff]  ;;  %s9248_s1 = sld [smem:[#allocation6 + $0xd]] }
 0x349   : > { %v862_v45 = vadd.f32 %v10946_v24, %v848_v41  ;;  %v9014_v38 = vadd.f32 %v10949_v48, %v8871_v54  ;;  %v9016_v10 = vadd.f32 %v2329_v11, %v2325_v26  ;;  %v2439_v61 = vstv %s8936_s12  ;;  %v10950_v26 = vld [vmem:[#allocation84_spill] sm:$0xff]  ;;  %s9303_s12 = sld [smem:[#allocation6 + $0xe]] }
 0x34a   : > { %v9008_v52 = vpop.permute.xlu1 %3380  ;;  %v9010_v8 = vpop.permute.xlu0 %3271  ;;  %v3960_v28 = vmul.f32 %v8633_v13, %v3958_v63  ;;  %v3959_v54 = vmul.f32 %v8628_v17, %v3958_v63  ;;  %v757_v41 = vmax.f32 %v755_v14, 0.0  ;;  %v867_v24 = vmax.f32 %v865_v50, 0.0  ;;  %v10955_v50 = vld [vmem:[#allocation85_spill] sm:$0xff]  ;;  %v10956_v63 = vld [vmem:[#allocation86_spill] sm:$0xff] }
 0x34b   : > { %10947 = vst [vmem:[#allocation36_spill] sm:$0xff] %v9008_v52  ;;  %10948 = vst [vmem:[#allocation51_spill] sm:$0xff] %v9010_v8  ;;  %v1472_v11 = vadd.f32 %v10950_v26, %v8875_v44  ;;  %v2326_v49 = vmul.f32 %v8612_v53, %v2324_v12  ;;  %v2330_v1 = vmul.f32 %v8633_v13, %v2328_v15  ;;  %v10951_v48 = vstv %s8646_s23  ;;  %v10957_v15 = vld [vmem:[#allocation89_spill] sm:$0xff] }
 0x34c   : > { %3854 = vrot.lane.b32.xlu1 %v3849_v19, %s10804_s19  ;;  %3951 = vrot.lane.b32.xlu0 %v3946_v2, %s10804_s19  ;;  %v976_v52 = vadd.f32 %v10951_v48, %v972_v3  ;;  %v10952_v8 = vstv %s8604_s16  ;;  %v2436_v2 = vmul.f32 %v8576_v30, %v2435_v27  ;;  %v2440_v47 = vmul.f32 %v8628_v17, %v2439_v61  ;;  %v10958_v3 = vld [vmem:[#allocation90_spill] sm:$0xff]  ;;  %s9061_s16 = sld [smem:[#allocation3 + $0xa0]] }
 0x34d   : > { %v866_v19 = vadd.f32 %v10952_v8, %v862_v45  ;;  %v1790_v44 = vadd.f32 %v10955_v50, %v8621_v21  ;;  %v1680_v12 = vadd.f32 %v10956_v63, %v8594_v33  ;;  %v1069_v26 = vadd.f32 %v10957_v15, %v8903_v43  ;;  %v10959_v8 = vld [vmem:[#allocation91_spill] sm:$0xff]  ;;  %v10961_v43 = vld [vmem:[#allocation93_spill] sm:$0xff] }
 0x34e   : > { %v9041_v31 = vpop.permute.xlu1 %3588  ;;  %v9043_v14 = vpop.permute.xlu0 %3479  ;;  %v959_v45 = vadd.f32 %v10958_v3, %v8907_v34  ;;  %v9055_v48 = vadd.f32 %v10959_v8, %v8916_v0  ;;  %v9068_v33 = vsel %vm535_vm0, %v757_v41, 0.0  ;;  %v9071_v21 = vsel %vm535_vm0, %v867_v24, 0.0  ;;  %v10962_v0 = vld [vmem:[#allocation111_spill] sm:$0xff] }
 0x34f   : > { %10953 = vst [vmem:[#allocation37_spill] sm:$0xff] %v9041_v31  ;;  %10954 = vst [vmem:[#allocation38_spill] sm:$0xff] %v9043_v14  ;;  %v9059_v31 = vadd.f32 %v10960_v9, %v8920_v37  ;;  %v1485_v34 = vadd.f32 %v10961_v43, %v8924_v56  ;;  %v1083_v37 = vadd.f32 %v10962_v0, %v1069_v26  ;;  %v10963_v9 = vld [vmem:[#allocation112_spill] sm:$0xff]  ;;  %v868_v3 = vmax.f32 %v866_v19, 0.0  ;;  %v10969_v43 = vld [vmem:[#allocation97_spill] sm:$0xff] }
 0x350   : > { %3965 = vrot.lane.b32.xlu1 %v3960_v28, %s10804_s19  ;;  %3963 = vrot.lane.b32.xlu0 %v3959_v54, %s10804_s19  ;;  %v973_v50 = vadd.f32 %v10963_v9, %v959_v45  ;;  %v9077_v63 = vadd.f32 %v2330_v1, %v2326_v49  ;;  %v10964_v28 = vld [vmem:[#allocation94_spill] sm:$0xff]  ;;  %v9081_v54 = vadd.f32 %v2440_v47, %v2436_v2  ;;  %v978_v56 = vmax.f32 %v976_v52, 0.0  ;;  %s9091_s19 = sld [smem:[#allocation6 + $0xa]]  ;;  %v10968_v1 = vld [vmem:[#allocation96_spill] sm:$0xff] }
 0x351   : > { %v1375_v15 = vadd.f32 %v10964_v28, %v8948_v25  ;;  %v2546_v8 = vstv %s9020_s26  ;;  %v2550_v26 = vstv %s9022_s17  ;;  %v2437_v45 = vmul.f32 %v8612_v53, %v2435_v27  ;;  %v10967_v25 = vld [vmem:[#allocation95_spill] sm:$0xff]  ;;  %v10970_v52 = vld [vmem:[#allocation98_spill] sm:$0xff]  ;;  %v10971_v28 = vld [vmem:[#allocation101_spill] sm:$0xff]  ;;  %s9354_s26 = sld [smem:[#allocation3 + $0xc9]]  ;;  %s9370_s17 = sld [smem:[#allocation6 + $0xf]] }
 0x352   : > { %v9083_v41 = vpop.permute.xlu1 %3796  ;;  %v9085_v24 = vpop.permute.xlu0 %3687  ;;  %v2441_v49 = vmul.f32 %v8633_v13, %v2439_v61  ;;  %v1693_v47 = vadd.f32 %v10967_v25, %v8957_v51  ;;  %v1583_v2 = vadd.f32 %v10968_v1, %v8961_v57  ;;  %v1901_v0 = vadd.f32 %v10969_v43, %v8670_v59  ;;  %v10974_v51 = vld [vmem:[#allocation102_spill] sm:$0xff] }
 0x353   : > { %10965 = vst [vmem:[#allocation39_spill] sm:$0xff] %v9083_v41  ;;  %10966 = vst [vmem:[#allocation40_spill] sm:$0xff] %v9085_v24  ;;  %v1791_v19 = vadd.f32 %v10970_v52, %v8672_v18  ;;  %v1180_v27 = vadd.f32 %v10971_v28, %v8989_v5  ;;  %v10972_v61 = vstv %s8674_s2  ;;  %v10973_v41 = vstv %s8646_s23  ;;  %v10977_v5 = vld [vmem:[#allocation103_spill] sm:$0xff]  ;;  %s9132_s23 = sld [smem:[#allocation3 + $0xa8]] }
 0x354   : > { %v1087_v24 = vadd.f32 %v10972_v61, %v1083_v37  ;;  %v977_v14 = vadd.f32 %v10973_v41, %v973_v50  ;;  %v1070_v25 = vadd.f32 %v10974_v51, %v8993_v23  ;;  %v2547_v57 = vmul.f32 %v8576_v30, %v2546_v8  ;;  %v10978_v37 = vld [vmem:[#allocation104_spill] sm:$0xff]  ;;  %v10979_v28 = vld [vmem:[#allocation123_spill] sm:$0xff] }
 0x355   : > { %v2551_v59 = vmul.f32 %v8628_v17, %v2550_v26  ;;  %v9117_v18 = vsel %vm535_vm0, %v868_v3, 0.0  ;;  %v1388_v52 = vadd.f32 %v10977_v5, %v9000_v60  ;;  %v1278_v50 = vadd.f32 %v10978_v37, %v9004_v36  ;;  %v10980_v51 = vld [vmem:[#allocation124_spill] sm:$0xff]  ;;  %v10981_v60 = vld [vmem:[#allocation105_spill] sm:$0xff]  ;;  %v10982_v36 = vld [vmem:[#allocation106_spill] sm:$0xff] }
 0x356   : > { %v9112_v1 = vpop.permute.xlu1 %2966  ;;  %v9114_v43 = vpop.permute.xlu0 %3895  ;;  %v9123_v41 = vadd.f32 %v2441_v49, %v2437_v45  ;;  %v9126_v23 = vsel %vm535_vm0, %v978_v56, 0.0  ;;  %v1194_v61 = vadd.f32 %v10979_v28, %v1180_v27  ;;  %v1084_v9 = vadd.f32 %v10980_v51, %v1070_v25  ;;  %v10983_v5 = vld [vmem:[#allocation107_spill] sm:$0xff] }
 0x357   : > { %10975 = vst [vmem:[#allocation41_spill] sm:$0xff] %v9112_v1  ;;  %10976 = vst [vmem:[#allocation42_spill] sm:$0xff] %v9114_v43  ;;  %v2657_v1 = vstv %s9061_s16  ;;  %v2661_v43 = vstv %s9063_s22  ;;  %v1596_v3 = vadd.f32 %v10981_v60, %v9014_v38  ;;  %v1486_v45 = vadd.f32 %v10982_v36, %v1472_v11  ;;  %v10986_v38 = vld [vmem:[#allocation108_spill] sm:$0xff]  ;;  %s9417_s16 = sld [smem:[#allocation3 + $0xd1]]  ;;  %s9432_s22 = sld [smem:[#allocation6 + $0x10]] }
 0x358   : > { %v979_v49 = vmax.f32 %v977_v14, 0.0  ;;  %v1089_v56 = vmax.f32 %v1087_v24, 0.0  ;;  %v1804_v27 = vadd.f32 %v10983_v5, %v1790_v44  ;;  %v9140_v37 = vadd.f32 %v2551_v59, %v2547_v57  ;;  %v10987_v44 = vld [vmem:[#allocation109_spill] sm:$0xff] }
 0x359   : > { %v2548_v25 = vmul.f32 %v8612_v53, %v2546_v8  ;;  %v2552_v28 = vmul.f32 %v8633_v13, %v2550_v26  ;;  %v1694_v11 = vadd.f32 %v10986_v38, %v1680_v12  ;;  %v2658_v14 = vmul.f32 %v8576_v30, %v2657_v1  ;;  %v10988_v8 = vld [vmem:[#allocation110_spill] sm:$0xff] }
 0x35a   : > { %v9146_v51 = vpop.permute.xlu1 %3174  ;;  %v9148_v39 = vpop.permute.xlu0 %3075  ;;  %v2662_v24 = vmul.f32 %v8628_v17, %v2661_v43  ;;  %v2012_v57 = vadd.f32 %v10987_v44, %v8756_v40  ;;  %v1902_v59 = vadd.f32 %v10988_v8, %v8742_v42  ;;  %v10989_v26 = vstv %s8783_s28  ;;  %v10992_v12 = vld [vmem:[#allocation114_spill] sm:$0xff]  ;;  %v10993_v44 = vld [vmem:[#allocation115_spill] sm:$0xff]  ;;  %v10994_v8 = vld [vmem:[#allocation116_spill] sm:$0xff] }
 0x35b   : > { %10984 = vst [vmem:[#allocation43_spill] sm:$0xff] %v9146_v51  ;;  %10985 = vst [vmem:[#allocation44_spill] sm:$0xff] %v9148_v39  ;;  %v1198_v36 = vadd.f32 %v10989_v26, %v1194_v61  ;;  %v10990_v5 = vstv %s8674_s2  ;;  %v10991_v51 = vld [vmem:[#allocation113_spill] sm:$0xff]  ;;  %v1181_v38 = vadd.f32 %v10992_v12, %v9059_v31  ;;  %v9167_v60 = vsel %vm535_vm0, %v979_v49, 0.0  ;;  %s9179_s2 = sld [smem:[#allocation3 + $0xb0]]  ;;  %v10999_v49 = vld [vmem:[#allocation118_spill] sm:$0xff] }
 0x35c   : > { %v1088_v35 = vadd.f32 %v10990_v5, %v1084_v9  ;;  %v1291_v39 = vadd.f32 %v10991_v51, %v9055_v48  ;;  %v9170_v40 = vsel %vm535_vm0, %v1089_v56, 0.0  ;;  %v1499_v42 = vadd.f32 %v10993_v44, %v1485_v34  ;;  %v10995_v26 = vld [vmem:[#allocation117_spill] sm:$0xff]  ;;  %v11000_v51 = vld [vmem:[#allocation135_spill] sm:$0xff]  ;;  %v11001_v12 = vld [vmem:[#allocation136_spill] sm:$0xff] }
 0x35d   : > { %v1389_v61 = vadd.f32 %v10994_v8, %v1375_v15  ;;  %v9175_v9 = vadd.f32 %v10995_v26, %v1693_v47  ;;  %v9177_v5 = vadd.f32 %v2552_v28, %v2548_v25  ;;  %v1597_v56 = vadd.f32 %v10999_v49, %v1583_v2  ;;  %v11003_v26 = vld [vmem:[#allocation119_spill] sm:$0xff] }
 0x35e   : > { %v9183_v31 = vpop.permute.xlu1 %3382  ;;  %v9185_v48 = vpop.permute.xlu0 %3283  ;;  %v1305_v34 = vadd.f32 %v11000_v51, %v1291_v39  ;;  %v1195_v15 = vadd.f32 %v11001_v12, %v1181_v38  ;;  %v9190_v44 = vadd.f32 %v2662_v24, %v2658_v14  ;;  %v2768_v47 = vstv %s9132_s23  ;;  %v11005_v38 = vld [vmem:[#allocation121_spill] sm:$0xff]  ;;  %v11007_v51 = vld [vmem:[#allocation126_spill] sm:$0xff]  ;;  %s9497_s23 = sld [smem:[#allocation3 + $0xd9]] }
 0x35f   : > { %10996 = vst [vmem:[#allocation45_spill] sm:$0xff] %v9177_v5  ;;  %10997 = vst [vmem:[#allocation46_spill] sm:$0xff] %v9183_v31  ;;  %v2772_v25 = vstv %s9134_s20  ;;  %v1090_v28 = vmax.f32 %v1088_v35, 0.0  ;;  %v1200_v8 = vmax.f32 %v1198_v36, 0.0  ;;  %v1915_v31 = vadd.f32 %v11003_v26, %v1901_v0  ;;  %v11006_v24 = vld [vmem:[#allocation125_spill] sm:$0xff]  ;;  %v11013_v26 = vld [vmem:[#allocation127_spill] sm:$0xff] }
 0x360   : > { %10998 = vst [vmem:[#allocation47_spill] sm:$0xff] %v9185_v48  ;;  %11002 = vst [vmem:[#allocation48_spill] sm:$0xff] %v9190_v44  ;;  %v11004_v48 = vld [vmem:[#allocation120_spill] sm:$0xff]  ;;  %v2659_v2 = vmul.f32 %v8612_v53, %v2657_v1  ;;  %v2663_v39 = vmul.f32 %v8633_v13, %v2661_v43  ;;  %v9202_v14 = vadd.f32 %v11005_v38, %v8843_v6  ;;  %v11010_v0 = vstv %s8866_s25  ;;  %s9504_s20 = sld [smem:[#allocation6 + $0x11]] }
 0x361   : > { %v1805_v4 = vadd.f32 %v11004_v48, %v1791_v19  ;;  %v1402_v49 = vadd.f32 %v11006_v24, %v1388_v52  ;;  %v1292_v12 = vadd.f32 %v11007_v51, %v1278_v50  ;;  %v1309_v19 = vadd.f32 %v11010_v0, %v1305_v34  ;;  %v11012_v48 = vld [vmem:[#allocation122_spill] sm:$0xff]  ;;  %v11014_v51 = vld [vmem:[#allocation128_spill] sm:$0xff]  ;;  %v11015_v34 = vld [vmem:[#allocation147_spill] sm:$0xff] }
 0x362   : > { %v9207_v5 = vpop.permute.xlu1 %3590  ;;  %v9209_v35 = vpop.permute.xlu0 %3491  ;;  %v11011_v1 = vstv %s8783_s28  ;;  %v2769_v43 = vmul.f32 %v8576_v30, %v2768_v47  ;;  %v2773_v6 = vmul.f32 %v8628_v17, %v2772_v25  ;;  %v2013_v52 = vadd.f32 %v11012_v48, %v8827_v7  ;;  %v11019_v7 = vld [vmem:[#allocation130_spill] sm:$0xff]  ;;  %s9235_s28 = sld [smem:[#allocation3 + $0xb8]] }
 0x363   : > { %11008 = vst [vmem:[#allocation63_spill] sm:$0xff] %v9207_v5  ;;  %11009 = vst [vmem:[#allocation64_spill] sm:$0xff] %v9209_v35  ;;  %v1199_v36 = vadd.f32 %v11011_v1, %v1195_v15  ;;  %v1610_v50 = vadd.f32 %v11013_v26, %v1596_v3  ;;  %v9221_v38 = vsel %vm535_vm0, %v1090_v28, 0.0  ;;  %v9224_v24 = vsel %vm535_vm0, %v1200_v8, 0.0  ;;  %v11016_v15 = vld [vmem:[#allocation148_spill] sm:$0xff]  ;;  %v11018_v35 = vld [vmem:[#allocation129_spill] sm:$0xff] }
 0x364   : > { %v1500_v46 = vadd.f32 %v11014_v51, %v1486_v45  ;;  %v1416_v0 = vadd.f32 %v11015_v34, %v1402_v49  ;;  %v1306_v1 = vadd.f32 %v11016_v15, %v1292_v12  ;;  %v9229_v5 = vadd.f32 %v2663_v39, %v2659_v2  ;;  %v11022_v49 = vld [vmem:[#allocation131_spill] sm:$0xff]  ;;  %v11023_v39 = vld [vmem:[#allocation132_spill] sm:$0xff]  ;;  %v11029_v26 = vld [vmem:[#allocation138_spill] sm:$0xff] }
 0x365   : > { %v1818_v44 = vadd.f32 %v11018_v35, %v1804_v27  ;;  %v1708_v48 = vadd.f32 %v11019_v7, %v1694_v11  ;;  %v2879_v3 = vstv %s9179_s2  ;;  %v2883_v28 = vstv %s9181_s15  ;;  %s9548_s2 = sld [smem:[#allocation3 + $0xe1]]  ;;  %s9585_s15 = sld [smem:[#allocation6 + $0x12]] }
 0x366   : > { %11017 = vst [vmem:[#allocation49_spill] sm:$0xff] %v9229_v5  ;;  %v9239_v45 = vpop.permute.xlu1 %3798  ;;  %v9241_v8 = vpop.permute.xlu0 %3699  ;;  %v9244_v12 = vadd.f32 %v11022_v49, %v2012_v57  ;;  %v9246_v2 = vadd.f32 %v2773_v6, %v2769_v43  ;;  %v1201_v27 = vmax.f32 %v1199_v36, 0.0  ;;  %v1311_v11 = vmax.f32 %v1309_v19, 0.0  ;;  %v11026_v6 = vld [vmem:[#allocation133_spill] sm:$0xff]  ;;  %v11027_v19 = vld [vmem:[#allocation134_spill] sm:$0xff] }
 0x367   : > { %11020 = vst [vmem:[#allocation50_spill] sm:$0xff] %v9239_v45  ;;  %11021 = vst [vmem:[#allocation52_spill] sm:$0xff] %v9241_v8  ;;  %v1916_v35 = vadd.f32 %v11023_v39, %v1902_v59  ;;  %v2770_v51 = vmul.f32 %v8612_v53, %v2768_v47  ;;  %v2774_v34 = vmul.f32 %v8633_v13, %v2772_v25  ;;  %v11024_v15 = vstv %s8953_s24  ;;  %v11028_v59 = vld [vmem:[#allocation137_spill] sm:$0xff] }
 0x368   : > { %v1420_v7 = vadd.f32 %v11024_v15, %v1416_v0  ;;  %v11025_v45 = vstv %s8866_s25  ;;  %v2880_v57 = vmul.f32 %v8576_v30, %v2879_v3  ;;  %v2884_v43 = vmul.f32 %v8628_v17, %v2883_v28  ;;  %v11032_v0 = vld [vmem:[#allocation139_spill] sm:$0xff]  ;;  %s9277_s25 = sld [smem:[#allocation3 + $0xc0]] }
 0x369   : > { %v1310_v8 = vadd.f32 %v11025_v45, %v1306_v1  ;;  %v2234_v49 = vadd.f32 %v11026_v6, %v8926_v58  ;;  %v2124_v36 = vadd.f32 %v11027_v19, %v8909_v62  ;;  %v1513_v39 = vadd.f32 %v11028_v59, %v1499_v42  ;;  %v11033_v45 = vld [vmem:[#allocation140_spill] sm:$0xff]  ;;  %v11034_v42 = vld [vmem:[#allocation141_spill] sm:$0xff]  ;;  %v11037_v59 = vld [vmem:[#allocation142_spill] sm:$0xff] }
 0x36a   : > { %v1403_v47 = vadd.f32 %v11029_v26, %v1389_v61  ;;  %v9266_v5 = vpop.permute.xlu1 %3077  ;;  %v9268_v25 = vpop.permute.xlu0 %3907  ;;  %v9272_v1 = vadd.f32 %v11032_v0, %v9175_v9  ;;  %v9275_v15 = vadd.f32 %v11033_v45, %v1597_v56  ;;  %v9282_v62 = vsel %vm535_vm0, %v1201_v27, 0.0  ;;  %v11035_v26 = vld [vmem:[#allocation159_spill] sm:$0xff]  ;;  %v11036_v9 = vld [vmem:[#allocation160_spill] sm:$0xff] }
 0x36b   : > { %11030 = vst [vmem:[#allocation53_spill] sm:$0xff] %v9266_v5  ;;  %11031 = vst [vmem:[#allocation54_spill] sm:$0xff] %v9268_v25  ;;  %v9285_v58 = vsel %vm535_vm0, %v1311_v11, 0.0  ;;  %v9288_v61 = vadd.f32 %v11034_v42, %v1915_v31  ;;  %v1527_v6 = vadd.f32 %v11035_v26, %v1513_v39  ;;  %v9292_v56 = vadd.f32 %v2774_v34, %v2770_v51  ;;  %v11044_v26 = vld [vmem:[#allocation149_spill] sm:$0xff]  ;;  %v11048_v42 = vld [vmem:[#allocation151_spill] sm:$0xff] }
 0x36c   : > { %v1417_v19 = vadd.f32 %v11036_v9, %v1403_v47  ;;  %v9295_v0 = vadd.f32 %v11037_v59, %v1805_v4  ;;  %v9297_v45 = vadd.f32 %v2884_v43, %v2880_v57  ;;  %v1312_v27 = vmax.f32 %v1310_v8, 0.0  ;;  %v11040_v4 = vld [vmem:[#allocation143_spill] sm:$0xff]  ;;  %v11041_v57 = vld [vmem:[#allocation144_spill] sm:$0xff] }
 0x36d   : > { %v1422_v25 = vmax.f32 %v1420_v7, 0.0  ;;  %v2990_v11 = vstv %s9235_s28  ;;  %v2994_v5 = vstv %s9237_s14  ;;  %v2881_v31 = vmul.f32 %v8612_v53, %v2879_v3  ;;  %v11042_v7 = vld [vmem:[#allocation145_spill] sm:$0xff]  ;;  %v11043_v3 = vld [vmem:[#allocation146_spill] sm:$0xff]  ;;  %s9695_s28 = sld [smem:[#allocation3 + $0xf0]]  ;;  %s9697_s14 = sld [smem:[#allocation3 + $0xf1]] }
 0x36e   : > { %v2885_v39 = vmul.f32 %v8633_v13, %v2883_v28  ;;  %v9305_v47 = vpop.permute.xlu1 %3285  ;;  %v9307_v51 = vpop.permute.xlu0 %3186  ;;  %v2137_v34 = vadd.f32 %v11040_v4, %v9202_v14  ;;  %v2027_v8 = vadd.f32 %v11041_v57, %v2013_v52  ;;  %v9314_v43 = vadd.f32 %v11042_v7, %v9016_v10  ;;  %v11047_v52 = vld [vmem:[#allocation150_spill] sm:$0xff] }
 0x36f   : > { %11038 = vst [vmem:[#allocation55_spill] sm:$0xff] %v9305_v47  ;;  %11039 = vst [vmem:[#allocation56_spill] sm:$0xff] %v9307_v51  ;;  %537 = vadd.xlane.f32.xlu0 %v8818_v20  ;;  %v9320_v28 = vadd.f32 %v11043_v3, %v8995_v22  ;;  %v1624_v9 = vadd.f32 %v11044_v26, %v1610_v50  ;;  %v11045_v59 = vstv %s9024_s0  ;;  %v11046_v14 = vstv %s8953_s24  ;;  %v11049_v3 = vld [vmem:[#allocation152_spill] sm:$0xff]  ;;  %v11052_v26 = vld [vmem:[#allocation171_spill] sm:$0xff]  ;;  %s9352_s24 = sld [smem:[#allocation3 + $0xc8]] }
 0x370   : > { %v1531_v47 = vadd.f32 %v11045_v59, %v1527_v6  ;;  %v1421_v4 = vadd.f32 %v11046_v14, %v1417_v19  ;;  %v1514_v57 = vadd.f32 %v11047_v52, %v1500_v46  ;;  %v2991_v10 = vmul.f32 %v8576_v30, %v2990_v11  ;;  %v11053_v14 = vld [vmem:[#allocation172_spill] sm:$0xff] }
 0x371   : > { %v2995_v7 = vmul.f32 %v8628_v17, %v2994_v5  ;;  %v9331_v20 = vsel %vm535_vm0, %v1312_v27, 0.0  ;;  %v9334_v22 = vadd.f32 %v11048_v42, %v1818_v44  ;;  %v9337_v51 = vadd.f32 %v11049_v3, %v1708_v48  ;;  %v11054_v48 = vld [vmem:[#allocation153_spill] sm:$0xff] }
 0x372   : > { %v9339_v50 = vadd.f32 %v2885_v39, %v2881_v31  ;;  %v9341_v6 = vpop.permute.xlu1 %3493  ;;  %v9343_v19 = vpop.permute.xlu0 %3394  ;;  %v9346_v46 = vsel %vm535_vm0, %v1422_v25, 0.0  ;;  %v1638_v59 = vadd.f32 %v11052_v26, %v1624_v9  ;;  %v1528_v27 = vadd.f32 %v11053_v14, %v1514_v57  ;;  %v11055_v39 = vld [vmem:[#allocation154_spill] sm:$0xff]  ;;  %v11056_v57 = vld [vmem:[#allocation155_spill] sm:$0xff] }
 0x373   : > { %11050 = vst [vmem:[#allocation57_spill] sm:$0xff] %v9341_v6  ;;  %11051 = vst [vmem:[#allocation58_spill] sm:$0xff] %v9343_v19  ;;  %v3101_v52 = vstv %s9277_s25  ;;  %v3105_v44 = vstv %s9279_s29  ;;  %648 = vadd.xlane.f32.xlu0 %v8896_v32  ;;  %v2040_v31 = vadd.f32 %v11054_v48, %v9244_v12  ;;  %v9360_v42 = vadd.f32 %v11055_v39, %v1916_v35  ;;  %v11057_v12 = vld [vmem:[#allocation156_spill] sm:$0xff]  ;;  %s9766_s25 = sld [smem:[#allocation3 + $0xf8]]  ;;  %s9768_s29 = sld [smem:[#allocation3 + $0xf9]] }
 0x374   : > { %540 = vadd.xlane.f32.xlu1 %v8899_v29  ;;  %v1423_v25 = vmax.f32 %v1421_v4, 0.0  ;;  %v1533_v9 = vmax.f32 %v1531_v47, 0.0  ;;  %v9364_v3 = vadd.f32 %v11056_v57, %v2234_v49  ;;  %v9366_v26 = vadd.f32 %v2995_v7, %v2991_v10  ;;  %v11060_v49 = vld [vmem:[#allocation157_spill] sm:$0xff] }
 0x375   : > { %v2992_v14 = vmul.f32 %v8612_v53, %v2990_v11  ;;  %v2996_v32 = vmul.f32 %v8633_v13, %v2994_v5  ;;  %v2138_v35 = vadd.f32 %v11057_v12, %v2124_v36  ;;  %v3102_v29 = vmul.f32 %v8576_v30, %v3101_v52  ;;  %v11061_v11 = vld [vmem:[#allocation158_spill] sm:$0xff]  ;;  %v11064_v12 = vld [vmem:[#allocation161_spill] sm:$0xff] }
 0x376   : > { %v3106_v4 = vmul.f32 %v8628_v17, %v3105_v44  ;;  %v9376_v39 = vpop.permute.xlu1 %3701  ;;  %v9378_v47 = vpop.permute.xlu0 %3602  ;;  %v2456_v10 = vadd.f32 %v11060_v49, %v9081_v54  ;;  %v9384_v7 = vadd.f32 %v11061_v11, %v9077_v63  ;;  %v11062_v5 = vstv %s9091_s19 }
 0x377   : > { %11058 = vst [vmem:[#allocation59_spill] sm:$0xff] %v9376_v39  ;;  %11059 = vst [vmem:[#allocation60_spill] sm:$0xff] %v9378_v47  ;;  %v1642_v57 = vadd.f32 %v11062_v5, %v1638_v59  ;;  %v11063_v6 = vstv %s9024_s0  ;;  %651 = vadd.xlane.f32.xlu0 %v8976_v16  ;;  %v1735_v48 = vadd.f32 %v11064_v12, %v9272_v1  ;;  %v11065_v39 = vld [vmem:[#allocation162_spill] sm:$0xff]  ;;  %v9397_v54 = vsel %vm535_vm0, %v1423_v25, 0.0  ;;  %v11067_v16 = vld [vmem:[#allocation164_spill] sm:$0xff]  ;;  %s9415_s0 = sld [smem:[#allocation3 + $0xd0]] }
 0x378   : > { %v1532_v36 = vadd.f32 %v11063_v6, %v1528_v27  ;;  %v1625_v19 = vadd.f32 %v11065_v39, %v9275_v15  ;;  %759 = vadd.xlane.f32.xlu1 %v8985_v55  ;;  %v9400_v63 = vsel %vm535_vm0, %v1533_v9, 0.0  ;;  %v11066_v6 = vld [vmem:[#allocation163_spill] sm:$0xff]  ;;  %v9408_v1 = vadd.f32 %v11067_v16, %v9295_v0  ;;  %v11068_v27 = vld [vmem:[#allocation165_spill] sm:$0xff]  ;;  %v11069_v55 = vld [vmem:[#allocation166_spill] sm:$0xff] }
 0x379   : > { %v9404_v59 = vadd.f32 %v11066_v6, %v9288_v61  ;;  %v9411_v15 = vadd.f32 %v11068_v27, %v2137_v34  ;;  %v9413_v39 = vadd.f32 %v2996_v32, %v2992_v14  ;;  %v9420_v25 = vadd.f32 %v11069_v55, %v2027_v8  ;;  %v11070_v9 = vld [vmem:[#allocation183_spill] sm:$0xff]  ;;  %v11071_v61 = vld [vmem:[#allocation184_spill] sm:$0xff]  ;;  %v11076_v27 = vld [vmem:[#allocation169_spill] sm:$0xff] }
 0x37a   : > { %v1749_v49 = vadd.f32 %v11070_v9, %v1735_v48  ;;  %v1639_v11 = vadd.f32 %v11071_v61, %v1625_v19  ;;  %v9424_v5 = vadd.f32 %v3106_v4, %v3102_v29  ;;  %v9426_v0 = vpop.permute.xlu1 %3909  ;;  %v9428_v34 = vpop.permute.xlu0 %3810  ;;  %v3212_v14 = vstv %s9352_s24  ;;  %v11074_v48 = vld [vmem:[#allocation167_spill] sm:$0xff]  ;;  %v11075_v29 = vld [vmem:[#allocation168_spill] sm:$0xff]  ;;  %s9830_s24 = sld [smem:[#allocation6 + $0x16]] }
 0x37b   : > { %11072 = vst [vmem:[#allocation75_spill] sm:$0xff] %v9426_v0  ;;  %11073 = vst [vmem:[#allocation76_spill] sm:$0xff] %v9428_v34  ;;  %v3216_v32 = vstv %s9354_s26  ;;  %762 = vadd.xlane.f32.xlu0 %v9068_v33  ;;  %v1534_v8 = vmax.f32 %v1532_v36, 0.0  ;;  %v1644_v12 = vmax.f32 %v1642_v57, 0.0  ;;  %v2359_v19 = vadd.f32 %v11074_v48, %v9314_v43  ;;  %v11077_v33 = vld [vmem:[#allocation173_spill] sm:$0xff]  ;;  %v11078_v36 = vld [vmem:[#allocation174_spill] sm:$0xff] }
 0x37c   : > { %v9439_v4 = vadd.f32 %v11075_v29, %v9320_v28  ;;  %v3103_v6 = vmul.f32 %v8612_v53, %v3101_v52  ;;  %v3107_v16 = vmul.f32 %v8633_v13, %v3105_v44  ;;  %870 = vadd.xlane.f32.xlu1 %v9071_v21  ;;  %v9446_v55 = vadd.f32 %v11076_v27, %v9140_v37  ;;  %v11085_v9 = vld [vmem:[#allocation196_spill] sm:$0xff]  ;;  %s9864_s26 = sld [smem:[#allocation6 + $0x17]] }
 0x37d   : > { %v1846_v57 = vadd.f32 %v11077_v33, %v9334_v22  ;;  %v1736_v43 = vadd.f32 %v11078_v36, %v9337_v51  ;;  %v11079_v61 = vstv %s9144_s13  ;;  %v11080_v48 = vstv %s9091_s19  ;;  %v11081_v22 = vld [vmem:[#allocation170_spill] sm:$0xff]  ;;  %v11082_v51 = vld [vmem:[#allocation175_spill] sm:$0xff]  ;;  %s9495_s19 = sld [smem:[#allocation3 + $0xd8]] }
 0x37e   : > { %v1753_v28 = vadd.f32 %v11079_v61, %v1749_v49  ;;  %v1643_v29 = vadd.f32 %v11080_v48, %v1639_v11  ;;  %v3213_v52 = vmul.f32 %v8576_v30, %v3212_v14  ;;  %v3217_v21 = vmul.f32 %v8628_v17, %v3216_v32  ;;  %v9459_v44 = vpop.permute.xlu1 %3297  ;;  %v9461_v37 = vpop.permute.xlu0 %3188  ;;  %v11083_v11 = vld [vmem:[#allocation176_spill] sm:$0xff]  ;;  %v11084_v61 = vld [vmem:[#allocation195_spill] sm:$0xff] }
 0x37f   : > { %v9465_v27 = vadd.f32 %v11081_v22, %v9123_v41  ;;  %v9468_v33 = vadd.f32 %v11082_v51, %v2040_v31  ;;  %873 = vadd.xlane.f32.xlu0 %v9117_v18  ;;  %v9472_v49 = vsel %vm535_vm0, %v1534_v8, 0.0  ;;  %v9475_v30 = vsel %vm535_vm0, %v1644_v12, 0.0  ;;  %v11086_v18 = vld [vmem:[#allocation177_spill] sm:$0xff]  ;;  %v11087_v8 = vld [vmem:[#allocation178_spill] sm:$0xff]  ;;  %v9523_v0 = vld [vmem:[%s6420_s30] sm:$0xff] }
 0x380   : > { %v9479_v36 = vadd.f32 %v11083_v11, %v9360_v42  ;;  %v1860_v48 = vadd.f32 %v11084_v61, %v1846_v57  ;;  %v1750_v41 = vadd.f32 %v11085_v9, %v1736_v43  ;;  %v9483_v22 = vadd.f32 %v3107_v16, %v3103_v6  ;;  %981 = vadd.xlane.f32.xlu1 %v9126_v23  ;;  %v11088_v6 = vld [vmem:[#allocation179_spill] sm:$0xff]  ;;  %v11091_v9 = vld [vmem:[#allocation180_spill] sm:$0xff] }
 0x381   : > { %v9488_v31 = vadd.f32 %v11086_v18, %v9364_v3  ;;  %v9491_v12 = vadd.f32 %v11087_v8, %v2138_v35  ;;  %v3323_v51 = vstv %s9415_s0  ;;  %v3327_v42 = vstv %s9417_s16  ;;  %s9896_s0 = sld [smem:[#allocation6 + $0x19]]  ;;  %s9926_s16 = sld [smem:[#allocation6 + $0x1a]] }
 0x382   : > { %v9500_v16 = vadd.f32 %v11088_v6, %v2456_v10  ;;  %v9502_v23 = vadd.f32 %v3217_v21, %v3213_v52  ;;  %v9506_v3 = vpop.permute.xlu1 %3505  ;;  %v9508_v35 = vpop.permute.xlu0 %3396  ;;  %v1645_v57 = vmax.f32 %v1643_v29, 0.0  ;;  %v1755_v43 = vmax.f32 %v1753_v28, 0.0 }
 0x383   : > { %11089 = vst [vmem:[#allocation61_spill] sm:$0xff] %v9506_v3  ;;  %11090 = vst [vmem:[#allocation62_spill] sm:$0xff] %v9508_v35  ;;  %v9512_v11 = vadd.f32 %v11091_v9, %v9384_v7  ;;  %v3214_v18 = vmul.f32 %v8612_v53, %v3212_v14  ;;  %v3218_v10 = vmul.f32 %v8633_v13, %v3216_v32  ;;  %984 = vadd.xlane.f32.xlu0 %v9167_v60  ;;  %v11094_v7 = vld [vmem:[#allocation48_spill] sm:$0xff]  ;;  %v11095_v9 = vld [vmem:[#allocation181_spill] sm:$0xff] }
 0x384   : > { %v11092_v52 = vstv %s9194_s11  ;;  %v11093_v8 = vstv %s9144_s13  ;;  %v3324_v29 = vmul.f32 %v9523_v0, %v3323_v51  ;;  %v3328_v28 = vmul.f32 %v8628_v17, %v3327_v42  ;;  %1092 = vadd.xlane.f32.xlu1 %v9170_v40  ;;  %v11096_v53 = vld [vmem:[#allocation45_spill] sm:$0xff]  ;;  %v11097_v14 = vld [vmem:[#allocation182_spill] sm:$0xff]  ;;  %v11101_v17 = vld [vmem:[#allocation188_spill] sm:$0xff]  ;;  %s9546_s13 = sld [smem:[#allocation3 + $0xe0]] }
 0x385   : > { %v1864_v21 = vadd.f32 %v11092_v52, %v1860_v48  ;;  %v1754_v6 = vadd.f32 %v11093_v8, %v1750_v41  ;;  %v2678_v61 = vadd.f32 %v11095_v9, %v11094_v7  ;;  %v9532_v13 = vadd.f32 %v11097_v14, %v11096_v53  ;;  %v11098_v60 = vld [vmem:[#allocation185_spill] sm:$0xff]  ;;  %v11099_v48 = vld [vmem:[#allocation186_spill] sm:$0xff]  ;;  %v11100_v52 = vld [vmem:[#allocation187_spill] sm:$0xff] }
 0x386   : > { %v1957_v32 = vadd.f32 %v11098_v60, %v9404_v59  ;;  %v1847_v41 = vadd.f32 %v11099_v48, %v9408_v1  ;;  %v9540_v8 = vadd.f32 %v11100_v52, %v9411_v15  ;;  %v9544_v40 = vadd.f32 %v11101_v17, %v9420_v25  ;;  %v9550_v7 = vpop.permute.xlu1 %3713  ;;  %v9552_v59 = vpop.permute.xlu0 %3604  ;;  %v11104_v25 = vld [vmem:[#allocation189_spill] sm:$0xff]  ;;  %v11105_v53 = vld [vmem:[#allocation207_spill] sm:$0xff]  ;;  %v11106_v60 = vld [vmem:[#allocation208_spill] sm:$0xff] }
 0x387   : > { %11102 = vst [vmem:[#allocation65_spill] sm:$0xff] %v9550_v7  ;;  %11103 = vst [vmem:[#allocation66_spill] sm:$0xff] %v9552_v59  ;;  %v9555_v1 = vsel %vm535_vm0, %v1645_v57, 0.0  ;;  %v9558_v15 = vsel %vm535_vm0, %v1755_v43, 0.0  ;;  %v9561_v9 = vadd.f32 %v11104_v25, %v2359_v19  ;;  %v9565_v52 = vadd.f32 %v3218_v10, %v3214_v18  ;;  %1095 = vadd.xlane.f32.xlu0 %v9221_v38  ;;  %v11107_v17 = vld [vmem:[#allocation190_spill] sm:$0xff]  ;;  %v9582_v38 = vld [vmem:[%s6425_s3 + $0x8] sm:$0xff] }
 0x388   : > { %v1971_v14 = vadd.f32 %v11105_v53, %v1957_v32  ;;  %v1861_v48 = vadd.f32 %v11106_v60, %v1847_v41  ;;  %v9570_v57 = vadd.f32 %v11107_v17, %v9439_v4  ;;  %v9572_v34 = vadd.f32 %v3328_v28, %v3324_v29  ;;  %1203 = vadd.xlane.f32.xlu1 %v9224_v24  ;;  %v9578_v41 = vld [vmem:[%s6420_s30 + $0x8] sm:$0xff]  ;;  %v11108_v10 = vld [vmem:[#allocation191_spill] sm:$0xff]  ;;  %v11113_v17 = vld [vmem:[#allocation194_spill] sm:$0xff]  ;;  %s9639_s30 = sld [smem:[#allocation3 + $0xe9]] }
 0x389   : > { %v1756_v43 = vmax.f32 %v1754_v6, 0.0  ;;  %v1866_v19 = vmax.f32 %v1864_v21, 0.0  ;;  %v3434_v32 = vstv %s9495_s19  ;;  %v3438_v25 = vstv %s9497_s23  ;;  %v11109_v6 = vld [vmem:[#allocation192_spill] sm:$0xff]  ;;  %v11110_v29 = vld [vmem:[#allocation193_spill] sm:$0xff]  ;;  %s9978_s19 = sld [smem:[#allocation6 + $0x1c]]  ;;  %s10079_s23 = sld [smem:[#allocation6 + $0x1d]] }
 0x38a   : > { %v3325_v18 = vmul.f32 %v9578_v41, %v3323_v51  ;;  %v3329_v4 = vmul.f32 %v9582_v38, %v3327_v42  ;;  %v2581_v24 = vadd.f32 %v11108_v10, %v9446_v55  ;;  %v2471_v21 = vadd.f32 %v11109_v6, %v9465_v27  ;;  %v9596_v60 = vpop.permute.xlu0 %3812  ;;  %v11112_v51 = vld [vmem:[#allocation49_spill] sm:$0xff]  ;;  %v9608_v27 = vpop.permute.xlu1 %3921  ;;  %v11122_v53 = vld [vmem:[#allocation220_spill] sm:$0xff] }
 0x38b   : > { %v9593_v28 = vadd.f32 %v11110_v29, %v9246_v2  ;;  %11111 = vst [vmem:[#allocation67_spill] sm:$0xff] %v9596_v60  ;;  %v9600_v7 = vadd.f32 %v11113_v17, %v11112_v51  ;;  %v11114_v42 = vld [vmem:[#allocation197_spill] sm:$0xff]  ;;  %v11115_v47 = vstv %s9248_s1  ;;  %v11116_v55 = vstv %s9194_s11  ;;  %11117 = vst [vmem:[#allocation68_spill] sm:$0xff] %v9608_v27  ;;  %1206 = vadd.xlane.f32.xlu0 %v9282_v62  ;;  %v11118_v2 = vld [vmem:[#allocation198_spill] sm:$0xff]  ;;  %s9653_s11 = sld [smem:[#allocation6 + $0x13]] }
 0x38c   : > { %v2068_v59 = vadd.f32 %v11114_v42, %v9468_v33  ;;  %v1975_v3 = vadd.f32 %v11115_v47, %v1971_v14  ;;  %v1865_v10 = vadd.f32 %v11116_v55, %v1861_v48  ;;  %v1958_v6 = vadd.f32 %v11118_v2, %v9479_v36  ;;  %v9615_v51 = vld [vmem:[%s6425_s3] sm:$0xff]  ;;  %1314 = vadd.xlane.f32.xlu1 %v9285_v58  ;;  %s9637_s3 = sld [smem:[#allocation3 + $0xe8]]  ;;  %v11132_v35 = vld [vmem:[#allocation209_spill] sm:$0xff] }
 0x38d   : > { %v3435_v29 = vmul.f32 %v9523_v0, %v3434_v32  ;;  %v3439_v17 = vmul.f32 %v9615_v51, %v3438_v25  ;;  %v9620_v47 = vsel %vm535_vm0, %v1756_v43, 0.0  ;;  %v11119_v33 = vld [vmem:[#allocation199_spill] sm:$0xff]  ;;  %v11120_v62 = vld [vmem:[#allocation200_spill] sm:$0xff]  ;;  %v9628_v42 = vadd.f32 %v3329_v4, %v3325_v18  ;;  %v11124_v18 = vld [vmem:[#allocation202_spill] sm:$0xff] }
 0x38e   : > { %v9624_v14 = vadd.f32 %v11119_v33, %v9488_v31  ;;  %v2166_v48 = vadd.f32 %v11120_v62, %v9491_v12  ;;  %v9631_v36 = vsel %vm535_vm0, %v1866_v19, 0.0  ;;  %v11121_v55 = vld [vmem:[#allocation219_spill] sm:$0xff]  ;;  %v1972_v27 = vadd.f32 %v11122_v53, %v1958_v6  ;;  %v9641_v31 = vpop.permute.xlu0 %3299  ;;  %v11123_v12 = vld [vmem:[#allocation201_spill] sm:$0xff] }
 0x38f   : > { %v2082_v2 = vadd.f32 %v11121_v55, %v2068_v59  ;;  %v3545_v58 = vstv %s9546_s13  ;;  %v3549_v60 = vstv %s9548_s2  ;;  %v2484_v43 = vadd.f32 %v11123_v12, %v9500_v16  ;;  %1317 = vadd.xlane.f32.xlu0 %v9331_v20  ;;  %v11125_v53 = vld [vmem:[#allocation203_spill] sm:$0xff]  ;;  %v11126_v16 = vld [vmem:[#allocation204_spill] sm:$0xff]  ;;  %v9661_v12 = vpop.permute.xlu1 %3408  ;;  %s10115_s13 = sld [smem:[#allocation6 + $0x1f]] }
 0x390   : > { %v2374_v19 = vadd.f32 %v11124_v18, %v9512_v11  ;;  %v1867_v59 = vmax.f32 %v1865_v10, 0.0  ;;  %v1977_v4 = vmax.f32 %v1975_v3, 0.0  ;;  %v2692_v6 = vadd.f32 %v11125_v53, %v2678_v61  ;;  %1425 = vadd.xlane.f32.xlu1 %v9346_v46  ;;  %11127 = vst [vmem:[#allocation69_spill] sm:$0xff] %v9661_v12  ;;  %v11128_v61 = vld [vmem:[#allocation205_spill] sm:$0xff] }
 0x391   : > { %v9649_v33 = vadd.f32 %v3439_v17, %v3435_v29  ;;  %v3436_v62 = vmul.f32 %v9578_v41, %v3434_v32  ;;  %v3440_v55 = vmul.f32 %v9582_v38, %v3438_v25  ;;  %v2582_v11 = vadd.f32 %v11126_v16, %v9532_v13  ;;  %v11129_v32 = vld [vmem:[#allocation206_spill] sm:$0xff] }
 0x392   : > { %v3546_v10 = vmul.f32 %v9523_v0, %v3545_v58  ;;  %v3550_v3 = vmul.f32 %v9615_v51, %v3549_v60  ;;  %v2900_v29 = vadd.f32 %v11128_v61, %v9297_v45  ;;  %v2790_v25 = vadd.f32 %v11129_v32, %v9292_v56  ;;  %v11133_v16 = vld [vmem:[#allocation210_spill] sm:$0xff]  ;;  %v11134_v56 = vld [vmem:[#allocation211_spill] sm:$0xff] }
 0x393   : > { %v11130_v17 = vstv %s9303_s12  ;;  %v11131_v53 = vstv %s9248_s1  ;;  %v2179_v13 = vadd.f32 %v11132_v35, %v9540_v8  ;;  %v2069_v20 = vadd.f32 %v11133_v16, %v9544_v40  ;;  %1428 = vadd.xlane.f32.xlu0 %v9397_v54  ;;  %v11136_v8 = vld [vmem:[#allocation213_spill] sm:$0xff]  ;;  %v9699_v54 = vpop.permute.xlu0 %3507  ;;  %s9711_s1 = sld [smem:[#allocation6 + $0x14]] }
 0x394   : > { %v2086_v18 = vadd.f32 %v11130_v17, %v2082_v2  ;;  %v1976_v46 = vadd.f32 %v11131_v53, %v1972_v27  ;;  %v9677_v12 = vsel %vm535_vm0, %v1867_v59, 0.0  ;;  %v9680_v45 = vsel %vm535_vm0, %v1977_v4, 0.0  ;;  %v11135_v27 = vld [vmem:[#allocation212_spill] sm:$0xff]  ;;  %1536 = vadd.xlane.f32.xlu1 %v9400_v63  ;;  %v11137_v59 = vld [vmem:[#allocation214_spill] sm:$0xff]  ;;  %v11138_v4 = vld [vmem:[#allocation231_spill] sm:$0xff] }
 0x395   : > { %v9684_v2 = vadd.f32 %v11134_v56, %v9561_v9  ;;  %v9688_v35 = vadd.f32 %v11135_v27, %v9570_v57  ;;  %v9691_v40 = vadd.f32 %v11136_v8, %v2581_v24  ;;  %v9693_v61 = vadd.f32 %v3440_v55, %v3436_v62  ;;  %v11139_v57 = vld [vmem:[#allocation232_spill] sm:$0xff]  ;;  %v11140_v63 = vld [vmem:[#allocation215_spill] sm:$0xff] }
 0x396   : > { %v9703_v9 = vadd.f32 %v11137_v59, %v2471_v21  ;;  %v2193_v32 = vadd.f32 %v11138_v4, %v2179_v13  ;;  %v2083_v17 = vadd.f32 %v11139_v57, %v2069_v20  ;;  %v9707_v24 = vadd.f32 %v3550_v3, %v3546_v10  ;;  %v11141_v21 = vld [vmem:[#allocation216_spill] sm:$0xff]  ;;  %v9719_v10 = vpop.permute.xlu1 %3616  ;;  %v11143_v3 = vld [vmem:[#allocation217_spill] sm:$0xff]  ;;  %v11145_v59 = vld [vmem:[#allocation222_spill] sm:$0xff] }
 0x397   : > { %v3656_v62 = vstv %s9637_s3  ;;  %v3660_v55 = vstv %s9639_s30  ;;  %v1978_v53 = vmax.f32 %v1976_v46, 0.0  ;;  %v2088_v16 = vmax.f32 %v2086_v18, 0.0  ;;  %11142 = vst [vmem:[#allocation70_spill] sm:$0xff] %v9719_v10  ;;  %1539 = vadd.xlane.f32.xlu0 %v9472_v49  ;;  %v11144_v46 = vld [vmem:[#allocation218_spill] sm:$0xff]  ;;  %s419_s3 = sand.u32 1, %s6247_s18  }
 0x398   : > { %v2803_v56 = vadd.f32 %v11140_v63, %v9593_v28  ;;  %v2693_v27 = vadd.f32 %v11141_v21, %v9600_v7  ;;  %v3547_v13 = vmul.f32 %v9578_v41, %v3545_v58  ;;  %v3551_v20 = vmul.f32 %v9582_v38, %v3549_v60  ;;  %1647 = vadd.xlane.f32.xlu1 %v9475_v30 }
 0x399   : > { %v3011_v8 = vadd.f32 %v11143_v3, %v9366_v26  ;;  %v2901_v18 = vadd.f32 %v11144_v46, %v9339_v50  ;;  %v2180_v4 = vadd.f32 %v11145_v59, %v2166_v48  ;;  %v11146_v7 = vstv %s9370_s17  ;;  %v11148_v26 = vld [vmem:[#allocation221_spill] sm:$0xff]  ;;  %v11149_v3 = vld [vmem:[#allocation223_spill] sm:$0xff]  ;;  %v9738_v46 = vpop.permute.xlu0 %3715 }
 0x39a   : > { %v2197_v57 = vadd.f32 %v11146_v7, %v2193_v32  ;;  %v11147_v58 = vstv %s9303_s12  ;;  %v3657_v63 = vmul.f32 %v9523_v0, %v3656_v62  ;;  %v3661_v49 = vmul.f32 %v9615_v51, %v3660_v55  ;;  %v11150_v32 = vld [vmem:[#allocation224_spill] sm:$0xff]  ;;  %v11151_v59 = vld [vmem:[#allocation225_spill] sm:$0xff]  ;;  %s9776_s12 = sld [smem:[#allocation6 + $0x15]] }
 0x39b   : > { %v2087_v60 = vadd.f32 %v11147_v58, %v2083_v17  ;;  %v2290_v21 = vadd.f32 %v11148_v26, %v9624_v14  ;;  %v2498_v50 = vadd.f32 %v11149_v3, %v2484_v43  ;;  %v9741_v48 = vsel %vm535_vm0, %v1978_v53, 0.0  ;;  %v11152_v58 = vld [vmem:[#allocation244_spill] sm:$0xff]  ;;  %1650 = vadd.xlane.f32.xlu0 %v9555_v1  ;;  %v11153_v14 = vld [vmem:[#allocation226_spill] sm:$0xff]  ;;  %v11154_v53 = vld [vmem:[#allocation243_spill] sm:$0xff]  ;;  %v9770_v1 = vpop.permute.xlu1 %3824 }
 0x39c   : > { %v9744_v30 = vsel %vm535_vm0, %v2088_v16, 0.0  ;;  %v2388_v17 = vadd.f32 %v11150_v32, %v2374_v19  ;;  %v9748_v7 = vadd.f32 %v11151_v59, %v2692_v6  ;;  %v2194_v28 = vadd.f32 %v11152_v58, %v2180_v4  ;;  %1758 = vadd.xlane.f32.xlu1 %v9558_v15  ;;  %v11155_v19 = vld [vmem:[#allocation227_spill] sm:$0xff]  ;;  %11156 = vst [vmem:[#allocation71_spill] sm:$0xff] %v9770_v1 }
 0x39d   : > { %v9751_v10 = vadd.f32 %v3551_v20, %v3547_v13  ;;  %v9755_v43 = vadd.f32 %v11153_v14, %v2582_v11  ;;  %v2304_v26 = vadd.f32 %v11154_v53, %v2290_v21  ;;  %v3767_v3 = vstv %s9695_s28  ;;  %v11157_v20 = vld [vmem:[#allocation228_spill] sm:$0xff]  ;;  %v11162_v53 = vld [vmem:[#allocation234_spill] sm:$0xff] }
 0x39e   : > { %v3771_v16 = vstv %s9697_s14  ;;  %v9762_v6 = vadd.f32 %v11155_v19, %v2900_v29  ;;  %v9764_v32 = vadd.f32 %v3661_v49, %v3657_v63  ;;  %v2089_v11 = vmax.f32 %v2087_v60, 0.0  ;;  %v11158_v29 = vld [vmem:[#allocation229_spill] sm:$0xff] }
 0x39f   : > { %v2199_v13 = vmax.f32 %v2197_v57, 0.0  ;;  %v2804_v4 = vadd.f32 %v11157_v20, %v2790_v25  ;;  %v3658_v59 = vmul.f32 %v9578_v41, %v3656_v62  ;;  %v3662_v15 = vmul.f32 %v9582_v38, %v3660_v55  ;;  %1761 = vadd.xlane.f32.xlu0 %v9620_v47  ;;  %v11160_v25 = vld [vmem:[#allocation230_spill] sm:$0xff]  ;;  %v11161_v62 = vld [vmem:[#allocation233_spill] sm:$0xff]  ;;  %v11166_v47 = vld [vmem:[#allocation236_spill] sm:$0xff] }
 0x3a0   : > { %v9780_v63 = vadd.f32 %v11158_v29, %v9424_v5  ;;  %v11159_v49 = vstv %s9370_s17  ;;  %v3768_v14 = vmul.f32 %v9523_v0, %v3767_v3  ;;  %v3772_v60 = vmul.f32 %v9615_v51, %v3771_v16  ;;  %v9797_v29 = vpop.permute.xlu0 %3923  ;;  %1869 = vadd.xlane.f32.xlu1 %v9631_v36  ;;  %v11170_v36 = vld [vmem:[#allocation238_spill] sm:$0xff]  ;;  %s9887_s17 = sld [smem:[#allocation6 + $0x18]] }
 0x3a1   : > { %v2198_v58 = vadd.f32 %v11159_v49, %v2194_v28  ;;  %v9789_v57 = vadd.f32 %v11160_v25, %v9413_v39  ;;  %v2401_v55 = vadd.f32 %v11161_v62, %v9684_v2  ;;  %v2291_v19 = vadd.f32 %v11162_v53, %v9688_v35  ;;  %11164 = vst [vmem:[#allocation87_spill] sm:$0xff] %v9797_v29  ;;  %v11165_v28 = vld [vmem:[#allocation235_spill] sm:$0xff]  ;;  %v11167_v2 = vld [vmem:[#allocation237_spill] sm:$0xff]  ;;  %v11169_v53 = vld [vmem:[#allocation256_spill] sm:$0xff] }
 0x3a2   : > { %v11163_v5 = vstv %s9432_s22  ;;  %v2609_v49 = vadd.f32 %v11165_v28, %v9691_v40  ;;  %v2499_v21 = vadd.f32 %v11166_v47, %v9703_v9  ;;  %v2093_v39 = vsel %vm535_vm0, %v2089_v11, 0.0  ;;  %v11168_v35 = vld [vmem:[#allocation255_spill] sm:$0xff]  ;;  %v9817_v11 = vpop.permute.xlu1 %3410 }
 0x3a3   : > { %v2308_v20 = vadd.f32 %v11163_v5, %v2304_v26  ;;  %v2201_v25 = vsel %vm535_vm0, %v2199_v13, 0.0  ;;  %v2817_v62 = vadd.f32 %v11167_v2, %v2803_v56  ;;  %v2415_v26 = vadd.f32 %v11168_v35, %v2401_v55  ;;  %v11171_v40 = vld [vmem:[#allocation239_spill] sm:$0xff]  ;;  %1872 = vadd.xlane.f32.xlu0 %v9677_v12  ;;  %v11172_v13 = vld [vmem:[#allocation240_spill] sm:$0xff]  ;;  %v11175_v12 = vld [vmem:[#allocation241_spill] sm:$0xff] }
 0x3a4   : > { %v2305_v5 = vadd.f32 %v11169_v53, %v2291_v19  ;;  %v9809_v29 = vadd.f32 %v3662_v15, %v3658_v59  ;;  %v2707_v1 = vadd.f32 %v11170_v36, %v2693_v27  ;;  %v9813_v28 = vadd.f32 %v11171_v40, %v3011_v8  ;;  %v11173_v59 = vld [vmem:[#allocation245_spill] sm:$0xff]  ;;  %v11174_v19 = vld [vmem:[#allocation246_spill] sm:$0xff]  ;;  %1980 = vadd.xlane.f32.xlu1 %v9680_v45  ;;  %v11179_v40 = vld [vmem:[#allocation267_spill] sm:$0xff] }
 0x3a5   : > { %v9815_v9 = vadd.f32 %v3772_v60, %v3768_v14  ;;  %v2200_v56 = vmax.f32 %v2198_v58, 0.0  ;;  %v9821_v55 = vadd.f32 %v11172_v13, %v2901_v18  ;;  %v2512_v15 = vadd.f32 %v11173_v59, %v2498_v50  ;;  %v11178_v45 = vld [vmem:[#allocation242_spill] sm:$0xff] }
 0x3a6   : > { %v2402_v27 = vadd.f32 %v11174_v19, %v2388_v17  ;;  %v2310_v8 = vmax.f32 %v2308_v20, 0.0  ;;  %v3878_v47 = vstv %s9766_s25  ;;  %v3882_v14 = vstv %s9768_s29  ;;  %v9839_v17 = vpop.permute.xlu0 %3519 }
 0x3a7   : > { %v3769_v60 = vmul.f32 %v9578_v41, %v3767_v3  ;;  %v3773_v2 = vmul.f32 %v9582_v38, %v3771_v16  ;;  %v3233_v58 = vadd.f32 %v11175_v12, %v9502_v23  ;;  %v11176_v18 = vstv %s9504_s20  ;;  %v11180_v3 = vld [vmem:[#allocation268_spill] sm:$0xff]  ;;  %1983 = vadd.xlane.f32.xlu0 %v9741_v48  ;;  %v11181_v23 = vld [vmem:[#allocation247_spill] sm:$0xff]  ;;  %v11183_v48 = vld [vmem:[#allocation249_spill] sm:$0xff] }
 0x3a8   : > { %v2419_v35 = vadd.f32 %v11176_v18, %v2415_v26  ;;  %v11177_v53 = vstv %s9432_s22  ;;  %v2862_v36 = vstv %s9776_s12  ;;  %v3123_v20 = vadd.f32 %v11178_v45, %v9483_v22  ;;  %2091 = vadd.xlane.f32.xlu1 %v9744_v30  ;;  %v11185_v45 = vld [vmem:[#allocation257_spill] sm:$0xff]  ;;  %s9948_s22 = sld [smem:[#allocation6 + $0x1b]]  ;;  %s11292_s12 = sld [smem:[#allocation305_spill]] }
 0x3a9   : > { %v2309_v50 = vadd.f32 %v11177_v53, %v2305_v5  ;;  %v2526_v13 = vadd.f32 %v11179_v40, %v2512_v15  ;;  %v2416_v59 = vadd.f32 %v11180_v3, %v2402_v27  ;;  %v2204_v16 = vsel %vm535_vm0, %v2200_v56, 0.0  ;;  %v11182_v15 = vld [vmem:[#allocation248_spill] sm:$0xff]  ;;  %v11184_v56 = vld [vmem:[#allocation250_spill] sm:$0xff] }
 0x3aa   : > { %v2720_v26 = vadd.f32 %v11181_v23, %v9748_v7  ;;  %v3879_v5 = vmul.f32 %v9523_v0, %v3878_v47  ;;  %v3883_v19 = vmul.f32 %v9615_v51, %v3882_v14  ;;  %v2312_v22 = vsel %vm535_vm0, %v2310_v8, 0.0  ;;  %v9860_v7 = vpop.permute.xlu1 %3618  ;;  %v11186_v40 = vld [vmem:[#allocation258_spill] sm:$0xff] }
 0x3ab   : > { %v2610_v27 = vadd.f32 %v11182_v15, %v9755_v43  ;;  %v2928_v12 = vadd.f32 %v11183_v48, %v9762_v6  ;;  %v2818_v18 = vadd.f32 %v11184_v56, %v2804_v4  ;;  %v9858_v53 = vadd.f32 %v3773_v2, %v3769_v60  ;;  %2094 = vadd.xlane.f32.xlu0 %v2093_v39  ;;  %v11189_v60 = vld [vmem:[#allocation251_spill] sm:$0xff] }
 0x3ac   : > { %v2623_v0 = vadd.f32 %v11185_v45, %v2609_v49  ;;  %v2513_v51 = vadd.f32 %v11186_v40, %v2499_v21  ;;  %v2311_v30 = vmax.f32 %v2309_v50, 0.0  ;;  %v2421_v8 = vmax.f32 %v2419_v35, 0.0  ;;  %v11190_v49 = vld [vmem:[#allocation279_spill] sm:$0xff]  ;;  %v11191_v21 = vld [vmem:[#allocation280_spill] sm:$0xff]  ;;  %v9878_v50 = vpop.permute.xlu0 %3727  ;;  %2202 = vadd.xlane.f32.xlu1 %v2201_v25 }
 0x3ad   : > { %v11187_v3 = vstv %s9585_s15  ;;  %v11188_v23 = vstv %s9504_s20  ;;  %v3880_v6 = vmul.f32 %v9578_v41, %v3878_v47  ;;  %v3884_v4 = vmul.f32 %v9582_v38, %v3882_v14  ;;  %v11192_v35 = vld [vmem:[#allocation252_spill] sm:$0xff]  ;;  %v11193_v41 = vld [vmem:[#allocation253_spill] sm:$0xff]  ;;  %v11194_v38 = vld [vmem:[#allocation254_spill] sm:$0xff]  ;;  %s10097_s20 = sld [smem:[#allocation6 + $0x1e]] }
 0x3ae   : > { %v2530_v43 = vadd.f32 %v11187_v3, %v2526_v13  ;;  %v2420_v15 = vadd.f32 %v11188_v23, %v2416_v59  ;;  %v3136_v2 = vadd.f32 %v11189_v60, %v9780_v63  ;;  %v2637_v48 = vadd.f32 %v11190_v49, %v2623_v0  ;;  %v11195_v14 = vld [vmem:[#allocation259_spill] sm:$0xff] }
 0x3af   : > { %v2527_v56 = vadd.f32 %v11191_v21, %v2513_v51  ;;  %v9876_v45 = vadd.f32 %v3883_v19, %v3879_v5  ;;  %v3026_v13 = vadd.f32 %v11192_v35, %v9789_v57  ;;  %v3344_v47 = vadd.f32 %v11193_v41, %v9572_v34  ;;  %v11196_v5 = vld [vmem:[#allocation260_spill] sm:$0xff]  ;;  %v11197_v57 = vld [vmem:[#allocation270_spill] sm:$0xff]  ;;  %v9898_v34 = vpop.permute.xlu1 %3826  ;;  %2205 = vadd.xlane.f32.xlu0 %v2204_v16 }
 0x3b0   : > { %v3234_v39 = vadd.f32 %v11194_v38, %v9565_v52  ;;  %v2973_v63 = vstv %s9830_s24  ;;  %v2831_v59 = vadd.f32 %v11195_v14, %v2817_v62  ;;  %v2721_v19 = vadd.f32 %v11196_v5, %v2707_v1  ;;  %v11198_v62 = vld [vmem:[#allocation261_spill] sm:$0xff]  ;;  %2313 = vadd.xlane.f32.xlu1 %v2312_v22  ;;  %v11204_v41 = vld [vmem:[#allocation264_spill] sm:$0xff]  ;;  %v11205_v16 = vld [vmem:[#allocation294_spill] sm:$0xff]  ;;  %v9918_v22 = vpop.permute.xlu0 %3935 }
 0x3b1   : > { %v2315_v25 = vsel %vm535_vm0, %v2311_v30, 0.0  ;;  %v2423_v0 = vsel %vm535_vm0, %v2421_v8, 0.0  ;;  %v2624_v40 = vadd.f32 %v11197_v57, %v2610_v27  ;;  %v9894_v51 = vadd.f32 %v3884_v4, %v3880_v6  ;;  %v11199_v1 = vld [vmem:[#allocation269_spill] sm:$0xff]  ;;  %v11202_v27 = vld [vmem:[#allocation262_spill] sm:$0xff]  ;;  %v11203_v4 = vld [vmem:[#allocation263_spill] sm:$0xff] }
 0x3b2   : > { %v2422_v52 = vmax.f32 %v2420_v15, 0.0  ;;  %v2532_v3 = vmax.f32 %v2530_v43, 0.0  ;;  %v3039_v23 = vadd.f32 %v11198_v62, %v9813_v28  ;;  %v2734_v60 = vadd.f32 %v11199_v1, %v2720_v26  ;;  %v11206_v43 = vld [vmem:[#allocation265_spill] sm:$0xff]  ;;  %v11207_v28 = vld [vmem:[#allocation266_spill] sm:$0xff] }
 0x3b3   : > { %v11200_v30 = vstv %s9653_s11  ;;  %v11201_v8 = vstv %s9585_s15  ;;  %v2929_v6 = vadd.f32 %v11202_v27, %v9821_v55  ;;  %v3247_v35 = vadd.f32 %v11203_v4, %v3233_v58  ;;  %v11208_v5 = vld [vmem:[#allocation293_spill] sm:$0xff]  ;;  %v11209_v55 = vld [vmem:[#allocation271_spill] sm:$0xff]  ;;  %v11210_v58 = vld [vmem:[#allocation272_spill] sm:$0xff]  ;;  %2316 = vadd.xlane.f32.xlu0 %v2315_v25 }
 0x3b4   : > { %v2641_v49 = vadd.f32 %v11200_v30, %v2637_v48  ;;  %v2531_v21 = vadd.f32 %v11201_v8, %v2527_v56  ;;  %v3137_v38 = vadd.f32 %v11204_v41, %v3123_v20  ;;  %v2638_v15 = vadd.f32 %v11205_v16, %v2624_v40  ;;  %v11211_v40 = vld [vmem:[#allocation273_spill] sm:$0xff]  ;;  %2424 = vadd.xlane.f32.xlu1 %v2423_v0  ;;  %v11213_v27 = vld [vmem:[#allocation274_spill] sm:$0xff] }
 0x3b5   : > { %v3455_v14 = vadd.f32 %v11206_v43, %v9649_v33  ;;  %v3345_v26 = vadd.f32 %v11207_v28, %v9628_v42  ;;  %v2748_v48 = vadd.f32 %v11208_v5, %v2734_v60  ;;  %v3084_v56 = vstv %s9864_s26  ;;  %v11212_v42 = vld [vmem:[#allocation282_spill] sm:$0xff]  ;;  %v11214_v4 = vld [vmem:[#allocation281_spill] sm:$0xff] }
 0x3b6   : > { %v2942_v57 = vadd.f32 %v11209_v55, %v2928_v12  ;;  %v2832_v62 = vadd.f32 %v11210_v58, %v2818_v18  ;;  %v2426_v20 = vsel %vm535_vm0, %v2422_v52, 0.0  ;;  %v2534_v33 = vsel %vm535_vm0, %v2532_v3, 0.0  ;;  %v9933_v52 = vpop.permute.xlu1 %3521  ;;  %v11216_v3 = vld [vmem:[#allocation275_spill] sm:$0xff]  ;;  %v11219_v55 = vld [vmem:[#allocation22_spill] sm:$0xff]  ;;  %v11220_v0 = vld [vmem:[#allocation277_spill] sm:$0xff] }
 0x3b7   : > { %v3150_v1 = vadd.f32 %v11211_v40, %v3136_v2  ;;  %v2735_v30 = vadd.f32 %v11212_v42, %v2721_v19  ;;  %v2533_v60 = vmax.f32 %v2531_v21, 0.0  ;;  %v2643_v8 = vmax.f32 %v2641_v49, 0.0  ;;  %v11217_v2 = vld [vmem:[#allocation276_spill] sm:$0xff]  ;;  %2427 = vadd.xlane.f32.xlu0 %v2426_v20  ;;  %v11223_v42 = vld [vmem:[#allocation283_spill] sm:$0xff] }
 0x3b8   : > { %v3040_v12 = vadd.f32 %v11213_v27, %v3026_v13  ;;  %v2845_v18 = vadd.f32 %v11214_v4, %v2831_v59  ;;  %v11215_v25 = vstv %s9653_s11  ;;  %v3195_v16 = vstv %s9887_s17  ;;  %v11221_v13 = vld [vmem:[#allocation278_spill] sm:$0xff]  ;;  %v11222_v59 = vld [vmem:[#allocation21_spill] sm:$0xff]  ;;  %2535 = vadd.xlane.f32.xlu1 %v2534_v33  ;;  %v11231_v33 = vld [vmem:[#allocation287_spill] sm:$0xff] }
 0x3b9   : > { %v2642_v41 = vadd.f32 %v11215_v25, %v2638_v15  ;;  %v3358_v43 = vadd.f32 %v11216_v3, %v3344_v47  ;;  %v3248_v28 = vadd.f32 %v11217_v2, %v3234_v39  ;;  %v11218_v19 = vstv %s9711_s1  ;;  %v11224_v47 = vld [vmem:[#allocation296_spill] sm:$0xff]  ;;  %v11226_v25 = vld [vmem:[#allocation285_spill] sm:$0xff]  ;;  %v11227_v3 = vld [vmem:[#allocation295_spill] sm:$0xff] }
 0x3ba   : > { %v2752_v5 = vadd.f32 %v11218_v19, %v2748_v48  ;;  %v2749_v58 = vadd.f32 %v11219_v55, %v2735_v30  ;;  %v3566_v49 = vadd.f32 %v11220_v0, %v9707_v24  ;;  %v3456_v21 = vadd.f32 %v11221_v13, %v9693_v61  ;;  %v9950_v48 = vpop.permute.xlu0 %3630  ;;  %v11225_v61 = vld [vmem:[#allocation284_spill] sm:$0xff]  ;;  %v11228_v2 = vld [vmem:[#allocation286_spill] sm:$0xff]  ;;  %v11230_v0 = vld [vmem:[#allocation33_spill] sm:$0xff] }
 0x3bb   : > { %v2859_v15 = vadd.f32 %v11222_v59, %v2845_v18  ;;  %v3306_v40 = vstv %s9896_s0  ;;  %v3053_v27 = vadd.f32 %v11223_v42, %v3039_v23  ;;  %v2846_v39 = vadd.f32 %v11224_v47, %v2832_v62 }
 0x3bc   : > { %v2537_v24 = vsel %vm535_vm0, %v2533_v60, 0.0  ;;  %v2645_v30 = vsel %vm535_vm0, %v2643_v8, 0.0  ;;  %v2943_v4 = vadd.f32 %v11225_v61, %v2929_v6  ;;  %v3261_v18 = vadd.f32 %v11226_v25, %v3247_v35  ;;  %v11232_v8 = vld [vmem:[#allocation23_spill] sm:$0xff]  ;;  %v11233_v35 = vld [vmem:[#allocation32_spill] sm:$0xff]  ;;  %v9968_v61 = vpop.permute.xlu1 %3729  ;;  %v11238_v25 = vld [vmem:[#allocation290_spill] sm:$0xff] }
 0x3bd   : > { %v2956_v20 = vadd.f32 %v11227_v3, %v2942_v57  ;;  %v2644_v23 = vmax.f32 %v2642_v41, 0.0  ;;  %v3151_v19 = vadd.f32 %v11228_v2, %v3137_v38  ;;  %v11229_v62 = vstv %s9711_s1  ;;  %2538 = vadd.xlane.f32.xlu0 %v2537_v24  ;;  %v11234_v57 = vld [vmem:[#allocation288_spill] sm:$0xff]  ;;  %v11235_v41 = vld [vmem:[#allocation291_spill] sm:$0xff]  ;;  %2646 = vadd.xlane.f32.xlu1 %v2645_v30  ;;  %v11240_v2 = vld [vmem:[#allocation297_spill] sm:$0xff] }
 0x3be   : > { %v2753_v55 = vadd.f32 %v11229_v62, %v2749_v58  ;;  %v2860_v13 = vadd.f32 %v11230_v0, %v2846_v39  ;;  %v2754_v59 = vmax.f32 %v2752_v5, 0.0  ;;  %v9962_v42 = vadd.f32 %v11231_v33, %v3455_v14  ;;  %v11236_v5 = vld [vmem:[#allocation292_spill] sm:$0xff] }
 0x3bf   : > { %v2863_v60 = vadd.f32 %v2862_v36, %v2859_v15  ;;  %v2957_v6 = vadd.f32 %v11232_v8, %v2943_v4  ;;  %v2970_v47 = vadd.f32 %v11233_v35, %v2956_v20  ;;  %v3359_v38 = vadd.f32 %v11234_v57, %v3345_v26  ;;  %v11237_v15 = vld [vmem:[#allocation298_spill] sm:$0xff]  ;;  %v11239_v20 = vld [vmem:[#allocation41_spill] sm:$0xff]  ;;  %v11243_v57 = vld [vmem:[#allocation299_spill] sm:$0xff] }
 0x3c0   : > { %v3677_v58 = vadd.f32 %v11235_v41, %v9764_v32  ;;  %v9975_v14 = vadd.f32 %v11236_v5, %v9751_v10  ;;  %v3417_v39 = vstv %s9926_s16  ;;  %v3054_v4 = vadd.f32 %v11237_v15, %v3040_v12  ;;  %v9987_v10 = vpop.permute.xlu0 %3838  ;;  %v11241_v12 = vld [vmem:[#allocation35_spill] sm:$0xff]  ;;  %v11246_v15 = vld [vmem:[#allocation289_spill] sm:$0xff] }
 0x3c1   : > { %v3067_v3 = vadd.f32 %v11238_v25, %v3053_v27  ;;  %v2971_v24 = vadd.f32 %v11239_v20, %v2957_v6  ;;  %v2648_v26 = vsel %vm535_vm0, %v2644_v23, 0.0  ;;  %v3164_v62 = vadd.f32 %v11240_v2, %v3150_v1  ;;  %v11242_v27 = vld [vmem:[#allocation44_spill] sm:$0xff]  ;;  %v10003_v20 = vpop.permute.xlu1 %3937 }
 0x3c2   : > { %v2864_v32 = vadd.f32 %v2862_v36, %v2860_v13  ;;  %v2756_v0 = vsel %vm535_vm0, %v2754_v59, 0.0  ;;  %v2755_v33 = vmax.f32 %v2753_v55, 0.0  ;;  %v2974_v30 = vadd.f32 %v2973_v63, %v2970_v47  ;;  %2649 = vadd.xlane.f32.xlu0 %v2648_v26  ;;  %v11244_v1 = vld [vmem:[#allocation300_spill] sm:$0xff]  ;;  %v11245_v36 = vld [vmem:[#allocation34_spill] sm:$0xff] }
 0x3c3   : > { %v3068_v8 = vadd.f32 %v11241_v12, %v3054_v4  ;;  %v3081_v35 = vadd.f32 %v11242_v27, %v3067_v3  ;;  %v2865_v6 = vmax.f32 %v2863_v60, 0.0  ;;  %v3372_v23 = vadd.f32 %v11243_v57, %v3358_v43  ;;  %2757 = vadd.xlane.f32.xlu1 %v2756_v0  ;;  %v11247_v55 = vld [vmem:[#allocation18_spill] sm:$0xff]  ;;  %v11248_v4 = vld [vmem:[#allocation53_spill] sm:$0xff]  ;;  %v11250_v43 = vld [vmem:[#allocation56_spill] sm:$0xff] }
 0x3c4   : > { %v3262_v41 = vadd.f32 %v11244_v1, %v3248_v28  ;;  %v3178_v13 = vadd.f32 %v11245_v36, %v3164_v62  ;;  %v3528_v5 = vstv %s9948_s22  ;;  %v3580_v59 = vadd.f32 %v11246_v15, %v3566_v49  ;;  %v11249_v60 = vld [vmem:[#allocation25_spill] sm:$0xff]  ;;  %v11251_v0 = vld [vmem:[#allocation24_spill] sm:$0xff]  ;;  %v11254_v57 = vld [vmem:[#allocation43_spill] sm:$0xff] }
 0x3c5   : > { %v3470_v25 = vadd.f32 %v11247_v55, %v3456_v21  ;;  %v2975_v47 = vadd.f32 %v2973_v63, %v2971_v24  ;;  %v3082_v3 = vadd.f32 %v11248_v4, %v3068_v8  ;;  %v3165_v26 = vadd.f32 %v11249_v60, %v3151_v19  ;;  %v11252_v24 = vld [vmem:[#allocation19_spill] sm:$0xff]  ;;  %v11253_v19 = vld [vmem:[#allocation20_spill] sm:$0xff] }
 0x3c6   : > { %v3192_v2 = vadd.f32 %v11250_v43, %v3178_v13  ;;  %v2759_v28 = vsel %vm535_vm0, %v2755_v33, 0.0  ;;  %v2866_v62 = vmax.f32 %v2864_v32, 0.0  ;;  %v3275_v12 = vadd.f32 %v11251_v0, %v3261_v18  ;;  %v10018_v33 = vpop.permute.xlu0 %3632  ;;  %v11255_v18 = vld [vmem:[#allocation27_spill] sm:$0xff]  ;;  %v11258_v60 = vld [vmem:[#allocation36_spill] sm:$0xff] }
 0x3c7   : > { %v3085_v49 = vadd.f32 %v3084_v56, %v3081_v35  ;;  %2760 = vadd.xlane.f32.xlu0 %v2759_v28  ;;  %v2867_v63 = vsel %vm535_vm0, %v2865_v6, 0.0  ;;  %v2976_v21 = vmax.f32 %v2974_v30, 0.0  ;;  %v3788_v8 = vadd.f32 %v11252_v24, %v9815_v9  ;;  %v11256_v13 = vld [vmem:[#allocation47_spill] sm:$0xff]  ;;  %v10031_v28 = vpop.permute.xlu1 %3741 }
 0x3c8   : > { %v3678_v27 = vadd.f32 %v11253_v19, %v9809_v29  ;;  %v3179_v1 = vadd.f32 %v11254_v57, %v3165_v26  ;;  %v3639_v36 = vstv %s9978_s19  ;;  %2868 = vadd.xlane.f32.xlu1 %v2867_v63  ;;  %v3373_v32 = vadd.f32 %v11255_v18, %v3359_v38  ;;  %v11257_v30 = vld [vmem:[#allocation51_spill] sm:$0xff] }
 0x3c9   : > { %v3289_v35 = vadd.f32 %v11256_v13, %v3275_v12  ;;  %v3086_v15 = vadd.f32 %v3084_v56, %v3082_v3  ;;  %v2977_v6 = vmax.f32 %v2975_v47, 0.0  ;;  %v3276_v55 = vadd.f32 %v11257_v30, %v3262_v41  ;;  %v11259_v41 = vld [vmem:[#allocation26_spill] sm:$0xff]  ;;  %v11260_v3 = vld [vmem:[#allocation28_spill] sm:$0xff] }
 0x3ca   : > { %v3196_v9 = vadd.f32 %v3195_v16, %v3192_v2  ;;  %v3193_v4 = vadd.f32 %v9461_v37, %v3179_v1  ;;  %v2870_v29 = vsel %vm535_vm0, %v2866_v62, 0.0  ;;  %v3386_v26 = vadd.f32 %v11258_v60, %v3372_v23  ;;  %v11261_v37 = vld [vmem:[#allocation38_spill] sm:$0xff]  ;;  %v11262_v62 = vld [vmem:[#allocation55_spill] sm:$0xff]  ;;  %v10046_v18 = vpop.permute.xlu0 %3840 }
 0x3cb   : > { %v3303_v43 = vadd.f32 %v9459_v44, %v3289_v35  ;;  %2871 = vadd.xlane.f32.xlu0 %v2870_v29  ;;  %v2978_v38 = vsel %vm535_vm0, %v2976_v21, 0.0  ;;  %v3087_v56 = vmax.f32 %v3085_v49, 0.0  ;;  %v3483_v47 = vadd.f32 %v11259_v41, %v9962_v42  ;;  %v11263_v23 = vld [vmem:[#allocation46_spill] sm:$0xff]  ;;  %v11265_v21 = vld [vmem:[#allocation64_spill] sm:$0xff]  ;;  %v11271_v29 = vld [vmem:[#allocation61_spill] sm:$0xff] }
 0x3cc   : > { %v3691_v2 = vadd.f32 %v11260_v3, %v3677_v58  ;;  %v3484_v0 = vadd.f32 %v11261_v37, %v3470_v25  ;;  %v3290_v12 = vadd.f32 %v11262_v62, %v3276_v55  ;;  %2979 = vadd.xlane.f32.xlu1 %v2978_v38  ;;  %v3387_v63 = vadd.f32 %v11263_v23, %v3373_v32  ;;  %v11264_v44 = vld [vmem:[#allocation58_spill] sm:$0xff]  ;;  %v11267_v32 = vld [vmem:[#allocation69_spill] sm:$0xff]  ;;  %v11274_v62 = vld [vmem:[#allocation60_spill] sm:$0xff] }
 0x3cd   : > { %v3400_v24 = vadd.f32 %v11264_v44, %v3386_v26  ;;  %v2981_v19 = vsel %vm535_vm0, %v2977_v6, 0.0  ;;  %v3088_v57 = vmax.f32 %v3086_v15, 0.0  ;;  %v3497_v1 = vadd.f32 %v11265_v21, %v3483_v47  ;;  %v11266_v13 = vld [vmem:[#allocation62_spill] sm:$0xff]  ;;  %v11268_v15 = vld [vmem:[#allocation29_spill] sm:$0xff]  ;;  %v11275_v23 = vld [vmem:[#allocation39_spill] sm:$0xff] }
 0x3ce   : > { %v3197_v49 = vadd.f32 %v3195_v16, %v3193_v4  ;;  %v3304_v42 = vadd.f32 %v9641_v31, %v3290_v12  ;;  %v3198_v58 = vmax.f32 %v3196_v9, 0.0  ;;  %v3307_v25 = vadd.f32 %v3306_v40, %v3303_v43  ;;  %v11269_v16 = vld [vmem:[#allocation30_spill] sm:$0xff]  ;;  %v11270_v4 = vld [vmem:[#allocation31_spill] sm:$0xff]  ;;  %v11272_v26 = vld [vmem:[#allocation37_spill] sm:$0xff]  ;;  %v3744_v21 = vpop.permute.xlu0 %3743 }
 0x3cf   : > { %v3401_v35 = vadd.f32 %v11266_v13, %v3387_v63  ;;  %v3414_v30 = vadd.f32 %v11267_v32, %v3400_v24  ;;  %2982 = vadd.xlane.f32.xlu0 %v2981_v19  ;;  %v3089_v6 = vsel %vm535_vm0, %v3087_v56, 0.0  ;;  %v3581_v55 = vadd.f32 %v11268_v15, %v9975_v14  ;;  %v11273_v38 = vld [vmem:[#allocation57_spill] sm:$0xff]  ;;  %v10063_v56 = vpop.permute.xlu1 %3949  ;;  %v11276_v44 = vld [vmem:[#allocation40_spill] sm:$0xff]  ;;  %v11278_v19 = vld [vmem:[#allocation63_spill] sm:$0xff] }
 0x3d0   : > { %v3899_v31 = vadd.f32 %v11269_v16, %v9876_v45  ;;  %v3789_v9 = vadd.f32 %v11270_v4, %v9858_v53  ;;  %v3511_v60 = vadd.f32 %v11271_v29, %v3497_v1  ;;  %3090 = vadd.xlane.f32.xlu1 %v3089_v6  ;;  %v3594_v43 = vadd.f32 %v11272_v26, %v3580_v59  ;;  %v11279_v1 = vld [vmem:[#allocation52_spill] sm:$0xff]  ;;  %v11282_v32 = vld [vmem:[#allocation65_spill] sm:$0xff]  ;;  %v11285_v29 = vld [vmem:[#allocation59_spill] sm:$0xff] }
 0x3d1   : > { %v3498_v41 = vadd.f32 %v11273_v38, %v3484_v0  ;;  %v3415_v47 = vadd.f32 %v9817_v11, %v3401_v35  ;;  %v3092_v3 = vsel %vm535_vm0, %v3088_v57, 0.0  ;;  %v3308_v14 = vadd.f32 %v3306_v40, %v3304_v42  ;;  %v11277_v40 = vld [vmem:[#allocation42_spill] sm:$0xff] }
 0x3d2   : > { %v3525_v45 = vadd.f32 %v9839_v17, %v3511_v60  ;;  %v3200_v37 = vsel %vm535_vm0, %v3198_v58, 0.0  ;;  %v3199_v53 = vmax.f32 %v3197_v49, 0.0  ;;  %v3608_v12 = vadd.f32 %v11274_v62, %v3594_v43  ;;  %v11280_v42 = vld [vmem:[#allocation70_spill] sm:$0xff]  ;;  %v11286_v43 = vld [vmem:[#allocation76_spill] sm:$0xff] }
 0x3d3   : > { %v3418_v59 = vadd.f32 %v3417_v39, %v3414_v30  ;;  %v3512_v0 = vadd.f32 %v9699_v54, %v3498_v41  ;;  %3093 = vadd.xlane.f32.xlu0 %v3092_v3  ;;  %v3309_v11 = vmax.f32 %v3307_v25, 0.0  ;;  %v3802_v63 = vadd.f32 %v11275_v23, %v3788_v8  ;;  %v11281_v8 = vld [vmem:[#allocation66_spill] sm:$0xff]  ;;  %v3853_v15 = vpop.permute.xlu1 %3852 }
 0x3d4   : > { %v3692_v24 = vadd.f32 %v11276_v44, %v3678_v27  ;;  %v3900_v17 = vadd.f32 %v11277_v40, %v9894_v51  ;;  %v3595_v57 = vadd.f32 %v11278_v19, %v3581_v55  ;;  %3201 = vadd.xlane.f32.xlu1 %v3200_v37  ;;  %v3705_v49 = vadd.f32 %v11279_v1, %v3691_v2 }
 0x3d5   : > { %v3622_v58 = vadd.f32 %v11280_v42, %v3608_v12  ;;  %v3419_v54 = vadd.f32 %v3417_v39, %v3415_v47  ;;  %v3526_v25 = vadd.f32 %v9933_v52, %v3512_v0  ;;  %v3529_v27 = vadd.f32 %v3528_v5, %v3525_v45  ;;  %v11283_v39 = vld [vmem:[#allocation50_spill] sm:$0xff] }
 0x3d6   : > { %v3609_v13 = vadd.f32 %v11281_v8, %v3595_v57  ;;  %v3203_v51 = vsel %vm535_vm0, %v3199_v53, 0.0  ;;  %v3310_v35 = vmax.f32 %v3308_v14, 0.0  ;;  %v3719_v30 = vadd.f32 %v11282_v32, %v3705_v49  ;;  %v11284_v52 = vld [vmem:[#allocation54_spill] sm:$0xff] }
 0x3d7   : > { %v3636_v6 = vadd.f32 %v9950_v48, %v3622_v58  ;;  %3204 = vadd.xlane.f32.xlu0 %v3203_v51  ;;  %v3311_v2 = vsel %vm535_vm0, %v3309_v11, 0.0  ;;  %v3420_v55 = vmax.f32 %v3418_v59, 0.0  ;;  %v3803_v16 = vadd.f32 %v11283_v39, %v3789_v9  ;;  %v11289_v59 = vld [vmem:[#allocation67_spill] sm:$0xff]  ;;  %v11290_v11 = vld [vmem:[#allocation68_spill] sm:$0xff]  ;;  %v3855_v44 = vpop.permute.xlu1 %3854 }
 0x3d8   : > { %v3913_v4 = vadd.f32 %v11284_v52, %v3899_v31  ;;  %v3706_v60 = vadd.f32 %v11285_v29, %v3692_v24  ;;  %v3623_v26 = vadd.f32 %v9860_v7, %v3609_v13  ;;  %3312 = vadd.xlane.f32.xlu1 %v3311_v2  ;;  %v3816_v38 = vadd.f32 %v11286_v43, %v3802_v63  ;;  %v3952_v31 = vpop.permute.xlu0 %3951  ;;  %v11287_v7 = vld [vmem:[#allocation71_spill] sm:$0xff] }
 0x3d9   : > { %v3733_v48 = vadd.f32 %v9878_v50, %v3719_v30  ;;  %v3530_v41 = vadd.f32 %v3528_v5, %v3526_v25  ;;  %v3421_v47 = vmax.f32 %v3419_v54, 0.0  ;;  %v3314_v14 = vsel %vm535_vm0, %v3310_v35, 0.0  ;;  %v11288_v5 = vld [vmem:[#allocation75_spill] sm:$0xff] }
 0x3da   : > { %v3720_v9 = vadd.f32 %v9738_v46, %v3706_v60  ;;  %v3637_v3 = vadd.f32 %v10018_v33, %v3623_v26  ;;  %v3531_v45 = vmax.f32 %v3529_v27, 0.0  ;;  %v3830_v37 = vadd.f32 %v11287_v7, %v3816_v38  ;;  %v11291_v58 = vld [vmem:[#allocation87_spill] sm:$0xff] }
 0x3db   : > { %v3640_v53 = vadd.f32 %v3639_v36, %v3636_v6  ;;  %v3747_v62 = vadd.f32 %v10031_v28, %v3733_v48  ;;  %3315 = vadd.xlane.f32.xlu0 %v3314_v14  ;;  %v3422_v50 = vsel %vm535_vm0, %v3420_v55, 0.0  ;;  %v3914_v12 = vadd.f32 %v11288_v5, %v3900_v17  ;;  %v3966_v35 = vpop.permute.xlu1 %3965  ;;  %v4083_v7 = vld [vmem:[%s10490_s5] sm:$0xff] }
 0x3dc   : > { %v3817_v46 = vadd.f32 %v11289_v59, %v3803_v16  ;;  %v3734_v33 = vadd.f32 %v9968_v61, %v3720_v9  ;;  %v3750_v0 = vstv %s10079_s23  ;;  %3423 = vadd.xlane.f32.xlu1 %v3422_v50  ;;  %v3927_v23 = vadd.f32 %v11290_v11, %v3913_v4  ;;  %v3964_v8 = vpop.permute.xlu0 %3963  ;;  %v4085_v11 = vld [vmem:[%s10490_s5 + $0x10] sm:$0xff]  ;;  %s6265_s23 = smov 32  }
 0x3dd   : > { %v3844_v63 = vadd.f32 %v9987_v10, %v3830_v37  ;;  %v3425_v28 = vsel %vm535_vm0, %v3421_v47, 0.0  ;;  %v3532_v24 = vmax.f32 %v3530_v41, 0.0  ;;  %v3641_v17 = vadd.f32 %v3639_v36, %v3637_v3  ;;  %v3990_v3 = vld [vmem:[%s10489_s4] sm:$0xff]  ;;  %v4084_v37 = vld [vmem:[%s10490_s5 + $0x8] sm:$0xff] }
 0x3de   : > { %v3831_v40 = vadd.f32 %v9898_v34, %v3817_v46  ;;  %v3748_v19 = vadd.f32 %v3744_v21, %v3734_v33  ;;  %v3533_v61 = vsel %vm535_vm0, %v3531_v45, 0.0  ;;  %v3941_v57 = vadd.f32 %v9918_v22, %v3927_v23  ;;  %v4086_v23 = vld [vmem:[%s10490_s5 + $0x18] sm:$0xff] }
 0x3df   : > { %v3751_v1 = vadd.f32 %v3750_v0, %v3747_v62  ;;  %v3858_v49 = vadd.f32 %v3853_v15, %v3844_v63  ;;  %3426 = vadd.xlane.f32.xlu0 %v3425_v28  ;;  %v3642_v42 = vmax.f32 %v3640_v53, 0.0  ;;  %v3928_v54 = vadd.f32 %v11291_v58, %v3914_v12  ;;  %v3992_v53 = vld [vmem:[%s10489_s4 + $0x10] sm:$0xff]  ;;  %v3993_v12 = vld [vmem:[%s10489_s4 + $0x18] sm:$0xff] }
 0x3e0   : > { %v3845_v10 = vadd.f32 %v10046_v18, %v3831_v40  ;;  %v3861_v25 = vstv %s10097_s20  ;;  %3534 = vadd.xlane.f32.xlu1 %v3533_v61  ;;  %v3955_v34 = vadd.f32 %v10063_v56, %v3941_v57  ;;  %v3536_v36 = vsel %vm535_vm0, %v3532_v24, 0.0  ;;  %s6266_s20 = smov 64  }
 0x3e1   : > { %v3942_v21 = vadd.f32 %v10003_v20, %v3928_v54  ;;  %v3752_v13 = vadd.f32 %v3750_v0, %v3748_v19  ;;  %v3643_v27 = vmax.f32 %v3641_v17, 0.0  ;;  %v3862_v51 = vadd.f32 %v3861_v25, %v3858_v49 }
 0x3e2   : > { %v3859_v22 = vadd.f32 %v3855_v44, %v3845_v10  ;;  %v3969_v32 = vadd.f32 %v3964_v8, %v3955_v34  ;;  %v3644_v30 = vsel %vm535_vm0, %v3642_v42, 0.0  ;;  %v3753_v18 = vmax.f32 %v3751_v1, 0.0 }
 0x3e3   : > { %3537 = vadd.xlane.f32.xlu0 %v3536_v36  ;;  %v3956_v6 = vadd.f32 %v3952_v31, %v3942_v21  ;;  %v3972_v15 = vstv %s10115_s13  ;;  %v3647_v56 = vsel %vm535_vm0, %v3643_v27, 0.0  ;;  %v3754_v39 = vmax.f32 %v3752_v13, 0.0  ;;  %v3991_v31 = vld [vmem:[%s10489_s4 + $0x8] sm:$0xff] }
 0x3e4   : > { %3645 = vadd.xlane.f32.xlu1 %v3644_v30  ;;  %v3863_v2 = vadd.f32 %v3861_v25, %v3859_v22  ;;  %v3973_v16 = vadd.f32 %v3972_v15, %v3969_v32  ;;  %v3755_v20 = vsel %vm535_vm0, %v3753_v18, 0.0  ;;  %v3864_v52 = vmax.f32 %v3862_v51, 0.0 }
 0x3e5   : > { %v3970_v55 = vadd.f32 %v3966_v35, %v3956_v6  ;;  %v3758_v29 = vsel %vm535_vm0, %v3754_v39, 0.0  ;;  %v5919_v45 = vpack.c.bf16 %v3991_v31, %v3990_v3  ;;  %v6262_v50 = vmov 0.0|0.0  }
 0x3e6   : > { %v3865_v60 = vmax.f32 %v3863_v2, 0.0  ;;  %v3866_v26 = vsel %vm535_vm0, %v3864_v52, 0.0  ;;  %v3975_v43 = vmax.f32 %v3973_v16, 0.0  ;;  %5927 = vmatprep.subr.bf16.mxu1 %v6262_v50  ;;  %v10157_v5 = vpack.c.bf16 %v4084_v37, %v4083_v7 }
 0x3e7   : > { %3648 = vadd.xlane.f32.xlu0 %v3647_v56  ;;  %v3974_v4 = vadd.f32 %v3972_v15, %v3970_v55  ;;  %5920 = vmatprep.subr.bf16.mxu0 %v5919_v45  ;;  %v5923_v33 = vpack.c.bf16 %v3993_v12, %v3992_v53  ;;  %v10172_v44 = vpack.c.bf16 %v4086_v23, %v4085_v11  ;;  %v6264_v19 = vmov 0.0  }
 0x3e8   : > { %3756 = vadd.xlane.f32.xlu1 %v3755_v20  ;;  %v3869_v38 = vsel %vm535_vm0, %v3865_v60, 0.0  ;;  %v3977_v41 = vsel %vm535_vm0, %v3975_v43, 0.0  ;;  %5922 = vmatpush3.bf16.msra.mxu0 %v5919_v45 }
 0x3e9   : > { %v3976_v48 = vmax.f32 %v3974_v4, 0.0  ;;  %5929 = vmatpush3.bf16.msra.mxu1 %v10157_v5  ;;  %5924 = vmatprep.subr.bf16.mxu0 %v5923_v33 }
 0x3ea   : > { %5930 = vmatprep.subr.bf16.mxu1 %v6262_v50  ;;  %5839 = vmatprep.mubr.msk.f32.mxu1 %vm6263_vm4, %v6264_v19 }
 0x3eb   : > { %3759 = vadd.xlane.f32.xlu0 %v3758_v29  ;;  %v3980_v47 = vsel %vm535_vm0, %v3976_v48, 0.0  ;;  %vm2098_vm0 = vcmask 121968  }
 0x3ec   : > { %3867 = vadd.xlane.f32.xlu1 %v3866_v26  ;;  %5926 = vmatpush3.bf16.msra.mxu0 %v5923_v33 }
 0x3ed   : > { %5933 = vmatprep.subr.bf16.mxu0 %v6262_v50  ;;  %5932 = vmatpush3.bf16.msra.mxu1 %v10172_v44 }
 0x3ee   : > { %5939 = vmatprep.subr.bf16.mxu1 %v6262_v50 }
 0x3ef   : > { %3870 = vadd.xlane.f32.xlu0 %v3869_v38 }
 0x3f0   : > { %3978 = vadd.xlane.f32.xlu1 %v3977_v41  ;;  %5840 = vmatmul.mubr.f32.vlgmr.msra.gmra.mrb[0].mxu1 %v6264_v19 }
 0x3f1   : > { %5941 = vmatpush3.bf16.msra.mxu1 %v10157_v5  ;;  %5861 = vmatprep.mubr.msk.f32.mxu1 %vm6263_vm4, %v6264_v19 }
 0x3f2   : > { %5942 = vmatprep.subr.bf16.mxu1 %v6262_v50 }
 0x3f3   : > { %3981 = vadd.xlane.f32.xlu0 %v3980_v47 }
 0x3f5   : > { %5944 = vmatpush3.bf16.msra.mxu1 %v10172_v44 }
 0x3f6   : > { %5951 = vmatprep.subr.bf16.mxu1 %v6262_v50 }
 0x3fc   : > { %v538_v9 = vpop.xlane.xlu0 %537 }
 0x3fd   : > { %v542_v14 = vmul.f32 0.0091743115, %v538_v9 }
 0x3ff   : > { %545 = vst.msk [vmem:[#allocation2] sm:$0xff] %vm544_vm1, %v542_v14 }
 0x400   : > { %v649_v62 = vpop.xlane.xlu0 %648 }
 0x401   : > { %v653_v59 = vmul.f32 0.0091743115, %v649_v62  ;;  %v541_v46 = vpop.xlane.xlu1 %540 }
 0x402   : > { %v543_v0 = vmul.f32 0.0091743115, %v541_v46 }
 0x403   : > { %656 = vst.msk [vmem:[#allocation2] sm:$0xff] %vm655_vm2, %v653_v59 }
 0x404   : > { %546 = vst.msk [vmem:[#allocation2 + $0x8] sm:$0xff] %vm544_vm1, %v543_v0  ;;  %v652_v63 = vpop.xlane.xlu0 %651  ;;  %vm2209_vm1 = vcmask 130168  }
 0x405   : > { %v654_v28 = vmul.f32 0.0091743115, %v652_v63  ;;  %v760_v24 = vpop.xlane.xlu1 %759 }
 0x406   : > { %v764_v40 = vmul.f32 0.0091743115, %v760_v24 }
 0x407   : > { %657 = vst.msk [vmem:[#allocation2 + $0x8] sm:$0xff] %vm655_vm2, %v654_v28  ;;  %vm2320_vm2 = vcmask 138368  }
 0x408   : > { %767 = vst.msk [vmem:[#allocation2] sm:$0xff] %vm766_vm3, %v764_v40  ;;  %v763_v17 = vpop.xlane.xlu0 %762 }
 0x409   : > { %v765_v61 = vmul.f32 0.0091743115, %v763_v17  ;;  %v871_v57 = vpop.xlane.xlu1 %870 }
 0x40a   : > { %v875_v1 = vmul.f32 0.0091743115, %v871_v57 }
 0x40b   : > { %768 = vst.msk [vmem:[#allocation2 + $0x8] sm:$0xff] %vm766_vm3, %v765_v61  ;;  %vm2431_vm3 = vcmask 146568  }
 0x40c   : > { %878 = vst.msk [vmem:[#allocation2] sm:$0xff] %vm877_vm5, %v875_v1  ;;  %v874_v49 = vpop.xlane.xlu0 %873 }
 0x40d   : > { %v876_v42 = vmul.f32 0.0091743115, %v874_v49  ;;  %v982_v58 = vpop.xlane.xlu1 %981 }
 0x40e   : > { %v986_v54 = vmul.f32 0.0091743115, %v982_v58 }
 0x40f   : > { %879 = vst.msk [vmem:[#allocation2 + $0x8] sm:$0xff] %vm877_vm5, %v876_v42  ;;  %vm2542_vm5 = vcmask 154768  }
 0x410   : > { %989 = vst.msk [vmem:[#allocation2] sm:$0xff] %vm988_vm6, %v986_v54  ;;  %v985_v10 = vpop.xlane.xlu0 %984 }
 0x411   : > { %v987_v25 = vmul.f32 0.0091743115, %v985_v10  ;;  %v1093_v8 = vpop.xlane.xlu1 %1092 }
 0x412   : > { %v1097_v34 = vmul.f32 0.0091743115, %v1093_v8 }
 0x413   : > { %990 = vst.msk [vmem:[#allocation2 + $0x8] sm:$0xff] %vm988_vm6, %v987_v25  ;;  %vm2653_vm6 = vcmask 162968  }
 0x414   : > { %1100 = vst.msk [vmem:[#allocation2] sm:$0xff] %vm1099_vm7, %v1097_v34  ;;  %v1096_v36 = vpop.xlane.xlu0 %1095 }
 0x415   : > { %v1098_v21 = vmul.f32 0.0091743115, %v1096_v36  ;;  %v1204_v13 = vpop.xlane.xlu1 %1203 }
 0x416   : > { %v1208_v22 = vmul.f32 0.0091743115, %v1204_v13 }
 0x417   : > { %1101 = vst.msk [vmem:[#allocation2 + $0x8] sm:$0xff] %vm1099_vm7, %v1098_v21  ;;  %vm2764_vm7 = vcmask 171168  }
 0x418   : > { %1211 = vst.msk [vmem:[#allocation2] sm:$0xff] %vm1210_vm8, %v1208_v22  ;;  %v1207_v27 = vpop.xlane.xlu0 %1206 }
 0x419   : > { %v1209_v51 = vmul.f32 0.0091743115, %v1207_v27  ;;  %v1315_v35 = vpop.xlane.xlu1 %1314 }
 0x41a   : > { %v1319_v32 = vmul.f32 0.0091743115, %v1315_v35 }
 0x41b   : > { %1212 = vst.msk [vmem:[#allocation2 + $0x8] sm:$0xff] %vm1210_vm8, %v1209_v51  ;;  %vm2875_vm8 = vcmask 179368  }
 0x41c   : > { %1322 = vst.msk [vmem:[#allocation2] sm:$0xff] %vm1321_vm9, %v1319_v32  ;;  %v1318_v30 = vpop.xlane.xlu0 %1317 }
 0x41d   : > { %v1320_v18 = vmul.f32 0.0091743115, %v1318_v30  ;;  %v1426_v6 = vpop.xlane.xlu1 %1425 }
 0x41e   : > { %v1430_v15 = vmul.f32 0.0091743115, %v1426_v6 }
 0x41f   : > { %1323 = vst.msk [vmem:[#allocation2 + $0x8] sm:$0xff] %vm1321_vm9, %v1320_v18  ;;  %vm2986_vm9 = vcmask 187568  }
 0x420   : > { %1433 = vst.msk [vmem:[#allocation2] sm:$0xff] %vm1432_vm10, %v1430_v15  ;;  %v1429_v2 = vpop.xlane.xlu0 %1428 }
 0x421   : > { %v1431_v55 = vmul.f32 0.0091743115, %v1429_v2  ;;  %v1537_v56 = vpop.xlane.xlu1 %1536 }
 0x422   : > { %v1541_v39 = vmul.f32 0.0091743115, %v1537_v56 }
 0x423   : > { %1434 = vst.msk [vmem:[#allocation2 + $0x8] sm:$0xff] %vm1432_vm10, %v1431_v55  ;;  %vm3097_vm10 = vcmask 195768  }
 0x424   : > { %1544 = vst.msk [vmem:[#allocation2] sm:$0xff] %vm1543_vm11, %v1541_v39  ;;  %v1540_v16 = vpop.xlane.xlu0 %1539 }
 0x425   : > { %v1542_v20 = vmul.f32 0.0091743115, %v1540_v16  ;;  %v1648_v52 = vpop.xlane.xlu1 %1647 }
 0x426   : > { %v1652_v4 = vmul.f32 0.0091743115, %v1648_v52 }
 0x427   : > { %1545 = vst.msk [vmem:[#allocation2 + $0x8] sm:$0xff] %vm1543_vm11, %v1542_v20  ;;  %vm3208_vm11 = vcmask 203968  }
 0x428   : > { %1655 = vst.msk [vmem:[#allocation2] sm:$0xff] %vm1654_vm12, %v1652_v4  ;;  %v1651_v29 = vpop.xlane.xlu0 %1650 }
 0x429   : > { %v1653_v60 = vmul.f32 0.0091743115, %v1651_v29  ;;  %v1759_v26 = vpop.xlane.xlu1 %1758 }
 0x42a   : > { %v1763_v43 = vmul.f32 0.0091743115, %v1759_v26 }
 0x42b   : > { %1656 = vst.msk [vmem:[#allocation2 + $0x8] sm:$0xff] %vm1654_vm12, %v1653_v60  ;;  %vm3319_vm12 = vcmask 212168  }
 0x42c   : > { %1766 = vst.msk [vmem:[#allocation2] sm:$0xff] %vm1765_vm13, %v1763_v43  ;;  %v1762_v38 = vpop.xlane.xlu0 %1761 }
 0x42d   : > { %v1764_v48 = vmul.f32 0.0091743115, %v1762_v38  ;;  %v1870_v41 = vpop.xlane.xlu1 %1869 }
 0x42e   : > { %v1874_v47 = vmul.f32 0.0091743115, %v1870_v41 }
 0x42f   : > { %1767 = vst.msk [vmem:[#allocation2 + $0x8] sm:$0xff] %vm1765_vm13, %v1764_v48  ;;  %vm3430_vm13 = vcmask 220368  }
 0x430   : > { %1877 = vst.msk [vmem:[#allocation2] sm:$0xff] %vm1876_vm14, %v1874_v47  ;;  %v1873_v9 = vpop.xlane.xlu0 %1872 }
 0x431   : > { %v1875_v3 = vmul.f32 0.0091743115, %v1873_v9  ;;  %v1981_v31 = vpop.xlane.xlu1 %1980 }
 0x432   : > { %v1985_v14 = vmul.f32 0.0091743115, %v1981_v31 }
 0x433   : > { %1878 = vst.msk [vmem:[#allocation2 + $0x8] sm:$0xff] %vm1876_vm14, %v1875_v3  ;;  %vm3541_vm14 = vcmask 228568  }
 0x434   : > { %1988 = vst.msk [vmem:[#allocation2] sm:$0xff] %vm1987_vm15, %v1985_v14  ;;  %v1984_v45 = vpop.xlane.xlu0 %1983 }
 0x435   : > { %v1986_v7 = vmul.f32 0.0091743115, %v1984_v45  ;;  %v2092_v37 = vpop.xlane.xlu1 %2091 }
 0x436   : > { %v2096_v53 = vmul.f32 0.0091743115, %v2092_v37 }
 0x437   : > { %1989 = vst.msk [vmem:[#allocation2 + $0x8] sm:$0xff] %vm1987_vm15, %v1986_v7  ;;  %vm3652_vm15 = vcmask 236768  }
 0x438   : > { %2099 = vst.msk [vmem:[#allocation2] sm:$0xff] %vm2098_vm0, %v2096_v53  ;;  %v2095_v62 = vpop.xlane.xlu0 %2094 }
 0x439   : > { %v2097_v12 = vmul.f32 0.0091743115, %v2095_v62  ;;  %v2203_v59 = vpop.xlane.xlu1 %2202 }
 0x43a   : > { %v2207_v46 = vmul.f32 0.0091743115, %v2203_v59 }
 0x43b   : > { %2100 = vst.msk [vmem:[#allocation2 + $0x8] sm:$0xff] %vm2098_vm0, %v2097_v12  ;;  %vm3763_vm0 = vcmask 244968  }
 0x43c   : > { %2210 = vst.msk [vmem:[#allocation2] sm:$0xff] %vm2209_vm1, %v2207_v46  ;;  %v2206_v33 = vpop.xlane.xlu0 %2205 }
 0x43d   : > { %v2208_v0 = vmul.f32 0.0091743115, %v2206_v33  ;;  %v2314_v11 = vpop.xlane.xlu1 %2313 }
 0x43e   : > { %v2318_v23 = vmul.f32 0.0091743115, %v2314_v11 }
 0x43f   : > { %2211 = vst.msk [vmem:[#allocation2 + $0x8] sm:$0xff] %vm2209_vm1, %v2208_v0  ;;  %vm3874_vm1 = vcmask 253168  }
 0x440   : > { %2321 = vst.msk [vmem:[#allocation2] sm:$0xff] %vm2320_vm2, %v2318_v23  ;;  %v2317_v63 = vpop.xlane.xlu0 %2316 }
 0x441   : > { %v2319_v28 = vmul.f32 0.0091743115, %v2317_v63  ;;  %v2425_v24 = vpop.xlane.xlu1 %2424 }
 0x442   : > { %v2429_v40 = vmul.f32 0.0091743115, %v2425_v24 }
 0x443   : > { %2322 = vst.msk [vmem:[#allocation2 + $0x8] sm:$0xff] %vm2320_vm2, %v2319_v28  ;;  %vm3985_vm2 = vcmask 261368  }
 0x444   : > { %2432 = vst.msk [vmem:[#allocation2] sm:$0xff] %vm2431_vm3, %v2429_v40  ;;  %v2428_v17 = vpop.xlane.xlu0 %2427 }
 0x445   : > { %v2430_v61 = vmul.f32 0.0091743115, %v2428_v17  ;;  %v2536_v57 = vpop.xlane.xlu1 %2535 }
 0x446   : > { %v2540_v1 = vmul.f32 0.0091743115, %v2536_v57  ;;  %v5751_v57 = vld [vmem:[%s10491_s6] ss:$0 sm:$0xff] }
 0x447   : > { %2433 = vst.msk [vmem:[#allocation2 + $0x8] sm:$0xff] %vm2431_vm3, %v2430_v61  ;;  %vm4001_vm3 = vcmask 261120  }
 0x448   : > { %2543 = vst.msk [vmem:[#allocation2] sm:$0xff] %vm2542_vm5, %v2540_v1 }
 0x44a   : > { %v2539_v49 = vpop.xlane.xlu0 %2538  ;;  %v2647_v58 = vpop.xlane.xlu1 %2646 }
 0x44b   : > { %v2541_v42 = vmul.f32 0.0091743115, %v2539_v49  ;;  %v2651_v54 = vmul.f32 0.0091743115, %v2647_v58 }
 0x44d   : > { %2544 = vst.msk [vmem:[#allocation2 + $0x8] sm:$0xff] %vm2542_vm5, %v2541_v42  ;;  %vm5349_vm5 = vcmask 8192  }
 0x44e   : > { %2654 = vst.msk [vmem:[#allocation2] sm:$0xff] %vm2653_vm6, %v2651_v54 }
 0x44f   : > { %v2650_v10 = vpop.xlane.xlu0 %2649 }
 0x450   : > { %v2652_v25 = vmul.f32 0.0091743115, %v2650_v10  ;;  %v2758_v8 = vpop.xlane.xlu1 %2757 }
 0x451   : > { %v2762_v34 = vmul.f32 0.0091743115, %v2758_v8 }
 0x452   : > { %2655 = vst.msk [vmem:[#allocation2 + $0x8] sm:$0xff] %vm2653_vm6, %v2652_v25 }
 0x453   : > { %2765 = vst.msk [vmem:[#allocation2] sm:$0xff] %vm2764_vm7, %v2762_v34 }
 0x454   : > { %v2761_v36 = vpop.xlane.xlu0 %2760 }
 0x455   : > { %v2763_v21 = vmul.f32 0.0091743115, %v2761_v36  ;;  %v2869_v13 = vpop.xlane.xlu1 %2868 }
 0x456   : > { %v2873_v22 = vmul.f32 0.0091743115, %v2869_v13 }
 0x457   : > { %2766 = vst.msk [vmem:[#allocation2 + $0x8] sm:$0xff] %vm2764_vm7, %v2763_v21 }
 0x458   : > { %2876 = vst.msk [vmem:[#allocation2] sm:$0xff] %vm2875_vm8, %v2873_v22  ;;  %v2872_v27 = vpop.xlane.xlu0 %2871 }
 0x459   : > { %v2874_v51 = vmul.f32 0.0091743115, %v2872_v27  ;;  %v2980_v35 = vpop.xlane.xlu1 %2979 }
 0x45a   : > { %v2984_v32 = vmul.f32 0.0091743115, %v2980_v35 }
 0x45b   : > { %2877 = vst.msk [vmem:[#allocation2 + $0x8] sm:$0xff] %vm2875_vm8, %v2874_v51 }
 0x45c   : > { %2987 = vst.msk [vmem:[#allocation2] sm:$0xff] %vm2986_vm9, %v2984_v32  ;;  %v2983_v30 = vpop.xlane.xlu0 %2982 }
 0x45d   : > { %v2985_v18 = vmul.f32 0.0091743115, %v2983_v30  ;;  %v3091_v6 = vpop.xlane.xlu1 %3090 }
 0x45e   : > { %v3095_v15 = vmul.f32 0.0091743115, %v3091_v6 }
 0x45f   : > { %2988 = vst.msk [vmem:[#allocation2 + $0x8] sm:$0xff] %vm2986_vm9, %v2985_v18 }
 0x460   : > { %3098 = vst.msk [vmem:[#allocation2] sm:$0xff] %vm3097_vm10, %v3095_v15  ;;  %v3094_v2 = vpop.xlane.xlu0 %3093 }
 0x461   : > { %v3096_v55 = vmul.f32 0.0091743115, %v3094_v2  ;;  %v3202_v56 = vpop.xlane.xlu1 %3201 }
 0x462   : > { %v3206_v39 = vmul.f32 0.0091743115, %v3202_v56 }
 0x463   : > { %3099 = vst.msk [vmem:[#allocation2 + $0x8] sm:$0xff] %vm3097_vm10, %v3096_v55 }
 0x464   : > { %3209 = vst.msk [vmem:[#allocation2] sm:$0xff] %vm3208_vm11, %v3206_v39  ;;  %v3205_v16 = vpop.xlane.xlu0 %3204 }
 0x465   : > { %v3207_v20 = vmul.f32 0.0091743115, %v3205_v16  ;;  %v3313_v52 = vpop.xlane.xlu1 %3312 }
 0x466   : > { %v3317_v4 = vmul.f32 0.0091743115, %v3313_v52 }
 0x467   : > { %3210 = vst.msk [vmem:[#allocation2 + $0x8] sm:$0xff] %vm3208_vm11, %v3207_v20 }
 0x468   : > { %3320 = vst.msk [vmem:[#allocation2] sm:$0xff] %vm3319_vm12, %v3317_v4  ;;  %v3316_v29 = vpop.xlane.xlu0 %3315 }
 0x469   : > { %v3318_v60 = vmul.f32 0.0091743115, %v3316_v29  ;;  %v3424_v26 = vpop.xlane.xlu1 %3423 }
 0x46a   : > { %v3428_v43 = vmul.f32 0.0091743115, %v3424_v26 }
 0x46b   : > { %3321 = vst.msk [vmem:[#allocation2 + $0x8] sm:$0xff] %vm3319_vm12, %v3318_v60 }
 0x46c   : > { %3431 = vst.msk [vmem:[#allocation2] sm:$0xff] %vm3430_vm13, %v3428_v43  ;;  %v3427_v38 = vpop.xlane.xlu0 %3426 }
 0x46d   : > { %v3429_v48 = vmul.f32 0.0091743115, %v3427_v38  ;;  %v3535_v41 = vpop.xlane.xlu1 %3534 }
 0x46e   : > { %v3539_v47 = vmul.f32 0.0091743115, %v3535_v41 }
 0x46f   : > { %3432 = vst.msk [vmem:[#allocation2 + $0x8] sm:$0xff] %vm3430_vm13, %v3429_v48 }
 0x470   : > { %3542 = vst.msk [vmem:[#allocation2] sm:$0xff] %vm3541_vm14, %v3539_v47  ;;  %v3538_v9 = vpop.xlane.xlu0 %3537 }
 0x471   : > { %v3540_v3 = vmul.f32 0.0091743115, %v3538_v9  ;;  %v3646_v31 = vpop.xlane.xlu1 %3645 }
 0x472   : > { %v3650_v14 = vmul.f32 0.0091743115, %v3646_v31 }
 0x473   : > { %3543 = vst.msk [vmem:[#allocation2 + $0x8] sm:$0xff] %vm3541_vm14, %v3540_v3 }
 0x474   : > { %3653 = vst.msk [vmem:[#allocation2] sm:$0xff] %vm3652_vm15, %v3650_v14  ;;  %v3649_v45 = vpop.xlane.xlu0 %3648 }
 0x475   : > { %v3651_v7 = vmul.f32 0.0091743115, %v3649_v45  ;;  %v3757_v37 = vpop.xlane.xlu1 %3756 }
 0x476   : > { %v3761_v53 = vmul.f32 0.0091743115, %v3757_v37 }
 0x477   : > { %3654 = vst.msk [vmem:[#allocation2 + $0x8] sm:$0xff] %vm3652_vm15, %v3651_v7 }
 0x478   : > { %3764 = vst.msk [vmem:[#allocation2] sm:$0xff] %vm3763_vm0, %v3761_v53  ;;  %v3760_v62 = vpop.xlane.xlu0 %3759 }
 0x479   : > { %v3762_v12 = vmul.f32 0.0091743115, %v3760_v62  ;;  %v3868_v59 = vpop.xlane.xlu1 %3867 }
 0x47a   : > { %v3872_v46 = vmul.f32 0.0091743115, %v3868_v59 }
 0x47b   : > { %3765 = vst.msk [vmem:[#allocation2 + $0x8] sm:$0xff] %vm3763_vm0, %v3762_v12 }
 0x47c   : > { %3875 = vst.msk [vmem:[#allocation2] sm:$0xff] %vm3874_vm1, %v3872_v46  ;;  %v3871_v33 = vpop.xlane.xlu0 %3870 }
 0x47d   : > { %v3873_v0 = vmul.f32 0.0091743115, %v3871_v33  ;;  %v3979_v11 = vpop.xlane.xlu1 %3978 }
 0x47e   : > { %v3983_v23 = vmul.f32 0.0091743115, %v3979_v11 }
 0x47f   : > { %3876 = vst.msk [vmem:[#allocation2 + $0x8] sm:$0xff] %vm3874_vm1, %v3873_v0 }
 0x480   : > { %3986 = vst.msk [vmem:[#allocation2] sm:$0xff] %vm3985_vm2, %v3983_v23  ;;  %v3982_v63 = vpop.xlane.xlu0 %3981 }
 0x481   : > { %v3984_v28 = vmul.f32 0.0091743115, %v3982_v63 }
 0x483   : > { %3987 = vst.msk [vmem:[#allocation2 + $0x8] sm:$0xff] %vm3985_vm2, %v3984_v28 }
 0x487   : > { %v3988_v24 = vld [vmem:[#allocation2] sm:$0xff] }
 0x488   : > { %5828 = vmatprep.mubr.msk.f32.mxu0 %vm4001_vm3, %v3988_v24 }
 0x48a   : > { %v3989_v40 = vld [vmem:[#allocation2 + $0x8] sm:$0xff] }
 0x48b   : > { %5829 = vmatmul.mubr.msk.f32.vlgmr.msra.gmra.mrb[0].mxu0 %vm4001_vm3, %v3989_v40 }
 0x48c   : > { %5935 = vmatpush3.bf16.msra.mxu0 %v10157_v5  ;;  %5850 = vmatprep.mubr.msk.f32.mxu0 %vm6263_vm4, %v6264_v19 }
 0x48d   : > { %5936 = vmatprep.subr.bf16.mxu0 %v6262_v50 }
 0x490   : > { %5938 = vmatpush3.bf16.msra.mxu0 %v10172_v44 }
 0x491   : > { %5945 = vmatprep.subr.bf16.mxu0 %v6262_v50 }
 0x4c3   : > { %v4160_v17 = vpop.f32.mrb[0].mxu1 }
 0x4c4   : > { %v5841_v61 = vpop.f32.mrb[1].mxu1 }
 0x55e   : > { %v5830_v1 = vpop.f32.mrb[0].mxu0 }
 0x55f   : > { %v10200_v49 = vadd.f32 %v5830_v1, %v5751_v57  ;;  %v4074_v42 = vpop.f32.mrb[1].mxu0 }
 0x560   : > { %v10202_v58 = vadd.f32 %v5751_v57, %v4074_v42 }
 0x562   : > { %v4164_v54 = vadd.f32 %v4160_v17, %v10202_v58 }
 0x564   : > { %6075 = vtanh.f32 %v4164_v54  ;;  %v5754_v25 = vmul.f32 -1.442695, %v4164_v54 }
 0x566   : > { %6077 = vpow2.f32 %v5754_v25 }
 0x56e   : > { %v6076_v10 = vpop.eup %6075 }
 0x56f   : > { %4174 = vrot.lane.b32.xlu1 %v6076_v10, %s6265_s23 }
 0x570   : > { %v6078_v8 = vpop.eup %6077 }
 0x571   : > { %v4168_v34 = vadd.f32 1.0, %v6078_v8 }
 0x573   : > { %6079 = vrcp.f32 %v4168_v34 }
 0x57d   : > { %v6080_v36 = vpop.eup %6079 }
 0x57e   : > { %v4172_v22 = vmul.f32 0.0, %v6080_v36 }
 0x5e1   : > { %v4175_v21 = vpop.permute.xlu1 %4174 }
 0x5e2   : > { %v4177_v13 = vmul.f32 %v6080_v36, %v4175_v21 }
 0x5e4   : > { %4179 = vrot.lane.b32.xlu0 %v4177_v13, %s6265_s23 }
 0x656   : > { %v4180_v27 = vpop.permute.xlu0 %4179 }
 0x657   : > { %v4182_v51 = vadd.f32 %v4180_v27, %v4172_v22 }
 0x659   : > { %6081 = vtanh.f32 %v4182_v51  ;;  %v4329_v60 = vrot.slane %v4182_v51, 6 }
 0x663   : > { %v6082_v35 = vpop.eup %6081 }
 0x664   : > { %4185 = vrot.lane.b32.xlu1 %v6082_v35, %s6265_s23 }
 0x6d6   : > { %v4186_v32 = vpop.permute.xlu1 %4185 }
 0x6d7   : > { %v10208_v30 = vmul.f32 %v6080_v36, %v4186_v32 }
 0x6d9   : > { %4243 = vrot.lane.b32.xlu1 %v10208_v30, %s6266_s20 }
 0x74b   : > { %v4244_v18 = vpop.permute.xlu1 %4243 }
 0x74c   : > { %5851 = vmatmul.mubr.msk.f32.vlgmr.msra.gmra.mrb[2].mxu0 %vm4001_vm3, %v4244_v18 }
 0x74d   : > { %5947 = vmatpush3.bf16.msra.mxu0 %v10157_v5  ;;  %5872 = vmatprep.mubr.msk.f32.mxu0 %vm6263_vm4, %v6264_v19 }
 0x74e   : > { %5948 = vmatprep.subr.bf16.mxu0 %v6262_v50 }
 0x751   : > { %5950 = vmatpush3.bf16.msra.mxu0 %v10172_v44 }
 0x752   : > { %5957 = vmatprep.subr.bf16.mxu0 %v6262_v50 }
 0x81f   : > { %v4313_v6 = vpop.f32.mrb[2].mxu0 }
 0x820   : > { %v4318_v15 = vrot.slane %v4313_v6, 6  ;;  %v5852_v2 = vpop.f32.mrb[3].mxu0 }
 0x822   : > { %v4320_v55 = vadd.f32 %v4318_v15, %v10202_v58 }
 0x824   : > { %6083 = vtanh.f32 %v4320_v55  ;;  %v5756_v39 = vmul.f32 -1.442695, %v4320_v55 }
 0x826   : > { %6085 = vpow2.f32 %v5756_v39 }
 0x82e   : > { %v6084_v56 = vpop.eup %6083 }
 0x82f   : > { %4333 = vrot.lane.b32.xlu0 %v6084_v56, %s6265_s23 }
 0x830   : > { %v6086_v16 = vpop.eup %6085 }
 0x831   : > { %v4324_v20 = vadd.f32 1.0, %v6086_v16 }
 0x833   : > { %6087 = vrcp.f32 %v4324_v20 }
 0x83d   : > { %v6088_v52 = vpop.eup %6087 }
 0x83e   : > { %v4331_v26 = vmul.f32 %v6088_v52, %v4329_v60 }
 0x8a1   : > { %v4334_v4 = vpop.permute.xlu0 %4333 }
 0x8a2   : > { %v4336_v29 = vmul.f32 %v6088_v52, %v4334_v4 }
 0x8a4   : > { %4338 = vrot.lane.b32.xlu1 %v4336_v29, %s6265_s23 }
 0x916   : > { %v4339_v43 = vpop.permute.xlu1 %4338 }
 0x917   : > { %v4341_v38 = vadd.f32 %v4339_v43, %v4331_v26 }
 0x919   : > { %6089 = vtanh.f32 %v4341_v38  ;;  %v4492_v0 = vrot.slane %v4341_v38, 6 }
 0x923   : > { %v6090_v48 = vpop.eup %6089 }
 0x924   : > { %4344 = vrot.lane.b32.xlu0 %v6090_v48, %s6265_s23 }
 0x996   : > { %v4345_v41 = vpop.permute.xlu0 %4344 }
 0x997   : > { %v10223_v47 = vmul.f32 %v6088_v52, %v4345_v41 }
 0x999   : > { %v4405_v9 = vrot.slane %v10223_v47, 2 }
 0x99b   : > { %4406 = vrot.lane.b32.xlu1 %v4405_v9, %s6266_s20 }
 0xa0d   : > { %v4407_v3 = vpop.permute.xlu1 %4406 }
 0xa0e   : > { %5862 = vmatmul.mubr.msk.f32.vlgmr.msra.gmra.mrb[2].mxu1 %vm4001_vm3, %v4407_v3 }
 0xa0f   : > { %5953 = vmatpush3.bf16.msra.mxu1 %v10157_v5  ;;  %5883 = vmatprep.mubr.msk.f32.mxu1 %vm6263_vm4, %v6264_v19 }
 0xa10   : > { %5954 = vmatprep.subr.bf16.mxu1 %v6262_v50 }
 0xa13   : > { %5956 = vmatpush3.bf16.msra.mxu1 %v10172_v44 }
 0xa14   : > { %5963 = vmatprep.subr.bf16.mxu1 %v6262_v50 }
 0xae1   : > { %v4476_v31 = vpop.f32.mrb[2].mxu1 }
 0xae2   : > { %v4481_v14 = vrot.slane %v4476_v31, 4  ;;  %v5863_v45 = vpop.f32.mrb[3].mxu1 }
 0xae4   : > { %v4483_v7 = vadd.f32 %v4481_v14, %v10202_v58 }
 0xae6   : > { %6091 = vtanh.f32 %v4483_v7  ;;  %v5758_v53 = vmul.f32 -1.442695, %v4483_v7 }
 0xae8   : > { %6093 = vpow2.f32 %v5758_v53 }
 0xaf0   : > { %v6092_v37 = vpop.eup %6091 }
 0xaf1   : > { %4496 = vrot.lane.b32.xlu0 %v6092_v37, %s6265_s23 }
 0xaf2   : > { %v6094_v62 = vpop.eup %6093 }
 0xaf3   : > { %v4487_v12 = vadd.f32 1.0, %v6094_v62 }
 0xaf5   : > { %6095 = vrcp.f32 %v4487_v12 }
 0xaff   : > { %v6096_v59 = vpop.eup %6095 }
 0xb00   : > { %v4494_v11 = vmul.f32 %v6096_v59, %v4492_v0 }
 0xb63   : > { %v4497_v46 = vpop.permute.xlu0 %4496 }
 0xb64   : > { %v4499_v33 = vmul.f32 %v6096_v59, %v4497_v46 }
 0xb66   : > { %4501 = vrot.lane.b32.xlu1 %v4499_v33, %s6265_s23 }
 0xbd8   : > { %v4502_v23 = vpop.permute.xlu1 %4501 }
 0xbd9   : > { %v4504_v63 = vadd.f32 %v4502_v23, %v4494_v11  ;;  %v10286_v11 = vld [vmem:[%s10492_s7] sm:$0x1] }
 0xbdb   : > { %6097 = vtanh.f32 %v4504_v63  ;;  %v4655_v22 = vrot.slane %v4504_v63, 6  ;;  %v4195_v63 = vrot.slane %v10286_v11, 7 }
 0xbe5   : > { %v6098_v28 = vpop.eup %6097 }
 0xbe6   : > { %4507 = vrot.lane.b32.xlu0 %v6098_v28, %s6265_s23  ;;  %v4190_v28 = vrot.slane %v10208_v30, 7 }
 0xc58   : > { %v4508_v24 = vpop.permute.xlu0 %4507 }
 0xc59   : > { %v10238_v40 = vmul.f32 %v6096_v59, %v4508_v24  ;;  %v4192_v24 = vsub.f32 %v10208_v30, %v4190_v28 }
 0xc5b   : > { %v4568_v17 = vrot.slane %v10238_v40, 4 }
 0xc5d   : > { %4569 = vrot.lane.b32.xlu1 %v4568_v17, %s6266_s20 }
 0xccf   : > { %v4570_v61 = vpop.permute.xlu1 %4569 }
 0xcd0   : > { %5873 = vmatmul.mubr.msk.f32.vlgmr.msra.gmra.mrb[4].mxu0 %vm4001_vm3, %v4570_v61 }
 0xcd1   : > { %5959 = vmatpush3.bf16.msra.mxu0 %v10157_v5  ;;  %5894 = vmatprep.mubr.msk.f32.mxu0 %vm6263_vm4, %v6264_v19 }
 0xcd2   : > { %5960 = vmatprep.subr.bf16.mxu0 %v6262_v50 }
 0xcd5   : > { %5962 = vmatpush3.bf16.msra.mxu0 %v10172_v44 }
 0xcd6   : > { %5969 = vmatprep.subr.bf16.mxu0 %v6262_v50 }
 0xda3   : > { %v4639_v57 = vpop.f32.mrb[4].mxu0 }
 0xda4   : > { %v4644_v1 = vrot.slane %v4639_v57, 2  ;;  %v5874_v42 = vpop.f32.mrb[5].mxu0 }
 0xda6   : > { %v4646_v54 = vadd.f32 %v4644_v1, %v10202_v58  ;;  %v4193_v1 = vand.u32 2147483647, %v4192_v24 }
 0xda8   : > { %6099 = vtanh.f32 %v4646_v54  ;;  %v5760_v25 = vmul.f32 -1.442695, %v4646_v54 }
 0xdaa   : > { %6101 = vpow2.f32 %v5760_v25 }
 0xdb2   : > { %v6100_v10 = vpop.eup %6099 }
 0xdb3   : > { %4659 = vrot.lane.b32.xlu0 %v6100_v10, %s6265_s23  ;;  %v10303_v10 = vld [vmem:[%s10492_s7 + $0x1] sm:$0x1] }
 0xdb4   : > { %v6102_v8 = vpop.eup %6101  ;;  %v4217_v30 = vrot.slane %v10303_v10, 7 }
 0xdb5   : > { %v4650_v34 = vadd.f32 1.0, %v6102_v8 }
 0xdb7   : > { %6103 = vrcp.f32 %v4650_v34 }
 0xdc1   : > { %v6104_v36 = vpop.eup %6103 }
 0xdc2   : > { %v4657_v27 = vmul.f32 %v6104_v36, %v4655_v22 }
 0xe25   : > { %v4660_v21 = vpop.permute.xlu0 %4659 }
 0xe26   : > { %v4662_v13 = vmul.f32 %v6104_v36, %v4660_v21 }
 0xe28   : > { %4664 = vrot.lane.b32.xlu1 %v4662_v13, %s6265_s23 }
 0xe9a   : > { %v4665_v51 = vpop.permute.xlu1 %4664 }
 0xe9b   : > { %v4667_v35 = vadd.f32 %v4665_v51, %v4657_v27  ;;  %v4353_v27 = vrot.slane %v10286_v11, 5 }
 0xe9d   : > { %6105 = vtanh.f32 %v4667_v35  ;;  %v4815_v26 = vrot.slane %v4667_v35, 6 }
 0xea7   : > { %v6106_v58 = vpop.eup %6105 }
 0xea8   : > { %4670 = vrot.lane.b32.xlu0 %v6106_v58, %s6265_s23  ;;  %v4349_v58 = vrot.slane %v10223_v47, 7 }
 0xf1a   : > { %v4671_v32 = vpop.permute.xlu0 %4670 }
 0xf1b   : > { %v10253_v18 = vmul.f32 %v6104_v36, %v4671_v32  ;;  %v4351_v32 = vsub.f32 %v10223_v47, %v4349_v58 }
 0xf1d   : > { %v4731_v6 = vrot.slane %v10253_v18, 6 }
 0xf1f   : > { %4732 = vrot.lane.b32.xlu1 %v4731_v6, %s6266_s20 }
 0xf91   : > { %v4733_v15 = vpop.permute.xlu1 %4732 }
 0xf92   : > { %5884 = vmatmul.mubr.msk.f32.vlgmr.msra.gmra.mrb[4].mxu1 %vm4001_vm3, %v4733_v15 }
 0xf93   : > { %5965 = vmatpush3.bf16.msra.mxu1 %v10157_v5  ;;  %5905 = vmatprep.mubr.msk.f32.mxu1 %vm6263_vm4, %v6264_v19 }
 0xf94   : > { %5966 = vmatprep.subr.bf16.mxu1 %v6262_v50 }
 0xf97   : > { %5968 = vmatpush3.bf16.msra.mxu1 %v10172_v44 }
0x1065   : > { %v4802_v2 = vpop.f32.mrb[4].mxu1 }
0x1066   : > { %v4806_v55 = vadd.f32 %v4802_v2, %v10200_v49  ;;  %v5885_v56 = vpop.f32.mrb[5].mxu1 }
0x1068   : > { %6107 = vtanh.f32 %v4806_v55  ;;  %v5762_v16 = vmul.f32 -1.442695, %v4806_v55  ;;  %v4352_v55 = vand.u32 2147483647, %v4351_v32 }
0x106a   : > { %6109 = vpow2.f32 %v5762_v16 }
0x1072   : > { %v6108_v39 = vpop.eup %6107 }
0x1073   : > { %4819 = vrot.lane.b32.xlu0 %v6108_v39, %s6265_s23 }
0x1074   : > { %v6110_v20 = vpop.eup %6109 }
0x1075   : > { %v4810_v52 = vadd.f32 1.0, %v6110_v20 }
0x1077   : > { %6111 = vrcp.f32 %v4810_v52 }
0x1081   : > { %v6112_v4 = vpop.eup %6111 }
0x1082   : > { %v4817_v43 = vmul.f32 %v6112_v4, %v4815_v26 }
0x10e5   : > { %v4820_v29 = vpop.permute.xlu0 %4819 }
0x10e6   : > { %v4822_v60 = vmul.f32 %v6112_v4, %v4820_v29  ;;  %v4373_v29 = vrot.slane %v10303_v10, 5 }
0x10e8   : > { %4824 = vrot.lane.b32.xlu1 %v4822_v60, %s6265_s23 }
0x115a   : > { %v4825_v38 = vpop.permute.xlu1 %4824 }
0x115b   : > { %v4827_v48 = vadd.f32 %v4825_v38, %v4817_v43 }
0x115d   : > { %6113 = vtanh.f32 %v4827_v48 }
0x1167   : > { %v6114_v41 = vpop.eup %6113 }
0x1168   : > { %4830 = vrot.lane.b32.xlu0 %v6114_v41, %s6265_s23 }
0x11da   : > { %v4831_v9 = vpop.permute.xlu0 %4830 }
0x11db   : > { %v10267_v3 = vmul.f32 %v6112_v4, %v4831_v9 }
0x11dd   : > { %4883 = vrot.lane.b32.xlu1 %v10267_v3, %s6266_s20 }
0x124f   : > { %v4884_v31 = vpop.permute.xlu1 %4883 }
0x1250   : > { %5895 = vmatmul.mubr.msk.f32.vlgmr.msra.gmra.mrb[6].mxu0 %vm4001_vm3, %v4884_v31 }
0x1251   : > { %5971 = vmatpush3.bf16.msra.mxu0 %v10157_v5  ;;  %5916 = vmatprep.mubr.msk.f32.mxu0 %vm6263_vm4, %v6264_v19  ;;  %vm4205_vm4 = vcmask 253952  }
0x1252   : > { %5972 = vmatprep.subr.bf16.mxu0 %v6262_v50  ;;  %v4969_v50 = vrot.slane %v4827_v48, 6 }
0x1255   : > { %5974 = vmatpush3.bf16.msra.mxu0 %v10172_v44 }
0x1323   : > { %v4953_v14 = vpop.f32.mrb[6].mxu0 }
0x1324   : > { %v4958_v45 = vrot.slane %v4953_v14, 6  ;;  %v5896_v7 = vpop.f32.mrb[7].mxu0 }
0x1326   : > { %v4960_v37 = vadd.f32 %v4958_v45, %v10200_v49 }
0x1328   : > { %6115 = vtanh.f32 %v4960_v37  ;;  %v5764_v62 = vmul.f32 -1.442695, %v4960_v37 }
0x132a   : > { %6117 = vpow2.f32 %v5764_v62 }
0x1332   : > { %v6116_v53 = vpop.eup %6115 }
0x1333   : > { %4973 = vrot.lane.b32.xlu0 %v6116_v53, %s6265_s23 }
0x1334   : > { %v6118_v12 = vpop.eup %6117 }
0x1335   : > { %v4964_v5 = vadd.f32 1.0, %v6118_v12  ;;  %v4516_v12 = vrot.slane %v10286_v11, 3 }
0x1337   : > { %6119 = vrcp.f32 %v4964_v5 }
0x1341   : > { %v6120_v59 = vpop.eup %6119 }
0x1342   : > { %v4971_v44 = vmul.f32 %v6120_v59, %v4969_v50 }
0x13a5   : > { %v4974_v19 = vpop.permute.xlu0 %4973 }
0x13a6   : > { %v4976_v46 = vmul.f32 %v6120_v59, %v4974_v19  ;;  %v4512_v19 = vrot.slane %v10238_v40, 7 }
0x13a8   : > { %4978 = vrot.lane.b32.xlu1 %v4976_v46, %s6265_s23  ;;  %v4514_v46 = vsub.f32 %v10238_v40, %v4512_v19 }
0x141a   : > { %v4979_v33 = vpop.permute.xlu1 %4978 }
0x141b   : > { %v10280_v0 = vadd.f32 %v4979_v33, %v4971_v44 }
0x141d   : > { %6121 = vtanh.f32 %v10280_v0 }
0x1427   : > { %v6122_v23 = vpop.eup %6121 }
0x1428   : > { %4984 = vrot.lane.b32.xlu0 %v6122_v23, %s6265_s23  ;;  %v4515_v23 = vand.u32 2147483647, %v4514_v46 }
0x142c   : > { %4196 = vrot.lane.b32.xlu0 %v4195_v63, %s6266_s20 }
0x149a   : > { %v4985_v17 = vpop.permute.xlu0 %4984 }
0x149b   : > { %v10293_v61 = vmul.f32 %v6120_v59, %v4985_v17 }
0x149d   : > { %v5037_v57 = vrot.slane %v10293_v61, 2 }
0x149e   : > { %v10296_v42 = vpop.permute.xlu0 %4196 }
0x149f   : > { %v4199_v54 = vmul.f32 %v10296_v42, %v4193_v1  ;;  %5038 = vrot.lane.b32.xlu1 %v5037_v57, %s6266_s20 }
0x14a1   : > { %v4201_v25 = vrot.slane %v4199_v54, 1  ;;  %v4536_v54 = vrot.slane %v10303_v10, 3 }
0x14a3   : > { %4202 = vrot.lane.b32.xlu1 %v4201_v25, %s6266_s20 }
0x14a7   : > { %4218 = vrot.lane.b32.xlu1 %v4217_v30, %s6266_s20 }
0x1511   : > { %v5039_v8 = vpop.permute.xlu1 %5038 }
0x1512   : > { %5906 = vmatmul.mubr.msk.f32.vlgmr.msra.gmra.mrb[6].mxu1 %vm4001_vm3, %v5039_v8 }
0x1515   : > { %v4203_v34 = vpop.permute.xlu1 %4202 }
0x1516   : > { %v4206_v36 = vsel %vm4205_vm4, %v4203_v34, 0.0 }
0x1517   : > { %4207 = vadd.xlane.f32.xlu0 %v4206_v36 }
0x1519   : > { %v10310_v21 = vpop.permute.xlu1 %4218 }
0x151a   : > { %v4221_v13 = vmul.f32 %v10310_v21, %v4193_v1 }
0x151c   : > { %v4223_v22 = vrot.slane %v4221_v13, 1 }
0x151e   : > { %4224 = vrot.lane.b32.xlu1 %v4223_v22, %s6266_s20 }
0x152d   : > { %4354 = vrot.lane.b32.xlu0 %v4353_v27, %s6266_s20 }
0x1590   : > { %v4225_v51 = vpop.permute.xlu1 %4224 }
0x1591   : > { %v4227_v35 = vsel %vm4205_vm4, %v4225_v51, 0.0 }
0x1592   : > { %4228 = vadd.xlane.f32.xlu1 %v4227_v35 }
0x15a4   : > { %v4208_v6 = vpop.xlane.xlu0 %4207 }
0x15a5   : > { %v4209_v15 = vrot.slane %v4208_v6, 4 }
0x15a7   : > { %v4210_v2 = vadd.f32 %v4209_v15, %v4208_v6  ;;  %v4679_v6 = vrot.slane %v10286_v11, 1 }
0x15a8   : > { %v10319_v56 = vpop.permute.xlu0 %4354 }
0x15a9   : > { %v4211_v39 = vrot.slane %v4210_v2, 2  ;;  %v4357_v16 = vmul.f32 %v10319_v56, %v4352_v55 }
0x15ab   : > { %v4359_v20 = vrot.slane %v4357_v16, 3  ;;  %v4212_v52 = vadd.f32 %v4211_v39, %v4210_v2  ;;  %v4699_v39 = vrot.slane %v10303_v10, 1 }
0x15ad   : > { %4360 = vrot.lane.b32.xlu1 %v4359_v20, %s6266_s20  ;;  %v4213_v4 = vrot.slane %v4212_v52, 1 }
0x15af   : > { %v4214_v60 = vadd.f32 %v4213_v4, %v4212_v52 }
0x15b1   : > { %5975 = vpush %v4214_v60  ;;  %4374 = vrot.lane.b32.xlu1 %v4373_v29, %s6266_s20 }
0x15e2   : > { %s5976_s30 = spop %5975 }
0x15e5   : > { %v10325_v47 = vpop.f32.mrb[6].mxu1 }
0x15e6   : > { %v5907_v26 = vpop.f32.mrb[7].mxu1 }
0x161f   : > { %v4229_v43 = vpop.xlane.xlu1 %4228 }
0x1620   : > { %v4230_v38 = vrot.slane %v4229_v43, 4 }
0x1622   : > { %v4231_v48 = vadd.f32 %v4230_v38, %v4229_v43 }
0x1623   : > { %v4361_v41 = vpop.permute.xlu1 %4360 }
0x1624   : > { %v4232_v9 = vrot.slane %v4231_v48, 2  ;;  %v4363_v31 = vsel %vm4205_vm4, %v4361_v41, 0.0 }
0x1625   : > { %4364 = vadd.xlane.f32.xlu0 %v4363_v31 }
0x1626   : > { %v4233_v14 = vadd.f32 %v4232_v9, %v4231_v48 }
0x1627   : > { %v10328_v45 = vpop.permute.xlu1 %4374 }
0x1628   : > { %v4377_v7 = vmul.f32 %v10328_v45, %v4352_v55  ;;  %v4234_v37 = vrot.slane %v4233_v14, 1  ;;  %v4675_v55 = vrot.slane %v10253_v18, 7 }
0x162a   : > { %v4379_v53 = vrot.slane %v4377_v7, 3  ;;  %v4235_v62 = vadd.f32 %v4234_v37, %v4233_v14  ;;  %v4677_v16 = vsub.f32 %v10253_v18, %v4675_v55 }
0x162c   : > { %5977 = vpush %v4235_v62  ;;  %4380 = vrot.lane.b32.xlu1 %v4379_v53, %s6266_s20  ;;  %v4678_v29 = vand.u32 2147483647, %v4677_v16 }
0x163b   : > { %4517 = vrot.lane.b32.xlu0 %v4516_v12, %s6266_s20 }
0x165d   : > { %s5978_s11 = spop %5977 }
0x169e   : > { %v4381_v5 = vpop.permute.xlu1 %4380 }
0x169f   : > { %v4383_v59 = vsel %vm4205_vm4, %v4381_v5, 0.0  ;;  %v4835_v5 = vrot.slane %v10267_v3, 7 }
0x16a0   : > { %4384 = vadd.xlane.f32.xlu1 %v4383_v59 }
0x16a1   : > { %v4837_v46 = vsub.f32 %v10267_v3, %v4835_v5 }
0x16b2   : > { %v4365_v50 = vpop.xlane.xlu0 %4364 }
0x16b3   : > { %v4366_v44 = vrot.slane %v4365_v50, 4 }
0x16b5   : > { %v4367_v33 = vadd.f32 %v4366_v44, %v4365_v50  ;;  %v4838_v50 = vand.u32 2147483647, %v4837_v46 }
0x16b6   : > { %v10337_v63 = vpop.permute.xlu0 %4517 }
0x16b7   : > { %v4368_v28 = vrot.slane %v4367_v33, 2  ;;  %v4520_v24 = vmul.f32 %v10337_v63, %v4515_v23  ;;  %v4839_v44 = vmul.f32 %v4838_v50, %v10296_v42 }
0x16b9   : > { %v4522_v17 = vrot.slane %v4520_v24, 5  ;;  %v4369_v57 = vadd.f32 %v4368_v28, %v4367_v33  ;;  %v4841_v33 = vrot.slane %v4839_v44, 1  ;;  %v4855_v24 = vmul.f32 %v4838_v50, %v10310_v21 }
0x16bb   : > { %4523 = vrot.lane.b32.xlu1 %v4522_v17, %s6266_s20  ;;  %v4370_v1 = vrot.slane %v4369_v57, 1  ;;  %v4857_v17 = vrot.slane %v4855_v24, 1 }
0x16bd   : > { %v4371_v25 = vadd.f32 %v4370_v1, %v4369_v57 }
0x16bf   : > { %5979 = vpush %v4371_v25  ;;  %4537 = vrot.lane.b32.xlu1 %v4536_v54, %s6266_s20 }
0x16f0   : > { %s5980_s28 = spop %5979 }
0x172d   : > { %v4385_v40 = vpop.xlane.xlu1 %4384 }
0x172e   : > { %v4386_v30 = vrot.slane %v4385_v40, 4 }
0x1730   : > { %v4387_v8 = vadd.f32 %v4386_v30, %v4385_v40 }
0x1731   : > { %v4524_v34 = vpop.permute.xlu1 %4523 }
0x1732   : > { %v4388_v36 = vrot.slane %v4387_v8, 2  ;;  %v4526_v13 = vsel %vm4205_vm4, %v4524_v34, 0.0  ;;  %v4989_v34 = vrot.slane %v10293_v61, 7 }
0x1733   : > { %4527 = vadd.xlane.f32.xlu0 %v4526_v13 }
0x1734   : > { %v4389_v22 = vadd.f32 %v4388_v36, %v4387_v8  ;;  %v5113_v36 = vrot.slane %v10325_v47, 4  ;;  %v4991_v21 = vsub.f32 %v10293_v61, %v4989_v34 }
0x1735   : > { %v10344_v27 = vpop.permute.xlu1 %4537 }
0x1736   : > { %v4540_v51 = vmul.f32 %v10344_v27, %v4515_v23  ;;  %v4390_v35 = vrot.slane %v4389_v22, 1  ;;  %v5115_v13 = vadd.f32 %v5113_v36, %v10200_v49 }
0x1738   : > { %v4542_v58 = vrot.slane %v4540_v51, 5  ;;  %v4391_v32 = vadd.f32 %v4390_v35, %v4389_v22  ;;  %v4992_v22 = vand.u32 2147483647, %v4991_v21  ;;  %6123 = vtanh.f32 %v5115_v13 }
0x173a   : > { %5981 = vpush %v4391_v32  ;;  %4543 = vrot.lane.b32.xlu1 %v4542_v58, %s6266_s20  ;;  %v4993_v51 = vmul.f32 %v4992_v22, %v10319_v56  ;;  %v5009_v56 = vmul.f32 %v4992_v22, %v10328_v45 }
0x173c   : > { %v4995_v35 = vrot.slane %v4993_v51, 3 }
0x1742   : > { %v6124_v58 = vpop.eup %6123 }
0x1749   : > { %4680 = vrot.lane.b32.xlu0 %v4679_v6, %s6266_s20 }
0x176b   : > { %s5982_s14 = spop %5981 }
0x17ac   : > { %v4544_v15 = vpop.permute.xlu1 %4543 }
0x17ad   : > { %v4546_v2 = vsel %vm4205_vm4, %v4544_v15, 0.0 }
0x17ae   : > { %4547 = vadd.xlane.f32.xlu1 %v4546_v2 }
0x17bf   : > { %4700 = vrot.lane.b32.xlu1 %v4699_v39, %s6266_s20 }
0x17c0   : > { %v4528_v20 = vpop.xlane.xlu0 %4527 }
0x17c1   : > { %v4529_v52 = vrot.slane %v4528_v20, 4 }
0x17c3   : > { %v4530_v4 = vadd.f32 %v4529_v52, %v4528_v20  ;;  %v5766_v20 = vmul.f32 -1.442695, %v5115_v13  ;;  %v5011_v52 = vrot.slane %v5009_v56, 3 }
0x17c4   : > { %v10355_v60 = vpop.permute.xlu0 %4680 }
0x17c5   : > { %v4531_v11 = vrot.slane %v4530_v4, 2  ;;  %v4683_v26 = vmul.f32 %v10355_v60, %v4678_v29  ;;  %6125 = vpow2.f32 %v5766_v20 }
0x17c7   : > { %v4685_v43 = vrot.slane %v4683_v26, 7  ;;  %v4532_v38 = vadd.f32 %v4531_v11, %v4530_v4 }
0x17c9   : > { %4686 = vrot.lane.b32.xlu0 %v4685_v43, %s6266_s20  ;;  %v4533_v48 = vrot.slane %v4532_v38, 1 }
0x17cb   : > { %v4534_v41 = vadd.f32 %v4533_v48, %v4532_v38 }
0x17cd   : > { %5983 = vpush %v4534_v41 }
0x17cf   : > { %v6126_v41 = vpop.eup %6125 }
0x17fe   : > { %s5984_s1 = spop %5983 }
0x183b   : > { %v4687_v10 = vpop.permute.xlu0 %4686  ;;  %v4548_v18 = vpop.xlane.xlu1 %4547 }
0x183c   : > { %v4689_v9 = vsel %vm4205_vm4, %v4687_v10, 0.0  ;;  %v4549_v31 = vrot.slane %v4548_v18, 4 }
0x183d   : > { %4690 = vadd.xlane.f32.xlu0 %v4689_v9 }
0x183e   : > { %v4550_v14 = vadd.f32 %v4549_v31, %v4548_v18  ;;  %v5119_v18 = vadd.f32 1.0, %v6126_v41 }
0x183f   : > { %v10360_v7 = vpop.permute.xlu1 %4700 }
0x1840   : > { %v4551_v37 = vrot.slane %v4550_v14, 2  ;;  %v4703_v53 = vmul.f32 %v10360_v7, %v4678_v29  ;;  %6127 = vrcp.f32 %v5119_v18 }
0x1842   : > { %v4705_v62 = vrot.slane %v4703_v53, 7  ;;  %v4552_v12 = vadd.f32 %v4551_v37, %v4550_v14 }
0x1844   : > { %4706 = vrot.lane.b32.xlu1 %v4705_v62, %s6266_s20  ;;  %v4553_v59 = vrot.slane %v4552_v12, 1 }
0x1846   : > { %v4554_v19 = vadd.f32 %v4553_v59, %v4552_v12 }
0x1848   : > { %5985 = vpush %v4554_v19 }
0x184a   : > { %v6128_v31 = vpop.eup %6127 }
0x1853   : > { %4842 = vrot.lane.b32.xlu0 %v4841_v33, %s6266_s20  ;;  %v5124_v33 = vrot.slane %v10280_v0, 6 }
0x1855   : > { %v5126_v24 = vmul.f32 %v6128_v31, %v5124_v33 }
0x1879   : > { %s5986_s26 = spop %5985 }
0x18b6   : > { %v4707_v23 = vpop.permute.xlu1 %4706 }
0x18b7   : > { %v4709_v28 = vsel %vm4205_vm4, %v4707_v23, 0.0 }
0x18b8   : > { %4710 = vadd.xlane.f32.xlu1 %v4709_v28 }
0x18c9   : > { %4858 = vrot.lane.b32.xlu1 %v4857_v17, %s6266_s20 }
0x18ca   : > { %v4691_v57 = vpop.xlane.xlu0 %4690 }
0x18cb   : > { %v4692_v1 = vrot.slane %v4691_v57, 4 }
0x18cd   : > { %v4693_v54 = vadd.f32 %v4692_v1, %v4691_v57 }
0x18ce   : > { %v4843_v3 = vpop.permute.xlu0 %4842 }
0x18cf   : > { %v4694_v25 = vrot.slane %v4693_v54, 2  ;;  %v4845_v40 = vsel %vm4205_vm4, %v4843_v3, 0.0 }
0x18d0   : > { %4846 = vadd.xlane.f32.xlu0 %v4845_v40 }
0x18d1   : > { %v4695_v42 = vadd.f32 %v4694_v25, %v4693_v54 }
0x18d3   : > { %v4696_v30 = vrot.slane %v4695_v42, 1 }
0x18d5   : > { %v4697_v8 = vadd.f32 %v4696_v30, %v4695_v42 }
0x18d7   : > { %5987 = vpush %v4697_v8 }
0x18e6   : > { %4996 = vrot.lane.b32.xlu0 %v4995_v35, %s6266_s20 }
0x18ea   : > { %5128 = vrot.lane.b32.xlu0 %v6124_v58, %s6265_s23 }
0x1908   : > { %s5988_s17 = spop %5987 }
0x1945   : > { %v4711_v32 = vpop.xlane.xlu1 %4710 }
0x1946   : > { %v4712_v6 = vrot.slane %v4711_v32, 4 }
0x1948   : > { %v4713_v15 = vadd.f32 %v4712_v6, %v4711_v32 }
0x1949   : > { %v4859_v2 = vpop.permute.xlu1 %4858 }
0x194a   : > { %v4714_v47 = vrot.slane %v4713_v15, 2  ;;  %v4861_v55 = vsel %vm4205_vm4, %v4859_v2, 0.0 }
0x194b   : > { %4862 = vadd.xlane.f32.xlu1 %v4861_v55 }
0x194c   : > { %v4715_v61 = vadd.f32 %v4714_v47, %v4713_v15 }
0x194e   : > { %v4716_v39 = vrot.slane %v4715_v61, 1 }
0x1950   : > { %v4717_v16 = vadd.f32 %v4716_v39, %v4715_v61 }
0x1952   : > { %5989 = vpush %v4717_v16 }
0x195c   : > { %5012 = vrot.lane.b32.xlu1 %v5011_v52, %s6266_s20 }
0x195d   : > { %v4847_v4 = vpop.xlane.xlu0 %4846 }
0x195e   : > { %v4848_v29 = vrot.slane %v4847_v4, 4 }
0x1960   : > { %v4849_v11 = vadd.f32 %v4848_v29, %v4847_v4 }
0x1961   : > { %v4997_v26 = vpop.permute.xlu0 %4996 }
0x1962   : > { %v4850_v43 = vrot.slane %v4849_v11, 2  ;;  %v4999_v38 = vsel %vm4205_vm4, %v4997_v26, 0.0 }
0x1963   : > { %5000 = vadd.xlane.f32.xlu0 %v4999_v38 }
0x1964   : > { %v4851_v48 = vadd.f32 %v4850_v43, %v4849_v11 }
0x1965   : > { %v5129_v45 = vpop.permute.xlu0 %5128 }
0x1966   : > { %v4852_v10 = vrot.slane %v4851_v48, 1  ;;  %v5131_v14 = vmul.f32 %v6128_v31, %v5129_v45 }
0x1968   : > { %v4853_v9 = vadd.f32 %v4852_v10, %v4851_v48 }
0x196a   : > { %5991 = vpush %v4853_v9 }
0x1979   : > { %5133 = vrot.lane.b32.xlu0 %v5131_v14, %s6265_s23 }
0x1983   : > { %s5990_s0 = spop %5989 }
0x199b   : > { %s5992_s16 = spop %5991 }
0x19d8   : > { %v4863_v37 = vpop.xlane.xlu1 %4862 }
0x19d9   : > { %v4864_v53 = vrot.slane %v4863_v37, 4 }
0x19db   : > { %v4865_v62 = vadd.f32 %v4864_v53, %v4863_v37 }
0x19dc   : > { %v5013_v12 = vpop.permute.xlu1 %5012 }
0x19dd   : > { %v4866_v5 = vrot.slane %v4865_v62, 2  ;;  %v5015_v59 = vsel %vm4205_vm4, %v5013_v12, 0.0 }
0x19de   : > { %5016 = vadd.xlane.f32.xlu1 %v5015_v59 }
0x19df   : > { %v4867_v19 = vadd.f32 %v4866_v5, %v4865_v62 }
0x19e1   : > { %v4868_v46 = vrot.slane %v4867_v19, 1 }
0x19e3   : > { %v4869_v50 = vadd.f32 %v4868_v46, %v4867_v19 }
0x19e5   : > { %5993 = vpush %v4869_v50 }
0x19f0   : > { %v5001_v44 = vpop.xlane.xlu0 %5000 }
0x19f1   : > { %v5002_v23 = vrot.slane %v5001_v44, 4 }
0x19f3   : > { %v5003_v28 = vadd.f32 %v5002_v23, %v5001_v44 }
0x19f4   : > { %v5134_v17 = vpop.permute.xlu0 %5133 }
0x19f5   : > { %v5004_v57 = vrot.slane %v5003_v28, 2  ;;  %v10386_v1 = vadd.f32 %v5134_v17, %v5126_v24 }
0x19f7   : > { %6129 = vtanh.f32 %v10386_v1  ;;  %v5005_v54 = vadd.f32 %v5004_v57, %v5003_v28  ;;  %v5279_v46 = vrot.slane %v10386_v1, 6 }
0x19f9   : > { %v5006_v3 = vrot.slane %v5005_v54, 1 }
0x19fb   : > { %v5007_v25 = vadd.f32 %v5006_v3, %v5005_v54 }
0x19fd   : > { %5995 = vpush %v5007_v25 }
0x1a01   : > { %v6130_v40 = vpop.eup %6129 }
0x1a02   : > { %5139 = vrot.lane.b32.xlu0 %v6130_v40, %s6265_s23 }
0x1a16   : > { %s5994_s22 = spop %5993 }
0x1a2e   : > { %s5996_s19 = spop %5995 }
0x1a6b   : > { %v5017_v42 = vpop.xlane.xlu1 %5016 }
0x1a6c   : > { %v5018_v30 = vrot.slane %v5017_v42, 4 }
0x1a6e   : > { %v5019_v8 = vadd.f32 %v5018_v30, %v5017_v42 }
0x1a70   : > { %v5020_v0 = vrot.slane %v5019_v8, 2 }
0x1a72   : > { %v5021_v34 = vadd.f32 %v5020_v0, %v5019_v8 }
0x1a74   : > { %v5140_v36 = vpop.permute.xlu0 %5139  ;;  %v5022_v21 = vrot.slane %v5021_v34, 1 }
0x1a75   : > { %v5142_v13 = vmul.f32 %v6128_v31, %v5140_v36 }
0x1a76   : > { %v5023_v22 = vadd.f32 %v5022_v21, %v5021_v34 }
0x1a77   : > { %v5144_v51 = vrot.slane %v5142_v13, 7  ;;  %v5192_v35 = vrot.slane %v5142_v13, 4 }
0x1a78   : > { %5997 = vpush %v5023_v22 }
0x1a79   : > { %v5146_v58 = vsub.f32 %v5142_v13, %v5144_v51  ;;  %5193 = vrot.lane.b32.xlu0 %v5192_v35, %s6266_s20 }
0x1a7b   : > { %v5147_v32 = vand.u32 2147483647, %v5146_v58 }
0x1a7d   : > { %v5148_v6 = vmul.f32 %v5147_v32, %v10337_v63  ;;  %v5164_v15 = vmul.f32 %v5147_v32, %v10344_v27 }
0x1a7f   : > { %v5150_v2 = vrot.slane %v5148_v6, 5  ;;  %v5166_v47 = vrot.slane %v5164_v15, 5 }
0x1a81   : > { %5151 = vrot.lane.b32.xlu1 %v5150_v2, %s6266_s20  ;;  %v4393_v2 = vstv %s5980_s28  ;;  %s5769_s28 = sshll.u32 %s6349_s21, 4  ;;  %s6267_s21 = smov [#allocation8]  }
0x1a82   : > { %s10443_s24 = scalar_lea.hbm %s11292_s12, %s5769_s28 }
0x1a85   : > { %5167 = vrot.lane.b32.xlu1 %v5166_v47, %s6266_s20  ;;  %v10412_v47 = vld [vmem:[%s10493_s8] sm:$0xff] }
0x1aeb   : > { %v5194_v55 = vpop.permute.xlu0 %5193 }
0x1aec   : > { %5917 = vmatmul.mubr.msk.f32.vlgmr.msra.gmra.mrb[8].mxu0 %vm4001_vm3, %v5194_v55  ;;  %v10417_v55 = vld [vmem:[%s10494_s9] sm:$0xff] }
0x1af3   : > { %v5152_v61 = vpop.permute.xlu1 %5151 }
0x1af4   : > { %v5154_v39 = vsel %vm4205_vm4, %v5152_v61, 0.0  ;;  %v4240_v61 = vstv %s5978_s11 }
0x1af5   : > { %5155 = vadd.xlane.f32.xlu0 %v5154_v39  ;;  %v4399_v39 = vstv %s5982_s14  ;;  %s420_s14 = scalar_lea.vmem [#allocation8], %s419_s3 }
0x1af7   : > { %v5168_v16 = vpop.permute.xlu1 %5167 }
0x1af8   : > { %v5170_v56 = vsel %vm4205_vm4, %v5168_v16, 0.0  ;;  %v4394_v16 = vmul.f32 %v4393_v2, %v10412_v47 }
0x1af9   : > { %5171 = vadd.xlane.f32.xlu1 %v5170_v56  ;;  %v4237_v56 = vstv %s5976_s30 }
0x1b82   : > { %v5156_v63 = vpop.xlane.xlu0 %5155 }
0x1b83   : > { %v5157_v20 = vrot.slane %v5156_v63, 4 }
0x1b85   : > { %v5158_v27 = vadd.f32 %v5157_v20, %v5156_v63  ;;  %v4556_v63 = vstv %s5984_s1  ;;  %v4241_v20 = vmul.f32 %v4240_v61, %v10417_v55  ;;  %s5364_s1 = sshll.u32 %s420_s14, 4  ;;  %s10445_s1 = int_to_ptr.vmem [resolvable:$true] %s5364_s1 }
0x1b86   : > { %v5172_v52 = vpop.xlane.xlu1 %5171 }
0x1b87   : > { %v5159_v4 = vrot.slane %v5158_v27, 2  ;;  %v5173_v29 = vrot.slane %v5172_v52, 4 }
0x1b89   : > { %v5174_v11 = vadd.f32 %v5173_v29, %v5172_v52  ;;  %v5160_v26 = vadd.f32 %v5159_v4, %v5158_v27  ;;  %v4400_v27 = vmul.f32 %v4399_v39, %v10417_v55  ;;  %v4562_v52 = vstv %s5986_s26  ;;  %s5352_s26 = scalar_lea.sflag [#allocation4], %s419_s3 }
0x1b8a   : > { %v4238_v4 = vmul.f32 %v4237_v56, %v10412_v47  ;;  %v4396_v29 = vrot.slane %v4394_v16, 1 }
0x1b8b   : > { %v5175_v43 = vrot.slane %v5174_v11, 2  ;;  %v5161_v38 = vrot.slane %v5160_v26, 1 }
0x1b8d   : > { %v5162_v48 = vadd.f32 %v5161_v38, %v5160_v26  ;;  %v5176_v41 = vadd.f32 %v5175_v43, %v5174_v11  ;;  %v4557_v11 = vmul.f32 %v4556_v63, %v10412_v47  ;;  %v4719_v26 = vstv %s5988_s17  ;;  %s6185_s17 = scalar_lea.vmem %s10445_s1, 16 }
0x1b8e   : > { %v4242_v43 = vadd.f32 %v4241_v20, %v4238_v4  ;;  %v4402_v38 = vrot.slane %v4400_v27, 1  ;;  %p6186_p10 = scmp.ne.s32.totalorder %s10445_s1, %s6185_s17 }
0x1b8f   : > { %5999 = vpush %v5162_v48  ;;  %v5177_v10 = vrot.slane %v5176_v41, 1  ;;  %v4563_v48 = vmul.f32 %v4562_v52, %v10417_v55 }
0x1b90   : > { %p6187_p0 = pnand %p6186_p10, %p11293_p12 }
0x1b91   : > { %v5178_v18 = vadd.f32 %v5177_v10, %v5176_v41  ;;  %v4725_v41 = vstv %s5990_s0  ;;  %v4398_v10 = vadd.f32 %v4396_v29, %v4242_v43  ;;  %s6189_s0 = sshll.u32 %s6267_s21, 4  ;;  %s6190_s0 = int_to_ptr.vmem [resolvable:$false] %s6189_s0 }
0x1b92   : > { %p6188_p7 = pneg %p6187_p0  ;;  %p6192_p8 = scmp.lt.s32.totalorder %s10445_s1, %s6190_s0 }
0x1b93   : > { %6001 = vpush %v5178_v18  ;;  %v4559_v18 = vrot.slane %v4557_v11, 2 }
0x1bbf   : > { %v5263_v9 = vpop.f32.mrb[8].mxu0 }
0x1bc0   : > { %v5268_v45 = vrot.slane %v5263_v9, 2  ;;  %v5918_v31 = vpop.f32.mrb[9].mxu0  ;;  %v4720_v9 = vmul.f32 %v4719_v26, %v10412_v47 }
0x1bc1   : > { %v4404_v31 = vadd.f32 %v4402_v38, %v4398_v10 }
0x1bc2   : > { %v5270_v14 = vadd.f32 %v5268_v45, %v10200_v49  ;;  %v4871_v45 = vstv %s5992_s16  ;;  %s6191_s16 = scalar_lea.vmem %s6190_s0, 32 }
0x1bc3   : > { %p6193_p11 = scmp.lt.s32.totalorder %s6191_s16, %s6185_s17 }
0x1bc4   : > { %6131 = vtanh.f32 %v5270_v14  ;;  %v5768_v53 = vmul.f32 -1.442695, %v5270_v14  ;;  %v4565_v14 = vrot.slane %v4563_v48, 2 }
0x1bc5   : > { %p6194_p13 = por %p6193_p11, %p6192_p8 }
0x1bc6   : > { %6133 = vpow2.f32 %v5768_v53  ;;  %v4877_v53 = vstv %s5994_s22 }
0x1bc7   : > { %p6195_p1 = pnand %p6194_p13, %p6188_p7 }
0x1bce   : > { %v6132_v37 = vpop.eup %6131 }
0x1bcf   : > { %5283 = vrot.lane.b32.xlu0 %v6132_v37, %s6265_s23  ;;  %v4726_v37 = vmul.f32 %v4725_v41, %v10417_v55 }
0x1bd0   : > { %v6134_v62 = vpop.eup %6133 }
0x1bd1   : > { %v5274_v12 = vadd.f32 1.0, %v6134_v62  ;;  %v4561_v62 = vadd.f32 %v4559_v18, %v4404_v31 }
0x1bd3   : > { %6135 = vrcp.f32 %v5274_v12  ;;  %v4722_v12 = vrot.slane %v4720_v9, 3 }
0x1bdd   : > { %v6136_v5 = vpop.eup %6135 }
0x1bde   : > { %v5281_v50 = vmul.f32 %v6136_v5, %v5279_v46  ;;  %v4728_v46 = vrot.slane %v4726_v37, 3 }
0x1c41   : > { %v5284_v59 = vpop.permute.xlu0 %5283 }
0x1c42   : > { %v5286_v19 = vmul.f32 %v6136_v5, %v5284_v59  ;;  %v5025_v59 = vstv %s5996_s19 }
0x1c44   : > { %5288 = vrot.lane.b32.xlu1 %v5286_v19, %s6265_s23  ;;  %v4567_v19 = vadd.f32 %v4565_v14, %v4561_v62 }
0x1cb6   : > { %v5289_v44 = vpop.permute.xlu1 %5288 }
0x1cb7   : > { %v5291_v33 = vadd.f32 %v5289_v44, %v5281_v50  ;;  %v4878_v50 = vmul.f32 %v4877_v53, %v10417_v55 }
0x1cb9   : > { %6137 = vtanh.f32 %v5291_v33  ;;  %v4724_v33 = vadd.f32 %v4722_v12, %v4567_v19 }
0x1cc3   : > { %v6138_v49 = vpop.eup %6137 }
0x1cc4   : > { %5294 = vrot.lane.b32.xlu0 %v6138_v49, %s6265_s23  ;;  %s5998_s23 = spop %5997 }
0x1cc5   : > { %v5031_v44 = vstv %s5998_s23 }
0x1d36   : > { %v5295_v23 = vpop.permute.xlu0 %5294 }
0x1d37   : > { %v5297_v28 = vmul.f32 %v6136_v5, %v5295_v23  ;;  %v4872_v5 = vmul.f32 %v4871_v45, %v10412_v47  ;;  %v5026_v23 = vmul.f32 %v5025_v59, %v10412_v47 }
0x1d39   : > { %v5299_v24 = vrot.slane %v5297_v28, 7  ;;  %v4874_v49 = vrot.slane %v4872_v5, 4 }
0x1d3b   : > { %v5301_v17 = vsub.f32 %v5297_v28, %v5299_v24  ;;  %v4730_v24 = vadd.f32 %v4728_v46, %v4724_v33 }
0x1d3d   : > { %v5302_v57 = vand.u32 2147483647, %v5301_v17  ;;  %v4880_v17 = vrot.slane %v4878_v50, 4 }
0x1d3f   : > { %v5303_v54 = vmul.f32 %v5302_v57, %v10355_v60  ;;  %v5319_v3 = vmul.f32 %v5302_v57, %v10360_v7  ;;  %v5032_v57 = vmul.f32 %v5031_v44, %v10417_v55 }
0x1d41   : > { %v5305_v25 = vrot.slane %v5303_v54, 7  ;;  %v5321_v40 = vrot.slane %v5319_v3, 7  ;;  %v4876_v3 = vadd.f32 %v4874_v49, %v4730_v24 }
0x1d43   : > { %5322 = vrot.lane.b32.xlu1 %v5321_v40, %s6266_s20  ;;  %5306 = vrot.lane.b32.xlu0 %v5305_v25, %s6266_s20  ;;  %s6000_s20 = spop %5999  ;;  %v5028_v25 = vrot.slane %v5026_v23, 5 }
0x1d44   : > { %s6002_s13 = spop %6001  ;;  %v5180_v28 = vstv %s6000_s20 }
0x1d45   : > { %v5186_v54 = vstv %s6002_s13  ;;  %v5181_v40 = vmul.f32 %v5180_v28, %v10412_v47 }
0x1db5   : > { %v5323_v1 = vpop.permute.xlu1 %5322  ;;  %v5307_v42 = vpop.permute.xlu0 %5306 }
0x1db6   : > { %v5325_v30 = vsel %vm4205_vm4, %v5323_v1, 0.0  ;;  %v5309_v8 = vsel %vm4205_vm4, %v5307_v42, 0.0  ;;  %v4882_v1 = vadd.f32 %v4880_v17, %v4876_v3  ;;  %v5034_v42 = vrot.slane %v5032_v57, 5 }
0x1db7   : > { %5326 = vadd.xlane.f32.xlu1 %v5325_v30  ;;  %5310 = vadd.xlane.f32.xlu0 %v5309_v8  ;;  %v5187_v30 = vmul.f32 %v5186_v54, %v10417_v55 }
0x1db8   : > { %v5030_v8 = vadd.f32 %v5028_v25, %v4882_v1 }
0x1e44   : > { %v5327_v0 = vpop.xlane.xlu1 %5326  ;;  %v5311_v34 = vpop.xlane.xlu0 %5310 }
0x1e45   : > { %v5328_v36 = vrot.slane %v5327_v0, 4  ;;  %v5312_v60 = vrot.slane %v5311_v34, 4 }
0x1e47   : > { %v5329_v21 = vadd.f32 %v5328_v36, %v5327_v0  ;;  %v5313_v7 = vadd.f32 %v5312_v60, %v5311_v34  ;;  %v5183_v0 = vrot.slane %v5181_v40, 6  ;;  %v5036_v34 = vadd.f32 %v5034_v42, %v5030_v8 }
0x1e48   : > { %v5189_v36 = vrot.slane %v5187_v30, 6 }
0x1e49   : > { %v5330_v13 = vrot.slane %v5329_v21, 2  ;;  %v5314_v22 = vrot.slane %v5313_v7, 2 }
0x1e4b   : > { %v5331_v51 = vadd.f32 %v5330_v13, %v5329_v21  ;;  %v5315_v35 = vadd.f32 %v5314_v22, %v5313_v7  ;;  %v5185_v21 = vadd.f32 %v5183_v0, %v5036_v34 }
0x1e4d   : > { %v5316_v58 = vrot.slane %v5315_v35, 1  ;;  %v5332_v32 = vrot.slane %v5331_v51, 1 }
0x1e4f   : > { %v5317_v6 = vadd.f32 %v5316_v58, %v5315_v35  ;;  %v5333_v15 = vadd.f32 %v5332_v32, %v5331_v51  ;;  %v5191_v51 = vadd.f32 %v5189_v36, %v5185_v21 }
0x1e51   : > { %6003 = vpush %v5317_v6  ;;  %v5347_v6 = vld [vmem:[%s10495_s10] sm:$0x1] }
0x1e52   : > { %6005 = vpush %v5333_v15 }
0x1e82   : > { %s6004_s2 = spop %6003 }
0x1e83   : > { %v5335_v60 = vstv %s6004_s2  ;;  %s6006_s15 = spop %6005 }
0x1e84   : > { %v5336_v7 = vmul.f32 %v5335_v60, %v10412_v47  ;;  %v5341_v13 = vstv %s6006_s15 }
0x1e85   : > { %v5342_v22 = vmul.f32 %v5341_v13, %v10417_v55 }
0x1e86   : > { %v5338_v35 = vrot.slane %v5336_v7, 7 }
0x1e87   : > { %v5344_v32 = vrot.slane %v5342_v22, 7 }
0x1e88   : > { %v5340_v58 = vadd.f32 %v5338_v35, %v5191_v51 }
0x1e8a   : > { %v5346_v15 = vadd.f32 %v5344_v32, %v5340_v58 }
0x1e8c   : > { %v5348_v2 = vadd.f32 %v5347_v6, %v5346_v15 }
0x1e8e   : > { %5350 = vst.msk [vmem:[%s420_s14] sm:$0x1] %vm5349_vm5, %v5348_v2 }
0x1e8f   : > { %6198 = shalt.err (!%p6195_p1)
}
0x1e90   : > { %s6199_s22 = scalar_lea.hbm %s10443_s24, 16  ;;  %s6203_s20 = scalar_lea.hbm %s11292_s12, 32 }
0x1e91   : > { %p6200_p2 = scmp.ne.s32.totalorder %s10443_s24, %s6199_s22  ;;  %p6204_p9 = scmp.lt.u32.totalorder %s10443_s24, %s11292_s12 }
0x1e92   : > { %p6205_p5 = scmp.lt.u32.totalorder %s6203_s20, %s6199_s22  ;;  %p6207_p10 = scmp.lt.u32.totalorder %s6199_s22, %s10443_s24 }
0x1e93   : > { %p6201_p3 = pnand %p6200_p2, %p11293_p12 }
0x1e94   : > { %p6206_p6 = por %p6205_p5, %p6204_p9 }
0x1e95   : > { %p6202_p4 = pneg %p6201_p3 }
0x1e96   : > { %p6208_p0 = por %p6207_p10, %p6206_p6 }
0x1e98   : > { %p6209_p7 = pnand %p6208_p0, %p6202_p4 }
0x1e9a   : > { %6212 = shalt.err (!%p6209_p7)
}
0x1e9b   : > { %6015 = dma.vmem_to_hbm [thread:$0]  (%p11293_p12), %s10445_s1, 16, %s10443_s24, %s5352_s26  }
0x1e9c PF: > { %s11294_s15 = sld [smem:[#allocation14_spill]]  ;;  %s11295_s3 = sld [smem:[#allocation12_spill]] }
0x1e9d   : > { %s11296_s30 = sld [smem:[#allocation17_spill]] }
0x1ea2   : > { %p6032_p8 = scmp.ge.s32.totalorder %s11294_s15, 2  ;;  %s5376_s11 = sand.u32 1, %s11295_s3  }
0x1ea3   : > { %p11297_p11 = scmp.ne.s32.totalorder %s11296_s30, 0  ;;  %s5377_s28 = scalar_lea.sflag [#allocation4], %s5376_s11 }
0x1ea5   : > { %p6025_p13 = pnand %p6032_p8, %p11297_p11 }
0x1ea7   : > { %6238 = dma.done.wait (!%p6025_p13), %s5377_s28, 16  }
0x1ea8   : > { %6240 = vsyncadd (!%p6025_p13), %s5377_s28, 4294967280  ;;  %s11298_s20 = sld [smem:[#allocation15_spill]]  ;;  %s11299_s14 = sld [smem:[#allocation13_spill]] }
0x1ea9   : > { %s11300_s19 = sld [smem:[#allocation16_spill]]  ;;  %s11301_s17 = smov %s6247_s18 }
0x1eae   : > { %p23_p1 = scmp.ge.s32.totalorder %s11298_s20, 4   ;;  %s11302_s18 = smov %s11299_s14 }
0x1eb0   :  { %25 = sbr.rel (!%p23_p1) target bundleno = 11 (0xb), region = 111 }
0x1eb7   :  { %5381 = vsyncpa [#allocation4], 1 }
0x1eb8   :  { %5383 = vsyncpa [#allocation4 + $0x1], 1 }
0x1eb9   :  { %5384 = vsyncpa [#allocation5], 1 }
0x1eba   :  { %5386 = vsyncpa [#allocation5 + $0x1], 1 }
0x1ebb   :  { %5387 = vsyncpa [#allocation7], 1 }

</bundles_post_ra>
